<compile_context>
chip_gen: v7x
topology: tpu7x:2x2x1
jax: 0.10.0
libtpu: 0.0.40
codegen_flags: <defaults>
</compile_context>

<pallas_src>
import functools

import jax
import jax.numpy as jnp
import numpy as np
from jax.experimental import pallas as pl
from jax.experimental.pallas import tpu as pltpu


def attention_kernel(xq_ref, xkv_ref, wq_ref, wkv_ref, wp_ref, bp_ref, o_ref,
                     q_s, m_s, l_s, acc_s, *, num_heads, scale):
    # xq_ref  : (1, TQ, C)  query rows of one batch element
    # xkv_ref : (1, TK, C)  key/value rows of the same batch element (current KV block)
    # wq_ref  : (C, C)      Wq  (y = x @ W convention)
    # wkv_ref : (C, 2C)     [Wk | Wv] fused
    # wp_ref  : (C, C)      output projection
    # bp_ref  : (1, C)      output projection bias (f32)
    # o_ref   : (1, TQ, C)
    # q_s     : (H, TQ, D)  per-head scaled q (MXU dtype), resident across KV blocks
    # m_s/l_s : (H, TQ, 1)  online-softmax running max / sum (f32)
    # acc_s   : (H, TQ, D)  unnormalized output accumulator (f32)
    H = num_heads
    C = wq_ref.shape[0]
    D = C // H
    ki = pl.program_id(2)

    @pl.when(ki == 0)
    def _init():
        # Lane-dense Q projection (TQ,C)x(C,C); scale folded into q (N*C elems, not N*N).
        qf = jnp.dot(xq_ref[0], wq_ref[...],
                     preferred_element_type=jnp.float32) * scale           # (TQ, C) f32
        # Head split via static lane slices -> (H, TQ, D); computed once per q tile.
        q_s[...] = jnp.stack(
            [qf[:, h * D:(h + 1) * D] for h in range(H)], axis=0
        ).astype(q_s.dtype)
        m_s[...] = jnp.full(m_s.shape, -jnp.inf, m_s.dtype)
        l_s[...] = jnp.zeros(l_s.shape, l_s.dtype)
        acc_s[...] = jnp.zeros(acc_s.shape, acc_s.dtype)

    # Fused lane-dense K/V projection for this KV block: (TK,C)x(C,2C).
    kvf = jnp.dot(xkv_ref[0], wkv_ref[...], preferred_element_type=jnp.float32)
    k = jnp.stack([kvf[:, h * D:(h + 1) * D] for h in range(H)],
                  axis=0).astype(xkv_ref.dtype)                            # (H, TK, D)
    v = jnp.stack([kvf[:, C + h * D:C + (h + 1) * D] for h in range(H)],
                  axis=0).astype(xkv_ref.dtype)                            # (H, TK, D)

    # Scores for this KV block only: (H, TQ, TK) -- never the full (H, N, N).
    s = jnp.einsum('hqd,hkd->hqk', q_s[...], k,
                   preferred_element_type=jnp.float32)

    # Online (flash) softmax update; exp stays unnormalized (deferred normalization).
    m_prev = m_s[...]
    m_new = jnp.maximum(m_prev, jnp.max(s, axis=-1, keepdims=True))
    alpha = jnp.exp(m_prev - m_new)
    p = jnp.exp(s - m_new)
    l_s[...] = alpha * l_s[...] + jnp.sum(p, axis=-1, keepdims=True)
    acc_s[...] = alpha * acc_s[...] + jnp.einsum(
        'hqk,hkd->hqd', p.astype(v.dtype), v, preferred_element_type=jnp.float32)
    m_s[...] = m_new

    @pl.when(ki == pl.num_programs(2) - 1)
    def _finalize():
        # Deferred normalization over (H, TQ, D); reciprocal runs on the EUP slot.
        o = acc_s[...] * pl.reciprocal(l_s[...], approx=True)              # (H, TQ, D)
        # Head concat -> (TQ, C), then a single lane-dense output projection + bias.
        oc = jnp.concatenate([o[h] for h in range(H)], axis=-1)            # (TQ, C)
        out = jnp.dot(oc.astype(wp_ref.dtype), wp_ref[...],
                      preferred_element_type=jnp.float32) + bp_ref[...]
        o_ref[0] = out.astype(o_ref.dtype)


def attention_forward(x, wq, wk, wv, wp, bp, *, num_heads,
                      block_q=128, block_k=128, mxu_dtype=jnp.bfloat16):
    """x: (B, N, C); wq/wk/wv/wp: (C, C) in `y = x @ W` convention; bp: (C,)."""
    B, N, C = x.shape
    H = num_heads
    assert C % H == 0, "dim must be divisible by num_heads"
    D = C // H
    scale = float(D) ** -0.5

    TQ = min(block_q, N)
    TK = min(block_k, N)
    assert N % TQ == 0 and N % TK == 0, "N must be divisible by the block sizes"
    assert (TQ % 8 == 0 or TQ == N) and (TK % 8 == 0 or TK == N)

    # Wrapper-side layout plumbing: fuse K and V weights into one lane-dense (C, 2C)
    # projection; cast operands to the MXU dtype (accumulation stays f32 in-kernel).
    wkv = jnp.concatenate([wk, wv], axis=1)
    xd = x.astype(mxu_dtype)
    wq_d = wq.astype(mxu_dtype)
    wkv_d = wkv.astype(mxu_dtype)
    wp_d = wp.astype(mxu_dtype)
    bp2 = bp.reshape(1, C).astype(jnp.float32)

    kernel = functools.partial(attention_kernel, num_heads=H, scale=scale)

    return pl.pallas_call(
        kernel,
        out_shape=jax.ShapeDtypeStruct((B, N, C), x.dtype),
        grid_spec=pltpu.PrefetchScalarGridSpec(
            num_scalar_prefetch=0,
            grid=(B, N // TQ, N // TK),
            in_specs=[
                pl.BlockSpec((1, TQ, C), lambda b, qi, ki: (b, qi, 0)),   # x (query rows)
                pl.BlockSpec((1, TK, C), lambda b, qi, ki: (b, ki, 0)),   # x (kv rows)
                pl.BlockSpec((C, C), lambda b, qi, ki: (0, 0)),           # Wq (constant)
                pl.BlockSpec((C, 2 * C), lambda b, qi, ki: (0, 0)),       # Wkv (constant)
                pl.BlockSpec((C, C), lambda b, qi, ki: (0, 0)),           # Wproj (constant)
                pl.BlockSpec((1, C), lambda b, qi, ki: (0, 0)),           # bias (constant)
            ],
            out_specs=pl.BlockSpec((1, TQ, C), lambda b, qi, ki: (b, qi, 0)),
            scratch_shapes=[
                pltpu.VMEM((H, TQ, D), mxu_dtype),     # q (per-head, pre-scaled)
                pltpu.VMEM((H, TQ, 1), jnp.float32),   # running max
                pltpu.VMEM((H, TQ, 1), jnp.float32),   # running sum
                pltpu.VMEM((H, TQ, D), jnp.float32),   # output accumulator
            ],
        ),
        compiler_params=pltpu.CompilerParams(
            dimension_semantics=("parallel", "parallel", "arbitrary"),
            vmem_limit_bytes=64 * 1024 * 1024,
        ),
    )(xd, xd, wq_d, wkv_d, wp_d, bp2)


def attention_reference(x, wq, wk, wv, wp, bp, *, num_heads):
    """Pure-JAX reference reproducing the PyTorch Attention.forward math."""
    B, N, C = x.shape
    H = num_heads
    D = C // H
    scale = float(D) ** -0.5
    hi = jax.lax.Precision.HIGHEST

    q = jnp.matmul(x, wq, precision=hi).reshape(B, N, H, D).transpose(0, 2, 1, 3)
    k = jnp.matmul(x, wk, precision=hi).reshape(B, N, H, D).transpose(0, 2, 1, 3)
    v = jnp.matmul(x, wv, precision=hi).reshape(B, N, H, D).transpose(0, 2, 1, 3)

    attn = jnp.einsum('bhnd,bhmd->bhnm', q, k, precision=hi) * scale
    attn = jax.nn.softmax(attn, axis=-1)
    o = jnp.einsum('bhnm,bhmd->bhnd', attn, v, precision=hi)
    o = o.transpose(0, 2, 1, 3).reshape(B, N, C)
    return jnp.matmul(o, wp, precision=hi) + bp[None, None, :]


if __name__ == "__main__":
    # small shapes: batch=2, seq=128, dim=256, heads=8 (head_dim=32); 64-row q/kv blocks
    # exercise the flash accumulation across multiple KV steps and multiple q tiles.
    B, N, C, H = 2, 128, 256, 8

    key = jax.random.PRNGKey(0)
    kx, kq, kk, kv, kp, kb = jax.random.split(key, 6)
    x = jax.random.normal(kx, (B, N, C), jnp.float32)
    wq = jax.random.normal(kq, (C, C), jnp.float32) * (C ** -0.5)
    wk = jax.random.normal(kk, (C, C), jnp.float32) * (C ** -0.5)
    wv = jax.random.normal(kv, (C, C), jnp.float32) * (C ** -0.5)
    wp = jax.random.normal(kp, (C, C), jnp.float32) * (C ** -0.5)
    bp = jax.random.normal(kb, (C,), jnp.float32) * 0.1

    out = jax.block_until_ready(
        attention_forward(x, wq, wk, wv, wp, bp, num_heads=H, block_q=64, block_k=64))

    # Reference on the same bf16-rounded operands the kernel sees (f32/HIGHEST math),
    # so the comparison isolates kernel arithmetic from the operand quantization.
    rd = lambda a: a.astype(jnp.bfloat16).astype(jnp.float32)
    ref = jax.block_until_ready(
        attention_reference(rd(x), rd(wq), rd(wk), rd(wv), rd(wp), bp, num_heads=H))

    assert out.shape == (B, N, C)
    np.testing.assert_allclose(np.asarray(out), np.asarray(ref), rtol=2e-2, atol=2e-2)

    print("KERNEL_OK")
</pallas_src>

<mosaic_0001>
module attributes {stable_mosaic.version = 11 : i64} {
  func.func @attention_kernel(%arg0: i32, %arg1: i32, %arg2: i32, %arg3: memref<1x64x256xbf16, #tpu.memory_space<vmem>>, %arg4: memref<1x64x256xbf16, #tpu.memory_space<vmem>>, %arg5: memref<256x256xbf16, #tpu.memory_space<vmem>>, %arg6: memref<256x512xbf16, #tpu.memory_space<vmem>>, %arg7: memref<256x256xbf16, #tpu.memory_space<vmem>>, %arg8: memref<1x256xf32, #tpu.memory_space<vmem>>, %arg9: memref<1x64x256xf32, #tpu.memory_space<vmem>>, %arg10: memref<8x64x32xbf16, #tpu.memory_space<vmem>>, %arg11: memref<8x64x1xf32, #tpu.memory_space<vmem>>, %arg12: memref<8x64x1xf32, #tpu.memory_space<vmem>>, %arg13: memref<8x64x32xf32, #tpu.memory_space<vmem>>) attributes {dimension_semantics = [#tpu.dimension_semantics<parallel>, #tpu.dimension_semantics<parallel>, #tpu.dimension_semantics<arbitrary>], iteration_bounds = array<i64: 2, 2, 2>, scalar_prefetch = 0 : i64, scratch_operands = 4 : i64, tpu.core_type = #tpu.core_type<tc>, window_params = [{transform_indices = @transform_0, window_bounds = array<i64: 1, 64, 256>}, {transform_indices = @transform_1, window_bounds = array<i64: 1, 64, 256>}, {pipeline_mode = #tpu.pipeline_mode<synchronous>, transform_indices = @transform_2, window_bounds = array<i64: 256, 256>}, {pipeline_mode = #tpu.pipeline_mode<synchronous>, transform_indices = @transform_3, window_bounds = array<i64: 256, 512>}, {pipeline_mode = #tpu.pipeline_mode<synchronous>, transform_indices = @transform_4, window_bounds = array<i64: 256, 256>}, {pipeline_mode = #tpu.pipeline_mode<synchronous>, transform_indices = @transform_5, window_bounds = array<i64: 1, 256>}, {transform_indices = @transform_6, window_bounds = array<i64: 1, 64, 256>}]} {
    %c0_i32 = arith.constant 0 : i32
    %0 = arith.cmpi eq, %arg2, %c0_i32 : i32
    %1 = arith.extui %0 : i1 to i32
    %c0_i32_0 = arith.constant 0 : i32
    %2 = arith.cmpi ne, %1, %c0_i32_0 : i32
    scf.if %2 {
      %c0_31 = arith.constant 0 : index
      %c0_32 = arith.constant 0 : index
      %c0_33 = arith.constant 0 : index
      %71 = vector.load %arg3[%c0_31, %c0_32, %c0_33] : memref<1x64x256xbf16, #tpu.memory_space<vmem>>, vector<1x64x256xbf16>
      %72 = vector.shape_cast %71 : vector<1x64x256xbf16> to vector<64x256xbf16>
      %c0_34 = arith.constant 0 : index
      %c0_35 = arith.constant 0 : index
      %73 = vector.load %arg5[%c0_34, %c0_35] : memref<256x256xbf16, #tpu.memory_space<vmem>>, vector<256x256xbf16>
      %cst_36 = arith.constant dense<0.000000e+00> : vector<64x256xf32>
      %74 = tpu.matmul %72, %73, %cst_36 {dimension_numbers = #tpu.dot_dimension_numbers<[1], [0], [0], [1], [0, 0, 1, 1], [], []>} : vector<64x256xbf16>, vector<256x256xbf16>, vector<64x256xf32> -> vector<64x256xf32>
      %cst_37 = arith.constant 0.176776692 : f32
      %75 = vector.broadcast %cst_37 : f32 to vector<64x256xf32>
      %76 = arith.mulf %74, %75 : vector<64x256xf32>
      %77 = vector.extract_strided_slice %76 {offsets = [0, 0], sizes = [64, 32], strides = [1, 1]} : vector<64x256xf32> to vector<64x32xf32>
      %78 = vector.extract_strided_slice %76 {offsets = [0, 32], sizes = [64, 32], strides = [1, 1]} : vector<64x256xf32> to vector<64x32xf32>
      %79 = vector.extract_strided_slice %76 {offsets = [0, 64], sizes = [64, 32], strides = [1, 1]} : vector<64x256xf32> to vector<64x32xf32>
      %80 = vector.extract_strided_slice %76 {offsets = [0, 96], sizes = [64, 32], strides = [1, 1]} : vector<64x256xf32> to vector<64x32xf32>
      %81 = vector.extract_strided_slice %76 {offsets = [0, 128], sizes = [64, 32], strides = [1, 1]} : vector<64x256xf32> to vector<64x32xf32>
      %82 = vector.extract_strided_slice %76 {offsets = [0, 160], sizes = [64, 32], strides = [1, 1]} : vector<64x256xf32> to vector<64x32xf32>
      %83 = vector.extract_strided_slice %76 {offsets = [0, 192], sizes = [64, 32], strides = [1, 1]} : vector<64x256xf32> to vector<64x32xf32>
      %84 = vector.extract_strided_slice %76 {offsets = [0, 224], sizes = [64, 32], strides = [1, 1]} : vector<64x256xf32> to vector<64x32xf32>
      %85 = vector.shape_cast %77 : vector<64x32xf32> to vector<1x64x32xf32>
      %86 = vector.shape_cast %78 : vector<64x32xf32> to vector<1x64x32xf32>
      %87 = vector.shape_cast %79 : vector<64x32xf32> to vector<1x64x32xf32>
      %88 = vector.shape_cast %80 : vector<64x32xf32> to vector<1x64x32xf32>
      %89 = vector.shape_cast %81 : vector<64x32xf32> to vector<1x64x32xf32>
      %90 = vector.shape_cast %82 : vector<64x32xf32> to vector<1x64x32xf32>
      %91 = vector.shape_cast %83 : vector<64x32xf32> to vector<1x64x32xf32>
      %92 = vector.shape_cast %84 : vector<64x32xf32> to vector<1x64x32xf32>
      %93 = tpu.concatenate %85, %86, %87, %88, %89, %90, %91, %92 in 0 : vector<1x64x32xf32>, vector<1x64x32xf32>, vector<1x64x32xf32>, vector<1x64x32xf32>, vector<1x64x32xf32>, vector<1x64x32xf32>, vector<1x64x32xf32>, vector<1x64x32xf32> -> vector<8x64x32xf32>
      %94 = arith.truncf %93 : vector<8x64x32xf32> to vector<8x64x32xbf16>
      %c0_38 = arith.constant 0 : index
      %c0_39 = arith.constant 0 : index
      %c0_40 = arith.constant 0 : index
      %95 = vector.load %arg10[%c0_38, %c0_39, %c0_40] : memref<8x64x32xbf16, #tpu.memory_space<vmem>>, vector<8x64x32xbf16>
      tpu.vector_store %arg10[%c0_38, %c0_39, %c0_40], %94 {strides = array<i32>} : memref<8x64x32xbf16, #tpu.memory_space<vmem>>, vector<8x64x32xbf16>,
      %cst_41 = arith.constant 0xFF800000 : f32
      %96 = vector.broadcast %cst_41 : f32 to vector<8x64x1xf32>
      %c0_42 = arith.constant 0 : index
      %c0_43 = arith.constant 0 : index
      %c0_44 = arith.constant 0 : index
      %97 = vector.load %arg11[%c0_42, %c0_43, %c0_44] : memref<8x64x1xf32, #tpu.memory_space<vmem>>, vector<8x64x1xf32>
      tpu.vector_store %arg11[%c0_42, %c0_43, %c0_44], %96 {strides = array<i32>} : memref<8x64x1xf32, #tpu.memory_space<vmem>>, vector<8x64x1xf32>,
      %cst_45 = arith.constant 0.000000e+00 : f32
      %98 = vector.broadcast %cst_45 : f32 to vector<8x64x1xf32>
      %c0_46 = arith.constant 0 : index
      %c0_47 = arith.constant 0 : index
      %c0_48 = arith.constant 0 : index
      %99 = vector.load %arg12[%c0_46, %c0_47, %c0_48] : memref<8x64x1xf32, #tpu.memory_space<vmem>>, vector<8x64x1xf32>
      tpu.vector_store %arg12[%c0_46, %c0_47, %c0_48], %98 {strides = array<i32>} : memref<8x64x1xf32, #tpu.memory_space<vmem>>, vector<8x64x1xf32>,
      %cst_49 = arith.constant 0.000000e+00 : f32
      %100 = vector.broadcast %cst_49 : f32 to vector<8x64x32xf32>
      %c0_50 = arith.constant 0 : index
      %c0_51 = arith.constant 0 : index
      %c0_52 = arith.constant 0 : index
      %101 = vector.load %arg13[%c0_50, %c0_51, %c0_52] : memref<8x64x32xf32, #tpu.memory_space<vmem>>, vector<8x64x32xf32>
      tpu.vector_store %arg13[%c0_50, %c0_51, %c0_52], %100 {strides = array<i32>} : memref<8x64x32xf32, #tpu.memory_space<vmem>>, vector<8x64x32xf32>,
    } else {
    }
    %c0 = arith.constant 0 : index
    %c0_1 = arith.constant 0 : index
    %c0_2 = arith.constant 0 : index
    %3 = vector.load %arg4[%c0, %c0_1, %c0_2] : memref<1x64x256xbf16, #tpu.memory_space<vmem>>, vector<1x64x256xbf16>
    %4 = vector.shape_cast %3 : vector<1x64x256xbf16> to vector<64x256xbf16>
    %c0_3 = arith.constant 0 : index
    %c0_4 = arith.constant 0 : index
    %5 = vector.load %arg6[%c0_3, %c0_4] : memref<256x512xbf16, #tpu.memory_space<vmem>>, vector<256x512xbf16>
    %cst = arith.constant dense<0.000000e+00> : vector<64x512xf32>
    %6 = tpu.matmul %4, %5, %cst {dimension_numbers = #tpu.dot_dimension_numbers<[1], [0], [0], [1], [0, 0, 1, 1], [], []>} : vector<64x256xbf16>, vector<256x512xbf16>, vector<64x512xf32> -> vector<64x512xf32>
    %7 = vector.extract_strided_slice %6 {offsets = [0, 0], sizes = [64, 32], strides = [1, 1]} : vector<64x512xf32> to vector<64x32xf32>
    %8 = vector.extract_strided_slice %6 {offsets = [0, 32], sizes = [64, 32], strides = [1, 1]} : vector<64x512xf32> to vector<64x32xf32>
    %9 = vector.extract_strided_slice %6 {offsets = [0, 64], sizes = [64, 32], strides = [1, 1]} : vector<64x512xf32> to vector<64x32xf32>
    %10 = vector.extract_strided_slice %6 {offsets = [0, 96], sizes = [64, 32], strides = [1, 1]} : vector<64x512xf32> to vector<64x32xf32>
    %11 = vector.extract_strided_slice %6 {offsets = [0, 128], sizes = [64, 32], strides = [1, 1]} : vector<64x512xf32> to vector<64x32xf32>
    %12 = vector.extract_strided_slice %6 {offsets = [0, 160], sizes = [64, 32], strides = [1, 1]} : vector<64x512xf32> to vector<64x32xf32>
    %13 = vector.extract_strided_slice %6 {offsets = [0, 192], sizes = [64, 32], strides = [1, 1]} : vector<64x512xf32> to vector<64x32xf32>
    %14 = vector.extract_strided_slice %6 {offsets = [0, 224], sizes = [64, 32], strides = [1, 1]} : vector<64x512xf32> to vector<64x32xf32>
    %15 = vector.shape_cast %7 : vector<64x32xf32> to vector<1x64x32xf32>
    %16 = vector.shape_cast %8 : vector<64x32xf32> to vector<1x64x32xf32>
    %17 = vector.shape_cast %9 : vector<64x32xf32> to vector<1x64x32xf32>
    %18 = vector.shape_cast %10 : vector<64x32xf32> to vector<1x64x32xf32>
    %19 = vector.shape_cast %11 : vector<64x32xf32> to vector<1x64x32xf32>
    %20 = vector.shape_cast %12 : vector<64x32xf32> to vector<1x64x32xf32>
    %21 = vector.shape_cast %13 : vector<64x32xf32> to vector<1x64x32xf32>
    %22 = vector.shape_cast %14 : vector<64x32xf32> to vector<1x64x32xf32>
    %23 = tpu.concatenate %15, %16, %17, %18, %19, %20, %21, %22 in 0 : vector<1x64x32xf32>, vector<1x64x32xf32>, vector<1x64x32xf32>, vector<1x64x32xf32>, vector<1x64x32xf32>, vector<1x64x32xf32>, vector<1x64x32xf32>, vector<1x64x32xf32> -> vector<8x64x32xf32>
    %24 = arith.truncf %23 : vector<8x64x32xf32> to vector<8x64x32xbf16>
    %25 = vector.extract_strided_slice %6 {offsets = [0, 256], sizes = [64, 32], strides = [1, 1]} : vector<64x512xf32> to vector<64x32xf32>
    %26 = vector.extract_strided_slice %6 {offsets = [0, 288], sizes = [64, 32], strides = [1, 1]} : vector<64x512xf32> to vector<64x32xf32>
    %27 = vector.extract_strided_slice %6 {offsets = [0, 320], sizes = [64, 32], strides = [1, 1]} : vector<64x512xf32> to vector<64x32xf32>
    %28 = vector.extract_strided_slice %6 {offsets = [0, 352], sizes = [64, 32], strides = [1, 1]} : vector<64x512xf32> to vector<64x32xf32>
    %29 = vector.extract_strided_slice %6 {offsets = [0, 384], sizes = [64, 32], strides = [1, 1]} : vector<64x512xf32> to vector<64x32xf32>
    %30 = vector.extract_strided_slice %6 {offsets = [0, 416], sizes = [64, 32], strides = [1, 1]} : vector<64x512xf32> to vector<64x32xf32>
    %31 = vector.extract_strided_slice %6 {offsets = [0, 448], sizes = [64, 32], strides = [1, 1]} : vector<64x512xf32> to vector<64x32xf32>
    %32 = vector.extract_strided_slice %6 {offsets = [0, 480], sizes = [64, 32], strides = [1, 1]} : vector<64x512xf32> to vector<64x32xf32>
    %33 = vector.shape_cast %25 : vector<64x32xf32> to vector<1x64x32xf32>
    %34 = vector.shape_cast %26 : vector<64x32xf32> to vector<1x64x32xf32>
    %35 = vector.shape_cast %27 : vector<64x32xf32> to vector<1x64x32xf32>
    %36 = vector.shape_cast %28 : vector<64x32xf32> to vector<1x64x32xf32>
    %37 = vector.shape_cast %29 : vector<64x32xf32> to vector<1x64x32xf32>
    %38 = vector.shape_cast %30 : vector<64x32xf32> to vector<1x64x32xf32>
    %39 = vector.shape_cast %31 : vector<64x32xf32> to vector<1x64x32xf32>
    %40 = vector.shape_cast %32 : vector<64x32xf32> to vector<1x64x32xf32>
    %41 = tpu.concatenate %33, %34, %35, %36, %37, %38, %39, %40 in 0 : vector<1x64x32xf32>, vector<1x64x32xf32>, vector<1x64x32xf32>, vector<1x64x32xf32>, vector<1x64x32xf32>, vector<1x64x32xf32>, vector<1x64x32xf32>, vector<1x64x32xf32> -> vector<8x64x32xf32>
    %42 = arith.truncf %41 : vector<8x64x32xf32> to vector<8x64x32xbf16>
    %c0_5 = arith.constant 0 : index
    %c0_6 = arith.constant 0 : index
    %c0_7 = arith.constant 0 : index
    %43 = vector.load %arg10[%c0_5, %c0_6, %c0_7] : memref<8x64x32xbf16, #tpu.memory_space<vmem>>, vector<8x64x32xbf16>
    "tpu.trace_start"() <{level = 10 : i32, message = "hqd,hkd->hqk"}> : () -> ()
    %cst_8 = arith.constant dense<0.000000e+00> : vector<8x64x64xf32>
    %44 = tpu.matmul %43, %24, %cst_8 {dimension_numbers = #tpu.dot_dimension_numbers<[2], [2], [1], [1], [0, 0, 0, 1, 1, 1], [0], [0]>} : vector<8x64x32xbf16>, vector<8x64x32xbf16>, vector<8x64x64xf32> -> vector<8x64x64xf32>
    "tpu.trace_stop"() : () -> ()
    %c0_9 = arith.constant 0 : index
    %c0_10 = arith.constant 0 : index
    %c0_11 = arith.constant 0 : index
    %45 = vector.load %arg11[%c0_9, %c0_10, %c0_11] : memref<8x64x1xf32, #tpu.memory_space<vmem>>, vector<8x64x1xf32>
    %cst_12 = arith.constant dense<0xFF800000> : vector<8x64xf32>
    %46 = vector.multi_reduction <maximumf>, %44, %cst_12 [2] : vector<8x64x64xf32> to vector<8x64xf32>
    %47 = vector.shape_cast %46 : vector<8x64xf32> to vector<8x64x1xf32>
    %48 = arith.maximumf %45, %47 : vector<8x64x1xf32>
    %49 = arith.subf %45, %48 : vector<8x64x1xf32>
    %50 = math.exp %49 : vector<8x64x1xf32>
    %51 = vector.broadcast %48 : vector<8x64x1xf32> to vector<8x64x64xf32>
    %52 = arith.subf %44, %51 : vector<8x64x64xf32>
    %53 = math.exp %52 : vector<8x64x64xf32>
    %c0_13 = arith.constant 0 : index
    %c0_14 = arith.constant 0 : index
    %c0_15 = arith.constant 0 : index
    %54 = vector.load %arg12[%c0_13, %c0_14, %c0_15] : memref<8x64x1xf32, #tpu.memory_space<vmem>>, vector<8x64x1xf32>
    %55 = arith.mulf %50, %54 : vector<8x64x1xf32>
    %cst_16 = arith.constant dense<0.000000e+00> : vector<8x64xf32>
    %56 = vector.multi_reduction <add>, %53, %cst_16 [2] : vector<8x64x64xf32> to vector<8x64xf32>
    %57 = vector.shape_cast %56 : vector<8x64xf32> to vector<8x64x1xf32>
    %58 = arith.addf %55, %57 : vector<8x64x1xf32>
    %c0_17 = arith.constant 0 : index
    %c0_18 = arith.constant 0 : index
    %c0_19 = arith.constant 0 : index
    %59 = vector.load %arg12[%c0_17, %c0_18, %c0_19] : memref<8x64x1xf32, #tpu.memory_space<vmem>>, vector<8x64x1xf32>
    tpu.vector_store %arg12[%c0_17, %c0_18, %c0_19], %58 {strides = array<i32>} : memref<8x64x1xf32, #tpu.memory_space<vmem>>, vector<8x64x1xf32>,
    %c0_20 = arith.constant 0 : index
    %c0_21 = arith.constant 0 : index
    %c0_22 = arith.constant 0 : index
    %60 = vector.load %arg13[%c0_20, %c0_21, %c0_22] : memref<8x64x32xf32, #tpu.memory_space<vmem>>, vector<8x64x32xf32>
    %61 = vector.broadcast %50 : vector<8x64x1xf32> to vector<8x64x32xf32>
    %62 = arith.mulf %61, %60 : vector<8x64x32xf32>
    %63 = arith.truncf %53 : vector<8x64x64xf32> to vector<8x64x64xbf16>
    "tpu.trace_start"() <{level = 10 : i32, message = "hqk,hkd->hqd"}> : () -> ()
    %cst_23 = arith.constant dense<0.000000e+00> : vector<8x64x32xf32>
    %64 = tpu.matmul %63, %42, %cst_23 {dimension_numbers = #tpu.dot_dimension_numbers<[2], [1], [1], [2], [0, 0, 0, 1, 1, 2], [0], [0]>} : vector<8x64x64xbf16>, vector<8x64x32xbf16>, vector<8x64x32xf32> -> vector<8x64x32xf32>
    "tpu.trace_stop"() : () -> ()
    %65 = arith.addf %62, %64 : vector<8x64x32xf32>
    %c0_24 = arith.constant 0 : index
    %c0_25 = arith.constant 0 : index
    %c0_26 = arith.constant 0 : index
    %66 = vector.load %arg13[%c0_24, %c0_25, %c0_26] : memref<8x64x32xf32, #tpu.memory_space<vmem>>, vector<8x64x32xf32>
    tpu.vector_store %arg13[%c0_24, %c0_25, %c0_26], %65 {strides = array<i32>} : memref<8x64x32xf32, #tpu.memory_space<vmem>>, vector<8x64x32xf32>,
    %c0_27 = arith.constant 0 : index
    %c0_28 = arith.constant 0 : index
    %c0_29 = arith.constant 0 : index
    %67 = vector.load %arg11[%c0_27, %c0_28, %c0_29] : memref<8x64x1xf32, #tpu.memory_space<vmem>>, vector<8x64x1xf32>
    tpu.vector_store %arg11[%c0_27, %c0_28, %c0_29], %48 {strides = array<i32>} : memref<8x64x1xf32, #tpu.memory_space<vmem>>, vector<8x64x1xf32>,
    %c1_i32 = arith.constant 1 : i32
    %68 = arith.cmpi eq, %arg2, %c1_i32 : i32
    %69 = arith.extui %68 : i1 to i32
    %c0_i32_30 = arith.constant 0 : i32
    %70 = arith.cmpi ne, %69, %c0_i32_30 : i32
    scf.if %70 {
      %c0_31 = arith.constant 0 : index
      %c0_32 = arith.constant 0 : index
      %c0_33 = arith.constant 0 : index
      %71 = vector.load %arg13[%c0_31, %c0_32, %c0_33] : memref<8x64x32xf32, #tpu.memory_space<vmem>>, vector<8x64x32xf32>
      %c0_34 = arith.constant 0 : index
      %c0_35 = arith.constant 0 : index
      %c0_36 = arith.constant 0 : index
      %72 = vector.load %arg12[%c0_34, %c0_35, %c0_36] : memref<8x64x1xf32, #tpu.memory_space<vmem>>, vector<8x64x1xf32>
      %73 = tpu.reciprocal %72 {approx = true} : vector<8x64x1xf32> -> vector<8x64x1xf32>
      %74 = vector.broadcast %73 : vector<8x64x1xf32> to vector<8x64x32xf32>
      %75 = arith.mulf %71, %74 : vector<8x64x32xf32>
      %76 = vector.extract_strided_slice %75 {offsets = [0, 0, 0], sizes = [1, 64, 32], strides = [1, 1, 1]} : vector<8x64x32xf32> to vector<1x64x32xf32>
      %77 = vector.shape_cast %76 : vector<1x64x32xf32> to vector<64x32xf32>
      %78 = vector.extract_strided_slice %75 {offsets = [1, 0, 0], sizes = [1, 64, 32], strides = [1, 1, 1]} : vector<8x64x32xf32> to vector<1x64x32xf32>
      %79 = vector.shape_cast %78 : vector<1x64x32xf32> to vector<64x32xf32>
      %80 = vector.extract_strided_slice %75 {offsets = [2, 0, 0], sizes = [1, 64, 32], strides = [1, 1, 1]} : vector<8x64x32xf32> to vector<1x64x32xf32>
      %81 = vector.shape_cast %80 : vector<1x64x32xf32> to vector<64x32xf32>
      %82 = vector.extract_strided_slice %75 {offsets = [3, 0, 0], sizes = [1, 64, 32], strides = [1, 1, 1]} : vector<8x64x32xf32> to vector<1x64x32xf32>
      %83 = vector.shape_cast %82 : vector<1x64x32xf32> to vector<64x32xf32>
      %84 = vector.extract_strided_slice %75 {offsets = [4, 0, 0], sizes = [1, 64, 32], strides = [1, 1, 1]} : vector<8x64x32xf32> to vector<1x64x32xf32>
      %85 = vector.shape_cast %84 : vector<1x64x32xf32> to vector<64x32xf32>
      %86 = vector.extract_strided_slice %75 {offsets = [5, 0, 0], sizes = [1, 64, 32], strides = [1, 1, 1]} : vector<8x64x32xf32> to vector<1x64x32xf32>
      %87 = vector.shape_cast %86 : vector<1x64x32xf32> to vector<64x32xf32>
      %88 = vector.extract_strided_slice %75 {offsets = [6, 0, 0], sizes = [1, 64, 32], strides = [1, 1, 1]} : vector<8x64x32xf32> to vector<1x64x32xf32>
      %89 = vector.shape_cast %88 : vector<1x64x32xf32> to vector<64x32xf32>
      %90 = vector.extract_strided_slice %75 {offsets = [7, 0, 0], sizes = [1, 64, 32], strides = [1, 1, 1]} : vector<8x64x32xf32> to vector<1x64x32xf32>
      %91 = vector.shape_cast %90 : vector<1x64x32xf32> to vector<64x32xf32>
      %92 = tpu.concatenate %77, %79, %81, %83, %85, %87, %89, %91 in 1 : vector<64x32xf32>, vector<64x32xf32>, vector<64x32xf32>, vector<64x32xf32>, vector<64x32xf32>, vector<64x32xf32>, vector<64x32xf32>, vector<64x32xf32> -> vector<64x256xf32>
      %93 = arith.truncf %92 : vector<64x256xf32> to vector<64x256xbf16>
      %c0_37 = arith.constant 0 : index
      %c0_38 = arith.constant 0 : index
      %94 = vector.load %arg7[%c0_37, %c0_38] : memref<256x256xbf16, #tpu.memory_space<vmem>>, vector<256x256xbf16>
      %cst_39 = arith.constant dense<0.000000e+00> : vector<64x256xf32>
      %95 = tpu.matmul %93, %94, %cst_39 {dimension_numbers = #tpu.dot_dimension_numbers<[1], [0], [0], [1], [0, 0, 1, 1], [], []>} : vector<64x256xbf16>, vector<256x256xbf16>, vector<64x256xf32> -> vector<64x256xf32>
      %c0_40 = arith.constant 0 : index
      %c0_41 = arith.constant 0 : index
      %96 = vector.load %arg8[%c0_40, %c0_41] : memref<1x256xf32, #tpu.memory_space<vmem>>, vector<1x256xf32>
      %97 = vector.broadcast %96 : vector<1x256xf32> to vector<64x256xf32>
      %98 = arith.addf %95, %97 : vector<64x256xf32>
      %c0_42 = arith.constant 0 : index
      %c0_43 = arith.constant 0 : index
      %c0_44 = arith.constant 0 : index
      %99 = vector.load %arg9[%c0_42, %c0_43, %c0_44] : memref<1x64x256xf32, #tpu.memory_space<vmem>>, vector<1x64x256xf32>
      %100 = vector.shape_cast %99 : vector<1x64x256xf32> to vector<64x256xf32>
      %101 = vector.shape_cast %98 : vector<64x256xf32> to vector<1x64x256xf32>
      tpu.vector_store %arg9[%c0_42, %c0_43, %c0_44], %101 {strides = array<i32>} : memref<1x64x256xf32, #tpu.memory_space<vmem>>, vector<1x64x256xf32>,
    } else {
    }
    return
  }
  func.func @transform_0(%arg0: i32, %arg1: i32, %arg2: i32) -> (i32, i32, i32) {
    %c0_i32 = arith.constant 0 : i32
    %c0_i32_0 = arith.constant 0 : i32
    return %arg0, %arg1, %c0_i32 : i32, i32, i32
  }
  func.func @transform_1(%arg0: i32, %arg1: i32, %arg2: i32) -> (i32, i32, i32) {
    %c0_i32 = arith.constant 0 : i32
    %c0_i32_0 = arith.constant 0 : i32
    return %arg0, %arg2, %c0_i32 : i32, i32, i32
  }
  func.func @transform_2(%arg0: i32, %arg1: i32, %arg2: i32) -> (i32, i32) {
    %c0_i32 = arith.constant 0 : i32
    %c0_i32_0 = arith.constant 0 : i32
    %c0_i32_1 = arith.constant 0 : i32
    return %c0_i32, %c0_i32_0 : i32, i32
  }
  func.func @transform_3(%arg0: i32, %arg1: i32, %arg2: i32) -> (i32, i32) {
    %c0_i32 = arith.constant 0 : i32
    %c0_i32_0 = arith.constant 0 : i32
    %c0_i32_1 = arith.constant 0 : i32
    return %c0_i32, %c0_i32_0 : i32, i32
  }
  func.func @transform_4(%arg0: i32, %arg1: i32, %arg2: i32) -> (i32, i32) {
    %c0_i32 = arith.constant 0 : i32
    %c0_i32_0 = arith.constant 0 : i32
    %c0_i32_1 = arith.constant 0 : i32
    return %c0_i32, %c0_i32_0 : i32, i32
  }
  func.func @transform_5(%arg0: i32, %arg1: i32, %arg2: i32) -> (i32, i32) {
    %c0_i32 = arith.constant 0 : i32
    %c0_i32_0 = arith.constant 0 : i32
    %c0_i32_1 = arith.constant 0 : i32
    return %c0_i32, %c0_i32_0 : i32, i32
  }
  func.func @transform_6(%arg0: i32, %arg1: i32, %arg2: i32) -> (i32, i32, i32) {
    %c0_i32 = arith.constant 0 : i32
    %c0_i32_0 = arith.constant 0 : i32
    return %arg0, %arg1, %c0_i32 : i32, i32, i32
  }
}

</mosaic_0001>

<bundles_post_ra>
// kernel: tpu_custom_call.1
= control target key start
LH: loop header
LB: loop body
LE: loop exit
PB: predicated region body
PF: predicated region fallthrough
CT: control target
= control target key end

     0   :  { %s12714_s0 = inlined_call_operand.hbm [shape: bf16[2,128,256], index: 0, kind: input, shape index: {}]   ;;  %s12715_s1 = inlined_call_operand.hbm [shape: bf16[2,128,256], index: 1, kind: input, shape index: {}]   ;;  %s12716_s2 = inlined_call_operand.hbm [shape: bf16[256,256], index: 2, kind: input, shape index: {}]   ;;  %s12717_s3 = inlined_call_operand.hbm [shape: bf16[256,512], index: 3, kind: input, shape index: {}]   ;;  %s12718_s4 = inlined_call_operand.hbm [shape: bf16[256,256], index: 4, kind: input, shape index: {}]   ;;  %s12719_s5 = inlined_call_operand.hbm [shape: f32[1,256], index: 5, kind: input, shape index: {}]   ;;  %s12720_s6 = inlined_call_operand.hbm [shape: f32[2,128,256], index: 6, kind: output, shape index: {}]  }
   0x1   :  { %12963 = sst [smem:[#allocation187_spill]] %s12715_s1 }
   0x2   :  { %12964 = sst [smem:[#allocation188_spill]] %s12716_s2 }
   0x3   :  { %12965 = sst [smem:[#allocation189_spill]] %s12717_s3 }
   0x4   :  { %12966 = sst [smem:[#allocation190_spill]] %s12718_s4 }
   0x5   :  { %12967 = sst [smem:[#allocation191_spill]] %s12719_s5 }
   0x6   :  { %12968 = sst [smem:[#allocation192_spill]] %s12720_s6 }
   0x7   :  { %11 = vsyncpa [#allocation7], 0 }
   0x8   :  { %13 = vsyncpa [#allocation7 + $0x1], 0 }
   0x9   :  { %14 = vsyncpa [#allocation10], 0 }
   0xa   :  { %16 = vsyncpa [#allocation10 + $0x1], 0 }
   0xb   :  { %17 = vsyncpa [#allocation13], 0 }
   0xc   :  { %18 = vsyncpa [#allocation16], 0 }
   0xd   :  { %19 = vsyncpa [#allocation8], 0 }
   0xe   :  { %21 = vsyncpa [#allocation8 + $0x1], 0  ;;  %s9302_s21 = smov 0   ;;  %s9304_s22 = smov 0  }
   0xf   :  { %s9306_s23 = smov 0   ;;  %s9308_s24 = smov 0  }
  0x10   :  { %s9310_s25 = smov 0   ;;  %s9312_s26 = smov 0  }
  0x11   :  { %s9314_s27 = smov 0   ;;  %s9316_s28 = smov 0  }
  0x12   :  { %s9318_s29 = smov 0   ;;  %s9320_s30 = smov 0  }
  0x13   :  { %s9322_s7 = smov 0   ;;  %s9324_s8 = smov 0  }
  0x14   :  { %s9326_s9 = smov 0  }
  0x15 LB: > { %12969 = sst [smem:[#allocation24_spill]] %s9195_s22  ;;  %s9366_s10 = sadd.s32 4294967295, %s9239_s9   ;;  %s9239_s9 = sphi %s9326_s9, %s27_s9   ;;  %s9235_s8 = sphi %s9324_s8, %s13497_s8   ;;  %s9231_s7 = sphi %s9322_s7, %s13496_s7   ;;  %s9227_s30 = sphi %s9320_s30, %s13495_s30   ;;  %s9223_s29 = sphi %s9318_s29, %s13494_s29   ;;  %s9219_s28 = sphi %s9316_s28, %s13493_s28   ;;  %s9215_s27 = sphi %s9314_s27, %s13492_s27   ;;  %s9211_s26 = sphi %s9312_s26, %s13491_s26   ;;  %s9207_s25 = sphi %s9310_s25, %s13490_s25   ;;  %s9203_s24 = sphi %s9308_s24, %s13489_s24   ;;  %s9199_s23 = sphi %s9306_s23, %s13488_s23   ;;  %s9195_s22 = sphi %s9304_s22, %s13487_s22   ;;  %s9191_s21 = sphi %s9302_s21, %s13483_s21  }
  0x16   : > { %12970 = sst [smem:[#allocation25_spill]] %s9203_s24  ;;  %p96_p0 = scmp.ne.s32.totalorder %s9195_s22, %s9191_s21 }
  0x17   : > { %12971 = sst [smem:[#allocation26_spill]] %s9215_s27  ;;  %p12722_p1 = scmp.eq.s32.totalorder %s9366_s10, 0 }
  0x18   : > { %12972 = sst [smem:[#allocation27_spill]] %s9219_s28  ;;  %p6922_p3 = scmp.ge.s32.totalorder %s9239_s9, 1 }
  0x19   : > { %12973 = sst [smem:[#allocation28_spill]] %s9223_s29  ;;  %p219_p4 = scmp.lt.s32.totalorder %s9239_s9, 9 }
  0x1a   : > { %p9375_p5 = por %p96_p0, %p12722_p1  ;;  %s9241_s13 = smov [#allocation11]  }
  0x1b   : > { %p9379_p6 = pnand %p6922_p3, %p219_p4  ;;  %s231_s14 = sshll.u32 %s9241_s13, 4  ;;  %s232_s14 = int_to_ptr.vmem [resolvable:$true] %s231_s14 }
  0x1c   : > { %s12974_s11 = scalar_select %p9375_p5, 1, 0 }
  0x1d   : > { %s12976_s12 = scalar_select %p9379_p6, 1, 0 }
  0x1e   : > { %12975 = sst [smem:[#allocation29_spill]] %s12974_s11  ;;  %p7668_p7 = pneg %p9379_p6 }
  0x1f   : > { %12977 = sst [smem:[#allocation30_spill]] %s12976_s12  ;;  %s9242_s16 = smov [#allocation12]  }
  0x20   : > { %p9387_p8 = pnand %p7668_p7, %p12722_p1  ;;  %s244_s17 = sshll.u32 %s9242_s16, 4  ;;  %s9391_s17 = int_to_ptr.vmem [resolvable:$true] %s244_s17 }
  0x21   : > { %s12979_s2 = sld [smem:[#allocation188_spill]] }
  0x22   : > { %p9401_p10 = pneg %p9387_p8 }
  0x27   : > { %s8913_s20 = scalar_lea.hbm %s12979_s2, 4096 }
  0x28   : > { %p8914_p9 = scmp.ne.s32.totalorder %s12979_s2, %s8913_s20  ;;  %p8920_p13 = scmp.lt.u32.totalorder %s8913_s20, %s12979_s2 }
  0x2a   : > { %p8916_p11 = pnand %p9401_p10, %p8914_p9 }
  0x2c   : > { %p8917_p12 = pneg %p8916_p11 }
  0x2e   : > { %p8922_p0 = pnand %p8920_p13, %p8917_p12 }
  0x30   : > { %8925 = shalt.err (!%p8922_p0)
}
  0x31   : > { %s8926_s18 = scalar_lea.vmem %s232_s14, 4096  ;;  %p8934_p2 = scmp.lt.s32.totalorder %s232_s14, %s232_s14 }
  0x32   : > { %p8927_p3 = scmp.ne.s32.totalorder %s232_s14, %s8926_s18  ;;  %p8935_p1 = scmp.lt.s32.totalorder %s8926_s18, %s8926_s18 }
  0x34   : > { %p8929_p4 = pnand %p8927_p3, %p9401_p10  ;;  %p8936_p5 = por %p8935_p1, %p8934_p2 }
  0x36   : > { %p8930_p7 = pneg %p8929_p4 }
  0x38   : > { %p8937_p6 = pnand %p8936_p5, %p8930_p7 }
  0x3a   : > { %8940 = shalt.err (!%p8937_p6)
}
  0x3b   : > { %s12728_s6 = smov 128   ;;  %s12730_s19 = smov 8  }
  0x3c   : > { %7671 = dma.hbm_to_vmem [thread:$0]  (!%p9387_p8), %s12979_s2, 4096, %s232_s14, [#allocation10], %s12728_s6, %s12728_s6, %s12730_s19  }
  0x3d   : > { %s12981_s3 = sld [smem:[#allocation189_spill]] }
  0x43   : > { %s8941_s28 = scalar_lea.hbm %s12981_s3, 8192 }
  0x44   : > { %p8942_p1 = scmp.ne.s32.totalorder %s12981_s3, %s8941_s28  ;;  %p8948_p6 = scmp.lt.u32.totalorder %s8941_s28, %s12981_s3 }
  0x46   : > { %p8944_p2 = pnand %p8942_p1, %p9401_p10 }
  0x48   : > { %p8945_p5 = pneg %p8944_p2 }
  0x4a   : > { %p8950_p9 = pnand %p8948_p6, %p8945_p5 }
  0x4c   : > { %8953 = shalt.err (!%p8950_p9)
}
  0x4d   : > { %s8954_s14 = scalar_lea.vmem %s9391_s17, 8192  ;;  %p8962_p0 = scmp.lt.s32.totalorder %s9391_s17, %s9391_s17 }
  0x4e   : > { %p8955_p11 = scmp.ne.s32.totalorder %s9391_s17, %s8954_s14  ;;  %p8963_p3 = scmp.lt.s32.totalorder %s8954_s14, %s8954_s14 }
  0x50   : > { %p8957_p12 = pnand %p8955_p11, %p9401_p10  ;;  %p8964_p4 = por %p8963_p3, %p8962_p0 }
  0x52   : > { %p8958_p13 = pneg %p8957_p12 }
  0x54   : > { %p8965_p7 = pnand %p8964_p4, %p8958_p13 }
  0x56   : > { %8968 = shalt.err (!%p8965_p7)
}
  0x57   : > { %s9245_s27 = smov 256   ;;  %s9246_s28 = smov 16  }
  0x58   : > { %7674 = dma.hbm_to_vmem [thread:$0]  (!%p9387_p8), %s12981_s3, 8192, %s9391_s17, [#allocation13], %s9245_s27, %s9245_s27, %s9246_s28  }
  0x59   : > { %s9247_s29 = smov [#allocation14]   ;;  %s9248_s21 = smov [#allocation15]  }
  0x5a   : > { %s257_s20 = sshll.u32 %s9247_s29, 4  ;;  %s271_s16 = sshll.u32 %s9248_s21, 4  ;;  %s258_s20 = int_to_ptr.vmem [resolvable:$true] %s257_s20  ;;  %s272_s16 = int_to_ptr.vmem [resolvable:$true] %s271_s16 }
  0x5b   : > { %s12982_s4 = sld [smem:[#allocation190_spill]] }
  0x61   : > { %s8969_s6 = scalar_lea.hbm %s12982_s4, 4096 }
  0x62   : > { %p8970_p1 = scmp.ne.s32.totalorder %s12982_s4, %s8969_s6  ;;  %p8976_p6 = scmp.lt.u32.totalorder %s8969_s6, %s12982_s4 }
  0x64   : > { %p8972_p2 = pnand %p8970_p1, %p9401_p10 }
  0x66   : > { %p8973_p5 = pneg %p8972_p2 }
  0x68   : > { %p8978_p9 = pnand %p8976_p6, %p8973_p5 }
  0x6a   : > { %8981 = shalt.err (!%p8978_p9)
}
  0x6b   : > { %s8982_s17 = scalar_lea.vmem %s258_s20, 4096  ;;  %p8990_p0 = scmp.lt.s32.totalorder %s258_s20, %s258_s20 }
  0x6c   : > { %p8983_p11 = scmp.ne.s32.totalorder %s258_s20, %s8982_s17  ;;  %p8991_p3 = scmp.lt.s32.totalorder %s8982_s17, %s8982_s17 }
  0x6e   : > { %p8985_p12 = pnand %p8983_p11, %p9401_p10  ;;  %p8992_p4 = por %p8991_p3, %p8990_p0 }
  0x70   : > { %p8986_p13 = pneg %p8985_p12 }
  0x72   : > { %p8993_p7 = pnand %p8992_p4, %p8986_p13 }
  0x74   : > { %8996 = shalt.err (!%p8993_p7)
}
  0x75   : > { %s12983_s2 = smov 8   ;;  %s12984_s19 = smov 128  }
  0x76   : > { %7677 = dma.hbm_to_vmem [thread:$0]  (!%p9387_p8), %s12982_s4, 4096, %s258_s20, [#allocation13], %s12984_s19, %s12984_s19, %s12983_s2  }
  0x77   : > { %s12985_s5 = sld [smem:[#allocation191_spill]] }
  0x7d   : > { %s8997_s28 = scalar_lea.hbm %s12985_s5, 32 }
  0x7e   : > { %p8998_p1 = scmp.ne.s32.totalorder %s12985_s5, %s8997_s28  ;;  %p9004_p6 = scmp.lt.u32.totalorder %s8997_s28, %s12985_s5 }
  0x80   : > { %p9000_p2 = pnand %p8998_p1, %p9401_p10 }
  0x82   : > { %p9001_p5 = pneg %p9000_p2 }
  0x84   : > { %p9006_p9 = pnand %p9004_p6, %p9001_p5 }
  0x86   : > { %9009 = shalt.err (!%p9006_p9)
}
  0x87   : > { %s9010_s18 = scalar_lea.vmem %s272_s16, 32  ;;  %p9018_p0 = scmp.lt.s32.totalorder %s272_s16, %s272_s16 }
  0x88   : > { %p9011_p11 = scmp.ne.s32.totalorder %s272_s16, %s9010_s18  ;;  %p9019_p3 = scmp.lt.s32.totalorder %s9010_s18, %s9010_s18 }
  0x8a   : > { %p9013_p12 = pnand %p9011_p11, %p9401_p10  ;;  %p9020_p4 = por %p9019_p3, %p9018_p0 }
  0x8c   : > { %p9014_p13 = pneg %p9013_p12 }
  0x8e   : > { %p9021_p7 = pnand %p9020_p4, %p9014_p13 }
  0x90   : > { %9024 = shalt.err (!%p9021_p7)
}
  0x91   : > { %7680 = dma.hbm_to_vmem [thread:$0]  (!%p9387_p8), %s12985_s5, 32, %s272_s16, [#allocation16]  }
  0x92   : > { %s6921_s15 = sadd.s32 4294967294, %s9239_s9   ;;  %s39_s13 = sadd.s32 1, %s9227_s30 }
  0x93   : > { %s42_s17 = sadd.s32 1, %s9231_s7  ;;  %p40_p10 = scmp.ge.s32.totalorder %s39_s13, 2 }
  0x94   : > { %s46_s1 = sadd.s32 1, %s9235_s8  ;;  %s55_s22 = sadd.s32 1, %s9211_s26 }
  0x95   : > { %p62_p1 = scmp.ne.s32.totalorder %s9211_s26, %s9207_s25  ;;  %s13499_s13 = smov (%p40_p10, %s39_s13), 0 }
  0x96   : > { %12986 = sst [smem:[#allocation31_spill]] %s13499_s13  ;;  %s13501_s17 = smov (!%p40_p10, %s42_s17), %s9231_s7 }
  0x97   : > { %p12739_p2 = scmp.eq.s32.totalorder %s9239_s9, 0  ;;  %p68_p8 = scmp.ne.s32.totalorder %s9207_s25, %s9203_s24 }
  0x98   : > { %p44_p5 = scmp.ge.s32.totalorder %s13501_s17, 2  ;;  %s79_s16 = ssub.s32 %s9227_s30, %s13499_s13 }
  0x99   : > { %p9499_p6 = por %p12739_p2, %p62_p1  ;;  %p12988_p9 = scmp.eq.s32.totalorder %s9366_s10, 0 }
  0x9a   : > { %s13503_s17 = smov (%p44_p5, %s13501_s17), 0  ;;  %s13505_s1 = smov (!%p44_p5, %s46_s1), %s9235_s8 }
  0x9b   : > { %p9508_p11 = por %p12988_p9, %p68_p8  ;;  %12990 = sst [smem:[#allocation32_spill]] %s13503_s17 }
  0x9c   : > { %s51_s28 = ssub.s32 %s9231_s7, %s13503_s17  ;;  %p12991_p12 = scmp.eq.s32.totalorder %s9366_s10, 7 }
  0x9d   : > { %p48_p0 = scmp.ge.s32.totalorder %s13505_s1, 2  ;;  %p212_p3 = scmp.eq.s32.totalorder %s6921_s15, 7 }
  0x9e   : > { %p9519_p13 = por %p12991_p12, %p62_p1  ;;  %p12738_p4 = scmp.lt.s32.totalorder %s9239_s9, 8 }
  0x9f   : > { %s282_s12 = sand.u32 1, %s9211_s26   ;;  %s13507_s1 = smov (%p48_p0, %s13505_s1), 0 }
  0xa0   : > { %s12992_s11 = scalar_select %p9519_p13, 1, 0 }
  0xa1   : > { %12993 = sst [smem:[#allocation33_spill]] %s13507_s1  ;;  %p9530_p7 = por %p212_p3, %p68_p8 }
  0xa2   : > { %s50_s21 = ssub.s32 %s9235_s8, %s13507_s1  ;;  %s6928_s18 = sshll.u32 %s282_s12, 6 }
  0xa3   : > { %s12994_s29 = scalar_select %p9530_p7, 1, 0 }
  0xa4   : > { %s52_s20 = sor.u32 %s51_s28, %s50_s21  ;;  %s9536_s14 = sor.u32 %s79_s16, %s50_s21 }
  0xa5   : > { %p53_p10 = scmp.eq.s32.totalorder %s52_s20, 0  ;;  %s7163_s15 = sshll.u32 %s9231_s7, 4 }
  0xa6   : > { %s6931_s4 = sshll.u32 %s9235_s8, 5  ;;  %s286_s5 = scalar_lea.vmem [#allocation6], %s6928_s18 }
  0xa7   : > { %s9541_s3 = scalar_select %p53_p10, %s9211_s26, %s55_s22  }
  0xa8   : > { %s296_s17 = sshll.u32 %s286_s5, 4  ;;  %s293_s13 = sadd.s32 %s7163_s15, %s6931_s4  ;;  %s9544_s17 = int_to_ptr.vmem [resolvable:$true] %s296_s17 }
  0xa9   : > { %s6932_s24 = sshll.u32 %s293_s13, 6  ;;  %p9550_p8 = pnand %p12738_p4, %p9499_p6 }
  0xaa   : > { %s9557_s22 = scalar_lea.hbm %s12714_s0, %s6932_s24  ;;  %s7164_s5 = sshll.u32 %s9227_s30, 4 }
  0xab   : > { %s9560_s21 = sadd.s32 %s7164_s5, %s6931_s4  ;;  %s9562_s13 = scalar_lea.sflag [#allocation7], %s282_s12 }
  0xac   : > { %s9025_s6 = scalar_lea.hbm %s9557_s22, 1024  ;;  %p9027_p6 = pneg %p9550_p8 }
  0xad   : > { %p9026_p5 = scmp.ne.s32.totalorder %s9557_s22, %s9025_s6  ;;  %s9030_s20 = scalar_lea.hbm %s12714_s0, 4096 }
  0xae   : > { %p9031_p0 = scmp.lt.u32.totalorder %s9557_s22, %s12714_s0  ;;  %p9032_p3 = scmp.lt.u32.totalorder %s9030_s20, %s9025_s6 }
  0xaf   : > { %p9028_p9 = pnand %p9027_p6, %p9026_p5  ;;  %p9034_p4 = scmp.lt.u32.totalorder %s9025_s6, %s9557_s22 }
  0xb0   : > { %p9033_p10 = por %p9032_p3, %p9031_p0 }
  0xb1   : > { %p9029_p12 = pneg %p9028_p9 }
  0xb2   : > { %p9035_p2 = por %p9034_p4, %p9033_p10 }
  0xb4   : > { %p9036_p1 = pnand %p9035_p2, %p9029_p12 }
  0xb6   : > { %9039 = shalt.err (!%p9036_p1)
}
  0xb7   : > { %s9040_s4 = scalar_lea.vmem %s9544_s17, 1024  ;;  %s9249_s12 = smov [#allocation6]  }
  0xb8   : > { %p9041_p5 = scmp.ne.s32.totalorder %s9544_s17, %s9040_s4  ;;  %s9045_s28 = sshll.u32 %s9249_s12, 4  ;;  %s9046_s28 = int_to_ptr.vmem [resolvable:$false] %s9045_s28 }
  0xb9   : > { %s9047_s5 = scalar_lea.vmem %s9046_s28, 2048  ;;  %p9048_p13 = scmp.lt.s32.totalorder %s9544_s17, %s9046_s28 }
  0xba   : > { %p9043_p9 = pnand %p9041_p5, %p9027_p6  ;;  %p9049_p0 = scmp.lt.s32.totalorder %s9047_s5, %s9040_s4 }
  0xbc   : > { %p9044_p7 = pneg %p9043_p9  ;;  %p9050_p3 = por %p9049_p0, %p9048_p13 }
  0xbe   : > { %p9051_p4 = pnand %p9050_p3, %p9044_p7 }
  0xc0   : > { %9054 = shalt.err (!%p9051_p4)
}
  0xc1   : > { %s12996_s6 = sld [smem:[#allocation24_spill]]  ;;  %s6937_s18 = sshll.u32 %s9560_s21, 6 }
  0xc2   : > { %7684 = dma.hbm_to_vmem [thread:$0]  (!%p9550_p8), %s9557_s22, 1024, %s9544_s17, %s9562_s13, %s12984_s19, %s12984_s19, %s12983_s2  }
  0xc3   : > { %s83_s24 = sadd.s32 1, %s9199_s23  ;;  %p12997_p13 = scmp.eq.s32.totalorder %s9536_s14, 0 }
  0xc4   : > { %p12998_p7 = scmp.eq.s32.totalorder %s9239_s9, 0  ;;  %s306_s20 = sand.u32 1, %s9239_s9  }
  0xc5   : > { %s9600_s1 = scalar_select %p12997_p13, %s9199_s23, %s83_s24  }
  0xc6   : > { %s12999_s4 = sld [smem:[#allocation187_spill]]  ;;  %s308_s28 = sand.u32 1, %s9199_s23  }
  0xc7   : > { %p90_p2 = scmp.ne.s32.totalorder %s9199_s23, %s12996_s6  ;;  %s6933_s17 = sshll.u32 %s308_s28, 6 }
  0xc8   : > { %p13000_p8 = scmp.lt.s32.totalorder %s9239_s9, 8  ;;  %s310_s14 = scalar_lea.vmem [#allocation9], %s6933_s17 }
  0xc9   : > { %p92_p1 = por %p90_p2, %p12998_p7  ;;  %s320_s21 = sshll.u32 %s310_s14, 4  ;;  %s9617_s21 = int_to_ptr.vmem [resolvable:$true] %s320_s21 }
  0xca   : > { %s9619_s13 = scalar_lea.sflag [#allocation10], %s306_s20 }
  0xcb   : > { %p9613_p6 = pnand %p13000_p8, %p92_p1 }
  0xcc   : > { %s9608_s12 = scalar_lea.hbm %s12999_s4, %s6937_s18  ;;  %s9060_s24 = scalar_lea.hbm %s12999_s4, 4096 }
  0xcd   : > { %s9055_s5 = scalar_lea.hbm %s9608_s12, 1024  ;;  %p9057_p10 = pneg %p9613_p6 }
  0xce   : > { %p9056_p12 = scmp.ne.s32.totalorder %s9608_s12, %s9055_s5  ;;  %p9061_p0 = scmp.lt.u32.totalorder %s9608_s12, %s12999_s4 }
  0xcf   : > { %p9062_p3 = scmp.lt.u32.totalorder %s9060_s24, %s9055_s5  ;;  %p9064_p2 = scmp.lt.u32.totalorder %s9055_s5, %s9608_s12 }
  0xd0   : > { %p9058_p5 = pnand %p9057_p10, %p9056_p12 }
  0xd1   : > { %p9063_p4 = por %p9062_p3, %p9061_p0 }
  0xd2   : > { %p9059_p9 = pneg %p9058_p5 }
  0xd3   : > { %p9065_p13 = por %p9064_p2, %p9063_p4 }
  0xd5   : > { %p9066_p7 = pnand %p9065_p13, %p9059_p9 }
  0xd7   : > { %9069 = shalt.err (!%p9066_p7)
}
  0xd8   : > { %s9070_s20 = scalar_lea.vmem %s9617_s21, 1024  ;;  %s9250_s28 = smov [#allocation9]  }
  0xd9   : > { %p9071_p1 = scmp.ne.s32.totalorder %s9617_s21, %s9070_s20  ;;  %s9075_s17 = sshll.u32 %s9250_s28, 4  ;;  %s9076_s17 = int_to_ptr.vmem [resolvable:$false] %s9075_s17 }
  0xda   : > { %s9077_s14 = scalar_lea.vmem %s9076_s17, 2048  ;;  %p9078_p5 = scmp.lt.s32.totalorder %s9617_s21, %s9076_s17 }
  0xdb   : > { %p9073_p8 = pnand %p9071_p1, %p9057_p10  ;;  %p9079_p0 = scmp.lt.s32.totalorder %s9077_s14, %s9070_s20 }
  0xdd   : > { %p9074_p12 = pneg %p9073_p8  ;;  %p9080_p3 = por %p9079_p0, %p9078_p5 }
  0xdf   : > { %p9081_p4 = pnand %p9080_p3, %p9074_p12 }
  0xe1   : > { %9084 = shalt.err (!%p9081_p4)
}
  0xe2   : > { %7687 = dma.hbm_to_vmem [thread:$0]  (!%p9613_p6), %s9608_s12, 1024, %s9617_s21, %s9619_s13, %s12984_s19, %s12984_s19, %s12983_s2  }
  0xe3   : > { %s13002_s5 = sld [smem:[#allocation30_spill]] }
  0xe9   : > { %p13003_p10 = scmp.ne.s32.totalorder %s13002_s5, 0 }
  0xeb   : > { %332 = sbr.rel (%p13003_p10) target bundleno = 2966 (0xb96), region = 44 }
  0xf2   : > { %s9653_s6 = sand.u32 1, %s9207_s25  }
  0xf3   : > { %s6939_s18 = sshll.u32 %s9653_s6, 6  ;;  %s335_s24 = scalar_lea.sflag [#allocation7], %s9653_s6 }
  0xf4   : > { %s9657_s15 = scalar_lea.vmem [#allocation6], %s6939_s18 }
  0xf5   : > { %9166 = dma.done.wait (%p9508_p11), %s335_s24, 1024  }
  0xf6   : > { %9168 = vsyncadd (%p9508_p11), %s335_s24, 4294966272  ;;  %s13004_s2 = sld [smem:[#allocation24_spill]]  ;;  %s343_s12 = sand.u32 1, %s9366_s10  }
  0xf7   : > { %s13005_s19 = sld [smem:[#allocation29_spill]]  ;;  %s344_s13 = scalar_lea.sflag [#allocation10], %s343_s12 }
  0xfc   : > { %s345_s22 = sand.u32 1, %s13004_s2  }
  0xfd   : > { %s6940_s21 = sshll.u32 %s345_s22, 6  ;;  %p13006_p6 = scmp.ne.s32.totalorder %s13005_s19, 0 }
  0xfe   : > { %s9665_s16 = scalar_lea.vmem [#allocation9], %s6940_s21 }
  0xff   : > { %9170 = dma.done.wait (%p13006_p6), %s344_s13, 1024  }
 0x100   : > { %9172 = vsyncadd (%p13006_p6), %s344_s13, 4294966272  ;;  %p13007_p9 = scmp.eq.s32.totalorder %s9366_s10, 0 }
 0x102   : > { %9174 = dma.done.wait (%p13007_p9), [#allocation10], 4096   ;;  %p13008_p2 = pmov %p13007_p9 }
 0x104   : > { %9176 = vsyncadd (%p13008_p2), [#allocation10], 4294963200  ;;  %p13009_p11 = pmov %p13008_p2 }
 0x105   : > { %p13010_p13 = pmov %p13008_p2 }
 0x106   : > { %9178 = dma.done.wait (%p13009_p11), [#allocation13], 12288  }
 0x107   : > { %9180 = vsyncadd (%p13010_p13), [#allocation13], 4294955008  ;;  %p13011_p7 = pmov %p13008_p2 }
 0x108   : > { %p13012_p1 = pmov %p13008_p2 }
 0x109   : > { %9182 = dma.done.wait (%p13011_p7), [#allocation16], 32  }
 0x10a   : > { %9184 = vsyncadd (%p13012_p1), [#allocation16], 4294967264  ;;  %s6945_s27 = sshll.u32 %s9653_s6, 7  ;;  %s13013_s28 = sld [smem:[#allocation26_spill]] }
 0x10b   : > { %s9684_s20 = scalar_lea.vmem [#allocation17], %s6945_s27 }
 0x110   : > { %p6946_p8 = scmp.ne.s32.totalorder %s13013_s28, 0 }
 0x111   : > { %v7949_v0 = vld [vmem:[#allocation11 + $0x4] ss:$8 sps:$4 sm:$0xff] (!%p6946_p8)   ;;  %v7951_v1 = vld [vmem:[#allocation11] ss:$8 sps:$4 sm:$0xff] (!%p6946_p8)   ;;  %v7952_v2 = vld [vmem:[#allocation11 + $0x14] ss:$8 sps:$4 sm:$0xff] (!%p6946_p8)  }
 0x112   : > { %404 = sbr.rel (%p6946_p8) target bundleno = 724 (0x2d4), region = 72  ;;  %645 = vmatprep.subr.bf16.mxu0 (!%p6946_p8), %v7949_v0  ;;  %7550 = vmatprep.subr.bf16.mxu1 (!%p6946_p8), %v7949_v0  ;;  %v7954_v3 = vld [vmem:[#allocation11 + $0x10] ss:$8 sps:$4 sm:$0xff] (!%p6946_p8)   ;;  %v7955_v4 = vld [vmem:[#allocation11 + $0x24] ss:$8 sps:$4 sm:$0xff] (!%p6946_p8)   ;;  %vm926_vm0 = vcmask (!%p6946_p8), 261120  }
 0x113   : > { %646 = vmatpush1.bf16.msra.mxu0 (!%p6946_p8), %v7951_v1  ;;  %7566 = vmatpush1.bf16.msra.mxu1 (!%p6946_p8), %v7951_v1  ;;  %v7957_v5 = vld [vmem:[#allocation11 + $0x20] ss:$8 sps:$4 sm:$0xff] (!%p6946_p8)   ;;  %v7958_v6 = vld [vmem:[#allocation11 + $0x34] ss:$8 sps:$4 sm:$0xff] (!%p6946_p8)   ;;  %v7960_v7 = vld [vmem:[#allocation11 + $0x30] ss:$8 sps:$4 sm:$0xff] (!%p6946_p8)  }
 0x114   : > { %647 = vmatprep.subr.bf16.mxu0 (!%p6946_p8), %v7952_v2  ;;  %7551 = vmatprep.subr.bf16.mxu1 (!%p6946_p8), %v7952_v2  ;;  %v7961_v8 = vld [vmem:[#allocation11 + $0x44] ss:$8 sps:$4 sm:$0xff] (!%p6946_p8)   ;;  %v7963_v9 = vld [vmem:[#allocation11 + $0x40] ss:$8 sps:$4 sm:$0xff] (!%p6946_p8)   ;;  %v7964_v10 = vld [vmem:[#allocation11 + $0x54] ss:$8 sps:$4 sm:$0xff] (!%p6946_p8)  }
 0x115   : > { %v7966_v11 = vld [vmem:[#allocation11 + $0x50] ss:$8 sps:$4 sm:$0xff] (!%p6946_p8)   ;;  %v7967_v12 = vld [vmem:[#allocation11 + $0x64] ss:$8 sps:$4 sm:$0xff] (!%p6946_p8)   ;;  %v7969_v14 = vld [vmem:[#allocation11 + $0x60] ss:$8 sps:$4 sm:$0xff] (!%p6946_p8)  }
 0x116   : > { %v7999_v13 = vld [vmem:[%s9657_s15 + $0x4] ss:$8 sps:$4 sm:$0xff] (!%p6946_p8)   ;;  %v7970_v16 = vld [vmem:[#allocation11 + $0x74] ss:$8 sps:$4 sm:$0xff] (!%p6946_p8)   ;;  %v7972_v17 = vld [vmem:[#allocation11 + $0x70] ss:$8 sps:$4 sm:$0xff] (!%p6946_p8)  }
 0x117   : > { %648 = vmatpush1.bf16.msra.mxu0 (!%p6946_p8), %v7954_v3  ;;  %7567 = vmatpush1.bf16.msra.mxu1 (!%p6946_p8), %v7954_v3  ;;  %v8002_v15 = vld [vmem:[%s9657_s15 + $0x24] ss:$8 sps:$4 sm:$0xff] (!%p6946_p8)   ;;  %v7975_v19 = vld [vmem:[#allocation11 + $0x80] ss:$8 sps:$4 sm:$0xff] (!%p6946_p8)   ;;  %v7976_v20 = vld [vmem:[#allocation11 + $0x94] ss:$8 sps:$4 sm:$0xff] (!%p6946_p8)  }
 0x118   : > { %649 = vmatprep.subr.bf16.mxu0 (!%p6946_p8), %v7955_v4  ;;  %7552 = vmatprep.subr.bf16.mxu1 (!%p6946_p8), %v7955_v4  ;;  %v7973_v18 = vld [vmem:[#allocation11 + $0x84] ss:$8 sps:$4 sm:$0xff] (!%p6946_p8)   ;;  %v7978_v21 = vld [vmem:[#allocation11 + $0x90] ss:$8 sps:$4 sm:$0xff] (!%p6946_p8)   ;;  %v7981_v23 = vld [vmem:[#allocation11 + $0xa0] ss:$8 sps:$4 sm:$0xff] (!%p6946_p8)  }
 0x119   : > { %677 = vmatprep.mubr.bf16.mxu0 %v7999_v13  ;;  %697 = vmatprep.mubr.bf16.mxu1 %v8002_v15  ;;  %v7979_v22 = vld [vmem:[#allocation11 + $0xa4] ss:$8 sps:$4 sm:$0xff]   ;;  %v7982_v24 = vld [vmem:[#allocation11 + $0xb4] ss:$8 sps:$4 sm:$0xff]   ;;  %v7984_v25 = vld [vmem:[#allocation11 + $0xb0] ss:$8 sps:$4 sm:$0xff]  }
 0x11a   : > { %v7985_v26 = vld [vmem:[#allocation11 + $0xc4] ss:$8 sps:$4 sm:$0xff]   ;;  %v7987_v27 = vld [vmem:[#allocation11 + $0xc0] ss:$8 sps:$4 sm:$0xff]   ;;  %v7988_v28 = vld [vmem:[#allocation11 + $0xd4] ss:$8 sps:$4 sm:$0xff]  }
 0x11b   : > { %650 = vmatpush1.bf16.msra.mxu0 %v7957_v5  ;;  %7568 = vmatpush1.bf16.msra.mxu1 %v7957_v5  ;;  %v7990_v29 = vld [vmem:[#allocation11 + $0xd0] ss:$8 sps:$4 sm:$0xff]   ;;  %v7991_v30 = vld [vmem:[#allocation11 + $0xe4] ss:$8 sps:$4 sm:$0xff]   ;;  %v7993_v31 = vld [vmem:[#allocation11 + $0xe0] ss:$8 sps:$4 sm:$0xff]  }
 0x11c   : > { %651 = vmatprep.subr.bf16.mxu0 %v7958_v6  ;;  %7553 = vmatprep.subr.bf16.mxu1 %v7958_v6  ;;  %v7994_v32 = vld [vmem:[#allocation11 + $0xf4] ss:$8 sps:$4 sm:$0xff]   ;;  %v7996_v33 = vld [vmem:[#allocation11 + $0xf0] ss:$8 sps:$4 sm:$0xff]   ;;  %v7997_v34 = vld [vmem:[%s9657_s15] ss:$8 sps:$4 sm:$0xff]  }
 0x11d   : > { %v8000_v35 = vld [vmem:[%s9657_s15 + $0x20] ss:$8 sps:$4 sm:$0xff]   ;;  %v8003_v36 = vld [vmem:[%s9657_s15 + $0x34] ss:$8 sps:$4 sm:$0xff]   ;;  %v8007_v38 = vld [vmem:[%s9657_s15 + $0x30] ss:$8 sps:$4 sm:$0xff]  }
 0x11e   : > { %v8005_v37 = vld [vmem:[%s9657_s15 + $0x14] ss:$8 sps:$4 sm:$0xff]   ;;  %v8008_v39 = vld [vmem:[%s9657_s15 + $0x10] ss:$8 sps:$4 sm:$0xff]   ;;  %s9251_s10 = smov 96   ;;  %s9252_s17 = smov 64  }
 0x11f   : > { %652 = vmatpush1.bf16.msra.mxu0 %v7960_v7  ;;  %7569 = vmatpush1.bf16.msra.mxu1 %v7960_v7  ;;  %s9253_s14 = smov 32   ;;  %vm959_vm1 = vcmask 7168  }
 0x120   : > { %653 = vmatprep.subr.bf16.mxu0 %v7961_v8  ;;  %7554 = vmatprep.subr.bf16.mxu1 %v7961_v8 }
 0x123   : > { %654 = vmatpush1.bf16.msra.mxu0 %v7963_v9  ;;  %7570 = vmatpush1.bf16.msra.mxu1 %v7963_v9 }
 0x124   : > { %655 = vmatprep.subr.bf16.mxu0 %v7964_v10  ;;  %7555 = vmatprep.subr.bf16.mxu1 %v7964_v10 }
 0x127   : > { %656 = vmatpush1.bf16.msra.mxu0 %v7966_v11  ;;  %7571 = vmatpush1.bf16.msra.mxu1 %v7966_v11 }
 0x128   : > { %657 = vmatprep.subr.bf16.mxu0 %v7967_v12  ;;  %7556 = vmatprep.subr.bf16.mxu1 %v7967_v12 }
 0x12b   : > { %658 = vmatpush1.bf16.msra.mxu0 %v7969_v14  ;;  %7572 = vmatpush1.bf16.msra.mxu1 %v7969_v14 }
 0x12c   : > { %659 = vmatprep.subr.bf16.mxu0 %v7970_v16  ;;  %7557 = vmatprep.subr.bf16.mxu1 %v7970_v16 }
 0x12f   : > { %660 = vmatpush1.bf16.msra.mxu0 %v7972_v17  ;;  %7573 = vmatpush1.bf16.msra.mxu1 %v7972_v17 }
 0x130   : > { %661 = vmatprep.subr.bf16.mxu0 %v7973_v18  ;;  %7558 = vmatprep.subr.bf16.mxu1 %v7973_v18 }
 0x133   : > { %662 = vmatpush1.bf16.msra.mxu0 %v7975_v19  ;;  %7574 = vmatpush1.bf16.msra.mxu1 %v7975_v19 }
 0x134   : > { %663 = vmatprep.subr.bf16.mxu0 %v7976_v20  ;;  %7559 = vmatprep.subr.bf16.mxu1 %v7976_v20 }
 0x137   : > { %664 = vmatpush1.bf16.msra.mxu0 %v7978_v21  ;;  %7575 = vmatpush1.bf16.msra.mxu1 %v7978_v21 }
 0x138   : > { %665 = vmatprep.subr.bf16.mxu0 %v7979_v22  ;;  %7560 = vmatprep.subr.bf16.mxu1 %v7979_v22 }
 0x13b   : > { %666 = vmatpush1.bf16.msra.mxu0 %v7981_v23  ;;  %7576 = vmatpush1.bf16.msra.mxu1 %v7981_v23 }
 0x13c   : > { %667 = vmatprep.subr.bf16.mxu0 %v7982_v24  ;;  %7561 = vmatprep.subr.bf16.mxu1 %v7982_v24  ;;  %v9254_v24 = vmov -inf  }
 0x13d   : > { %960 = vst.msk [vmem:[#allocation3] sm:$0xff] %vm959_vm1, %v9254_v24  ;;  %961 = vst.msk [vmem:[#allocation3 + $0x8] sm:$0xff] %vm959_vm1, %v9254_v24 }
 0x13e   : > { %962 = vst.msk [vmem:[#allocation3 + $0x10] sm:$0xff] %vm959_vm1, %v9254_v24  ;;  %963 = vst.msk [vmem:[#allocation3 + $0x18] sm:$0xff] %vm959_vm1, %v9254_v24 }
 0x13f   : > { %668 = vmatpush1.bf16.msra.mxu0 %v7984_v25  ;;  %7577 = vmatpush1.bf16.msra.mxu1 %v7984_v25  ;;  %964 = vst.msk [vmem:[#allocation3 + $0x20] sm:$0xff] %vm959_vm1, %v9254_v24  ;;  %965 = vst.msk [vmem:[#allocation3 + $0x28] sm:$0xff] %vm959_vm1, %v9254_v24  ;;  %v9255_v25 = vmov 0.0  }
 0x140   : > { %669 = vmatprep.subr.bf16.mxu0 %v7985_v26  ;;  %7562 = vmatprep.subr.bf16.mxu1 %v7985_v26  ;;  %966 = vst.msk [vmem:[#allocation3 + $0x30] sm:$0xff] %vm959_vm1, %v9254_v24  ;;  %967 = vst.msk [vmem:[#allocation3 + $0x38] sm:$0xff] %vm959_vm1, %v9254_v24 }
 0x141   : > { %968 = vst.msk [vmem:[#allocation3 + $0x40] sm:$0xff] %vm959_vm1, %v9254_v24  ;;  %969 = vst.msk [vmem:[#allocation3 + $0x48] sm:$0xff] %vm959_vm1, %v9254_v24 }
 0x142   : > { %970 = vst.msk [vmem:[#allocation3 + $0x50] sm:$0xff] %vm959_vm1, %v9254_v24  ;;  %971 = vst.msk [vmem:[#allocation3 + $0x58] sm:$0xff] %vm959_vm1, %v9254_v24 }
 0x143   : > { %670 = vmatpush1.bf16.msra.mxu0 %v7987_v27  ;;  %7578 = vmatpush1.bf16.msra.mxu1 %v7987_v27  ;;  %972 = vst.msk [vmem:[#allocation3 + $0x60] sm:$0xff] %vm959_vm1, %v9254_v24  ;;  %973 = vst.msk [vmem:[#allocation3 + $0x68] sm:$0xff] %vm959_vm1, %v9254_v24 }
 0x144   : > { %671 = vmatprep.subr.bf16.mxu0 %v7988_v28  ;;  %7563 = vmatprep.subr.bf16.mxu1 %v7988_v28  ;;  %974 = vst.msk [vmem:[#allocation3 + $0x70] sm:$0xff] %vm959_vm1, %v9254_v24  ;;  %975 = vst.msk [vmem:[#allocation3 + $0x78] sm:$0xff] %vm959_vm1, %v9254_v24 }
 0x145   : > { %976 = vst.msk [vmem:[#allocation3 + $0x80] sm:$0xff] %vm959_vm1, %v9254_v24  ;;  %977 = vst.msk [vmem:[#allocation3 + $0x88] sm:$0xff] %vm959_vm1, %v9254_v24 }
 0x146   : > { %978 = vst.msk [vmem:[#allocation3 + $0x90] sm:$0xff] %vm959_vm1, %v9254_v24  ;;  %979 = vst.msk [vmem:[#allocation3 + $0x98] sm:$0xff] %vm959_vm1, %v9254_v24 }
 0x147   : > { %672 = vmatpush1.bf16.msra.mxu0 %v7990_v29  ;;  %7579 = vmatpush1.bf16.msra.mxu1 %v7990_v29  ;;  %980 = vst.msk [vmem:[#allocation3 + $0xa0] sm:$0xff] %vm959_vm1, %v9254_v24  ;;  %981 = vst.msk [vmem:[#allocation3 + $0xa8] sm:$0xff] %vm959_vm1, %v9254_v24 }
 0x148   : > { %673 = vmatprep.subr.bf16.mxu0 %v7991_v30  ;;  %7564 = vmatprep.subr.bf16.mxu1 %v7991_v30  ;;  %982 = vst.msk [vmem:[#allocation3 + $0xb0] sm:$0xff] %vm959_vm1, %v9254_v24  ;;  %983 = vst.msk [vmem:[#allocation3 + $0xb8] sm:$0xff] %vm959_vm1, %v9254_v24 }
 0x149   : > { %984 = vst.msk [vmem:[#allocation3 + $0xc0] sm:$0xff] %vm959_vm1, %v9254_v24  ;;  %985 = vst.msk [vmem:[#allocation3 + $0xc8] sm:$0xff] %vm959_vm1, %v9254_v24 }
 0x14a   : > { %986 = vst.msk [vmem:[#allocation3 + $0xd0] sm:$0xff] %vm959_vm1, %v9254_v24  ;;  %987 = vst.msk [vmem:[#allocation3 + $0xd8] sm:$0xff] %vm959_vm1, %v9254_v24 }
 0x14b   : > { %674 = vmatpush1.bf16.msra.mxu0 %v7993_v31  ;;  %7580 = vmatpush1.bf16.msra.mxu1 %v7993_v31  ;;  %988 = vst.msk [vmem:[#allocation3 + $0xe0] sm:$0xff] %vm959_vm1, %v9254_v24  ;;  %989 = vst.msk [vmem:[#allocation3 + $0xe8] sm:$0xff] %vm959_vm1, %v9254_v24 }
 0x14c   : > { %675 = vmatprep.subr.bf16.mxu0 %v7994_v32  ;;  %7565 = vmatprep.subr.bf16.mxu1 %v7994_v32  ;;  %990 = vst.msk [vmem:[#allocation3 + $0xf0] sm:$0xff] %vm959_vm1, %v9254_v24  ;;  %991 = vst.msk [vmem:[#allocation3 + $0xf8] sm:$0xff] %vm959_vm1, %v9254_v24 }
 0x14d   : > { %992 = vst.msk [vmem:[#allocation3 + $0x100] sm:$0xff] %vm959_vm1, %v9254_v24  ;;  %993 = vst.msk [vmem:[#allocation3 + $0x108] sm:$0xff] %vm959_vm1, %v9254_v24 }
 0x14e   : > { %994 = vst.msk [vmem:[#allocation3 + $0x110] sm:$0xff] %vm959_vm1, %v9254_v24  ;;  %995 = vst.msk [vmem:[#allocation3 + $0x118] sm:$0xff] %vm959_vm1, %v9254_v24 }
 0x14f   : > { %676 = vmatpush1.bf16.msra.mxu0 %v7996_v33  ;;  %7581 = vmatpush1.bf16.msra.mxu1 %v7996_v33  ;;  %996 = vst.msk [vmem:[#allocation3 + $0x120] sm:$0xff] %vm959_vm1, %v9254_v24  ;;  %997 = vst.msk [vmem:[#allocation3 + $0x128] sm:$0xff] %vm959_vm1, %v9254_v24 }
 0x150   : > { %998 = vst.msk [vmem:[#allocation3 + $0x130] sm:$0xff] %vm959_vm1, %v9254_v24  ;;  %999 = vst.msk [vmem:[#allocation3 + $0x138] sm:$0xff] %vm959_vm1, %v9254_v24 }
 0x151   : > { %1000 = vst.msk [vmem:[#allocation3 + $0x140] sm:$0xff] %vm959_vm1, %v9254_v24  ;;  %1001 = vst.msk [vmem:[#allocation3 + $0x148] sm:$0xff] %vm959_vm1, %v9254_v24 }
 0x152   : > { %678 = vmatmul.mubr.bf16.vlgmr.msra.gmra.mrb[0].mxu0 %v7997_v34  ;;  %698 = vmatmul.mubr.bf16.vlgmr.msra.gmra.mrb[0].mxu1 %v8000_v35  ;;  %1002 = vst.msk [vmem:[#allocation3 + $0x150] sm:$0xff] %vm959_vm1, %v9254_v24  ;;  %1003 = vst.msk [vmem:[#allocation3 + $0x158] sm:$0xff] %vm959_vm1, %v9254_v24 }
 0x153   : > { %707 = vmatprep.mubr.bf16.mxu1 %v8003_v36  ;;  %687 = vmatprep.mubr.bf16.mxu0 %v8005_v37  ;;  %1004 = vst.msk [vmem:[#allocation3 + $0x160] sm:$0xff] %vm959_vm1, %v9254_v24  ;;  %1005 = vst.msk [vmem:[#allocation3 + $0x168] sm:$0xff] %vm959_vm1, %v9254_v24 }
 0x154   : > { %1006 = vst.msk [vmem:[#allocation3 + $0x170] sm:$0xff] %vm959_vm1, %v9254_v24  ;;  %1007 = vst.msk [vmem:[#allocation3 + $0x178] sm:$0xff] %vm959_vm1, %v9254_v24 }
 0x155   : > { %1008 = vst.msk [vmem:[#allocation3 + $0x180] sm:$0xff] %vm959_vm1, %v9254_v24  ;;  %1009 = vst.msk [vmem:[#allocation3 + $0x188] sm:$0xff] %vm959_vm1, %v9254_v24 }
 0x156   : > { %1010 = vst.msk [vmem:[#allocation3 + $0x190] sm:$0xff] %vm959_vm1, %v9254_v24  ;;  %1011 = vst.msk [vmem:[#allocation3 + $0x198] sm:$0xff] %vm959_vm1, %v9254_v24 }
 0x157   : > { %1012 = vst.msk [vmem:[#allocation3 + $0x1a0] sm:$0xff] %vm959_vm1, %v9254_v24  ;;  %1013 = vst.msk [vmem:[#allocation3 + $0x1a8] sm:$0xff] %vm959_vm1, %v9254_v24 }
 0x158   : > { %1014 = vst.msk [vmem:[#allocation3 + $0x1b0] sm:$0xff] %vm959_vm1, %v9254_v24  ;;  %1015 = vst.msk [vmem:[#allocation3 + $0x1b8] sm:$0xff] %vm959_vm1, %v9254_v24 }
 0x159   : > { %1016 = vst.msk [vmem:[#allocation3 + $0x1c0] sm:$0xff] %vm959_vm1, %v9254_v24  ;;  %1017 = vst.msk [vmem:[#allocation3 + $0x1c8] sm:$0xff] %vm959_vm1, %v9254_v24 }
 0x15a   : > { %708 = vmatmul.mubr.bf16.gmra.mrb[4].mxu1 %v8007_v38  ;;  %688 = vmatmul.mubr.bf16.gmra.mrb[4].mxu0 %v8008_v39  ;;  %1018 = vst.msk [vmem:[#allocation3 + $0x1d0] sm:$0xff] %vm959_vm1, %v9254_v24  ;;  %1019 = vst.msk [vmem:[#allocation3 + $0x1d8] sm:$0xff] %vm959_vm1, %v9254_v24 }
 0x15b   : > { %1020 = vst.msk [vmem:[#allocation3 + $0x1e0] sm:$0xff] %vm959_vm1, %v9254_v24  ;;  %1021 = vst.msk [vmem:[#allocation3 + $0x1e8] sm:$0xff] %vm959_vm1, %v9254_v24 }
 0x15c   : > { %1022 = vst.msk [vmem:[#allocation3 + $0x1f0] sm:$0xff] %vm959_vm1, %v9254_v24  ;;  %1023 = vst.msk [vmem:[#allocation3 + $0x1f8] sm:$0xff] %vm959_vm1, %v9254_v24 }
 0x15d   : > { %1024 = vst.msk [vmem:[#allocation4] sm:$0xff] %vm959_vm1, %v9255_v25  ;;  %1025 = vst.msk [vmem:[#allocation4 + $0x8] sm:$0xff] %vm959_vm1, %v9255_v25 }
 0x15e   : > { %1026 = vst.msk [vmem:[#allocation4 + $0x10] sm:$0xff] %vm959_vm1, %v9255_v25  ;;  %1027 = vst.msk [vmem:[#allocation4 + $0x18] sm:$0xff] %vm959_vm1, %v9255_v25 }
 0x15f   : > { %1028 = vst.msk [vmem:[#allocation4 + $0x20] sm:$0xff] %vm959_vm1, %v9255_v25  ;;  %1029 = vst.msk [vmem:[#allocation4 + $0x28] sm:$0xff] %vm959_vm1, %v9255_v25 }
 0x160   : > { %1030 = vst.msk [vmem:[#allocation4 + $0x30] sm:$0xff] %vm959_vm1, %v9255_v25  ;;  %1031 = vst.msk [vmem:[#allocation4 + $0x38] sm:$0xff] %vm959_vm1, %v9255_v25 }
 0x161   : > { %1032 = vst.msk [vmem:[#allocation4 + $0x40] sm:$0xff] %vm959_vm1, %v9255_v25  ;;  %1033 = vst.msk [vmem:[#allocation4 + $0x48] sm:$0xff] %vm959_vm1, %v9255_v25 }
 0x162   : > { %1034 = vst.msk [vmem:[#allocation4 + $0x50] sm:$0xff] %vm959_vm1, %v9255_v25  ;;  %1035 = vst.msk [vmem:[#allocation4 + $0x58] sm:$0xff] %vm959_vm1, %v9255_v25 }
 0x163   : > { %1036 = vst.msk [vmem:[#allocation4 + $0x60] sm:$0xff] %vm959_vm1, %v9255_v25  ;;  %1037 = vst.msk [vmem:[#allocation4 + $0x68] sm:$0xff] %vm959_vm1, %v9255_v25 }
 0x164   : > { %1038 = vst.msk [vmem:[#allocation4 + $0x70] sm:$0xff] %vm959_vm1, %v9255_v25  ;;  %1039 = vst.msk [vmem:[#allocation4 + $0x78] sm:$0xff] %vm959_vm1, %v9255_v25 }
 0x165   : > { %1040 = vst.msk [vmem:[#allocation4 + $0x80] sm:$0xff] %vm959_vm1, %v9255_v25  ;;  %1041 = vst.msk [vmem:[#allocation4 + $0x88] sm:$0xff] %vm959_vm1, %v9255_v25 }
 0x166   : > { %1042 = vst.msk [vmem:[#allocation4 + $0x90] sm:$0xff] %vm959_vm1, %v9255_v25  ;;  %1043 = vst.msk [vmem:[#allocation4 + $0x98] sm:$0xff] %vm959_vm1, %v9255_v25 }
 0x167   : > { %1044 = vst.msk [vmem:[#allocation4 + $0xa0] sm:$0xff] %vm959_vm1, %v9255_v25  ;;  %1045 = vst.msk [vmem:[#allocation4 + $0xa8] sm:$0xff] %vm959_vm1, %v9255_v25 }
 0x168   : > { %1046 = vst.msk [vmem:[#allocation4 + $0xb0] sm:$0xff] %vm959_vm1, %v9255_v25  ;;  %1047 = vst.msk [vmem:[#allocation4 + $0xb8] sm:$0xff] %vm959_vm1, %v9255_v25 }
 0x169   : > { %1048 = vst.msk [vmem:[#allocation4 + $0xc0] sm:$0xff] %vm959_vm1, %v9255_v25  ;;  %1049 = vst.msk [vmem:[#allocation4 + $0xc8] sm:$0xff] %vm959_vm1, %v9255_v25 }
 0x16a   : > { %1050 = vst.msk [vmem:[#allocation4 + $0xd0] sm:$0xff] %vm959_vm1, %v9255_v25  ;;  %1051 = vst.msk [vmem:[#allocation4 + $0xd8] sm:$0xff] %vm959_vm1, %v9255_v25 }
 0x16b   : > { %1052 = vst.msk [vmem:[#allocation4 + $0xe0] sm:$0xff] %vm959_vm1, %v9255_v25  ;;  %1053 = vst.msk [vmem:[#allocation4 + $0xe8] sm:$0xff] %vm959_vm1, %v9255_v25 }
 0x16c   : > { %1054 = vst.msk [vmem:[#allocation4 + $0xf0] sm:$0xff] %vm959_vm1, %v9255_v25  ;;  %1055 = vst.msk [vmem:[#allocation4 + $0xf8] sm:$0xff] %vm959_vm1, %v9255_v25 }
 0x16d   : > { %1056 = vst.msk [vmem:[#allocation4 + $0x100] sm:$0xff] %vm959_vm1, %v9255_v25  ;;  %1057 = vst.msk [vmem:[#allocation4 + $0x108] sm:$0xff] %vm959_vm1, %v9255_v25 }
 0x16e   : > { %1058 = vst.msk [vmem:[#allocation4 + $0x110] sm:$0xff] %vm959_vm1, %v9255_v25  ;;  %1059 = vst.msk [vmem:[#allocation4 + $0x118] sm:$0xff] %vm959_vm1, %v9255_v25 }
 0x16f   : > { %1060 = vst.msk [vmem:[#allocation4 + $0x120] sm:$0xff] %vm959_vm1, %v9255_v25  ;;  %1061 = vst.msk [vmem:[#allocation4 + $0x128] sm:$0xff] %vm959_vm1, %v9255_v25 }
 0x170   : > { %1062 = vst.msk [vmem:[#allocation4 + $0x130] sm:$0xff] %vm959_vm1, %v9255_v25  ;;  %1063 = vst.msk [vmem:[#allocation4 + $0x138] sm:$0xff] %vm959_vm1, %v9255_v25 }
 0x171   : > { %1064 = vst.msk [vmem:[#allocation4 + $0x140] sm:$0xff] %vm959_vm1, %v9255_v25  ;;  %1065 = vst.msk [vmem:[#allocation4 + $0x148] sm:$0xff] %vm959_vm1, %v9255_v25 }
 0x172   : > { %1066 = vst.msk [vmem:[#allocation4 + $0x150] sm:$0xff] %vm959_vm1, %v9255_v25  ;;  %1067 = vst.msk [vmem:[#allocation4 + $0x158] sm:$0xff] %vm959_vm1, %v9255_v25 }
 0x173   : > { %1068 = vst.msk [vmem:[#allocation4 + $0x160] sm:$0xff] %vm959_vm1, %v9255_v25  ;;  %1069 = vst.msk [vmem:[#allocation4 + $0x168] sm:$0xff] %vm959_vm1, %v9255_v25 }
 0x174   : > { %1070 = vst.msk [vmem:[#allocation4 + $0x170] sm:$0xff] %vm959_vm1, %v9255_v25  ;;  %1071 = vst.msk [vmem:[#allocation4 + $0x178] sm:$0xff] %vm959_vm1, %v9255_v25 }
 0x175   : > { %1072 = vst.msk [vmem:[#allocation4 + $0x180] sm:$0xff] %vm959_vm1, %v9255_v25  ;;  %1073 = vst.msk [vmem:[#allocation4 + $0x188] sm:$0xff] %vm959_vm1, %v9255_v25 }
 0x176   : > { %1074 = vst.msk [vmem:[#allocation4 + $0x190] sm:$0xff] %vm959_vm1, %v9255_v25  ;;  %1075 = vst.msk [vmem:[#allocation4 + $0x198] sm:$0xff] %vm959_vm1, %v9255_v25 }
 0x177   : > { %1076 = vst.msk [vmem:[#allocation4 + $0x1a0] sm:$0xff] %vm959_vm1, %v9255_v25  ;;  %1077 = vst.msk [vmem:[#allocation4 + $0x1a8] sm:$0xff] %vm959_vm1, %v9255_v25 }
 0x178   : > { %1078 = vst.msk [vmem:[#allocation4 + $0x1b0] sm:$0xff] %vm959_vm1, %v9255_v25  ;;  %1079 = vst.msk [vmem:[#allocation4 + $0x1b8] sm:$0xff] %vm959_vm1, %v9255_v25 }
 0x179   : > { %1080 = vst.msk [vmem:[#allocation4 + $0x1c0] sm:$0xff] %vm959_vm1, %v9255_v25  ;;  %1081 = vst.msk [vmem:[#allocation4 + $0x1c8] sm:$0xff] %vm959_vm1, %v9255_v25 }
 0x17a   : > { %1082 = vst.msk [vmem:[#allocation4 + $0x1d0] sm:$0xff] %vm959_vm1, %v9255_v25  ;;  %1083 = vst.msk [vmem:[#allocation4 + $0x1d8] sm:$0xff] %vm959_vm1, %v9255_v25 }
 0x17b   : > { %1084 = vst.msk [vmem:[#allocation4 + $0x1e0] sm:$0xff] %vm959_vm1, %v9255_v25  ;;  %1085 = vst.msk [vmem:[#allocation4 + $0x1e8] sm:$0xff] %vm959_vm1, %v9255_v25 }
 0x17c   : > { %1086 = vst.msk [vmem:[#allocation4 + $0x1f0] sm:$0xff] %vm959_vm1, %v9255_v25  ;;  %1087 = vst.msk [vmem:[#allocation4 + $0x1f8] sm:$0xff] %vm959_vm1, %v9255_v25 }
 0x17d   : > { %1088 = vst.msk [vmem:[#allocation5] sm:$0xff] %vm926_vm0, %v9255_v25  ;;  %1089 = vst.msk [vmem:[#allocation5 + $0x8] sm:$0xff] %vm926_vm0, %v9255_v25 }
 0x17e   : > { %1090 = vst.msk [vmem:[#allocation5 + $0x10] sm:$0xff] %vm926_vm0, %v9255_v25  ;;  %1091 = vst.msk [vmem:[#allocation5 + $0x18] sm:$0xff] %vm926_vm0, %v9255_v25 }
 0x17f   : > { %1092 = vst.msk [vmem:[#allocation5 + $0x20] sm:$0xff] %vm926_vm0, %v9255_v25  ;;  %1093 = vst.msk [vmem:[#allocation5 + $0x28] sm:$0xff] %vm926_vm0, %v9255_v25 }
 0x180   : > { %1094 = vst.msk [vmem:[#allocation5 + $0x30] sm:$0xff] %vm926_vm0, %v9255_v25  ;;  %1095 = vst.msk [vmem:[#allocation5 + $0x38] sm:$0xff] %vm926_vm0, %v9255_v25 }
 0x181   : > { %1096 = vst.msk [vmem:[#allocation5 + $0x40] sm:$0xff] %vm926_vm0, %v9255_v25  ;;  %1097 = vst.msk [vmem:[#allocation5 + $0x48] sm:$0xff] %vm926_vm0, %v9255_v25 }
 0x182   : > { %1098 = vst.msk [vmem:[#allocation5 + $0x50] sm:$0xff] %vm926_vm0, %v9255_v25  ;;  %1099 = vst.msk [vmem:[#allocation5 + $0x58] sm:$0xff] %vm926_vm0, %v9255_v25 }
 0x183   : > { %1100 = vst.msk [vmem:[#allocation5 + $0x60] sm:$0xff] %vm926_vm0, %v9255_v25  ;;  %1101 = vst.msk [vmem:[#allocation5 + $0x68] sm:$0xff] %vm926_vm0, %v9255_v25 }
 0x184   : > { %1102 = vst.msk [vmem:[#allocation5 + $0x70] sm:$0xff] %vm926_vm0, %v9255_v25  ;;  %1103 = vst.msk [vmem:[#allocation5 + $0x78] sm:$0xff] %vm926_vm0, %v9255_v25 }
 0x185   : > { %1104 = vst.msk [vmem:[#allocation5 + $0x80] sm:$0xff] %vm926_vm0, %v9255_v25  ;;  %1105 = vst.msk [vmem:[#allocation5 + $0x88] sm:$0xff] %vm926_vm0, %v9255_v25 }
 0x186   : > { %1106 = vst.msk [vmem:[#allocation5 + $0x90] sm:$0xff] %vm926_vm0, %v9255_v25  ;;  %1107 = vst.msk [vmem:[#allocation5 + $0x98] sm:$0xff] %vm926_vm0, %v9255_v25 }
 0x187   : > { %1108 = vst.msk [vmem:[#allocation5 + $0xa0] sm:$0xff] %vm926_vm0, %v9255_v25  ;;  %1109 = vst.msk [vmem:[#allocation5 + $0xa8] sm:$0xff] %vm926_vm0, %v9255_v25 }
 0x188   : > { %1110 = vst.msk [vmem:[#allocation5 + $0xb0] sm:$0xff] %vm926_vm0, %v9255_v25  ;;  %1111 = vst.msk [vmem:[#allocation5 + $0xb8] sm:$0xff] %vm926_vm0, %v9255_v25 }
 0x189   : > { %1112 = vst.msk [vmem:[#allocation5 + $0xc0] sm:$0xff] %vm926_vm0, %v9255_v25  ;;  %1113 = vst.msk [vmem:[#allocation5 + $0xc8] sm:$0xff] %vm926_vm0, %v9255_v25 }
 0x18a   : > { %1114 = vst.msk [vmem:[#allocation5 + $0xd0] sm:$0xff] %vm926_vm0, %v9255_v25  ;;  %1115 = vst.msk [vmem:[#allocation5 + $0xd8] sm:$0xff] %vm926_vm0, %v9255_v25 }
 0x18b   : > { %1116 = vst.msk [vmem:[#allocation5 + $0xe0] sm:$0xff] %vm926_vm0, %v9255_v25  ;;  %1117 = vst.msk [vmem:[#allocation5 + $0xe8] sm:$0xff] %vm926_vm0, %v9255_v25 }
 0x18c   : > { %1118 = vst.msk [vmem:[#allocation5 + $0xf0] sm:$0xff] %vm926_vm0, %v9255_v25  ;;  %1119 = vst.msk [vmem:[#allocation5 + $0xf8] sm:$0xff] %vm926_vm0, %v9255_v25 }
 0x18d   : > { %1120 = vst.msk [vmem:[#allocation5 + $0x100] sm:$0xff] %vm926_vm0, %v9255_v25  ;;  %1121 = vst.msk [vmem:[#allocation5 + $0x108] sm:$0xff] %vm926_vm0, %v9255_v25 }
 0x18e   : > { %1122 = vst.msk [vmem:[#allocation5 + $0x110] sm:$0xff] %vm926_vm0, %v9255_v25  ;;  %1123 = vst.msk [vmem:[#allocation5 + $0x118] sm:$0xff] %vm926_vm0, %v9255_v25 }
 0x18f   : > { %1124 = vst.msk [vmem:[#allocation5 + $0x120] sm:$0xff] %vm926_vm0, %v9255_v25  ;;  %1125 = vst.msk [vmem:[#allocation5 + $0x128] sm:$0xff] %vm926_vm0, %v9255_v25 }
 0x190   : > { %1126 = vst.msk [vmem:[#allocation5 + $0x130] sm:$0xff] %vm926_vm0, %v9255_v25  ;;  %1127 = vst.msk [vmem:[#allocation5 + $0x138] sm:$0xff] %vm926_vm0, %v9255_v25 }
 0x191   : > { %1128 = vst.msk [vmem:[#allocation5 + $0x140] sm:$0xff] %vm926_vm0, %v9255_v25  ;;  %1129 = vst.msk [vmem:[#allocation5 + $0x148] sm:$0xff] %vm926_vm0, %v9255_v25 }
 0x192   : > { %1130 = vst.msk [vmem:[#allocation5 + $0x150] sm:$0xff] %vm926_vm0, %v9255_v25  ;;  %1131 = vst.msk [vmem:[#allocation5 + $0x158] sm:$0xff] %vm926_vm0, %v9255_v25 }
 0x193   : > { %1132 = vst.msk [vmem:[#allocation5 + $0x160] sm:$0xff] %vm926_vm0, %v9255_v25  ;;  %1133 = vst.msk [vmem:[#allocation5 + $0x168] sm:$0xff] %vm926_vm0, %v9255_v25 }
 0x194   : > { %1134 = vst.msk [vmem:[#allocation5 + $0x170] sm:$0xff] %vm926_vm0, %v9255_v25  ;;  %1135 = vst.msk [vmem:[#allocation5 + $0x178] sm:$0xff] %vm926_vm0, %v9255_v25 }
 0x195   : > { %1136 = vst.msk [vmem:[#allocation5 + $0x180] sm:$0xff] %vm926_vm0, %v9255_v25  ;;  %1137 = vst.msk [vmem:[#allocation5 + $0x188] sm:$0xff] %vm926_vm0, %v9255_v25 }
 0x196   : > { %1138 = vst.msk [vmem:[#allocation5 + $0x190] sm:$0xff] %vm926_vm0, %v9255_v25  ;;  %1139 = vst.msk [vmem:[#allocation5 + $0x198] sm:$0xff] %vm926_vm0, %v9255_v25 }
 0x197   : > { %1140 = vst.msk [vmem:[#allocation5 + $0x1a0] sm:$0xff] %vm926_vm0, %v9255_v25  ;;  %1141 = vst.msk [vmem:[#allocation5 + $0x1a8] sm:$0xff] %vm926_vm0, %v9255_v25 }
 0x198   : > { %1142 = vst.msk [vmem:[#allocation5 + $0x1b0] sm:$0xff] %vm926_vm0, %v9255_v25  ;;  %1143 = vst.msk [vmem:[#allocation5 + $0x1b8] sm:$0xff] %vm926_vm0, %v9255_v25 }
 0x199   : > { %1144 = vst.msk [vmem:[#allocation5 + $0x1c0] sm:$0xff] %vm926_vm0, %v9255_v25  ;;  %1145 = vst.msk [vmem:[#allocation5 + $0x1c8] sm:$0xff] %vm926_vm0, %v9255_v25 }
 0x19a   : > { %1146 = vst.msk [vmem:[#allocation5 + $0x1d0] sm:$0xff] %vm926_vm0, %v9255_v25  ;;  %1147 = vst.msk [vmem:[#allocation5 + $0x1d8] sm:$0xff] %vm926_vm0, %v9255_v25 }
 0x19b   : > { %1148 = vst.msk [vmem:[#allocation5 + $0x1e0] sm:$0xff] %vm926_vm0, %v9255_v25  ;;  %1149 = vst.msk [vmem:[#allocation5 + $0x1e8] sm:$0xff] %vm926_vm0, %v9255_v25 }
 0x19c   : > { %1150 = vst.msk [vmem:[#allocation5 + $0x1f0] sm:$0xff] %vm926_vm0, %v9255_v25  ;;  %1151 = vst.msk [vmem:[#allocation5 + $0x1f8] sm:$0xff] %vm926_vm0, %v9255_v25 }
 0x225   : > { %v679_v40 = vpop.f32.mrb[0].mxu0  ;;  %v699_v41 = vpop.f32.mrb[0].mxu1 }
 0x226   : > { %v718_v42 = vmul.f32 0.17677669, %v679_v40  ;;  %v681_v43 = vpop.f32.mrb[1].mxu0  ;;  %v701_v44 = vpop.f32.mrb[1].mxu1  ;;  %v726_v45 = vmul.f32 0.17677669, %v699_v41 }
 0x227   : > { %v719_v46 = vmul.f32 0.17677669, %v681_v43  ;;  %v683_v47 = vpop.f32.mrb[2].mxu0  ;;  %v703_v48 = vpop.f32.mrb[2].mxu1  ;;  %v727_v53 = vmul.f32 0.17677669, %v701_v44 }
 0x228   : > { %v720_v49 = vmul.f32 0.17677669, %v683_v47  ;;  %v728_v50 = vmul.f32 0.17677669, %v703_v48  ;;  %v705_v51 = vpop.f32.mrb[3].mxu1  ;;  %v685_v52 = vpop.f32.mrb[3].mxu0 }
 0x229   : > { %v729_v54 = vmul.f32 0.17677669, %v705_v51  ;;  %v721_v55 = vmul.f32 0.17677669, %v685_v52 }
 0x22a   : > { %v894_v56 = vpack.c.bf16 %v720_v49, %v718_v42  ;;  %v896_v57 = vpack.c.bf16 %v728_v50, %v726_v45  ;;  %v7834_v58 = vpack.i.bf16 %v728_v50, %v726_v45  ;;  %v7829_v59 = vpack.i.bf16 %v720_v49, %v718_v42 }
 0x22b   : > { %v912_v60 = vpack.c.bf16 %v729_v54, %v727_v53  ;;  %v910_v61 = vpack.c.bf16 %v721_v55, %v719_v46  ;;  %v7859_v62 = vpack.i.bf16 %v721_v55, %v719_v46  ;;  %v9701_v1 = vpack.i.bf16 %v729_v54, %v727_v53 }
 0x22c   : > { %927 = vst.msk [vmem:[#allocation2] sm:$0xff] %vm926_vm0, %v894_v56  ;;  %929 = vst.msk [vmem:[#allocation2 + $0x10] sm:$0xff] %vm926_vm0, %v896_v57  ;;  %7835 = vrot.lane.b32.xlu1 %v7834_v58, %s9251_s10  ;;  %7830 = vrot.lane.b32.xlu0 %v7829_v59, %s9251_s10 }
 0x22d   : > { %945 = vst.msk [vmem:[#allocation2 + $0x90] sm:$0xff] %vm926_vm0, %v912_v60  ;;  %943 = vst.msk [vmem:[#allocation2 + $0x80] sm:$0xff] %vm926_vm0, %v910_v61  ;;  %v709_v63 = vpop.f32.mrb[4].mxu1  ;;  %v689_v0 = vpop.f32.mrb[4].mxu0 }
 0x22e   : > { %v722_v2 = vmul.f32 0.17677669, %v689_v0  ;;  %v711_v3 = vpop.f32.mrb[5].mxu1  ;;  %v691_v4 = vpop.f32.mrb[5].mxu0  ;;  %v730_v5 = vmul.f32 0.17677669, %v709_v63 }
 0x22f   : > { %v723_v6 = vmul.f32 0.17677669, %v691_v4  ;;  %v713_v7 = vpop.f32.mrb[6].mxu1  ;;  %v693_v8 = vpop.f32.mrb[6].mxu0  ;;  %v731_v13 = vmul.f32 0.17677669, %v711_v3 }
 0x230   : > { %v732_v9 = vmul.f32 0.17677669, %v713_v7  ;;  %v715_v10 = vpop.f32.mrb[7].mxu1  ;;  %7840 = vrot.lane.b32.xlu0 %v7829_v59, %s9252_s17  ;;  %v724_v11 = vmul.f32 0.17677669, %v693_v8  ;;  %v695_v12 = vpop.f32.mrb[7].mxu0 }
 0x231   : > { %v733_v14 = vmul.f32 0.17677669, %v715_v10  ;;  %v725_v15 = vmul.f32 0.17677669, %v695_v12 }
 0x232   : > { %v897_v16 = vpack.c.bf16 %v732_v9, %v730_v5  ;;  %v895_v17 = vpack.c.bf16 %v724_v11, %v722_v2  ;;  %v7889_v18 = vpack.i.bf16 %v732_v9, %v730_v5  ;;  %v7894_v19 = vpack.i.bf16 %v724_v11, %v722_v2 }
 0x233   : > { %v913_v20 = vpack.c.bf16 %v733_v14, %v731_v13  ;;  %v911_v21 = vpack.c.bf16 %v725_v15, %v723_v6  ;;  %v9708_v22 = vpack.i.bf16 %v725_v15, %v723_v6  ;;  %v9710_v23 = vpack.i.bf16 %v733_v14, %v731_v13 }
 0x234   : > { %930 = vst.msk [vmem:[#allocation2 + $0x18] sm:$0xff] %vm926_vm0, %v897_v16  ;;  %928 = vst.msk [vmem:[#allocation2 + $0x8] sm:$0xff] %vm926_vm0, %v895_v17  ;;  %7890 = vrot.lane.b32.xlu1 %v7889_v18, %s9251_s10  ;;  %7845 = vrot.lane.b32.xlu0 %v7834_v58, %s9252_s17 }
 0x235   : > { %946 = vst.msk [vmem:[#allocation2 + $0x98] sm:$0xff] %vm926_vm0, %v913_v20  ;;  %944 = vst.msk [vmem:[#allocation2 + $0x88] sm:$0xff] %vm926_vm0, %v911_v21 }
 0x238   : > { %7850 = vrot.lane.b32.xlu0 %v7829_v59, %s9253_s14  ;;  %7895 = vrot.lane.b32.xlu1 %v7894_v19, %s9252_s17 }
 0x23c   : > { %7855 = vrot.lane.b32.xlu0 %v7834_v58, %s9253_s14  ;;  %7900 = vrot.lane.b32.xlu1 %v7889_v18, %s9252_s17 }
 0x240   : > { %7860 = vrot.lane.b32.xlu0 %v7859_v62, %s9251_s10  ;;  %7905 = vrot.lane.b32.xlu1 %v7894_v19, %s9253_s14 }
 0x244   : > { %7865 = vrot.lane.b32.xlu0 %v9701_v1, %s9251_s10  ;;  %7910 = vrot.lane.b32.xlu1 %v7889_v18, %s9253_s14 }
 0x248   : > { %7870 = vrot.lane.b32.xlu0 %v7859_v62, %s9252_s17  ;;  %7915 = vrot.lane.b32.xlu1 %v9708_v22, %s9251_s10 }
 0x24c   : > { %7875 = vrot.lane.b32.xlu0 %v9701_v1, %s9252_s17  ;;  %7920 = vrot.lane.b32.xlu1 %v9710_v23, %s9251_s10 }
 0x250   : > { %7880 = vrot.lane.b32.xlu0 %v7859_v62, %s9253_s14  ;;  %7925 = vrot.lane.b32.xlu1 %v9708_v22, %s9252_s17 }
 0x254   : > { %7885 = vrot.lane.b32.xlu0 %v7894_v19, %s9251_s10  ;;  %7930 = vrot.lane.b32.xlu1 %v9710_v23, %s9252_s17 }
 0x258   : > { %7940 = vrot.lane.b32.xlu0 %v9701_v1, %s9253_s14  ;;  %7935 = vrot.lane.b32.xlu1 %v9708_v22, %s9253_s14 }
 0x25c   : > { %7945 = vrot.lane.b32.xlu1 %v9710_v23, %s9253_s14 }
 0x29e   : > { %v7836_v26 = vpop.permute.xlu1 %7835  ;;  %v7831_v27 = vpop.permute.xlu0 %7830 }
 0x29f   : > { %v7838_v28 = vunpack.i.h.bf16 %v7836_v26  ;;  %v7837_v29 = vunpack.i.l.bf16 %v7836_v26  ;;  %v7833_v30 = vunpack.i.h.bf16 %v7831_v27  ;;  %v7832_v31 = vunpack.i.l.bf16 %v7831_v27 }
 0x2a1   : > { %v900_v32 = vpack.c.bf16 %v7838_v28, %v7837_v29  ;;  %v898_v33 = vpack.c.bf16 %v7833_v30, %v7832_v31 }
 0x2a2   : > { %v7841_v34 = vpop.permute.xlu0 %7840 }
 0x2a3   : > { %933 = vst.msk [vmem:[#allocation2 + $0x30] sm:$0xff] %vm926_vm0, %v900_v32  ;;  %931 = vst.msk [vmem:[#allocation2 + $0x20] sm:$0xff] %vm926_vm0, %v898_v33  ;;  %v7843_v35 = vunpack.i.h.bf16 %v7841_v34  ;;  %v7842_v36 = vunpack.i.l.bf16 %v7841_v34 }
 0x2a5   : > { %v902_v37 = vpack.c.bf16 %v7843_v35, %v7842_v36 }
 0x2a6   : > { %v7891_v38 = vpop.permute.xlu1 %7890  ;;  %v7846_v39 = vpop.permute.xlu0 %7845 }
 0x2a7   : > { %935 = vst.msk [vmem:[#allocation2 + $0x40] sm:$0xff] %vm926_vm0, %v902_v37  ;;  %v7893_v40 = vunpack.i.h.bf16 %v7891_v38  ;;  %v7892_v41 = vunpack.i.l.bf16 %v7891_v38  ;;  %v7848_v42 = vunpack.i.h.bf16 %v7846_v39  ;;  %v7847_v43 = vunpack.i.l.bf16 %v7846_v39 }
 0x2a9   : > { %v901_v44 = vpack.c.bf16 %v7893_v40, %v7892_v41  ;;  %v904_v45 = vpack.c.bf16 %v7848_v42, %v7847_v43 }
 0x2aa   : > { %v7851_v46 = vpop.permute.xlu0 %7850  ;;  %v7896_v47 = vpop.permute.xlu1 %7895 }
 0x2ab   : > { %934 = vst.msk [vmem:[#allocation2 + $0x38] sm:$0xff] %vm926_vm0, %v901_v44  ;;  %937 = vst.msk [vmem:[#allocation2 + $0x50] sm:$0xff] %vm926_vm0, %v904_v45  ;;  %v7853_v48 = vunpack.i.h.bf16 %v7851_v46  ;;  %v7852_v49 = vunpack.i.l.bf16 %v7851_v46  ;;  %v7898_v50 = vunpack.i.h.bf16 %v7896_v47  ;;  %v7897_v51 = vunpack.i.l.bf16 %v7896_v47 }
 0x2ad   : > { %v906_v52 = vpack.c.bf16 %v7853_v48, %v7852_v49  ;;  %v903_v53 = vpack.c.bf16 %v7898_v50, %v7897_v51 }
 0x2ae   : > { %v7856_v54 = vpop.permute.xlu0 %7855  ;;  %v7901_v55 = vpop.permute.xlu1 %7900 }
 0x2af   : > { %939 = vst.msk [vmem:[#allocation2 + $0x60] sm:$0xff] %vm926_vm0, %v906_v52  ;;  %936 = vst.msk [vmem:[#allocation2 + $0x48] sm:$0xff] %vm926_vm0, %v903_v53  ;;  %v7858_v56 = vunpack.i.h.bf16 %v7856_v54  ;;  %v7857_v57 = vunpack.i.l.bf16 %v7856_v54  ;;  %v7903_v58 = vunpack.i.h.bf16 %v7901_v55  ;;  %v7902_v59 = vunpack.i.l.bf16 %v7901_v55 }
 0x2b1   : > { %v908_v60 = vpack.c.bf16 %v7858_v56, %v7857_v57  ;;  %v905_v61 = vpack.c.bf16 %v7903_v58, %v7902_v59 }
 0x2b2   : > { %v7861_v62 = vpop.permute.xlu0 %7860  ;;  %v7906_v63 = vpop.permute.xlu1 %7905 }
 0x2b3   : > { %941 = vst.msk [vmem:[#allocation2 + $0x70] sm:$0xff] %vm926_vm0, %v908_v60  ;;  %938 = vst.msk [vmem:[#allocation2 + $0x58] sm:$0xff] %vm926_vm0, %v905_v61  ;;  %v7863_v0 = vunpack.i.h.bf16 %v7861_v62  ;;  %v7862_v1 = vunpack.i.l.bf16 %v7861_v62  ;;  %v7908_v2 = vunpack.i.h.bf16 %v7906_v63  ;;  %v7907_v3 = vunpack.i.l.bf16 %v7906_v63 }
 0x2b5   : > { %v914_v4 = vpack.c.bf16 %v7863_v0, %v7862_v1  ;;  %v907_v5 = vpack.c.bf16 %v7908_v2, %v7907_v3 }
 0x2b6   : > { %v7866_v6 = vpop.permute.xlu0 %7865  ;;  %v7911_v7 = vpop.permute.xlu1 %7910 }
 0x2b7   : > { %947 = vst.msk [vmem:[#allocation2 + $0xa0] sm:$0xff] %vm926_vm0, %v914_v4  ;;  %940 = vst.msk [vmem:[#allocation2 + $0x68] sm:$0xff] %vm926_vm0, %v907_v5  ;;  %v7868_v8 = vunpack.i.h.bf16 %v7866_v6  ;;  %v7867_v9 = vunpack.i.l.bf16 %v7866_v6  ;;  %v7913_v10 = vunpack.i.h.bf16 %v7911_v7  ;;  %v7912_v11 = vunpack.i.l.bf16 %v7911_v7 }
 0x2b9   : > { %v916_v12 = vpack.c.bf16 %v7868_v8, %v7867_v9  ;;  %v909_v13 = vpack.c.bf16 %v7913_v10, %v7912_v11 }
 0x2ba   : > { %v7871_v14 = vpop.permute.xlu0 %7870  ;;  %v7916_v15 = vpop.permute.xlu1 %7915 }
 0x2bb   : > { %949 = vst.msk [vmem:[#allocation2 + $0xb0] sm:$0xff] %vm926_vm0, %v916_v12  ;;  %942 = vst.msk [vmem:[#allocation2 + $0x78] sm:$0xff] %vm926_vm0, %v909_v13  ;;  %v7873_v16 = vunpack.i.h.bf16 %v7871_v14  ;;  %v7872_v17 = vunpack.i.l.bf16 %v7871_v14  ;;  %v7918_v18 = vunpack.i.h.bf16 %v7916_v15  ;;  %v7917_v19 = vunpack.i.l.bf16 %v7916_v15 }
 0x2bd   : > { %v918_v20 = vpack.c.bf16 %v7873_v16, %v7872_v17  ;;  %v915_v21 = vpack.c.bf16 %v7918_v18, %v7917_v19 }
 0x2be   : > { %v7876_v22 = vpop.permute.xlu0 %7875  ;;  %v7921_v23 = vpop.permute.xlu1 %7920 }
 0x2bf   : > { %951 = vst.msk [vmem:[#allocation2 + $0xc0] sm:$0xff] %vm926_vm0, %v918_v20  ;;  %948 = vst.msk [vmem:[#allocation2 + $0xa8] sm:$0xff] %vm926_vm0, %v915_v21  ;;  %v7878_v24 = vunpack.i.h.bf16 %v7876_v22  ;;  %v7877_v25 = vunpack.i.l.bf16 %v7876_v22  ;;  %v7923_v26 = vunpack.i.h.bf16 %v7921_v23  ;;  %v7922_v27 = vunpack.i.l.bf16 %v7921_v23 }
 0x2c1   : > { %v920_v28 = vpack.c.bf16 %v7878_v24, %v7877_v25  ;;  %v917_v29 = vpack.c.bf16 %v7923_v26, %v7922_v27 }
 0x2c2   : > { %v7881_v30 = vpop.permute.xlu0 %7880  ;;  %v7926_v31 = vpop.permute.xlu1 %7925 }
 0x2c3   : > { %953 = vst.msk [vmem:[#allocation2 + $0xd0] sm:$0xff] %vm926_vm0, %v920_v28  ;;  %950 = vst.msk [vmem:[#allocation2 + $0xb8] sm:$0xff] %vm926_vm0, %v917_v29  ;;  %v7883_v32 = vunpack.i.h.bf16 %v7881_v30  ;;  %v7882_v33 = vunpack.i.l.bf16 %v7881_v30  ;;  %v7928_v34 = vunpack.i.h.bf16 %v7926_v31  ;;  %v7927_v35 = vunpack.i.l.bf16 %v7926_v31 }
 0x2c5   : > { %v922_v36 = vpack.c.bf16 %v7883_v32, %v7882_v33  ;;  %v919_v37 = vpack.c.bf16 %v7928_v34, %v7927_v35 }
 0x2c6   : > { %v7886_v38 = vpop.permute.xlu0 %7885  ;;  %v7931_v39 = vpop.permute.xlu1 %7930 }
 0x2c7   : > { %955 = vst.msk [vmem:[#allocation2 + $0xe0] sm:$0xff] %vm926_vm0, %v922_v36  ;;  %952 = vst.msk [vmem:[#allocation2 + $0xc8] sm:$0xff] %vm926_vm0, %v919_v37  ;;  %v7888_v40 = vunpack.i.h.bf16 %v7886_v38  ;;  %v7887_v41 = vunpack.i.l.bf16 %v7886_v38  ;;  %v7933_v42 = vunpack.i.h.bf16 %v7931_v39  ;;  %v7932_v43 = vunpack.i.l.bf16 %v7931_v39 }
 0x2c9   : > { %v899_v44 = vpack.c.bf16 %v7888_v40, %v7887_v41  ;;  %v921_v45 = vpack.c.bf16 %v7933_v42, %v7932_v43 }
 0x2ca   : > { %v7941_v46 = vpop.permute.xlu0 %7940  ;;  %v7936_v47 = vpop.permute.xlu1 %7935 }
 0x2cb   : > { %932 = vst.msk [vmem:[#allocation2 + $0x28] sm:$0xff] %vm926_vm0, %v899_v44  ;;  %954 = vst.msk [vmem:[#allocation2 + $0xd8] sm:$0xff] %vm926_vm0, %v921_v45  ;;  %v7943_v48 = vunpack.i.h.bf16 %v7941_v46  ;;  %v7942_v49 = vunpack.i.l.bf16 %v7941_v46  ;;  %v7938_v50 = vunpack.i.h.bf16 %v7936_v47  ;;  %v7937_v51 = vunpack.i.l.bf16 %v7936_v47 }
 0x2cd   : > { %v924_v52 = vpack.c.bf16 %v7943_v48, %v7942_v49  ;;  %v923_v53 = vpack.c.bf16 %v7938_v50, %v7937_v51 }
 0x2ce   : > { %v7946_v54 = vpop.permute.xlu1 %7945 }
 0x2cf   : > { %957 = vst.msk [vmem:[#allocation2 + $0xf0] sm:$0xff] %vm926_vm0, %v924_v52  ;;  %956 = vst.msk [vmem:[#allocation2 + $0xe8] sm:$0xff] %vm926_vm0, %v923_v53  ;;  %v7948_v55 = vunpack.i.h.bf16 %v7946_v54  ;;  %v7947_v56 = vunpack.i.l.bf16 %v7946_v54 }
 0x2d1   : > { %v925_v57 = vpack.c.bf16 %v7948_v55, %v7947_v56 }
 0x2d3   : > { %958 = vst.msk [vmem:[#allocation2 + $0xf8] sm:$0xff] %vm926_vm0, %v925_v57 }
 0x2d4 PF: > { %v8251_v58 = vld [vmem:[#allocation12 + $0x4] ss:$16 sps:$4 sm:$0xff]   ;;  %v8253_v59 = vld [vmem:[#allocation12] ss:$16 sps:$4 sm:$0xff]   ;;  %v8259_v63 = vld [vmem:[#allocation12 + $0xc] ss:$16 sps:$4 sm:$0xff]  }
 0x2d5   : > { %1584 = vmatprep.subr.bf16.mxu0 %v8251_v58  ;;  %v8254_v60 = vld [vmem:[#allocation12 + $0x24] ss:$16 sps:$4 sm:$0xff]   ;;  %v8256_v61 = vld [vmem:[#allocation12 + $0x20] ss:$16 sps:$4 sm:$0xff]   ;;  %v8262_v0 = vld [vmem:[#allocation12 + $0x8] ss:$16 sps:$4 sm:$0xff]   ;;  %1657 = vmatprep.subr.bf16.mxu1 %v8259_v63 }
 0x2d6   : > { %1585 = vmatpush1.bf16.msra.mxu0 %v8253_v59  ;;  %v8257_v62 = vld [vmem:[#allocation12 + $0x44] ss:$16 sps:$4 sm:$0xff]   ;;  %v8261_v1 = vld [vmem:[#allocation12 + $0x40] ss:$16 sps:$4 sm:$0xff]   ;;  %1658 = vmatpush1.bf16.msra.mxu1 %v8262_v0  ;;  %v8265_v2 = vld [vmem:[#allocation12 + $0x2c] ss:$16 sps:$4 sm:$0xff]  }
 0x2d7   : > { %1586 = vmatprep.subr.bf16.mxu0 %v8254_v60  ;;  %v8268_v3 = vld [vmem:[#allocation12 + $0x28] ss:$16 sps:$4 sm:$0xff]   ;;  %v8263_v4 = vld [vmem:[#allocation12 + $0x64] ss:$16 sps:$4 sm:$0xff]   ;;  %1659 = vmatprep.subr.bf16.mxu1 %v8265_v2  ;;  %v8271_v5 = vld [vmem:[#allocation12 + $0x4c] ss:$16 sps:$4 sm:$0xff]  }
 0x2d8   : > { %v8267_v6 = vld [vmem:[#allocation12 + $0x60] ss:$16 sps:$4 sm:$0xff]   ;;  %v8274_v7 = vld [vmem:[#allocation12 + $0x48] ss:$16 sps:$4 sm:$0xff]   ;;  %v8269_v8 = vld [vmem:[#allocation12 + $0x84] ss:$16 sps:$4 sm:$0xff]  }
 0x2d9   : > { %v8277_v9 = vld [vmem:[#allocation12 + $0x6c] ss:$16 sps:$4 sm:$0xff]   ;;  %v8273_v10 = vld [vmem:[#allocation12 + $0x80] ss:$16 sps:$4 sm:$0xff]   ;;  %v8275_v11 = vld [vmem:[#allocation12 + $0xa4] ss:$16 sps:$4 sm:$0xff]  }
 0x2da   : > { %1587 = vmatpush1.bf16.msra.mxu0 %v8256_v61  ;;  %1660 = vmatpush1.bf16.msra.mxu1 %v8268_v3  ;;  %v8280_v12 = vld [vmem:[#allocation12 + $0x68] ss:$16 sps:$4 sm:$0xff]   ;;  %v8283_v13 = vld [vmem:[#allocation12 + $0x8c] ss:$16 sps:$4 sm:$0xff]   ;;  %v8279_v14 = vld [vmem:[#allocation12 + $0xa0] ss:$16 sps:$4 sm:$0xff]  }
 0x2db   : > { %1588 = vmatprep.subr.bf16.mxu0 %v8257_v62  ;;  %1661 = vmatprep.subr.bf16.mxu1 %v8271_v5  ;;  %v8286_v15 = vld [vmem:[#allocation12 + $0x88] ss:$16 sps:$4 sm:$0xff]   ;;  %v8281_v16 = vld [vmem:[#allocation12 + $0xc4] ss:$16 sps:$4 sm:$0xff]   ;;  %v8289_v17 = vld [vmem:[#allocation12 + $0xac] ss:$16 sps:$4 sm:$0xff]  }
 0x2dc   : > { %v8285_v18 = vld [vmem:[#allocation12 + $0xc0] ss:$16 sps:$4 sm:$0xff]   ;;  %v8287_v19 = vld [vmem:[#allocation12 + $0xe4] ss:$16 sps:$4 sm:$0xff]   ;;  %v8292_v20 = vld [vmem:[#allocation12 + $0xa8] ss:$16 sps:$4 sm:$0xff]  }
 0x2dd   : > { %v8295_v21 = vld [vmem:[#allocation12 + $0xcc] ss:$16 sps:$4 sm:$0xff]   ;;  %v8291_v22 = vld [vmem:[#allocation12 + $0xe0] ss:$16 sps:$4 sm:$0xff]   ;;  %v8298_v23 = vld [vmem:[#allocation12 + $0xc8] ss:$16 sps:$4 sm:$0xff]  }
 0x2de   : > { %1589 = vmatpush1.bf16.msra.mxu0 %v8261_v1  ;;  %1662 = vmatpush1.bf16.msra.mxu1 %v8274_v7  ;;  %v8293_v24 = vld [vmem:[#allocation12 + $0x104] ss:$16 sps:$4 sm:$0xff]   ;;  %v8301_v25 = vld [vmem:[#allocation12 + $0xec] ss:$16 sps:$4 sm:$0xff]   ;;  %v8297_v26 = vld [vmem:[#allocation12 + $0x100] ss:$16 sps:$4 sm:$0xff]  }
 0x2df   : > { %1590 = vmatprep.subr.bf16.mxu0 %v8263_v4  ;;  %1663 = vmatprep.subr.bf16.mxu1 %v8277_v9  ;;  %v8299_v27 = vld [vmem:[#allocation12 + $0x124] ss:$16 sps:$4 sm:$0xff]   ;;  %v8304_v28 = vld [vmem:[#allocation12 + $0xe8] ss:$16 sps:$4 sm:$0xff]   ;;  %v8307_v29 = vld [vmem:[#allocation12 + $0x10c] ss:$16 sps:$4 sm:$0xff]  }
 0x2e0   : > { %v8303_v30 = vld [vmem:[#allocation12 + $0x120] ss:$16 sps:$4 sm:$0xff]   ;;  %v8310_v31 = vld [vmem:[#allocation12 + $0x108] ss:$16 sps:$4 sm:$0xff]   ;;  %v8305_v32 = vld [vmem:[#allocation12 + $0x144] ss:$16 sps:$4 sm:$0xff]  }
 0x2e1   : > { %v8313_v33 = vld [vmem:[#allocation12 + $0x12c] ss:$16 sps:$4 sm:$0xff]   ;;  %v8309_v34 = vld [vmem:[#allocation12 + $0x140] ss:$16 sps:$4 sm:$0xff]   ;;  %v8311_v35 = vld [vmem:[#allocation12 + $0x164] ss:$16 sps:$4 sm:$0xff]  }
 0x2e2   : > { %1591 = vmatpush1.bf16.msra.mxu0 %v8267_v6  ;;  %1664 = vmatpush1.bf16.msra.mxu1 %v8280_v12  ;;  %v8316_v36 = vld [vmem:[#allocation12 + $0x128] ss:$16 sps:$4 sm:$0xff]   ;;  %v8319_v37 = vld [vmem:[#allocation12 + $0x14c] ss:$16 sps:$4 sm:$0xff]   ;;  %v8315_v39 = vld [vmem:[#allocation12 + $0x160] ss:$16 sps:$4 sm:$0xff]  }
 0x2e3   : > { %1592 = vmatprep.subr.bf16.mxu0 %v8269_v8  ;;  %1665 = vmatprep.subr.bf16.mxu1 %v8283_v13  ;;  %v8343_v38 = vld [vmem:[%s9665_s16 + $0x4] ss:$8 sps:$4 sm:$0xff]   ;;  %v8322_v41 = vld [vmem:[#allocation12 + $0x148] ss:$16 sps:$4 sm:$0xff]   ;;  %v8321_v43 = vld [vmem:[#allocation12 + $0x180] ss:$16 sps:$4 sm:$0xff]  }
 0x2e4   : > { %v8317_v40 = vld [vmem:[#allocation12 + $0x184] ss:$16 sps:$4 sm:$0xff]   ;;  %v8325_v42 = vld [vmem:[#allocation12 + $0x16c] ss:$16 sps:$4 sm:$0xff]   ;;  %1616 = vmatprep.mubr.bf16.mxu0 %v8343_v38  ;;  %1689 = vmatprep.mubr.bf16.mxu1 %v8343_v38  ;;  %v8328_v44 = vld [vmem:[#allocation12 + $0x168] ss:$16 sps:$4 sm:$0xff]  }
 0x2e5   : > { %v8323_v45 = vld [vmem:[#allocation12 + $0x1a4] ss:$16 sps:$4 sm:$0xff]   ;;  %v8331_v46 = vld [vmem:[#allocation12 + $0x18c] ss:$16 sps:$4 sm:$0xff]   ;;  %v8327_v47 = vld [vmem:[#allocation12 + $0x1a0] ss:$16 sps:$4 sm:$0xff]  }
 0x2e6   : > { %1593 = vmatpush1.bf16.msra.mxu0 %v8273_v10  ;;  %1666 = vmatpush1.bf16.msra.mxu1 %v8286_v15  ;;  %v8334_v48 = vld [vmem:[#allocation12 + $0x188] ss:$16 sps:$4 sm:$0xff]   ;;  %v8329_v49 = vld [vmem:[#allocation12 + $0x1c4] ss:$16 sps:$4 sm:$0xff]   ;;  %v8337_v50 = vld [vmem:[#allocation12 + $0x1ac] ss:$16 sps:$4 sm:$0xff]  }
 0x2e7   : > { %1594 = vmatprep.subr.bf16.mxu0 %v8275_v11  ;;  %1667 = vmatprep.subr.bf16.mxu1 %v8289_v17  ;;  %v8333_v51 = vld [vmem:[#allocation12 + $0x1c0] ss:$16 sps:$4 sm:$0xff]   ;;  %v8340_v52 = vld [vmem:[#allocation12 + $0x1a8] ss:$16 sps:$4 sm:$0xff]   ;;  %v8335_v53 = vld [vmem:[#allocation12 + $0x1e4] ss:$16 sps:$4 sm:$0xff]  }
 0x2e8   : > { %v8344_v54 = vld [vmem:[#allocation12 + $0x1cc] ss:$16 sps:$4 sm:$0xff]   ;;  %v8339_v55 = vld [vmem:[#allocation12 + $0x1e0] ss:$16 sps:$4 sm:$0xff]   ;;  %v8346_v56 = vld [vmem:[#allocation12 + $0x1c8] ss:$16 sps:$4 sm:$0xff]  }
 0x2e9   : > { %v8347_v57 = vld [vmem:[#allocation12 + $0x1ec] ss:$16 sps:$4 sm:$0xff]   ;;  %v8341_v58 = vld [vmem:[%s9665_s16] ss:$8 sps:$4 sm:$0xff]   ;;  %v8352_v61 = vld [vmem:[%s9665_s16 + $0x10] ss:$8 sps:$4 sm:$0xff]  }
 0x2ea   : > { %1595 = vmatpush1.bf16.msra.mxu0 %v8279_v14  ;;  %1668 = vmatpush1.bf16.msra.mxu1 %v8292_v20  ;;  %v8349_v59 = vld [vmem:[#allocation12 + $0x1e8] ss:$16 sps:$4 sm:$0xff]   ;;  %v8350_v60 = vld [vmem:[%s9665_s16 + $0x14] ss:$8 sps:$4 sm:$0xff]   ;;  %v8353_v62 = vld [vmem:[%s9665_s16 + $0x24] ss:$8 sps:$4 sm:$0xff]  }
 0x2eb   : > { %1596 = vmatprep.subr.bf16.mxu0 %v8281_v16  ;;  %1669 = vmatprep.subr.bf16.mxu1 %v8295_v21  ;;  %v8355_v63 = vld [vmem:[%s9665_s16 + $0x20] ss:$8 sps:$4 sm:$0xff]   ;;  %v8356_v0 = vld [vmem:[%s9665_s16 + $0x34] ss:$8 sps:$4 sm:$0xff]   ;;  %v8358_v1 = vld [vmem:[%s9665_s16 + $0x30] ss:$8 sps:$4 sm:$0xff]  }
 0x2ec   : > { %vm2146_vm2 = vcmask 261120   ;;  %v2114_v2 = vld [vmem:[#allocation2] sm:$0xff]  ;;  %s9256_s5 = smov 96   ;;  %s9257_s18 = smov 64   ;;  %vm2923_vm3 = vcmask 523264   ;;  %vm4268_vm4 = vcmask 7168  }
 0x2ed   : > { %s9258_s24 = smov 32   ;;  %s13475_s15 = sld [smem:[#allocation26_spill]] }
 0x2ee   : > { %1597 = vmatpush1.bf16.msra.mxu0 %v8285_v18  ;;  %1670 = vmatpush1.bf16.msra.mxu1 %v8298_v23 }
 0x2ef   : > { %1598 = vmatprep.subr.bf16.mxu0 %v8287_v19  ;;  %1671 = vmatprep.subr.bf16.mxu1 %v8301_v25 }
 0x2f2   : > { %1599 = vmatpush1.bf16.msra.mxu0 %v8291_v22  ;;  %1672 = vmatpush1.bf16.msra.mxu1 %v8304_v28 }
 0x2f3   : > { %1600 = vmatprep.subr.bf16.mxu0 %v8293_v24  ;;  %1673 = vmatprep.subr.bf16.mxu1 %v8307_v29  ;;  %p7123_p12 = scmp.ne.s32.totalorder %s13475_s15, 1 }
 0x2f4   : > { %s9261_s2 = smov (!%p7123_p12), 32   ;;  %s9262_s19 = smov (!%p7123_p12), 64   ;;  %vm6409_vm5 = vcmask (!%p7123_p12), 785408  }
 0x2f5   : > { %s9263_s12 = smov (!%p7123_p12), 96  }
 0x2f6   : > { %1601 = vmatpush1.bf16.msra.mxu0 %v8297_v26  ;;  %1674 = vmatpush1.bf16.msra.mxu1 %v8310_v31 }
 0x2f7   : > { %1602 = vmatprep.subr.bf16.mxu0 %v8299_v27  ;;  %1675 = vmatprep.subr.bf16.mxu1 %v8313_v33 }
 0x2fa   : > { %1603 = vmatpush1.bf16.msra.mxu0 %v8303_v30  ;;  %1676 = vmatpush1.bf16.msra.mxu1 %v8316_v36 }
 0x2fb   : > { %1604 = vmatprep.subr.bf16.mxu0 %v8305_v32  ;;  %1677 = vmatprep.subr.bf16.mxu1 %v8319_v37 }
 0x2fe   : > { %1605 = vmatpush1.bf16.msra.mxu0 %v8309_v34  ;;  %1678 = vmatpush1.bf16.msra.mxu1 %v8322_v41 }
 0x2ff   : > { %1606 = vmatprep.subr.bf16.mxu0 %v8311_v35  ;;  %1679 = vmatprep.subr.bf16.mxu1 %v8325_v42 }
 0x302   : > { %1607 = vmatpush1.bf16.msra.mxu0 %v8315_v39  ;;  %1680 = vmatpush1.bf16.msra.mxu1 %v8328_v44 }
 0x303   : > { %1608 = vmatprep.subr.bf16.mxu0 %v8317_v40  ;;  %1681 = vmatprep.subr.bf16.mxu1 %v8331_v46 }
 0x306   : > { %1609 = vmatpush1.bf16.msra.mxu0 %v8321_v43  ;;  %1682 = vmatpush1.bf16.msra.mxu1 %v8334_v48 }
 0x307   : > { %1610 = vmatprep.subr.bf16.mxu0 %v8323_v45  ;;  %1683 = vmatprep.subr.bf16.mxu1 %v8337_v50 }
 0x30a   : > { %1611 = vmatpush1.bf16.msra.mxu0 %v8327_v47  ;;  %1684 = vmatpush1.bf16.msra.mxu1 %v8340_v52 }
 0x30b   : > { %1612 = vmatprep.subr.bf16.mxu0 %v8329_v49  ;;  %1685 = vmatprep.subr.bf16.mxu1 %v8344_v54 }
 0x30e   : > { %1613 = vmatpush1.bf16.msra.mxu0 %v8333_v51  ;;  %1686 = vmatpush1.bf16.msra.mxu1 %v8346_v56 }
 0x30f   : > { %1614 = vmatprep.subr.bf16.mxu0 %v8335_v53  ;;  %1687 = vmatprep.subr.bf16.mxu1 %v8347_v57 }
 0x312   : > { %1615 = vmatpush1.bf16.msra.mxu0 %v8339_v55  ;;  %1688 = vmatpush1.bf16.msra.mxu1 %v8349_v59 }
 0x315   : > { %1617 = vmatmul.mubr.bf16.vlgmr.msra.gmra.mrb[0].mxu0 %v8341_v58  ;;  %1690 = vmatmul.mubr.bf16.vlgmr.msra.gmra.mrb[0].mxu1 %v8341_v58 }
 0x316   : > { %1626 = vmatprep.mubr.bf16.mxu0 %v8350_v60  ;;  %1699 = vmatprep.mubr.bf16.mxu1 %v8350_v60 }
 0x31d   : > { %1627 = vmatmul.mubr.bf16.gmra.mrb[4].mxu0 %v8352_v61  ;;  %1700 = vmatmul.mubr.bf16.gmra.mrb[4].mxu1 %v8352_v61 }
 0x31e   : > { %1636 = vmatprep.mubr.bf16.mxu0 %v8353_v62  ;;  %1709 = vmatprep.mubr.bf16.mxu1 %v8353_v62 }
 0x325   : > { %1637 = vmatmul.mubr.bf16.gmra.mrb[8].mxu0 %v8355_v63  ;;  %1710 = vmatmul.mubr.bf16.gmra.mrb[8].mxu1 %v8355_v63 }
 0x326   : > { %1646 = vmatprep.mubr.bf16.mxu0 %v8356_v0  ;;  %1719 = vmatprep.mubr.bf16.mxu1 %v8356_v0  ;;  %v2115_v0 = vld [vmem:[#allocation2 + $0x8] sm:$0xff] }
 0x32d   : > { %1647 = vmatmul.mubr.bf16.gmra.mrb[12].mxu0 %v8358_v1  ;;  %1720 = vmatmul.mubr.bf16.gmra.mrb[12].mxu1 %v8358_v1  ;;  %v2116_v1 = vld [vmem:[#allocation2 + $0x10] sm:$0xff] }
 0x32e   : > { %7302 = vmatprep.mubr.msk.bf16.mxu0 %vm2146_vm2, %v2114_v2  ;;  %v2117_v2 = vld [vmem:[#allocation2 + $0x18] sm:$0xff] }
 0x3e8   : > { %v1618_v3 = vpop.f32.mrb[0].mxu0  ;;  %v1691_v10 = vpop.f32.mrb[0].mxu1 }
 0x3e9   : > { %v1620_v4 = vpop.f32.mrb[1].mxu0  ;;  %v1693_v13 = vpop.f32.mrb[1].mxu1 }
 0x3ea   : > { %v1622_v5 = vpop.f32.mrb[2].mxu0  ;;  %v1695_v14 = vpop.f32.mrb[2].mxu1 }
 0x3eb   : > { %v1890_v6 = vpack.c.bf16 %v1622_v5, %v1618_v3  ;;  %v1624_v7 = vpop.f32.mrb[3].mxu0  ;;  %v8009_v8 = vpack.i.bf16 %v1622_v5, %v1618_v3  ;;  %v1697_v15 = vpop.f32.mrb[3].mxu1  ;;  %v8024_v16 = vpack.i.bf16 %v1695_v14, %v1691_v10  ;;  %v10166_v17 = vpack.c.bf16 %v1695_v14, %v1691_v10  ;;  %v2122_v3 = vld [vmem:[#allocation2 + $0x40] sm:$0xff] }
 0x3ec   : > { %v10159_v9 = vpack.c.bf16 %v1624_v7, %v1620_v4  ;;  %v10161_v11 = vpack.i.bf16 %v1624_v7, %v1620_v4  ;;  %v10168_v19 = vpack.i.bf16 %v1697_v15, %v1693_v13  ;;  %v10170_v20 = vpack.c.bf16 %v1697_v15, %v1693_v13  ;;  %v2118_v4 = vld [vmem:[#allocation2 + $0x20] sm:$0xff] }
 0x3ed   : > { %8010 = vrot.lane.b32.xlu0 %v8009_v8, %s9256_s5  ;;  %7614 = vmatprep.subr.msk.bf16.mxu0 %vm2146_vm2, %v1890_v6  ;;  %v2160_v12 = vsel %vm2146_vm2, %v1890_v6, 0 }
 0x3ee   : > { %7295 = vmatpush3.bf16.xpose.msra.mxu0 %v2160_v12  ;;  %7318 = vmatprep.mubr.msk.bf16.mxu1 %vm2146_vm2, %v2118_v4 }
 0x3f0   : > { %v1628_v18 = vpop.f32.mrb[4].mxu0  ;;  %v1701_v27 = vpop.f32.mrb[4].mxu1 }
 0x3f1   : > { %8015 = vrot.lane.b32.xlu0 %v8009_v8, %s9257_s18  ;;  %v1630_v21 = vpop.f32.mrb[5].mxu0  ;;  %v1703_v30 = vpop.f32.mrb[5].mxu1 }
 0x3f2   : > { %v1632_v22 = vpop.f32.mrb[6].mxu0  ;;  %v1705_v31 = vpop.f32.mrb[6].mxu1 }
 0x3f3   : > { %v1891_v23 = vpack.c.bf16 %v1632_v22, %v1628_v18  ;;  %v1634_v24 = vpop.f32.mrb[7].mxu0  ;;  %v10173_v25 = vpack.i.bf16 %v1632_v22, %v1628_v18  ;;  %v1707_v32 = vpop.f32.mrb[7].mxu1  ;;  %v8084_v33 = vpack.i.bf16 %v1705_v31, %v1701_v27  ;;  %v10182_v34 = vpack.c.bf16 %v1705_v31, %v1701_v27 }
 0x3f4   : > { %v10175_v26 = vpack.c.bf16 %v1634_v24, %v1630_v21  ;;  %v8099_v28 = vpack.i.bf16 %v1634_v24, %v1630_v21  ;;  %v8114_v35 = vpack.i.bf16 %v1707_v32, %v1703_v30  ;;  %v10184_v37 = vpack.c.bf16 %v1707_v32, %v1703_v30 }
 0x3f5   : > { %8020 = vrot.lane.b32.xlu0 %v8009_v8, %s9258_s24  ;;  %8075 = vrot.lane.b32.xlu1 %v10173_v25, %s9257_s18  ;;  %v2163_v29 = vsel %vm2146_vm2, %v1891_v23, 0 }
 0x3f6   : > { %7615 = vmatprep.subr.msk.bf16.mxu0 %vm2146_vm2, %v1891_v23  ;;  %13014 = vst [vmem:[#allocation34_spill] sm:$0xff] %v10184_v37 }
 0x3f7   : > { %7297 = vmatpush3.bf16.xpose.msra.mxu0 %v2163_v29 }
 0x3f8   : > { %v1638_v36 = vpop.f32.mrb[8].mxu0  ;;  %v10191_v44 = vpop.f32.mrb[8].mxu1 }
 0x3f9   : > { %8025 = vrot.lane.b32.xlu0 %v8024_v16, %s9256_s5  ;;  %8080 = vrot.lane.b32.xlu1 %v10173_v25, %s9258_s24  ;;  %v1640_v38 = vpop.f32.mrb[9].mxu0  ;;  %v10198_v47 = vpop.f32.mrb[9].mxu1 }
 0x3fa   : > { %v1642_v39 = vpop.f32.mrb[10].mxu0  ;;  %v10201_v48 = vpop.f32.mrb[10].mxu1 }
 0x3fb   : > { %v1892_v40 = vpack.c.bf16 %v1642_v39, %v1638_v36  ;;  %v1644_v41 = vpop.f32.mrb[11].mxu0  ;;  %v8134_v42 = vpack.i.bf16 %v1642_v39, %v1638_v36  ;;  %v8144_v49 = vpack.i.bf16 %v10201_v48, %v10191_v44  ;;  %v10205_v50 = vpop.f32.mrb[11].mxu1  ;;  %v10274_v6 = vpack.c.bf16 %v10201_v48, %v10191_v44 }
 0x3fc   : > { %v10189_v43 = vpack.c.bf16 %v1644_v41, %v1640_v38  ;;  %v10193_v45 = vpack.i.bf16 %v1644_v41, %v1640_v38  ;;  %v8174_v5 = vpack.i.bf16 %v10205_v50, %v10198_v47  ;;  %v10279_v7 = vpack.c.bf16 %v10205_v50, %v10198_v47 }
 0x3fd   : > { %8030 = vrot.lane.b32.xlu0 %v8024_v16, %s9257_s18  ;;  %8085 = vrot.lane.b32.xlu1 %v8084_v33, %s9256_s5  ;;  %v2166_v46 = vsel %vm2146_vm2, %v1892_v40, 0 }
 0x3fe   : > { %7616 = vmatprep.subr.msk.bf16.mxu0 %vm2146_vm2, %v1892_v40  ;;  %13015 = vst [vmem:[#allocation35_spill] sm:$0xff] %v10279_v7 }
 0x3ff   : > { %7299 = vmatpush3.bf16.xpose.msra.mxu0 %v2166_v46 }
 0x400   : > { %v1648_v51 = vpop.f32.mrb[12].mxu0  ;;  %v10211_v58 = vpop.f32.mrb[12].mxu1 }
 0x401   : > { %8035 = vrot.lane.b32.xlu0 %v8024_v16, %s9258_s24  ;;  %8090 = vrot.lane.b32.xlu1 %v8084_v33, %s9257_s18  ;;  %v1650_v52 = vpop.f32.mrb[13].mxu0  ;;  %v10217_v61 = vpop.f32.mrb[13].mxu1 }
 0x402   : > { %v1652_v53 = vpop.f32.mrb[14].mxu0  ;;  %v10220_v62 = vpop.f32.mrb[14].mxu1 }
 0x403   : > { %v1893_v54 = vpack.c.bf16 %v1652_v53, %v1648_v51  ;;  %v8189_v55 = vpack.i.bf16 %v1652_v53, %v1648_v51  ;;  %v1654_v56 = vpop.f32.mrb[15].mxu0  ;;  %v8204_v63 = vpack.i.bf16 %v10220_v62, %v10211_v58  ;;  %v1727_v31 = vpop.f32.mrb[15].mxu1 }
 0x404   : > { %v10209_v57 = vpack.c.bf16 %v1654_v56, %v1650_v52  ;;  %v8219_v59 = vpack.i.bf16 %v1654_v56, %v1650_v52  ;;  %v10336_v56 = vpack.c.bf16 %v1727_v31, %v10217_v61 }
 0x405   : > { %8040 = vrot.lane.b32.xlu0 %v10161_v11, %s9256_s5  ;;  %8095 = vrot.lane.b32.xlu1 %v8084_v33, %s9258_s24  ;;  %v2169_v60 = vsel %vm2146_vm2, %v1893_v54, 0  ;;  %v8234_v33 = vpack.i.bf16 %v1727_v31, %v10217_v61  ;;  %v2124_v31 = vld [vmem:[#allocation2 + $0x50] sm:$0xff] }
 0x406   : > { %7617 = vmatprep.subr.msk.bf16.mxu0 %vm2146_vm2, %v1893_v54  ;;  %13023 = vst [vmem:[#allocation43_spill] sm:$0xff] %v10336_v56 }
 0x407   : > { %7301 = vmatpush3.bf16.xpose.msra.mxu0 %v2169_v60 }
 0x409   : > { %8045 = vrot.lane.b32.xlu0 %v10161_v11, %s9257_s18  ;;  %8100 = vrot.lane.b32.xlu1 %v8099_v28, %s9256_s5 }
 0x40d   : > { %8050 = vrot.lane.b32.xlu0 %v10161_v11, %s9258_s24  ;;  %8105 = vrot.lane.b32.xlu1 %v8099_v28, %s9257_s18 }
 0x40e   : > { %7303 = vmatmul.mubr.msk.bf16.vlgmr.msra.gmra.mrb[16].mxu0 %vm2146_vm2, %v2115_v0 }
 0x40f   : > { %7306 = vmatprep.mubr.msk.bf16.mxu0 %vm2146_vm2, %v2116_v1 }
 0x411   : > { %8055 = vrot.lane.b32.xlu0 %v10168_v19, %s9256_s5  ;;  %8110 = vrot.lane.b32.xlu1 %v8099_v28, %s9258_s24 }
 0x415   : > { %8060 = vrot.lane.b32.xlu0 %v10168_v19, %s9257_s18  ;;  %8115 = vrot.lane.b32.xlu1 %v8114_v35, %s9256_s5 }
 0x416   : > { %7307 = vmatmul.mubr.msk.bf16.gmra.mrb[20].mxu0 %vm2146_vm2, %v2117_v2 }
 0x417   : > { %7334 = vmatprep.mubr.msk.bf16.mxu0 %vm2146_vm2, %v2122_v3 }
 0x419   : > { %8065 = vrot.lane.b32.xlu0 %v10168_v19, %s9258_s24  ;;  %8120 = vrot.lane.b32.xlu1 %v8114_v35, %s9257_s18 }
 0x41d   : > { %8070 = vrot.lane.b32.xlu0 %v10173_v25, %s9256_s5  ;;  %8125 = vrot.lane.b32.xlu1 %v8114_v35, %s9258_s24  ;;  %v10300_v35 = vpack.c.bf16 %v10220_v62, %v10211_v58 }
 0x421   : > { %8135 = vrot.lane.b32.xlu0 %v8134_v42, %s9257_s18  ;;  %8130 = vrot.lane.b32.xlu1 %v8134_v42, %s9256_s5 }
 0x425   : > { %8140 = vrot.lane.b32.xlu0 %v8134_v42, %s9258_s24  ;;  %8190 = vrot.lane.b32.xlu1 %v8189_v55, %s9256_s5 }
 0x429   : > { %8145 = vrot.lane.b32.xlu0 %v8144_v49, %s9256_s5  ;;  %8195 = vrot.lane.b32.xlu1 %v8189_v55, %s9257_s18 }
 0x42d   : > { %8150 = vrot.lane.b32.xlu0 %v8144_v49, %s9257_s18  ;;  %8200 = vrot.lane.b32.xlu1 %v8189_v55, %s9258_s24 }
 0x431   : > { %8155 = vrot.lane.b32.xlu0 %v8144_v49, %s9258_s24  ;;  %8205 = vrot.lane.b32.xlu1 %v8204_v63, %s9256_s5 }
 0x435   : > { %8160 = vrot.lane.b32.xlu0 %v10193_v45, %s9256_s5  ;;  %8210 = vrot.lane.b32.xlu1 %v8204_v63, %s9257_s18 }
 0x439   : > { %8165 = vrot.lane.b32.xlu0 %v10193_v45, %s9257_s18  ;;  %8215 = vrot.lane.b32.xlu1 %v8204_v63, %s9258_s24 }
 0x43d   : > { %8170 = vrot.lane.b32.xlu0 %v10193_v45, %s9258_s24  ;;  %8220 = vrot.lane.b32.xlu1 %v8219_v59, %s9256_s5 }
 0x441   : > { %8225 = vrot.lane.b32.xlu1 %v8219_v59, %s9257_s18  ;;  %8175 = vrot.lane.b32.xlu0 %v8174_v5, %s9256_s5 }
 0x445   : > { %8230 = vrot.lane.b32.xlu1 %v8219_v59, %s9258_s24  ;;  %8180 = vrot.lane.b32.xlu0 %v8174_v5, %s9257_s18 }
 0x449   : > { %8185 = vrot.lane.b32.xlu0 %v8174_v5, %s9258_s24  ;;  %8235 = vrot.lane.b32.xlu1 %v8234_v33, %s9256_s5 }
 0x44d   : > { %8240 = vrot.lane.b32.xlu1 %v8234_v33, %s9257_s18 }
 0x451   : > { %8245 = vrot.lane.b32.xlu1 %v8234_v33, %s9258_s24 }
 0x45f   : > { %v8011_v8 = vpop.permute.xlu0 %8010 }
 0x460   : > { %v8013_v10 = vunpack.i.h.bf16 %v8011_v8  ;;  %v8012_v11 = vunpack.i.l.bf16 %v8011_v8 }
 0x462   : > { %v1894_v12 = vpack.c.bf16 %v8013_v10, %v8012_v11 }
 0x463   : > { %v8016_v13 = vpop.permute.xlu0 %8015 }
 0x464   : > { %v8018_v14 = vunpack.i.h.bf16 %v8016_v13  ;;  %v8017_v15 = vunpack.i.l.bf16 %v8016_v13  ;;  %7618 = vmatprep.subr.msk.bf16.mxu1 %vm2146_vm2, %v1894_v12  ;;  %v2249_v16 = vsel %vm2146_vm2, %v1894_v12, 0 }
 0x465   : > { %7311 = vmatpush3.bf16.xpose.msra.mxu1 %v2249_v16 }
 0x466   : > { %v1898_v18 = vpack.c.bf16 %v8018_v14, %v8017_v15 }
 0x467   : > { %v10283_v19 = vpop.permute.xlu0 %8020  ;;  %v8076_v21 = vpop.permute.xlu1 %8075 }
 0x468   : > { %v8078_v22 = vunpack.i.h.bf16 %v8076_v21  ;;  %v8077_v23 = vunpack.i.l.bf16 %v8076_v21  ;;  %7622 = vmatprep.subr.msk.bf16.mxu0 %vm2146_vm2, %v1898_v18  ;;  %v2338_v24 = vsel %vm2146_vm2, %v1898_v18, 0  ;;  %v8023_v18 = vunpack.i.h.bf16 %v10283_v19 }
 0x469   : > { %7327 = vmatpush3.bf16.xpose.msra.mxu0 %v2338_v24  ;;  %v8022_v21 = vunpack.i.l.bf16 %v10283_v19  ;;  %v2516_v19 = vsel %vm2146_vm2, %v10159_v9, 0 }
 0x46a   : > { %v1899_v25 = vpack.c.bf16 %v8078_v22, %v8077_v23 }
 0x46b   : > { %v10287_v27 = vpop.permute.xlu0 %8025  ;;  %v10289_v28 = vpop.permute.xlu1 %8080  ;;  %v1902_v23 = vpack.c.bf16 %v8023_v18, %v8022_v21 }
 0x46c   : > { %7623 = vmatprep.subr.msk.bf16.mxu0 %vm2146_vm2, %v1899_v25  ;;  %v2341_v32 = vsel %vm2146_vm2, %v1899_v25, 0  ;;  %v2123_v25 = vld [vmem:[#allocation2 + $0x48] sm:$0xff]  ;;  %v8082_v33 = vunpack.i.l.bf16 %v10289_v28 }
 0x46f   : > { %v10292_v29 = vpop.permute.xlu0 %8030  ;;  %v10294_v30 = vpop.permute.xlu1 %8085 }
 0x471   : > { %7329 = vmatpush3.bf16.xpose.msra.mxu0 %v2341_v32  ;;  %v8083_v32 = vunpack.i.h.bf16 %v10289_v28  ;;  %v2125_v28 = vld [vmem:[#allocation2 + $0x58] sm:$0xff] }
 0x473   : > { %v10302_v36 = vpop.permute.xlu0 %8035  ;;  %v10304_v38 = vpop.permute.xlu1 %8090 }
 0x477   : > { %v10307_v39 = vpop.permute.xlu0 %8040  ;;  %v10309_v40 = vpop.permute.xlu1 %8095 }
 0x478   : > { %13016 = vst [vmem:[#allocation36_spill] sm:$0xff] %v10309_v40  ;;  %v8042_v21 = vunpack.i.l.bf16 %v10307_v39 }
 0x47b   : > { %v10312_v41 = vpop.permute.xlu0 %8045  ;;  %v10314_v42 = vpop.permute.xlu1 %8100 }
 0x47f   : > { %v10317_v44 = vpop.permute.xlu0 %8050  ;;  %v10319_v45 = vpop.permute.xlu1 %8105 }
 0x483   : > { %v10321_v46 = vpop.permute.xlu0 %8055  ;;  %v10323_v47 = vpop.permute.xlu1 %8110 }
 0x484   : > { %13017 = vst [vmem:[#allocation37_spill] sm:$0xff] %v10321_v46 }
 0x487   : > { %v10325_v48 = vpop.permute.xlu0 %8060  ;;  %v10327_v49 = vpop.permute.xlu1 %8115 }
 0x488   : > { %13018 = vst [vmem:[#allocation38_spill] sm:$0xff] %v10325_v48  ;;  %13019 = vst [vmem:[#allocation39_spill] sm:$0xff] %v10327_v49 }
 0x48b   : > { %v10329_v50 = vpop.permute.xlu0 %8065  ;;  %v10331_v51 = vpop.permute.xlu1 %8120 }
 0x48c   : > { %13020 = vst [vmem:[#allocation40_spill] sm:$0xff] %v10329_v50  ;;  %13021 = vst [vmem:[#allocation41_spill] sm:$0xff] %v10331_v51 }
 0x48f   : > { %v8071_v52 = vpop.permute.xlu0 %8070  ;;  %v10333_v53 = vpop.permute.xlu1 %8125 }
 0x490   : > { %13022 = vst [vmem:[#allocation42_spill] sm:$0xff] %v10333_v53  ;;  %v8073_v54 = vunpack.i.h.bf16 %v8071_v52  ;;  %v8072_v55 = vunpack.i.l.bf16 %v8071_v52  ;;  %v2119_v52 = vld [vmem:[#allocation2 + $0x28] sm:$0xff] }
 0x492   : > { %v1895_v58 = vpack.c.bf16 %v8073_v54, %v8072_v55  ;;  %v2120_v54 = vld [vmem:[#allocation2 + $0x30] sm:$0xff] }
 0x493   : > { %v8136_v59 = vpop.permute.xlu0 %8135  ;;  %v8131_v60 = vpop.permute.xlu1 %8130 }
 0x494   : > { %v8138_v62 = vunpack.i.h.bf16 %v8136_v59  ;;  %v8137_v63 = vunpack.i.l.bf16 %v8136_v59  ;;  %v8133_v0 = vunpack.i.h.bf16 %v8131_v60  ;;  %v8132_v1 = vunpack.i.l.bf16 %v8131_v60  ;;  %7619 = vmatprep.subr.msk.bf16.mxu1 %vm2146_vm2, %v1895_v58 }
 0x495   : > { %v2252_v2 = vsel %vm2146_vm2, %v1895_v58, 0  ;;  %v1903_v58 = vpack.c.bf16 %v8083_v32, %v8082_v33  ;;  %v2427_v59 = vsel %vm2146_vm2, %v1902_v23, 0 }
 0x496   : > { %v1900_v3 = vpack.c.bf16 %v8138_v62, %v8137_v63  ;;  %v1896_v4 = vpack.c.bf16 %v8133_v0, %v8132_v1  ;;  %7313 = vmatpush3.bf16.xpose.msra.mxu1 %v2252_v2  ;;  %v2519_v63 = vsel %vm2146_vm2, %v10175_v26, 0  ;;  %v2121_v1 = vld [vmem:[#allocation2 + $0x38] sm:$0xff]  ;;  %v2126_v2 = vld [vmem:[#allocation2 + $0x60] sm:$0xff] }
 0x497   : > { %v8191_v5 = vpop.permute.xlu1 %8190  ;;  %v8141_v55 = vpop.permute.xlu0 %8140 }
 0x498   : > { %v8193_v8 = vunpack.i.h.bf16 %v8191_v5  ;;  %v8192_v10 = vunpack.i.l.bf16 %v8191_v5  ;;  %7624 = vmatprep.subr.msk.bf16.mxu0 %vm2146_vm2, %v1900_v3  ;;  %7620 = vmatprep.subr.msk.bf16.mxu1 %vm2146_vm2, %v1896_v4  ;;  %v2344_v61 = vsel %vm2146_vm2, %v1900_v3, 0  ;;  %v2255_v15 = vsel %vm2146_vm2, %v1896_v4, 0 }
 0x499   : > { %7331 = vmatpush3.bf16.xpose.msra.mxu0 %v2344_v61  ;;  %v8143_v60 = vunpack.i.h.bf16 %v8141_v55  ;;  %v8142_v62 = vunpack.i.l.bf16 %v8141_v55  ;;  %v2430_v5 = vsel %vm2146_vm2, %v1903_v58, 0  ;;  %v2522_v61 = vsel %vm2146_vm2, %v10189_v43, 0 }
 0x49a   : > { %v1897_v11 = vpack.c.bf16 %v8193_v8, %v8192_v10 }
 0x49b   : > { %v8196_v12 = vpop.permute.xlu1 %8195  ;;  %v10368_v0 = vpop.permute.xlu0 %8145  ;;  %v1904_v4 = vpack.c.bf16 %v8143_v60, %v8142_v62 }
 0x49c   : > { %v8198_v13 = vunpack.i.h.bf16 %v8196_v12  ;;  %v8197_v14 = vunpack.i.l.bf16 %v8196_v12  ;;  %v2258_v24 = vsel %vm2146_vm2, %v1897_v11, 0  ;;  %v8048_v12 = vunpack.i.h.bf16 %v10312_v41 }
 0x49e   : > { %v1901_v16 = vpack.c.bf16 %v8198_v13, %v8197_v14  ;;  %7315 = vmatpush3.bf16.xpose.msra.mxu1 %v2255_v15  ;;  %v8047_v13 = vunpack.i.l.bf16 %v10312_v41  ;;  %v2433_v15 = vsel %vm2146_vm2, %v1904_v4, 0 }
 0x49f   : > { %7621 = vmatprep.subr.msk.bf16.mxu1 %vm2146_vm2, %v1897_v11  ;;  %v8201_v3 = vpop.permute.xlu1 %8200 }
 0x4a0   : > { %7625 = vmatprep.subr.msk.bf16.mxu0 %vm2146_vm2, %v1901_v16  ;;  %v2347_v22 = vsel %vm2146_vm2, %v1901_v16, 0  ;;  %v8203_v8 = vunpack.i.h.bf16 %v8201_v3  ;;  %v8202_v10 = vunpack.i.l.bf16 %v8201_v3 }
 0x4a1   : > { %7333 = vmatpush3.bf16.xpose.msra.mxu0 %v2347_v22  ;;  %v1914_v22 = vpack.c.bf16 %v8048_v12, %v8047_v13 }
 0x4a2   : > { %7630 = vmatprep.subr.msk.bf16.mxu0 %vm2146_vm2, %v10159_v9  ;;  %v2130_v9 = vld [vmem:[#allocation2 + $0x80] sm:$0xff]  ;;  %v1905_v14 = vpack.c.bf16 %v8203_v8, %v8202_v10  ;;  %v2129_v10 = vld [vmem:[#allocation2 + $0x78] sm:$0xff] }
 0x4a3   : > { %v10381_v11 = vpop.permute.xlu1 %8205  ;;  %v2694_v55 = vsel %vm2146_vm2, %v1914_v22, 0 }
 0x4a4   : > { %v2436_v32 = vsel %vm2146_vm2, %v1905_v14, 0 }
 0x4a6   : > { %7317 = vmatpush3.bf16.xpose.msra.mxu1 %v2258_v24 }
 0x4a7   : > { %7626 = vmatprep.subr.msk.bf16.mxu1 %vm2146_vm2, %v1902_v23  ;;  %v10391_v18 = vpop.permute.xlu1 %8210  ;;  %v2525_v23 = vsel %vm2146_vm2, %v10209_v57, 0 }
 0x4a8   : > { %7335 = vmatmul.mubr.msk.bf16.vlgmr.msra.gmra.mrb[24].mxu0 %vm2146_vm2, %v2123_v25  ;;  %v8108_v25 = vunpack.i.h.bf16 %v10319_v45 }
 0x4a9   : > { %7359 = vmatpush3.bf16.xpose.msra.mxu0 %v2516_v19  ;;  %7338 = vmatprep.mubr.msk.bf16.mxu0 %vm2146_vm2, %v2124_v31  ;;  %v8107_v31 = vunpack.i.l.bf16 %v10319_v45  ;;  %v2131_v19 = vld [vmem:[#allocation2 + $0x88] sm:$0xff] }
 0x4aa   : > { %7631 = vmatprep.subr.msk.bf16.mxu0 %vm2146_vm2, %v10175_v26  ;;  %v10377_v26 = vpop.permute.xlu0 %8150  ;;  %v2127_v45 = vld [vmem:[#allocation2 + $0x68] sm:$0xff] }
 0x4ab   : > { %v10401_v33 = vpop.permute.xlu1 %8215 }
 0x4ac   : > { %13025 = vst [vmem:[#allocation45_spill] sm:$0xff] %v10401_v33 }
 0x4ad   : > { %7319 = vmatmul.mubr.msk.bf16.vlgmr.msra.gmra.mrb[16].mxu1 %vm2146_vm2, %v2119_v52  ;;  %v8102_v52 = vunpack.i.l.bf16 %v10314_v42 }
 0x4ae   : > { %7343 = vmatpush3.bf16.xpose.msra.mxu1 %v2427_v59  ;;  %7322 = vmatprep.mubr.msk.bf16.mxu1 %vm2146_vm2, %v2120_v54  ;;  %v10388_v16 = vpop.permute.xlu0 %8155  ;;  %v1915_v54 = vpack.c.bf16 %v8108_v25, %v8107_v31  ;;  %v2128_v59 = vld [vmem:[#allocation2 + $0x70] sm:$0xff]  ;;  %v8053_v25 = vunpack.i.h.bf16 %v10317_v44  ;;  %v8052_v31 = vunpack.i.l.bf16 %v10317_v44 }
 0x4af   : > { %7627 = vmatprep.subr.msk.bf16.mxu1 %vm2146_vm2, %v1903_v58  ;;  %13024 = vst [vmem:[#allocation44_spill] sm:$0xff] %v10388_v16 }
 0x4b0   : > { %7339 = vmatmul.mubr.msk.bf16.gmra.mrb[28].mxu0 %vm2146_vm2, %v2125_v28  ;;  %v8221_v28 = vpop.permute.xlu1 %8220  ;;  %v1918_v44 = vpack.c.bf16 %v8053_v25, %v8052_v31 }
 0x4b1   : > { %7361 = vmatpush3.bf16.xpose.msra.mxu0 %v2519_v63  ;;  %7366 = vmatprep.mubr.msk.bf16.mxu0 %vm2146_vm2, %v2130_v9  ;;  %v2133_v63 = vld [vmem:[#allocation2 + $0x98] sm:$0xff] }
 0x4b2   : > { %7632 = vmatprep.subr.msk.bf16.mxu0 %vm2146_vm2, %v10189_v43  ;;  %v8043_v43 = vunpack.i.h.bf16 %v10307_v39  ;;  %v8161_v41 = vpop.permute.xlu0 %8160  ;;  %v2132_v39 = vld [vmem:[#allocation2 + $0x90] sm:$0xff] }
 0x4b3   : > { %v8162_v3 = vunpack.i.l.bf16 %v8161_v41 }
 0x4b4   : > { %v1910_v24 = vpack.c.bf16 %v8043_v43, %v8042_v21  ;;  %v8226_v8 = vpop.permute.xlu1 %8225  ;;  %v8223_v43 = vunpack.i.h.bf16 %v8221_v28  ;;  %v8222_v21 = vunpack.i.l.bf16 %v8221_v28  ;;  %v2140_v28 = vld [vmem:[#allocation2 + $0xd0] sm:$0xff] }
 0x4b5   : > { %7323 = vmatmul.mubr.msk.bf16.gmra.mrb[20].mxu1 %vm2146_vm2, %v2121_v1  ;;  %v2138_v1 = vld [vmem:[#allocation2 + $0xc0] sm:$0xff]  ;;  %v8228_v13 = vunpack.i.h.bf16 %v8226_v8 }
 0x4b6   : > { %7345 = vmatpush3.bf16.xpose.msra.mxu1 %v2430_v5  ;;  %7350 = vmatprep.mubr.msk.bf16.mxu1 %vm2146_vm2, %v2126_v2  ;;  %v8166_v58 = vpop.permute.xlu0 %8165  ;;  %v8163_v2 = vunpack.i.h.bf16 %v8161_v41  ;;  %v2697_v5 = vsel %vm2146_vm2, %v1915_v54, 0  ;;  %v1913_v41 = vpack.c.bf16 %v8223_v43, %v8222_v21  ;;  %v2137_v21 = vld [vmem:[#allocation2 + $0xb8] sm:$0xff] }
 0x4b7   : > { %7628 = vmatprep.subr.msk.bf16.mxu1 %vm2146_vm2, %v1904_v4  ;;  %v8168_v60 = vunpack.i.h.bf16 %v8166_v58  ;;  %v8167_v62 = vunpack.i.l.bf16 %v8166_v58 }
 0x4b8   : > { %v1912_v12 = vpack.c.bf16 %v8163_v2, %v8162_v3  ;;  %v2614_v58 = vsel %vm2146_vm2, %v1913_v41, 0 }
 0x4b9   : > { %7363 = vmatpush3.bf16.xpose.msra.mxu0 %v2522_v61  ;;  %v1916_v4 = vpack.c.bf16 %v8168_v60, %v8167_v62  ;;  %v2134_v61 = vld [vmem:[#allocation2 + $0xa0] sm:$0xff]  ;;  %v8113_v60 = vunpack.i.h.bf16 %v10323_v47  ;;  %v8112_v62 = vunpack.i.l.bf16 %v10323_v47 }
 0x4ba   : > { %7633 = vmatprep.subr.msk.bf16.mxu0 %vm2146_vm2, %v10209_v57  ;;  %v8103_v57 = vunpack.i.h.bf16 %v10314_v42  ;;  %v2605_v42 = vsel %vm2146_vm2, %v1910_v24, 0 }
 0x4bc   : > { %v1911_v9 = vpack.c.bf16 %v8103_v57, %v8102_v52 }
 0x4be   : > { %7347 = vmatpush3.bf16.xpose.msra.mxu1 %v2433_v15  ;;  %v2608_v15 = vsel %vm2146_vm2, %v1911_v9, 0 }
 0x4bf   : > { %7629 = vmatprep.subr.msk.bf16.mxu1 %vm2146_vm2, %v1905_v14  ;;  %v8227_v14 = vunpack.i.l.bf16 %v8226_v8 }
 0x4c1   : > { %7365 = vmatpush3.bf16.xpose.msra.mxu0 %v2525_v23  ;;  %v2700_v23 = vsel %vm2146_vm2, %v1916_v4, 0 }
 0x4c2   : > { %7638 = vmatprep.subr.msk.bf16.mxu0 %vm2146_vm2, %v1914_v22  ;;  %v1917_v22 = vpack.c.bf16 %v8228_v13, %v8227_v14  ;;  %v8033_v13 = vunpack.i.h.bf16 %v10292_v29  ;;  %v8032_v14 = vunpack.i.l.bf16 %v10292_v29  ;;  %v2142_v29 = vld [vmem:[#allocation2 + $0xe0] sm:$0xff] }
 0x4c6   : > { %7349 = vmatpush3.bf16.xpose.msra.mxu1 %v2436_v32  ;;  %v2703_v32 = vsel %vm2146_vm2, %v1917_v22, 0 }
 0x4c7   : > { %7634 = vmatprep.subr.msk.bf16.mxu1 %vm2146_vm2, %v1910_v24  ;;  %v2611_v24 = vsel %vm2146_vm2, %v1912_v12, 0 }
 0x4c8   : > { %7367 = vmatmul.mubr.msk.bf16.vlgmr.msra.gmra.mrb[32].mxu0 %vm2146_vm2, %v2131_v19 }
 0x4c9   : > { %7391 = vmatpush3.bf16.xpose.msra.mxu0 %v2694_v55  ;;  %7370 = vmatprep.mubr.msk.bf16.mxu0 %vm2146_vm2, %v2132_v39 }
 0x4ca   : > { %7639 = vmatprep.subr.msk.bf16.mxu0 %vm2146_vm2, %v1915_v54 }
 0x4cd   : > { %7351 = vmatmul.mubr.msk.bf16.vlgmr.msra.gmra.mrb[24].mxu1 %vm2146_vm2, %v2127_v45 }
 0x4ce   : > { %7375 = vmatpush3.bf16.xpose.msra.mxu1 %v2605_v42  ;;  %7354 = vmatprep.mubr.msk.bf16.mxu1 %vm2146_vm2, %v2128_v59  ;;  %v2139_v59 = vld [vmem:[#allocation2 + $0xc8] sm:$0xff] }
 0x4cf   : > { %7635 = vmatprep.subr.msk.bf16.mxu1 %vm2146_vm2, %v1911_v9 }
 0x4d0   : > { %7371 = vmatmul.mubr.msk.bf16.gmra.mrb[36].mxu0 %vm2146_vm2, %v2133_v63  ;;  %v2135_v63 = vld [vmem:[#allocation2 + $0xa8] sm:$0xff] }
 0x4d1   : > { %7393 = vmatpush3.bf16.xpose.msra.mxu0 %v2697_v5  ;;  %7398 = vmatprep.mubr.msk.bf16.mxu0 %vm2146_vm2, %v2138_v1  ;;  %v2136_v5 = vld [vmem:[#allocation2 + $0xb0] sm:$0xff] }
 0x4d2   : > { %7640 = vmatprep.subr.msk.bf16.mxu0 %vm2146_vm2, %v1916_v4  ;;  %v1919_v4 = vpack.c.bf16 %v8113_v60, %v8112_v62  ;;  %v2144_v60 = vld [vmem:[#allocation2 + $0xf0] sm:$0xff] }
 0x4d5   : > { %7355 = vmatmul.mubr.msk.bf16.gmra.mrb[28].mxu1 %vm2146_vm2, %v2129_v10  ;;  %v8171_v10 = vpop.permute.xlu0 %8170 }
 0x4d6   : > { %7377 = vmatpush3.bf16.xpose.msra.mxu1 %v2608_v15  ;;  %7382 = vmatprep.mubr.msk.bf16.mxu1 %vm2146_vm2, %v2134_v61  ;;  %v8173_v15 = vunpack.i.h.bf16 %v8171_v10  ;;  %v8172_v43 = vunpack.i.l.bf16 %v8171_v10 }
 0x4d7   : > { %7636 = vmatprep.subr.msk.bf16.mxu1 %vm2146_vm2, %v1912_v12  ;;  %v2141_v12 = vld [vmem:[#allocation2 + $0xd8] sm:$0xff] }
 0x4d9   : > { %7395 = vmatpush3.bf16.xpose.msra.mxu0 %v2700_v23  ;;  %v2786_v23 = vsel %vm2146_vm2, %v1919_v4, 0 }
 0x4da   : > { %7641 = vmatprep.subr.msk.bf16.mxu0 %vm2146_vm2, %v1917_v22  ;;  %v1920_v22 = vpack.c.bf16 %v8173_v15, %v8172_v43 }
 0x4de   : > { %7379 = vmatpush3.bf16.xpose.msra.mxu1 %v2611_v24  ;;  %v8231_v24 = vpop.permute.xlu1 %8230 }
 0x4df   : > { %7637 = vmatprep.subr.msk.bf16.mxu1 %vm2146_vm2, %v1913_v41  ;;  %v10482_v41 = vpack.c.bf16 %v8033_v13, %v8032_v14  ;;  %v8232_v25 = vunpack.i.l.bf16 %v8231_v24  ;;  %v10518_v13 = vld [vmem:[#allocation3 + $0x10] sm:$0xff] }
 0x4e1   : > { %v10429_v19 = vpop.f32.mrb[16].mxu0  ;;  %7397 = vmatpush3.bf16.xpose.msra.mxu0 %v2703_v32  ;;  %v2789_v32 = vsel %vm2146_vm2, %v1920_v22, 0 }
 0x4e2   : > { %v2930_v39 = vsel %vm2923_vm3, %v10429_v19, -inf  ;;  %v10433_v57 = vpop.f32.mrb[17].mxu0  ;;  %7422 = vmatprep.subr.bf16.mxu0 %v10166_v17  ;;  %v10510_v10 = vpop.permute.xlu1 %8235 }
 0x4e3   : > { %2931 = vmax.xlane.f32.xlu0 %v2930_v39  ;;  %v10436_v52 = vpop.f32.mrb[18].mxu0  ;;  %v2924_v54 = vsel %vm2923_vm3, %v10433_v57, -inf  ;;  %v8028_v39 = vunpack.i.h.bf16 %v10287_v27  ;;  %13030 = vst [vmem:[#allocation50_spill] sm:$0xff] %v10510_v10 }
 0x4e4   : > { %v10440_v55 = vpop.f32.mrb[19].mxu0  ;;  %v2933_v9 = vsel %vm2923_vm3, %v10436_v52, -inf }
 0x4e5   : > { %v2927_v45 = vsel %vm2923_vm3, %v10440_v55, -inf }
 0x4e6   : > { %7381 = vmatpush3.bf16.xpose.msra.mxu1 %v2614_v58  ;;  %2928 = vmax.xlane.f32.xlu1 %v2927_v45  ;;  %v8088_v58 = vunpack.i.h.bf16 %v10294_v30  ;;  %v8087_v45 = vunpack.i.l.bf16 %v10294_v30  ;;  %v2145_v30 = vld [vmem:[#allocation2 + $0xf8] sm:$0xff] }
 0x4e7   : > { %7642 = vmatprep.subr.msk.bf16.mxu1 %vm2146_vm2, %v1918_v44  ;;  %2925 = vmax.xlane.f32.xlu0 %v2924_v54  ;;  %v8027_v54 = vunpack.i.l.bf16 %v10287_v27  ;;  %v8208_v27 = vunpack.i.h.bf16 %v10381_v11 }
 0x4e8   : > { %7399 = vmatmul.mubr.msk.bf16.vlgmr.msra.gmra.mrb[40].mxu0 %vm2146_vm2, %v2139_v59  ;;  %v2143_v59 = vld [vmem:[#allocation2 + $0xe8] sm:$0xff]  ;;  %v2087_v62 = vpack.c.bf16 %v8088_v58, %v8087_v45 }
 0x4e9   : > { %v10451_v42 = vpop.f32.mrb[20].mxu0  ;;  %7423 = vmatpush3.bf16.msra.mxu0 %v10166_v17  ;;  %7402 = vmatprep.mubr.msk.bf16.mxu0 %vm2146_vm2, %v2140_v28  ;;  %v2783_v17 = vsel %vm2146_vm2, %v1918_v44, 0  ;;  %v2086_v44 = vpack.c.bf16 %v8028_v39, %v8027_v54  ;;  %v8148_v28 = vunpack.i.h.bf16 %v10368_v0  ;;  %v10549_v39 = vld [vmem:[#allocation3 + $0x30] sm:$0xff] }
 0x4ea   : > { %v10454_v1 = vpop.f32.mrb[21].mxu0  ;;  %v2942_v2 = vsel %vm2923_vm3, %v10451_v42, -inf  ;;  %7424 = vmatprep.subr.bf16.mxu0 %v10182_v34 }
 0x4eb   : > { %13026 = vst [vmem:[#allocation46_spill] sm:$0xff] %v10454_v1  ;;  %2934 = vmax.xlane.f32.xlu0 %v2933_v9  ;;  %v10460_v3 = vpop.f32.mrb[22].mxu0  ;;  %2943 = vmax.xlane.f32.xlu1 %v2942_v2  ;;  %v2936_v61 = vsel %vm2923_vm3, %v10454_v1, -inf  ;;  %v8147_v9 = vunpack.i.l.bf16 %v10368_v0  ;;  %v8037_v0 = vunpack.i.l.bf16 %v10302_v36 }
 0x4ec   : > { %v10462_v47 = vpop.f32.mrb[23].mxu0  ;;  %v2945_v8 = vsel %vm2923_vm3, %v10460_v3, -inf }
 0x4ed   : > { %13027 = vst [vmem:[#allocation47_spill] sm:$0xff] %v10462_v47  ;;  %7383 = vmatmul.mubr.msk.bf16.vlgmr.msra.gmra.mrb[32].mxu1 %vm2146_vm2, %v2135_v63  ;;  %7425 = vmatpush3.bf16.msra.mxu0 %v10182_v34  ;;  %v2939_v34 = vsel %vm2923_vm3, %v10462_v47, -inf  ;;  %v8207_v63 = vunpack.i.l.bf16 %v10381_v11  ;;  %v2088_v2 = vpack.c.bf16 %v8148_v28, %v8147_v9  ;;  %v9259_v11 = vmov 0   ;;  %v10567_v9 = vld [vmem:[#allocation3 + $0x20] sm:$0xff] }
 0x4ee   : > { %7407 = vmatpush3.bf16.xpose.msra.mxu1 %v2783_v17  ;;  %7426 = vmatprep.subr.bf16.mxu0 %v10274_v6  ;;  %v8038_v17 = vunpack.i.h.bf16 %v10302_v36  ;;  %v10854_v47 = vld [vmem:[#allocation3 + $0x60] sm:$0xff] }
 0x4ef   : > { %7643 = vmatprep.subr.msk.bf16.mxu1 %vm2146_vm2, %v1919_v4  ;;  %7386 = vmatprep.mubr.msk.bf16.mxu1 %vm2146_vm2, %v2136_v5  ;;  %v2089_v4 = vpack.c.bf16 %v8208_v27, %v8207_v63 }
 0x4f0   : > { %2946 = vmax.xlane.f32.xlu0 %v2945_v8  ;;  %2937 = vmax.xlane.f32.xlu1 %v2936_v61  ;;  %v10505_v5 = vpack.c.bf16 %v8038_v17, %v8037_v0  ;;  %v10508_v8 = vpop.permute.xlu0 %8175  ;;  %v10581_v17 = vld [vmem:[#allocation3 + $0x28] sm:$0xff] }
 0x4f1   : > { %7403 = vmatmul.mubr.msk.bf16.gmra.mrb[44].mxu0 %vm2146_vm2, %v2141_v12  ;;  %8249 = vset.pattern.permute.xlu1 %v9259_v11  ;;  %13029 = vst [vmem:[#allocation49_spill] sm:$0xff] %v10508_v8  ;;  %v10514_v12 = vpop.permute.xlu1 %8240 }
 0x4f2   : > { %7427 = vmatpush3.bf16.msra.mxu0 %v10274_v6  ;;  %v8233_v6 = vunpack.i.h.bf16 %v8231_v24  ;;  %13028 = vst [vmem:[#allocation48_spill] sm:$0xff] %v10505_v5  ;;  %8250 = vset.pattern.permute.xlu0 %v9259_v11  ;;  %13032 = vst [vmem:[#allocation52_spill] sm:$0xff] %v10514_v12 }
 0x4f3   : > { %7428 = vmatprep.subr.bf16.mxu0 %v10300_v35 }
 0x4f4   : > { %2940 = vmax.xlane.f32.xlu0 %v2939_v34  ;;  %v1921_v31 = vpack.c.bf16 %v8233_v6, %v8232_v25  ;;  %v10512_v61 = vpop.permute.xlu0 %8180  ;;  %v10525_v34 = vld [vmem:[#allocation3 + $0x8] sm:$0xff]  ;;  %v10539_v25 = vld [vmem:[#allocation3 + $0x18] sm:$0xff] }
 0x4f5   : > { %7387 = vmatmul.mubr.msk.bf16.gmra.mrb[36].mxu1 %vm2146_vm2, %v2137_v21  ;;  %13031 = vst [vmem:[#allocation51_spill] sm:$0xff] %v10512_v61  ;;  %v10520_v14 = vpop.permute.xlu1 %8245  ;;  %v10527_v21 = vld [vmem:[#allocation3] sm:$0xff] }
 0x4f6   : > { %7409 = vmatpush3.bf16.xpose.msra.mxu1 %v2786_v23  ;;  %7429 = vmatpush3.bf16.msra.mxu0 %v10300_v35  ;;  %v2792_v35 = vsel %vm2146_vm2, %v1921_v31, 0  ;;  %13034 = vst [vmem:[#allocation54_spill] sm:$0xff] %v10520_v14 }
 0x4f7   : > { %7644 = vmatprep.subr.msk.bf16.mxu1 %vm2146_vm2, %v1920_v22  ;;  %7454 = vmatprep.subr.bf16.mxu0 %v10482_v41 }
 0x4f8   : > { %7414 = vmatprep.mubr.msk.bf16.mxu1 %vm2146_vm2, %v2142_v29  ;;  %v10516_v36 = vpop.permute.xlu0 %8185 }
 0x4f9   : > { %13033 = vst [vmem:[#allocation53_spill] sm:$0xff] %v10516_v36 }
 0x4fe   : > { %7411 = vmatpush3.bf16.xpose.msra.mxu1 %v2789_v32 }
 0x4ff   : > { %7645 = vmatprep.subr.msk.bf16.mxu1 %vm2146_vm2, %v1921_v31 }
 0x506   : > { %7413 = vmatpush3.bf16.xpose.msra.mxu1 %v2792_v35 }
 0x507   : > { %7438 = vmatprep.subr.bf16.mxu1 %v2086_v44 }
 0x50d   : > { %7415 = vmatmul.mubr.msk.bf16.vlgmr.msra.gmra.mrb[40].mxu1 %vm2146_vm2, %v2143_v59  ;;  %v10561_v59 = vld [vmem:[#allocation3 + $0x38] sm:$0xff] }
 0x50e   : > { %7439 = vmatpush3.bf16.msra.mxu1 %v2086_v44  ;;  %7418 = vmatprep.mubr.msk.bf16.mxu1 %vm2146_vm2, %v2144_v60 }
 0x50f   : > { %7440 = vmatprep.subr.bf16.mxu1 %v2087_v62 }
 0x512   : > { %7441 = vmatpush3.bf16.msra.mxu1 %v2087_v62 }
 0x513   : > { %7442 = vmatprep.subr.bf16.mxu1 %v2088_v2 }
 0x515   : > { %7419 = vmatmul.mubr.msk.bf16.gmra.mrb[44].mxu1 %vm2146_vm2, %v2145_v30 }
 0x516   : > { %7443 = vmatpush3.bf16.msra.mxu1 %v2088_v2 }
 0x517   : > { %7444 = vmatprep.subr.bf16.mxu1 %v2089_v4 }
 0x51a   : > { %7445 = vmatpush3.bf16.msra.mxu1 %v2089_v4 }
 0x51b   : > { %7470 = vmatprep.subr.bf16.mxu1 %v10505_v5 }
 0x570   : > { %v2932_v15 = vpop.xlane.xlu0 %2931 }
 0x571   : > { %v10523_v43 = vmax.f32 %v10518_v13, %v2932_v15 }
 0x573   : > { %5559 = vst.msk [vmem:[#allocation3 + $0x10] sm:$0xff] %vm4268_vm4, %v10523_v43  ;;  %v2929_v23 = vpop.xlane.xlu1 %2928 }
 0x574   : > { %v2926_v29 = vpop.xlane.xlu0 %2925  ;;  %v10534_v24 = vmax.f32 %v10525_v34, %v2929_v23 }
 0x575   : > { %v10537_v6 = vmax.f32 %v10527_v21, %v2926_v29 }
 0x576   : > { %5558 = vst.msk [vmem:[#allocation3 + $0x8] sm:$0xff] %vm4268_vm4, %v10534_v24 }
 0x577   : > { %5557 = vst.msk [vmem:[#allocation3] sm:$0xff] %vm4268_vm4, %v10537_v6 }
 0x578   : > { %v2935_v54 = vpop.xlane.xlu0 %2934  ;;  %v2944_v44 = vpop.xlane.xlu1 %2943 }
 0x579   : > { %v10552_v35 = vmax.f32 %v10539_v25, %v2935_v54  ;;  %v10555_v58 = vmax.f32 %v10549_v39, %v2944_v44 }
 0x57b   : > { %5560 = vst.msk [vmem:[#allocation3 + $0x18] sm:$0xff] %vm4268_vm4, %v10552_v35  ;;  %v10563_v28 = vpop.f32.mrb[24].mxu0  ;;  %5563 = vst.msk [vmem:[#allocation3 + $0x30] sm:$0xff] %vm4268_vm4, %v10555_v58 }
 0x57c   : > { %13035 = vst [vmem:[#allocation55_spill] sm:$0xff] %v10563_v28  ;;  %v10569_v60 = vpop.f32.mrb[25].mxu0 }
 0x57d   : > { %13036 = vst [vmem:[#allocation56_spill] sm:$0xff] %v10569_v60  ;;  %v2947_v62 = vpop.xlane.xlu0 %2946  ;;  %v10571_v27 = vpop.f32.mrb[26].mxu0  ;;  %v2972_v12 = vsel %vm2923_vm3, %v10569_v60, -inf }
 0x57e   : > { %13037 = vst [vmem:[#allocation57_spill] sm:$0xff] %v10571_v27  ;;  %v10574_v63 = vmax.f32 %v10561_v59, %v2947_v62  ;;  %v2938_v2 = vpop.xlane.xlu1 %2937  ;;  %v10576_v30 = vpop.f32.mrb[27].mxu0 }
 0x57f   : > { %13038 = vst [vmem:[#allocation58_spill] sm:$0xff] %v10576_v30  ;;  %v10579_v4 = vmax.f32 %v10567_v9, %v2938_v2  ;;  %v2978_v2 = vsel %vm2923_vm3, %v10563_v28, -inf }
 0x580   : > { %v10583_v0 = vpop.f32.mrb[16].mxu1  ;;  %5564 = vst.msk [vmem:[#allocation3 + $0x38] sm:$0xff] %vm4268_vm4, %v10574_v63 }
 0x581   : > { %13039 = vst [vmem:[#allocation59_spill] sm:$0xff] %v10583_v0  ;;  %v10587_v11 = vpop.f32.mrb[17].mxu1  ;;  %v2954_v15 = vsel %vm2923_vm3, %v10583_v0, -inf  ;;  %5561 = vst.msk [vmem:[#allocation3 + $0x20] sm:$0xff] %vm4268_vm4, %v10579_v4  ;;  %v2941_v23 = vpop.xlane.xlu0 %2940 }
 0x582   : > { %13040 = vst [vmem:[#allocation60_spill] sm:$0xff] %v10587_v11  ;;  %v10593_v29 = vpop.f32.mrb[18].mxu1  ;;  %2955 = vmax.xlane.f32.xlu1 %v2954_v15  ;;  %v10596_v54 = vmax.f32 %v10581_v17, %v2941_v23  ;;  %v2981_v23 = vsel %vm2923_vm3, %v10571_v27, -inf }
 0x583   : > { %13041 = vst [vmem:[#allocation61_spill] sm:$0xff] %v10593_v29  ;;  %v10598_v44 = vpop.f32.mrb[19].mxu1  ;;  %v2957_v62 = vsel %vm2923_vm3, %v10593_v29, -inf  ;;  %v10604_v45 = vpop.f32.mrb[28].mxu0 }
 0x584   : > { %13042 = vst [vmem:[#allocation62_spill] sm:$0xff] %v10598_v44  ;;  %2958 = vmax.xlane.f32.xlu0 %v2957_v62  ;;  %13043 = vst [vmem:[#allocation63_spill] sm:$0xff] %v10604_v45  ;;  %v10608_v32 = vpop.f32.mrb[29].mxu0  ;;  %v2948_v62 = vsel %vm2923_vm3, %v10587_v11, -inf  ;;  %v2990_v10 = vsel %vm2923_vm3, %v10604_v45, -inf }
 0x585   : > { %5562 = vst.msk [vmem:[#allocation3 + $0x28] sm:$0xff] %vm4268_vm4, %v10596_v54  ;;  %13044 = vst [vmem:[#allocation64_spill] sm:$0xff] %v10608_v32  ;;  %v10610_v15 = vpop.f32.mrb[30].mxu0  ;;  %v2984_v61 = vsel %vm2923_vm3, %v10608_v32, -inf }
 0x586   : > { %2979 = vmax.xlane.f32.xlu1 %v2978_v2  ;;  %13045 = vst [vmem:[#allocation65_spill] sm:$0xff] %v10610_v15  ;;  %v10614_v22 = vpop.f32.mrb[31].mxu0  ;;  %v2951_v2 = vsel %vm2923_vm3, %v10598_v44, -inf }
 0x587   : > { %13046 = vst [vmem:[#allocation66_spill] sm:$0xff] %v10614_v22 }
 0x588   : > { %2982 = vmax.xlane.f32.xlu0 %v2981_v23  ;;  %v10616_v31 = vpop.f32.mrb[20].mxu1  ;;  %v2975_v23 = vsel %vm2923_vm3, %v10576_v30, -inf }
 0x589   : > { %13047 = vst [vmem:[#allocation67_spill] sm:$0xff] %v10616_v31  ;;  %v10620_v14 = vpop.f32.mrb[21].mxu1  ;;  %v2966_v50 = vsel %vm2923_vm3, %v10616_v31, -inf }
 0x58a   : > { %13048 = vst [vmem:[#allocation68_spill] sm:$0xff] %v10620_v14  ;;  %2949 = vmax.xlane.f32.xlu1 %v2948_v62  ;;  %v10622_v36 = vpop.f32.mrb[22].mxu1 }
 0x58b   : > { %13049 = vst [vmem:[#allocation69_spill] sm:$0xff] %v10622_v36  ;;  %v10626_v53 = vpop.f32.mrb[23].mxu1  ;;  %v2969_v62 = vsel %vm2923_vm3, %v10622_v36, -inf }
 0x58c   : > { %13050 = vst [vmem:[#allocation70_spill] sm:$0xff] %v10626_v53  ;;  %2952 = vmax.xlane.f32.xlu0 %v2951_v2  ;;  %v2993_v2 = vsel %vm2923_vm3, %v10610_v15, -inf }
 0x58e   : > { %2973 = vmax.xlane.f32.xlu1 %v2972_v12  ;;  %v2960_v12 = vsel %vm2923_vm3, %v10620_v14, -inf }
 0x590   : > { %2976 = vmax.xlane.f32.xlu0 %v2975_v23  ;;  %v2963_v23 = vsel %vm2923_vm3, %v10626_v53, -inf }
 0x592   : > { %2967 = vmax.xlane.f32.xlu1 %v2966_v50 }
 0x594   : > { %2970 = vmax.xlane.f32.xlu0 %v2969_v62  ;;  %v2987_v62 = vsel %vm2923_vm3, %v10614_v22, -inf }
 0x596   : > { %2991 = vmax.xlane.f32.xlu1 %v2990_v10 }
 0x598   : > { %2994 = vmax.xlane.f32.xlu0 %v2993_v2 }
 0x59a   : > { %2961 = vmax.xlane.f32.xlu1 %v2960_v12 }
 0x59b   : > { %v10644_v50 = vpop.f32.mrb[32].mxu0 }
 0x59c   : > { %2964 = vmax.xlane.f32.xlu0 %v2963_v23  ;;  %13051 = vst [vmem:[#allocation71_spill] sm:$0xff] %v10644_v50  ;;  %v10648_v8 = vpop.f32.mrb[33].mxu0 }
 0x59d   : > { %13052 = vst [vmem:[#allocation72_spill] sm:$0xff] %v10648_v8  ;;  %v10650_v10 = vpop.f32.mrb[34].mxu0 }
 0x59e   : > { %2985 = vmax.xlane.f32.xlu1 %v2984_v61  ;;  %13053 = vst [vmem:[#allocation73_spill] sm:$0xff] %v10650_v10  ;;  %v10654_v2 = vpop.f32.mrb[35].mxu0  ;;  %v3029_v29 = vsel %vm2923_vm3, %v10650_v10, -inf }
 0x59f   : > { %13054 = vst [vmem:[#allocation74_spill] sm:$0xff] %v10654_v2 }
 0x5a0   : > { %2988 = vmax.xlane.f32.xlu0 %v2987_v62  ;;  %v10656_v12 = vpop.f32.mrb[24].mxu1 }
 0x5a1   : > { %13055 = vst [vmem:[#allocation75_spill] sm:$0xff] %v10656_v12  ;;  %v10658_v51 = vpop.f32.mrb[25].mxu1  ;;  %v3002_v11 = vsel %vm2923_vm3, %v10656_v12, -inf }
 0x5a2   : > { %13056 = vst [vmem:[#allocation76_spill] sm:$0xff] %v10658_v51  ;;  %v10660_v23 = vpop.f32.mrb[26].mxu1 }
 0x5a3   : > { %13057 = vst [vmem:[#allocation77_spill] sm:$0xff] %v10660_v23  ;;  %v10662_v49 = vpop.f32.mrb[27].mxu1  ;;  %v10664_v56 = vpop.f32.mrb[36].mxu0  ;;  %v3005_v0 = vsel %vm2923_vm3, %v10660_v23, -inf  ;;  %v3023_v23 = vsel %vm2923_vm3, %v10654_v2, -inf }
 0x5a4   : > { %13058 = vst [vmem:[#allocation78_spill] sm:$0xff] %v10662_v49  ;;  %13059 = vst [vmem:[#allocation79_spill] sm:$0xff] %v10664_v56  ;;  %v10666_v48 = vpop.f32.mrb[37].mxu0 }
 0x5a5   : > { %13060 = vst [vmem:[#allocation80_spill] sm:$0xff] %v10666_v48  ;;  %v10668_v61 = vpop.f32.mrb[38].mxu0 }
 0x5a6   : > { %13061 = vst [vmem:[#allocation81_spill] sm:$0xff] %v10668_v61  ;;  %v10670_v7 = vpop.f32.mrb[39].mxu0 }
 0x5a7   : > { %13062 = vst [vmem:[#allocation82_spill] sm:$0xff] %v10670_v7 }
 0x5a8   : > { %v10672_v46 = vpop.f32.mrb[28].mxu1 }
 0x5a9   : > { %13063 = vst [vmem:[#allocation83_spill] sm:$0xff] %v10672_v46  ;;  %v10674_v37 = vpop.f32.mrb[29].mxu1 }
 0x5aa   : > { %13064 = vst [vmem:[#allocation84_spill] sm:$0xff] %v10674_v37  ;;  %v10676_v62 = vpop.f32.mrb[30].mxu1 }
 0x5ab   : > { %13065 = vst [vmem:[#allocation85_spill] sm:$0xff] %v10676_v62  ;;  %v10678_v33 = vpop.f32.mrb[31].mxu1 }
 0x5ac   : > { %13066 = vst [vmem:[#allocation86_spill] sm:$0xff] %v10678_v33 }
 0x5af   : > { %3384 = vperm.xlu1 %8249, %v10523_v43  }
 0x5b3   : > { %3374 = vperm.xlu1 %8249, %v10537_v6  }
 0x5b6   : > { %3379 = vperm.xlu0 %8250, %v10534_v24  }
 0x5b7   : > { %3389 = vperm.xlu1 %8249, %v10552_v35  }
 0x5bb   : > { %v10684_v22 = vpop.f32.mrb[40].mxu0 }
 0x5bc   : > { %13067 = vst [vmem:[#allocation87_spill] sm:$0xff] %v10684_v22  ;;  %v10686_v5 = vpop.f32.mrb[41].mxu0 }
 0x5bd   : > { %13068 = vst [vmem:[#allocation88_spill] sm:$0xff] %v10686_v5  ;;  %v10688_v45 = vpop.f32.mrb[42].mxu0 }
 0x5be   : > { %13069 = vst [vmem:[#allocation89_spill] sm:$0xff] %v10688_v45  ;;  %v10690_v16 = vpop.f32.mrb[43].mxu0 }
 0x5bf   : > { %13070 = vst [vmem:[#allocation90_spill] sm:$0xff] %v10690_v16 }
 0x5c0   : > { %v10692_v53 = vpop.f32.mrb[32].mxu1 }
 0x5c1   : > { %13071 = vst [vmem:[#allocation91_spill] sm:$0xff] %v10692_v53  ;;  %v10694_v15 = vpop.f32.mrb[33].mxu1 }
 0x5c2   : > { %13072 = vst [vmem:[#allocation92_spill] sm:$0xff] %v10694_v15  ;;  %v10696_v32 = vpop.f32.mrb[34].mxu1 }
 0x5c3   : > { %13073 = vst [vmem:[#allocation93_spill] sm:$0xff] %v10696_v32  ;;  %v10698_v31 = vpop.f32.mrb[35].mxu1 }
 0x5c4   : > { %13074 = vst [vmem:[#allocation94_spill] sm:$0xff] %v10698_v31  ;;  %v10700_v40 = vpop.f32.mrb[44].mxu0 }
 0x5c5   : > { %13075 = vst [vmem:[#allocation95_spill] sm:$0xff] %v10700_v40  ;;  %v10702_v36 = vpop.f32.mrb[45].mxu0  ;;  %v10863_v40 = vld [vmem:[#allocation3 + $0x68] sm:$0xff] }
 0x5c6   : > { %13076 = vst [vmem:[#allocation96_spill] sm:$0xff] %v10702_v36  ;;  %v10704_v14 = vpop.f32.mrb[46].mxu0  ;;  %v2999_v36 = vsel %vm2923_vm3, %v10662_v49, -inf  ;;  %13107 = vst [vmem:[#allocation126_spill] sm:$0xff] %v10863_v40 }
 0x5c7   : > { %13077 = vst [vmem:[#allocation97_spill] sm:$0xff] %v10704_v14  ;;  %v10706_v30 = vpop.f32.mrb[47].mxu0 }
 0x5c8   : > { %13078 = vst [vmem:[#allocation98_spill] sm:$0xff] %v10706_v30  ;;  %v10708_v28 = vpop.f32.mrb[36].mxu1 }
 0x5c9   : > { %13079 = vst [vmem:[#allocation99_spill] sm:$0xff] %v10708_v28  ;;  %v10710_v44 = vpop.f32.mrb[37].mxu1  ;;  %v3053_v28 = vsel %vm2923_vm3, %v10696_v32, -inf }
 0x5ca   : > { %13080 = vst [vmem:[#allocation100_spill] sm:$0xff] %v10710_v44  ;;  %v10712_v27 = vpop.f32.mrb[38].mxu1  ;;  %v3026_v44 = vsel %vm2923_vm3, %v10644_v50, -inf }
 0x5cb   : > { %13081 = vst [vmem:[#allocation101_spill] sm:$0xff] %v10712_v27  ;;  %v10714_v60 = vpop.f32.mrb[39].mxu1 }
 0x5cc   : > { %13082 = vst [vmem:[#allocation102_spill] sm:$0xff] %v10714_v60 }
 0x5d5   : > { %3006 = vmax.xlane.f32.xlu0 %v3005_v0 }
 0x5d9   : > { %3030 = vmax.xlane.f32.xlu0 %v3029_v29  ;;  %v2996_v29 = vsel %vm2923_vm3, %v10658_v51, -inf }
 0x5db   : > { %3003 = vmax.xlane.f32.xlu1 %v3002_v11  ;;  %v3017_v11 = vsel %vm2923_vm3, %v10676_v62, -inf  ;;  %v3011_v62 = vsel %vm2923_vm3, %v10678_v33, -inf }
 0x5dd   : > { %3000 = vmax.xlane.f32.xlu0 %v2999_v36  ;;  %v3020_v36 = vsel %vm2923_vm3, %v10648_v8, -inf  ;;  %v3184_v8 = vsub.f32 %v10567_v9, %v10579_v4 }
 0x5df   : > { %3027 = vmax.xlane.f32.xlu1 %v3026_v44  ;;  %v3041_v44 = vsel %vm2923_vm3, %v10668_v61, -inf }
 0x5e0   : > { %v10728_v0 = vpop.f32.mrb[40].mxu1 }
 0x5e1   : > { %13083 = vst [vmem:[#allocation103_spill] sm:$0xff] %v10728_v0  ;;  %3024 = vmax.xlane.f32.xlu0 %v3023_v23  ;;  %v10730_v10 = vpop.f32.mrb[41].mxu1  ;;  %v10847_v0 = vld [vmem:[#allocation3 + $0xb8] sm:$0xff] }
 0x5e2   : > { %13084 = vst [vmem:[#allocation104_spill] sm:$0xff] %v10730_v10  ;;  %v10736_v49 = vpop.f32.mrb[42].mxu1  ;;  %v3014_v10 = vsel %vm2923_vm3, %v10672_v46, -inf  ;;  %13105 = vst [vmem:[#allocation124_spill] sm:$0xff] %v10847_v0  ;;  %v3038_v46 = vsel %vm2923_vm3, %v10664_v56, -inf }
 0x5e3   : > { %13085 = vst [vmem:[#allocation105_spill] sm:$0xff] %v10736_v49  ;;  %2997 = vmax.xlane.f32.xlu1 %v2996_v29  ;;  %v10738_v50 = vpop.f32.mrb[43].mxu1 }
 0x5e4   : > { %13086 = vst [vmem:[#allocation106_spill] sm:$0xff] %v10738_v50 }
 0x5e5   : > { %3018 = vmax.xlane.f32.xlu0 %v3017_v11  ;;  %v3035_v11 = vsel %vm2923_vm3, %v10670_v7, -inf  ;;  %v10796_v7 = vld [vmem:[#allocation3 + $0x40] sm:$0xff] }
 0x5e7   : > { %3021 = vmax.xlane.f32.xlu1 %v3020_v36  ;;  %v13091_v36 = vsub.f32 %v10525_v34, %v10534_v24  ;;  %v10772_v24 = vld [vmem:[#allocation3 + $0x50] sm:$0xff] }
 0x5e8   : > { %v10744_v23 = vpop.f32.mrb[44].mxu1 }
 0x5e9   : > { %13087 = vst [vmem:[#allocation107_spill] sm:$0xff] %v10744_v23  ;;  %3042 = vmax.xlane.f32.xlu0 %v3041_v44  ;;  %v10746_v2 = vpop.f32.mrb[45].mxu1  ;;  %v3246_v61 = vmul.f32 1.442695, %v13091_v36  ;;  %v3186_v44 = vsub.f32 %v10549_v39, %v10555_v58  ;;  %v10838_v23 = vld [vmem:[#allocation3 + $0xb0] sm:$0xff] }
 0x5ea   : > { %13088 = vst [vmem:[#allocation108_spill] sm:$0xff] %v10746_v2  ;;  %v10750_v12 = vpop.f32.mrb[46].mxu1 }
 0x5eb   : > { %13089 = vst [vmem:[#allocation109_spill] sm:$0xff] %v10750_v12  ;;  %v10752_v29 = vpop.f32.mrb[47].mxu1  ;;  %8359 = vpow2.f32 %v3246_v61  ;;  %v3256_v33 = vmul.f32 1.442695, %v3186_v44  ;;  %v10789_v44 = vld [vmem:[#allocation3 + $0x98] sm:$0xff] }
 0x5ec   : > { %13090 = vst [vmem:[#allocation110_spill] sm:$0xff] %v10752_v29  ;;  %13097 = vst [vmem:[#allocation116_spill] sm:$0xff] %v10789_v44 }
 0x5ed   : > { %3012 = vmax.xlane.f32.xlu0 %v3011_v62  ;;  %8361 = vpow2.f32 %v3256_v33  ;;  %v3252_v62 = vmul.f32 1.442695, %v3184_v8  ;;  %v10777_v33 = vld [vmem:[#allocation3 + $0x58] sm:$0xff] }
 0x5ee   : > { %13095 = vst [vmem:[#allocation114_spill] sm:$0xff] %v10777_v33 }
 0x5ef   : > { %8363 = vpow2.f32 %v3252_v62 }
 0x5f1   : > { %3036 = vmax.xlane.f32.xlu0 %v3035_v11 }
 0x5f5   : > { %v10766_v11 = vpop.eup %8359 }
 0x5f6   : > { %13092 = vst [vmem:[#allocation111_spill] sm:$0xff] %v10766_v11 }
 0x5f7   : > { %v10769_v34 = vpop.eup %8361 }
 0x5f8   : > { %3404 = vperm.xlu1 %8249, %v10555_v58   ;;  %13093 = vst [vmem:[#allocation112_spill] sm:$0xff] %v10769_v34 }
 0x5f9   : > { %v10774_v39 = vpop.eup %8363 }
 0x5fa   : > { %13094 = vst [vmem:[#allocation113_spill] sm:$0xff] %v10774_v39 }
 0x5fc   : > { %3394 = vperm.xlu1 %8249, %v10579_v4   ;;  %v10782_v4 = vld [vmem:[#allocation3 + $0x90] sm:$0xff] }
 0x600   : > { %3409 = vperm.xlu1 %8249, %v10574_v63  }
 0x607   : > { %4404 = vperm.xlu0 %8250, %v10766_v11   ;;  %v10810_v11 = vld [vmem:[#allocation3 + $0x80] sm:$0xff] }
 0x60b   : > { %4429 = vperm.xlu0 %8250, %v10769_v34   ;;  %v10803_v34 = vld [vmem:[#allocation3 + $0x48] sm:$0xff] }
 0x60c   : > { %13099 = vst [vmem:[#allocation118_spill] sm:$0xff] %v10803_v34 }
 0x60f   : > { %v2956_v58 = vpop.xlane.xlu1 %2955  ;;  %4419 = vperm.xlu0 %8250, %v10774_v39  }
 0x610   : > { %v10780_v8 = vmax.f32 %v10772_v24, %v2956_v58 }
 0x611   : > { %v2959_v9 = vpop.xlane.xlu0 %2958 }
 0x612   : > { %5567 = vst.msk [vmem:[#allocation3 + $0x50] sm:$0xff] %vm4268_vm4, %v10780_v8  ;;  %v10787_v61 = vmax.f32 %v10777_v33, %v2959_v9 }
 0x613   : > { %v2980_v36 = vpop.xlane.xlu1 %2979 }
 0x614   : > { %13096 = vst [vmem:[#allocation115_spill] sm:$0xff] %v10787_v61  ;;  %5568 = vst.msk [vmem:[#allocation3 + $0x58] sm:$0xff] %vm4268_vm4, %v10787_v61  ;;  %v10794_v62 = vmax.f32 %v10782_v4, %v2980_v36  ;;  %v10824_v61 = vld [vmem:[#allocation3 + $0x70] sm:$0xff] }
 0x615   : > { %v2983_v58 = vpop.xlane.xlu0 %2982 }
 0x616   : > { %5575 = vst.msk [vmem:[#allocation3 + $0x90] sm:$0xff] %vm4268_vm4, %v10794_v62  ;;  %v10801_v39 = vmax.f32 %v10789_v44, %v2983_v58  ;;  %v10817_v44 = vld [vmem:[#allocation3 + $0x88] sm:$0xff] }
 0x617   : > { %v2950_v9 = vpop.xlane.xlu1 %2949  ;;  %13101 = vst [vmem:[#allocation120_spill] sm:$0xff] %v10817_v44 }
 0x618   : > { %13098 = vst [vmem:[#allocation117_spill] sm:$0xff] %v10801_v39  ;;  %5576 = vst.msk [vmem:[#allocation3 + $0x98] sm:$0xff] %vm4268_vm4, %v10801_v39  ;;  %v10808_v51 = vmax.f32 %v10796_v7, %v2950_v9 }
 0x619   : > { %v2953_v36 = vpop.xlane.xlu0 %2952 }
 0x61a   : > { %5565 = vst.msk [vmem:[#allocation3 + $0x40] sm:$0xff] %vm4268_vm4, %v10808_v51  ;;  %v10815_v33 = vmax.f32 %v10803_v34, %v2953_v36  ;;  %v10831_v34 = vld [vmem:[#allocation3 + $0x78] sm:$0xff] }
 0x61b   : > { %v2974_v58 = vpop.xlane.xlu1 %2973  ;;  %13103 = vst [vmem:[#allocation122_spill] sm:$0xff] %v10831_v34 }
 0x61c   : > { %13100 = vst [vmem:[#allocation119_spill] sm:$0xff] %v10815_v33  ;;  %5566 = vst.msk [vmem:[#allocation3 + $0x48] sm:$0xff] %vm4268_vm4, %v10815_v33  ;;  %v10822_v39 = vmax.f32 %v10810_v11, %v2974_v58 }
 0x61d   : > { %v2977_v9 = vpop.xlane.xlu0 %2976 }
 0x61e   : > { %5573 = vst.msk [vmem:[#allocation3 + $0x80] sm:$0xff] %vm4268_vm4, %v10822_v39  ;;  %v10829_v2 = vmax.f32 %v10817_v44, %v2977_v9 }
 0x61f   : > { %v2968_v36 = vpop.xlane.xlu1 %2967 }
 0x620   : > { %13102 = vst [vmem:[#allocation121_spill] sm:$0xff] %v10829_v2  ;;  %5574 = vst.msk [vmem:[#allocation3 + $0x88] sm:$0xff] %vm4268_vm4, %v10829_v2  ;;  %v10836_v33 = vmax.f32 %v10824_v61, %v2968_v36 }
 0x621   : > { %v2971_v58 = vpop.xlane.xlu0 %2970 }
 0x622   : > { %5571 = vst.msk [vmem:[#allocation3 + $0x70] sm:$0xff] %vm4268_vm4, %v10836_v33  ;;  %v10845_v9 = vmax.f32 %v10831_v34, %v2971_v58 }
 0x623   : > { %v2992_v44 = vpop.xlane.xlu1 %2991 }
 0x624   : > { %13104 = vst [vmem:[#allocation123_spill] sm:$0xff] %v10845_v9  ;;  %5572 = vst.msk [vmem:[#allocation3 + $0x78] sm:$0xff] %vm4268_vm4, %v10845_v9  ;;  %v10852_v36 = vmax.f32 %v10838_v23, %v2992_v44  ;;  %3015 = vmax.xlane.f32.xlu1 %v3014_v10  ;;  %v10870_v9 = vld [vmem:[#allocation3 + $0xa0] sm:$0xff] }
 0x625   : > { %v2995_v2 = vpop.xlane.xlu0 %2994 }
 0x626   : > { %5579 = vst.msk [vmem:[#allocation3 + $0xb0] sm:$0xff] %vm4268_vm4, %v10852_v36  ;;  %v10861_v58 = vmax.f32 %v10847_v0, %v2995_v2  ;;  %v10877_v0 = vld [vmem:[#allocation3 + $0xa8] sm:$0xff] }
 0x627   : > { %v2962_v34 = vpop.xlane.xlu1 %2961  ;;  %13109 = vst [vmem:[#allocation128_spill] sm:$0xff] %v10877_v0 }
 0x628   : > { %13106 = vst [vmem:[#allocation125_spill] sm:$0xff] %v10861_v58  ;;  %5580 = vst.msk [vmem:[#allocation3 + $0xb8] sm:$0xff] %vm4268_vm4, %v10861_v58  ;;  %v10868_v10 = vmax.f32 %v10854_v47, %v2962_v34  ;;  %3039 = vmax.xlane.f32.xlu1 %v3038_v46 }
 0x629   : > { %v2965_v44 = vpop.xlane.xlu0 %2964 }
 0x62a   : > { %5569 = vst.msk [vmem:[#allocation3 + $0x60] sm:$0xff] %vm4268_vm4, %v10868_v10  ;;  %v10875_v56 = vmax.f32 %v10863_v40, %v2965_v44  ;;  %v3077_v40 = vsel %vm2923_vm3, %v10688_v45, -inf  ;;  %v3071_v45 = vsel %vm2923_vm3, %v10690_v16, -inf }
 0x62b   : > { %v2986_v2 = vpop.xlane.xlu1 %2985 }
 0x62c   : > { %13108 = vst [vmem:[#allocation127_spill] sm:$0xff] %v10875_v56  ;;  %5570 = vst.msk [vmem:[#allocation3 + $0x68] sm:$0xff] %vm4268_vm4, %v10875_v56  ;;  %v10884_v46 = vmax.f32 %v10870_v9, %v2986_v2  ;;  %v3047_v56 = vsel %vm2923_vm3, %v10698_v31, -inf  ;;  %v11157_v31 = vld [vmem:[#allocation3 + $0x198] sm:$0xff] }
 0x62d   : > { %v2989_v34 = vpop.xlane.xlu0 %2988  ;;  %13143 = vst [vmem:[#allocation150_spill] sm:$0xff] %v11157_v31 }
 0x62e   : > { %5577 = vst.msk [vmem:[#allocation3 + $0xa0] sm:$0xff] %vm4268_vm4, %v10884_v46  ;;  %v10889_v58 = vmax.f32 %v10877_v0, %v2989_v34  ;;  %3054 = vmax.xlane.f32.xlu0 %v3053_v28 }
 0x62f   : > { %v3385_v44 = vpop.permute.xlu1 %3384 }
 0x630   : > { %13110 = vst [vmem:[#allocation129_spill] sm:$0xff] %v10889_v58  ;;  %5578 = vst.msk [vmem:[#allocation3 + $0xa8] sm:$0xff] %vm4268_vm4, %v10889_v58  ;;  %v3694_v32 = vsub.f32 %v10429_v19, %v3385_v44  ;;  %v3083_v44 = vsel %vm2923_vm3, %v10706_v30, -inf  ;;  %v11054_v30 = vld [vmem:[#allocation3 + $0x128] sm:$0xff] }
 0x631   : > { %13123 = vst [vmem:[#allocation139_spill] sm:$0xff] %v11054_v30 }
 0x632   : > { %3078 = vmax.xlane.f32.xlu0 %v3077_v40  ;;  %v3760_v0 = vmul.f32 1.442695, %v3694_v32  ;;  %v8093_v32 = vunpack.i.h.bf16 %v10304_v38 }
 0x633   : > { %v3375_v2 = vpop.permute.xlu1 %3374 }
 0x634   : > { %v3692_v1 = vsub.f32 %v10433_v57, %v3375_v2  ;;  %v3065_v57 = vsel %vm2923_vm3, %v10712_v27, -inf  ;;  %v8153_v2 = vunpack.i.h.bf16 %v10377_v26 }
 0x635   : > { %v3380_v5 = vpop.permute.xlu0 %3379 }
 0x636   : > { %v3756_v34 = vmul.f32 1.442695, %v3692_v1  ;;  %v3693_v28 = vsub.f32 %v10440_v55, %v3380_v5  ;;  %3048 = vmax.xlane.f32.xlu0 %v3047_v56  ;;  %v3089_v56 = vsel %vm2923_vm3, %v10704_v14, -inf }
 0x637   : > { %v3390_v15 = vpop.permute.xlu1 %3389 }
 0x638   : > { %v3758_v58 = vmul.f32 1.442695, %v3693_v28  ;;  %v3695_v40 = vsub.f32 %v10436_v52, %v3390_v15  ;;  %8365 = vpow2.f32 %v3756_v34  ;;  %v3059_v52 = vsel %vm2923_vm3, %v10714_v60, -inf }
 0x639   : > { %3399 = vperm.xlu1 %8249, %v10596_v54   ;;  %v8152_v34 = vunpack.i.l.bf16 %v10377_v26  ;;  %v3101_v28 = vsel %vm2923_vm3, %v10736_v49, -inf  ;;  %v3095_v26 = vsel %vm2923_vm3, %v10738_v50, -inf }
 0x63a   : > { %8367 = vpow2.f32 %v3758_v58  ;;  %v3762_v19 = vmul.f32 1.442695, %v3695_v40  ;;  %3072 = vmax.xlane.f32.xlu0 %v3071_v45  ;;  %v8092_v45 = vunpack.i.l.bf16 %v10304_v38  ;;  %v8213_v40 = vunpack.i.h.bf16 %v10391_v18 }
 0x63b   : > { %8369 = vpow2.f32 %v3760_v0 }
 0x63c   : > { %8371 = vpow2.f32 %v3762_v19  ;;  %v2091_v38 = vpack.c.bf16 %v8093_v32, %v8092_v45  ;;  %v8212_v19 = vunpack.i.l.bf16 %v10391_v18  ;;  %v3107_v18 = vsel %vm2923_vm3, %v10752_v29, -inf  ;;  %v10946_v45 = vld [vmem:[#allocation3 + $0xd8] sm:$0xff] }
 0x63d   : > { %v3032_v32 = vsel %vm2923_vm3, %v10666_v48, -inf  ;;  %13111 = vst [vmem:[#allocation130_spill] sm:$0xff] %v10946_v45  ;;  %v3190_v29 = vsub.f32 %v10772_v24, %v10780_v8  ;;  %v11219_v48 = vld [vmem:[#allocation3 + $0x168] sm:$0xff] }
 0x63e   : > { %3066 = vmax.xlane.f32.xlu0 %v3065_v57  ;;  %v2092_v57 = vpack.c.bf16 %v8153_v2, %v8152_v34  ;;  %v10954_v34 = vld [vmem:[#allocation3 + $0x118] sm:$0xff]  ;;  %13159 = vst [vmem:[#allocation160_spill] sm:$0xff] %v11219_v48 }
 0x63f   : > { %13114 = vst [vmem:[#allocation132_spill] sm:$0xff] %v10954_v34 }
 0x642   : > { %3090 = vmax.xlane.f32.xlu0 %v3089_v56  ;;  %v10908_v55 = vpop.eup %8365  ;;  %v2093_v56 = vpack.c.bf16 %v8213_v40, %v8212_v19  ;;  %v13115_v40 = vsub.f32 %v10527_v21, %v10537_v6  ;;  %v13117_v21 = vsub.f32 %v10539_v25, %v10552_v35  ;;  %v10992_v35 = vld [vmem:[#allocation3 + $0xc0] sm:$0xff] }
 0x644   : > { %v10912_v1 = vpop.eup %8367  ;;  %v3244_v19 = vmul.f32 1.442695, %v13115_v40  ;;  %v3250_v6 = vmul.f32 1.442695, %v13117_v21  ;;  %v11002_v40 = vld [vmem:[#allocation3 + $0xf8] sm:$0xff] }
 0x645   : > { %v10914_v5 = vpop.eup %8369  ;;  %v4781_v15 = vpack.c.bf16 %v10912_v1, %v10908_v55  ;;  %13120 = vst [vmem:[#allocation136_spill] sm:$0xff] %v11002_v40 }
 0x646   : > { %v10920_v0 = vpop.eup %8371  ;;  %3060 = vmax.xlane.f32.xlu0 %v3059_v52  ;;  %v3008_v52 = vsel %vm2923_vm3, %v10674_v37, -inf  ;;  %v11226_v37 = vld [vmem:[#allocation3 + $0x1a8] sm:$0xff] }
 0x647   : > { %v4782_v58 = vpack.c.bf16 %v10920_v0, %v10914_v5  ;;  %7430 = vmatprep.mubr.msk.bf16.mxu0 %vm2923_vm3, %v4781_v15  ;;  %13161 = vst [vmem:[#allocation162_spill] sm:$0xff] %v11226_v37 }
 0x649   : > { %7431 = vmatmul.mubr.msk.bf16.vlgmr.msra.gmra.mrb[48].mxu0 %vm2923_vm3, %v4782_v58  ;;  %v13112_v58 = vsub.f32 %v10518_v13, %v10523_v43  ;;  %v10966_v43 = vld [vmem:[#allocation3 + $0xc8] sm:$0xff] }
 0x64a   : > { %7455 = vmatpush3.bf16.msra.mxu0 %v10482_v41  ;;  %3084 = vmax.xlane.f32.xlu0 %v3083_v44  ;;  %v3113_v41 = vsel %vm2923_vm3, %v10750_v12, -inf }
 0x64b   : > { %7456 = vmatprep.subr.bf16.mxu0 %v2091_v38  ;;  %v3248_v44 = vmul.f32 1.442695, %v13112_v58 }
 0x64d   : > { %8373 = vpow2.f32 %v3248_v44 }
 0x64e   : > { %7457 = vmatpush3.bf16.msra.mxu0 %v2091_v38  ;;  %3102 = vmax.xlane.f32.xlu0 %v3101_v28  ;;  %v10958_v28 = vld [vmem:[#allocation3 + $0xd0] sm:$0xff]  ;;  %8375 = vpow2.f32 %v3244_v19 }
 0x64f   : > { %7458 = vmatprep.subr.bf16.mxu0 %v2092_v57  ;;  %8377 = vpow2.f32 %v3250_v6 }
 0x652   : > { %7459 = vmatpush3.bf16.msra.mxu0 %v2092_v57  ;;  %3096 = vmax.xlane.f32.xlu0 %v3095_v26 }
 0x653   : > { %7460 = vmatprep.subr.bf16.mxu0 %v2093_v56 }
 0x656   : > { %7461 = vmatpush3.bf16.msra.mxu0 %v2093_v56  ;;  %3114 = vmax.xlane.f32.xlu0 %v3113_v41  ;;  %v10973_v41 = vld [vmem:[#allocation3 + $0x110] sm:$0xff] }
 0x657   : > { %7486 = vmatprep.subr.bf16.mxu0 %v10170_v20  ;;  %v11004_v19 = vpop.eup %8373 }
 0x65a   : > { %3108 = vmax.xlane.f32.xlu0 %v3107_v18  ;;  %v3187_v18 = vsub.f32 %v10561_v59, %v10574_v63  ;;  %v3185_v63 = vsub.f32 %v10581_v17, %v10596_v54  ;;  %v11012_v17 = vld [vmem:[#allocation3 + $0x100] sm:$0xff] }
 0x65c   : > { %v3258_v59 = vmul.f32 1.442695, %v3187_v18  ;;  %v11020_v18 = vld [vmem:[#allocation3 + $0x138] sm:$0xff] }
 0x65d   : > { %3009 = vmax.xlane.f32.xlu1 %v3008_v52  ;;  %13121 = vst [vmem:[#allocation137_spill] sm:$0xff] %v11020_v18 }
 0x65e   : > { %8379 = vpow2.f32 %v3258_v59 }
 0x661   : > { %3033 = vmax.xlane.f32.xlu1 %v3032_v32 }
 0x662   : > { %v3007_v15 = vpop.xlane.xlu0 %3006 }
 0x663   : > { %v10952_v2 = vmax.f32 %v10946_v45, %v3007_v15  ;;  %v10985_v15 = vld [vmem:[#allocation3 + $0x108] sm:$0xff]  ;;  %v13182_v45 = vld [vmem:[#allocation129_spill] sm:$0xff] }
 0x664   : > { %13118 = vst [vmem:[#allocation134_spill] sm:$0xff] %v10985_v15 }
 0x665   : > { %13113 = vst [vmem:[#allocation131_spill] sm:$0xff] %v10952_v2  ;;  %5584 = vst.msk [vmem:[#allocation3 + $0xd8] sm:$0xff] %vm4268_vm4, %v10952_v2 }
 0x666   : > { %v3031_v38 = vpop.xlane.xlu0 %3030 }
 0x667   : > { %v10964_v57 = vmax.f32 %v10954_v34, %v3031_v38 }
 0x668   : > { %v3004_v13 = vpop.xlane.xlu1 %3003 }
 0x669   : > { %13116 = vst [vmem:[#allocation133_spill] sm:$0xff] %v10964_v57  ;;  %5592 = vst.msk [vmem:[#allocation3 + $0x118] sm:$0xff] %vm4268_vm4, %v10964_v57  ;;  %v10971_v26 = vmax.f32 %v10958_v28, %v3004_v13 }
 0x66a   : > { %v3001_v56 = vpop.xlane.xlu0 %3000 }
 0x66b   : > { %5583 = vst.msk [vmem:[#allocation3 + $0xd0] sm:$0xff] %vm4268_vm4, %v10971_v26  ;;  %v10983_v52 = vmax.f32 %v10966_v43, %v3001_v56  ;;  %v3254_v56 = vmul.f32 1.442695, %v3185_v63 }
 0x66c   : > { %v3028_v32 = vpop.xlane.xlu1 %3027 }
 0x66d   : > { %5582 = vst.msk [vmem:[#allocation3 + $0xc8] sm:$0xff] %vm4268_vm4, %v10983_v52  ;;  %v10990_v58 = vmax.f32 %v10973_v41, %v3028_v32  ;;  %v11022_v32 = vpop.eup %8375  ;;  %8381 = vpow2.f32 %v3254_v56 }
 0x66e   : > { %v3025_v25 = vpop.xlane.xlu0 %3024 }
 0x66f   : > { %5591 = vst.msk [vmem:[#allocation3 + $0x110] sm:$0xff] %vm4268_vm4, %v10990_v58  ;;  %v10999_v44 = vmax.f32 %v10985_v15, %v3025_v25 }
 0x670   : > { %v2998_v38 = vpop.xlane.xlu1 %2997  ;;  %3424 = vperm.xlu0 %8250, %v10780_v8   ;;  %v3264_v8 = vmul.f32 1.442695, %v3190_v29  ;;  %v3188_v29 = vsub.f32 %v10796_v7, %v10808_v51 }
 0x671   : > { %13119 = vst [vmem:[#allocation135_spill] sm:$0xff] %v10999_v44  ;;  %5590 = vst.msk [vmem:[#allocation3 + $0x108] sm:$0xff] %vm4268_vm4, %v10999_v44  ;;  %v11009_v13 = vmax.f32 %v10992_v35, %v2998_v38 }
 0x672   : > { %4409 = vperm.xlu1 %8249, %v11004_v19   ;;  %v3019_v54 = vpop.xlane.xlu0 %3018  ;;  %8383 = vpow2.f32 %v3264_v8 }
 0x673   : > { %5581 = vst.msk [vmem:[#allocation3 + $0xc0] sm:$0xff] %vm4268_vm4, %v11009_v13  ;;  %v11017_v21 = vmax.f32 %v11002_v40, %v3019_v54  ;;  %v11036_v54 = vld [vmem:[#allocation3 + $0xe8] sm:$0xff] }
 0x674   : > { %v3022_v6 = vpop.xlane.xlu1 %3021  ;;  %3464 = vperm.xlu0 %8250, %v10794_v62   ;;  %13122 = vst [vmem:[#allocation138_spill] sm:$0xff] %v11036_v54  ;;  %v13179_v40 = vld [vmem:[#allocation118_spill] sm:$0xff] }
 0x675   : > { %v11025_v25 = vmax.f32 %v11012_v17, %v3022_v6  ;;  %5588 = vst.msk [vmem:[#allocation3 + $0xf8] sm:$0xff] %vm4268_vm4, %v11017_v21  ;;  %v11038_v6 = vpop.eup %8377 }
 0x676   : > { %4399 = vperm.xlu1 %8249, %v11022_v32   ;;  %v3043_v59 = vpop.xlane.xlu0 %3042  ;;  %v11056_v24 = vpop.eup %8379 }
 0x677   : > { %5589 = vst.msk [vmem:[#allocation3 + $0x100] sm:$0xff] %vm4268_vm4, %v11025_v25  ;;  %v11033_v63 = vmax.f32 %v11020_v18, %v3043_v59  ;;  %v3198_v59 = vsub.f32 %v10782_v4, %v10794_v62  ;;  %v11065_v60 = vpop.eup %8381 }
 0x678   : > { %v3405_v38 = vpop.permute.xlu1 %3404  ;;  %3454 = vperm.xlu0 %8250, %v10822_v39   ;;  %13125 = vst [vmem:[#allocation141_spill] sm:$0xff] %v11065_v60 }
 0x679   : > { %5596 = vst.msk [vmem:[#allocation3 + $0x138] sm:$0xff] %vm4268_vm4, %v11033_v63  ;;  %v3698_v50 = vsub.f32 %v10451_v42, %v3405_v38  ;;  %v3280_v62 = vmul.f32 1.442695, %v3198_v59 }
 0x67a   : > { %4414 = vperm.xlu1 %8249, %v11038_v6   ;;  %v3013_v56 = vpop.xlane.xlu0 %3012 }
 0x67b   : > { %v11048_v12 = vmax.f32 %v11036_v54, %v3013_v56  ;;  %v3768_v42 = vmul.f32 1.442695, %v3698_v50  ;;  %8385 = vpow2.f32 %v3280_v62  ;;  %v3260_v50 = vmul.f32 1.442695, %v3188_v29  ;;  %v13180_v54 = vld [vmem:[#allocation127_spill] sm:$0xff] }
 0x67c   : > { %v11051_v49 = vpop.permute.xlu1 %3394  ;;  %3444 = vperm.xlu0 %8250, %v10836_v33   ;;  %v11079_v8 = vpop.eup %8383 }
 0x67d   : > { %5586 = vst.msk [vmem:[#allocation3 + $0xe8] sm:$0xff] %vm4268_vm4, %v11048_v12  ;;  %8387 = vpow2.f32 %v3768_v42  ;;  %13126 = vst [vmem:[#allocation142_spill] sm:$0xff] %v11079_v8  ;;  %v3202_v42 = vsub.f32 %v10838_v23, %v10852_v36 }
 0x67e   : > { %4434 = vperm.xlu1 %8249, %v11056_v24   ;;  %v3037_v4 = vpop.xlane.xlu0 %3036 }
 0x67f   : > { %v11062_v56 = vmax.f32 %v11054_v30, %v3037_v4  ;;  %v3196_v4 = vsub.f32 %v10810_v11, %v10822_v39  ;;  %v13176_v30 = vld [vmem:[#allocation123_spill] sm:$0xff] }
 0x680   : > { %v3410_v38 = vpop.permute.xlu1 %3409  ;;  %3484 = vperm.xlu0 %8250, %v10852_v36   ;;  %v3200_v36 = vsub.f32 %v10870_v9, %v10884_v46  ;;  %v3050_v9 = vsel %vm2923_vm3, %v10692_v53, -inf  ;;  %v11208_v53 = vld [vmem:[#allocation3 + $0x1b8] sm:$0xff] }
 0x681   : > { %13124 = vst [vmem:[#allocation140_spill] sm:$0xff] %v11062_v56  ;;  %v3699_v14 = vsub.f32 %v10460_v3, %v3410_v38  ;;  %5594 = vst.msk [vmem:[#allocation3 + $0x128] sm:$0xff] %vm4268_vm4, %v11062_v56  ;;  %v3276_v7 = vmul.f32 1.442695, %v3196_v4  ;;  %v3194_v3 = vsub.f32 %v10824_v61, %v10836_v33  ;;  %v3288_v61 = vmul.f32 1.442695, %v3202_v42 }
 0x682   : > { %4424 = vperm.xlu1 %8249, %v11065_v60   ;;  %v3192_v38 = vsub.f32 %v10854_v47, %v10868_v10  ;;  %v11132_v33 = vld [vmem:[#allocation3 + $0x130] sm:$0xff]  ;;  %13156 = vst [vmem:[#allocation158_spill] sm:$0xff] %v11208_v53 }
 0x683   : > { %v3770_v59 = vmul.f32 1.442695, %v3699_v14  ;;  %v3272_v62 = vmul.f32 1.442695, %v3194_v3 }
 0x684   : > { %3434 = vperm.xlu0 %8250, %v10868_v10   ;;  %v3268_v23 = vmul.f32 1.442695, %v3192_v38 }
 0x685   : > { %8389 = vpow2.f32 %v3770_v59  ;;  %v11082_v14 = vpop.eup %8385 }
 0x686   : > { %8391 = vpow2.f32 %v3260_v50  ;;  %13127 = vst [vmem:[#allocation143_spill] sm:$0xff] %v11082_v14  ;;  %v3284_v50 = vmul.f32 1.442695, %v3200_v36  ;;  %v11119_v3 = vpop.permute.xlu0 %4404  ;;  %v13135_v36 = vld [vmem:[#allocation88_spill] sm:$0xff] }
 0x687   : > { %8393 = vpow2.f32 %v3276_v7  ;;  %v11086_v11 = vpop.eup %8387  ;;  %v3074_v7 = vsel %vm2923_vm3, %v10684_v22, -inf  ;;  %v13155_v22 = vld [vmem:[#allocation107_spill] sm:$0xff] }
 0x688   : > { %3474 = vperm.xlu0 %8250, %v10884_v46   ;;  %8395 = vpow2.f32 %v3272_v62  ;;  %v13134_v62 = vld [vmem:[#allocation92_spill] sm:$0xff] }
 0x689   : > { %8397 = vpow2.f32 %v3288_v61  ;;  %v3044_v42 = vsel %vm2923_vm3, %v13134_v62, -inf  ;;  %v11123_v61 = vld [vmem:[#allocation3 + $0xf0] sm:$0xff]  ;;  %v11192_v62 = vld [vmem:[#allocation3 + $0x178] sm:$0xff] }
 0x68a   : > { %8399 = vpow2.f32 %v3268_v23  ;;  %v11125_v38 = vpop.permute.xlu0 %4429  ;;  %13152 = vst [vmem:[#allocation156_spill] sm:$0xff] %v11192_v62 }
 0x68b   : > { %8401 = vpow2.f32 %v3284_v50  ;;  %v3068_v50 = vsel %vm2923_vm3, %v13135_v36, -inf  ;;  %v13151_v36 = vld [vmem:[#allocation104_spill] sm:$0xff] }
 0x68c   : > { %4449 = vperm.xlu0 %8250, %v11079_v8   ;;  %v11149_v8 = vld [vmem:[#allocation3 + $0x158] sm:$0xff] }
 0x68f   : > { %v11088_v39 = vpop.eup %8389 }
 0x690   : > { %4489 = vperm.xlu0 %8250, %v11082_v14   ;;  %v11095_v29 = vpop.eup %8391 }
 0x691   : > { %13128 = vst [vmem:[#allocation144_spill] sm:$0xff] %v11095_v29  ;;  %v11100_v59 = vpop.eup %8393 }
 0x692   : > { %13129 = vst [vmem:[#allocation145_spill] sm:$0xff] %v11100_v59  ;;  %v11103_v4 = vpop.eup %8395 }
 0x693   : > { %13130 = vst [vmem:[#allocation146_spill] sm:$0xff] %v11103_v4  ;;  %v11106_v47 = vpop.eup %8397 }
 0x694   : > { %4439 = vperm.xlu0 %8250, %v11095_v29   ;;  %13131 = vst [vmem:[#allocation147_spill] sm:$0xff] %v11106_v47  ;;  %v11109_v10 = vpop.eup %8399  ;;  %v13138_v29 = vld [vmem:[#allocation95_spill] sm:$0xff] }
 0x695   : > { %13132 = vst [vmem:[#allocation148_spill] sm:$0xff] %v11109_v10  ;;  %v11114_v46 = vpop.eup %8401  ;;  %v3086_v14 = vsel %vm2923_vm3, %v13138_v29, -inf }
 0x696   : > { %13133 = vst [vmem:[#allocation149_spill] sm:$0xff] %v11114_v46 }
 0x698   : > { %4479 = vperm.xlu0 %8250, %v11100_v59   ;;  %v11143_v59 = vpop.permute.xlu0 %4419 }
 0x69c   : > { %4469 = vperm.xlu0 %8250, %v11103_v4  }
 0x6a0   : > { %4509 = vperm.xlu0 %8250, %v11106_v47  }
 0x6a4   : > { %4459 = vperm.xlu0 %8250, %v11109_v10   ;;  %v13137_v10 = vld [vmem:[#allocation99_spill] sm:$0xff] }
 0x6a5   : > { %v3062_v47 = vsel %vm2923_vm3, %v13137_v10, -inf }
 0x6a6   : > { %3051 = vmax.xlane.f32.xlu1 %v3050_v9 }
 0x6a8   : > { %4499 = vperm.xlu0 %8250, %v11114_v46  }
 0x6aa   : > { %3075 = vmax.xlane.f32.xlu1 %v3074_v7  ;;  %v13136_v7 = vld [vmem:[#allocation46_spill] sm:$0xff] }
 0x6ab   : > { %13139 = vst [vmem:[#allocation46_spill] sm:$0xff] %v11149_v8 }
 0x6ae   : > { %3045 = vmax.xlane.f32.xlu1 %v3044_v42  ;;  %v3696_v42 = vsub.f32 %v13136_v7, %v11051_v49  ;;  %v13140_v49 = vld [vmem:[#allocation47_spill] sm:$0xff] }
 0x6b1   : > { %v3016_v23 = vpop.xlane.xlu1 %3015 }
 0x6b2   : > { %v11130_v9 = vmax.f32 %v11123_v61, %v3016_v23  ;;  %3069 = vmax.xlane.f32.xlu1 %v3068_v50  ;;  %v3764_v23 = vmul.f32 1.442695, %v3696_v42 }
 0x6b4   : > { %5587 = vst.msk [vmem:[#allocation3 + $0xf0] sm:$0xff] %vm4268_vm4, %v11130_v9  ;;  %8403 = vpow2.f32 %v3764_v23 }
 0x6b5   : > { %v3040_v46 = vpop.xlane.xlu1 %3039 }
 0x6b6   : > { %v11141_v4 = vmax.f32 %v11132_v33, %v3040_v46  ;;  %3063 = vmax.xlane.f32.xlu1 %v3062_v47  ;;  %v13142_v47 = vld [vmem:[#allocation100_spill] sm:$0xff] }
 0x6b7   : > { %v3056_v10 = vsel %vm2923_vm3, %v13142_v47, -inf  ;;  %v11175_v47 = vld [vmem:[#allocation3 + $0x188] sm:$0xff] }
 0x6b8   : > { %5595 = vst.msk [vmem:[#allocation3 + $0x130] sm:$0xff] %vm4268_vm4, %v11141_v4  ;;  %13149 = vst [vmem:[#allocation154_spill] sm:$0xff] %v11175_v47 }
 0x6b9   : > { %v3400_v50 = vpop.permute.xlu1 %3399 }
 0x6ba   : > { %v3697_v7 = vsub.f32 %v13140_v49, %v3400_v50  ;;  %3087 = vmax.xlane.f32.xlu1 %v3086_v14  ;;  %v13145_v14 = vld [vmem:[#allocation96_spill] sm:$0xff] }
 0x6bb   : > { %v3055_v27 = vpop.xlane.xlu0 %3054  ;;  %v3080_v49 = vsel %vm2923_vm3, %v13145_v14, -inf }
 0x6bc   : > { %v3766_v16 = vmul.f32 1.442695, %v3697_v7  ;;  %v11153_v46 = vmax.f32 %v11149_v8, %v3055_v27  ;;  %v11166_v27 = vld [vmem:[#allocation3 + $0x148] sm:$0xff] }
 0x6bd   : > { %13146 = vst [vmem:[#allocation152_spill] sm:$0xff] %v11166_v27  ;;  %v13173_v8 = vld [vmem:[#allocation119_spill] sm:$0xff] }
 0x6be   : > { %13141 = vst [vmem:[#allocation47_spill] sm:$0xff] %v11153_v46  ;;  %8405 = vpow2.f32 %v3766_v16  ;;  %3057 = vmax.xlane.f32.xlu1 %v3056_v10  ;;  %5600 = vst.msk [vmem:[#allocation3 + $0x158] sm:$0xff] %vm4268_vm4, %v11153_v46  ;;  %v13148_v10 = vld [vmem:[#allocation103_spill] sm:$0xff]  ;;  %v3884_v46 = vld [vmem:[#allocation4] sm:$0xff] }
 0x6bf   : > { %v3079_v42 = vpop.xlane.xlu0 %3078  ;;  %v3098_v7 = vsel %vm2923_vm3, %v13148_v10, -inf  ;;  %v3092_v10 = vsel %vm2923_vm3, %v13151_v36, -inf }
 0x6c0   : > { %v11162_v50 = vmax.f32 %v11157_v31, %v3079_v42  ;;  %v4018_v42 = vsel %vm2923_vm3, %v10914_v5, 0.0  ;;  %v4012_v5 = vsel %vm2923_vm3, %v10908_v55, 0.0  ;;  %v4021_v55 = vsel %vm2923_vm3, %v10920_v0, 0.0 }
 0x6c2   : > { %13144 = vst [vmem:[#allocation151_spill] sm:$0xff] %v11162_v50  ;;  %3081 = vmax.xlane.f32.xlu1 %v3080_v49  ;;  %5608 = vst.msk [vmem:[#allocation3 + $0x198] sm:$0xff] %vm4268_vm4, %v11162_v50  ;;  %v11181_v49 = vpop.eup %8403 }
 0x6c3   : > { %v3049_v23 = vpop.xlane.xlu0 %3048 }
 0x6c4   : > { %v11171_v16 = vmax.f32 %v11166_v27, %v3049_v23  ;;  %v13175_v27 = vld [vmem:[#allocation114_spill] sm:$0xff] }
 0x6c6   : > { %13147 = vst [vmem:[#allocation153_spill] sm:$0xff] %v11171_v16  ;;  %3099 = vmax.xlane.f32.xlu1 %v3098_v7  ;;  %5598 = vst.msk [vmem:[#allocation3 + $0x148] sm:$0xff] %vm4268_vm4, %v11171_v16 }
 0x6c7   : > { %4019 = vadd.xlane.f32.xlu0 %v4018_v42  ;;  %v3073_v14 = vpop.xlane.xlu0 %3072  ;;  %v13153_v42 = vpack.c.bf16 %v11088_v39, %v11086_v11 }
 0x6c8   : > { %v11183_v29 = vpop.eup %8405  ;;  %v11186_v23 = vmax.f32 %v11175_v47, %v3073_v14  ;;  %v11261_v47 = vld [vmem:[#allocation3 + $0xe0] sm:$0xff] }
 0x6c9   : > { %v4783_v7 = vpack.c.bf16 %v11183_v29, %v11181_v49 }
 0x6ca   : > { %13150 = vst [vmem:[#allocation155_spill] sm:$0xff] %v11186_v23  ;;  %3093 = vmax.xlane.f32.xlu1 %v3092_v10  ;;  %5606 = vst.msk [vmem:[#allocation3 + $0x188] sm:$0xff] %vm4268_vm4, %v11186_v23  ;;  %v3110_v10 = vsel %vm2923_vm3, %v13155_v22, -inf }
 0x6cb   : > { %7434 = vmatprep.mubr.msk.bf16.mxu0 %vm2923_vm3, %v4783_v7  ;;  %4013 = vadd.xlane.f32.xlu0 %v4012_v5  ;;  %v3067_v14 = vpop.xlane.xlu0 %3066 }
 0x6cc   : > { %7435 = vmatmul.mubr.msk.bf16.gmra.mrb[52].mxu0 %vm2923_vm3, %v13153_v42  ;;  %v11204_v36 = vmax.f32 %v11192_v62, %v3067_v14  ;;  %v13158_v42 = vld [vmem:[#allocation108_spill] sm:$0xff] }
 0x6cd   : > { %v3104_v14 = vsel %vm2923_vm3, %v13158_v42, -inf }
 0x6ce   : > { %13154 = vst [vmem:[#allocation157_spill] sm:$0xff] %v11204_v36  ;;  %3111 = vmax.xlane.f32.xlu1 %v3110_v10  ;;  %5604 = vst.msk [vmem:[#allocation3 + $0x178] sm:$0xff] %vm4268_vm4, %v11204_v36 }
 0x6cf   : > { %4022 = vadd.xlane.f32.xlu0 %v4021_v55  ;;  %v3091_v7 = vpop.xlane.xlu0 %3090 }
 0x6d0   : > { %v11215_v5 = vmax.f32 %v11208_v53, %v3091_v7  ;;  %v11233_v7 = vld [vmem:[#allocation3 + $0x1d8] sm:$0xff] }
 0x6d1   : > { %13163 = vst [vmem:[#allocation164_spill] sm:$0xff] %v11233_v7 }
 0x6d2   : > { %13157 = vst [vmem:[#allocation159_spill] sm:$0xff] %v11215_v5  ;;  %3105 = vmax.xlane.f32.xlu1 %v3104_v14  ;;  %5612 = vst.msk [vmem:[#allocation3 + $0x1b8] sm:$0xff] %vm4268_vm4, %v11215_v5 }
 0x6d3   : > { %v3061_v10 = vpop.xlane.xlu0 %3060 }
 0x6d4   : > { %v11224_v22 = vmax.f32 %v11219_v48, %v3061_v10  ;;  %v11240_v10 = vld [vmem:[#allocation3 + $0x1c8] sm:$0xff]  ;;  %v11273_v48 = vld [vmem:[#allocation3 + $0x120] sm:$0xff] }
 0x6d5   : > { %13165 = vst [vmem:[#allocation166_spill] sm:$0xff] %v11240_v10 }
 0x6d6   : > { %13160 = vst [vmem:[#allocation161_spill] sm:$0xff] %v11224_v22  ;;  %5602 = vst.msk [vmem:[#allocation3 + $0x168] sm:$0xff] %vm4268_vm4, %v11224_v22 }
 0x6d7   : > { %v3085_v0 = vpop.xlane.xlu0 %3084 }
 0x6d8   : > { %v11231_v55 = vmax.f32 %v11226_v37, %v3085_v0  ;;  %v11247_v0 = vld [vmem:[#allocation3 + $0x1f8] sm:$0xff] }
 0x6d9   : > { %13167 = vst [vmem:[#allocation168_spill] sm:$0xff] %v11247_v0 }
 0x6da   : > { %13162 = vst [vmem:[#allocation163_spill] sm:$0xff] %v11231_v55  ;;  %5610 = vst.msk [vmem:[#allocation3 + $0x1a8] sm:$0xff] %vm4268_vm4, %v11231_v55 }
 0x6db   : > { %v3103_v14 = vpop.xlane.xlu0 %3102 }
 0x6dc   : > { %v11238_v42 = vmax.f32 %v11233_v7, %v3103_v14  ;;  %v11256_v7 = vld [vmem:[#allocation3 + $0x1e8] sm:$0xff] }
 0x6dd   : > { %13169 = vst [vmem:[#allocation170_spill] sm:$0xff] %v11256_v7 }
 0x6de   : > { %13164 = vst [vmem:[#allocation165_spill] sm:$0xff] %v11238_v42  ;;  %5616 = vst.msk [vmem:[#allocation3 + $0x1d8] sm:$0xff] %vm4268_vm4, %v11238_v42 }
 0x6df   : > { %v3097_v53 = vpop.xlane.xlu0 %3096 }
 0x6e0   : > { %v11245_v31 = vmax.f32 %v11240_v10, %v3097_v53  ;;  %v13170_v53 = vld [vmem:[#allocation115_spill] sm:$0xff] }
 0x6e1   : > { %v3191_v18 = vsub.f32 %v13175_v27, %v13170_v53  ;;  %v13181_v27 = vld [vmem:[#allocation120_spill] sm:$0xff] }
 0x6e2   : > { %13166 = vst [vmem:[#allocation167_spill] sm:$0xff] %v11245_v31  ;;  %5614 = vst.msk [vmem:[#allocation3 + $0x1c8] sm:$0xff] %vm4268_vm4, %v11245_v31  ;;  %v3189_v31 = vsub.f32 %v13179_v40, %v13173_v8 }
 0x6e3   : > { %3414 = vperm.xlu1 %8249, %v10808_v51   ;;  %v3115_v37 = vpop.xlane.xlu0 %3114 }
 0x6e4   : > { %v11253_v14 = vmax.f32 %v11247_v0, %v3115_v37  ;;  %v13172_v0 = vld [vmem:[#allocation117_spill] sm:$0xff]  ;;  %v3262_v42 = vmul.f32 1.442695, %v3189_v31  ;;  %v13185_v31 = vld [vmem:[#allocation124_spill] sm:$0xff] }
 0x6e5   : > { %3504 = vperm.xlu0 %8250, %v10971_v26  }
 0x6e6   : > { %13168 = vst [vmem:[#allocation169_spill] sm:$0xff] %v11253_v14  ;;  %5620 = vst.msk [vmem:[#allocation3 + $0x1f8] sm:$0xff] %vm4268_vm4, %v11253_v14  ;;  %v13177_v14 = vld [vmem:[#allocation116_spill] sm:$0xff] }
 0x6e7   : > { %3429 = vperm.xlu1 %8249, %v13170_v53   ;;  %v3109_v10 = vpop.xlane.xlu0 %3108  ;;  %v3199_v15 = vsub.f32 %v13177_v14, %v13172_v0 }
 0x6e8   : > { %v11264_v62 = vmax.f32 %v11256_v7, %v3109_v10 }
 0x6e9   : > { %3544 = vperm.xlu0 %8250, %v10990_v58   ;;  %v3282_v34 = vmul.f32 1.442695, %v3199_v15  ;;  %v13183_v15 = vld [vmem:[#allocation122_spill] sm:$0xff] }
 0x6ea   : > { %13171 = vst [vmem:[#allocation115_spill] sm:$0xff] %v11264_v62  ;;  %v3010_v51 = vpop.xlane.xlu1 %3009  ;;  %5618 = vst.msk [vmem:[#allocation3 + $0x1e8] sm:$0xff] %vm4268_vm4, %v11264_v62  ;;  %v3266_v62 = vmul.f32 1.442695, %v3191_v18 }
 0x6eb   : > { %v11270_v37 = vmax.f32 %v11261_v47, %v3010_v51  ;;  %3469 = vperm.xlu1 %8249, %v13172_v0   ;;  %v13174_v51 = vld [vmem:[#allocation121_spill] sm:$0xff] }
 0x6ec   : > { %8407 = vpow2.f32 %v3266_v62  ;;  %v3197_v53 = vsub.f32 %v13181_v27, %v13174_v51  ;;  %v3195_v62 = vsub.f32 %v13183_v15, %v13176_v30  ;;  %v13187_v27 = vld [vmem:[#allocation126_spill] sm:$0xff] }
 0x6ed   : > { %5585 = vst.msk [vmem:[#allocation3 + $0xe0] sm:$0xff] %vm4268_vm4, %v11270_v37  ;;  %3494 = vperm.xlu0 %8250, %v11009_v13   ;;  %8409 = vpow2.f32 %v3282_v34 }
 0x6ee   : > { %v3034_v10 = vpop.xlane.xlu1 %3033  ;;  %8411 = vpow2.f32 %v3262_v42  ;;  %v3278_v0 = vmul.f32 1.442695, %v3197_v53  ;;  %v3274_v40 = vmul.f32 1.442695, %v3195_v62  ;;  %v13189_v62 = vld [vmem:[#allocation128_spill] sm:$0xff] }
 0x6ef   : > { %v11279_v7 = vmax.f32 %v11273_v48, %v3034_v10  ;;  %3419 = vperm.xlu1 %8249, %v13173_v8   ;;  %v13178_v10 = vld [vmem:[#allocation125_spill] sm:$0xff]  ;;  %v11294_v60 = vpop.permute.xlu0 %3424 }
 0x6f0   : > { %8413 = vpow2.f32 %v3278_v0  ;;  %v3203_v34 = vsub.f32 %v13185_v31, %v13178_v10  ;;  %v3201_v31 = vsub.f32 %v13189_v62, %v13182_v45 }
 0x6f1   : > { %5593 = vst.msk [vmem:[#allocation3 + $0x120] sm:$0xff] %vm4268_vm4, %v11279_v7  ;;  %3534 = vperm.xlu0 %8250, %v11025_v25   ;;  %8415 = vpow2.f32 %v3274_v40 }
 0x6f2   : > { %v3290_v42 = vmul.f32 1.442695, %v3203_v34  ;;  %v4410_v15 = vpop.permute.xlu1 %4409 }
 0x6f3   : > { %3459 = vperm.xlu1 %8249, %v13174_v51   ;;  %v11299_v18 = vpop.permute.xlu0 %3464 }
 0x6f4   : > { %8417 = vpow2.f32 %v3290_v42  ;;  %v4333_v42 = vld [vmem:[#allocation5] sm:$0xff] }
 0x6f6   : > { %v11304_v14 = vpop.eup %8407  ;;  %v4400_v34 = vpop.permute.xlu1 %4399 }
 0x6f7   : > { %3449 = vperm.xlu1 %8249, %v13176_v30   ;;  %13184 = vst [vmem:[#allocation117_spill] sm:$0xff] %v11304_v14  ;;  %v11309_v8 = vpop.permute.xlu0 %3454  ;;  %v11311_v51 = vpop.eup %8409  ;;  %v3193_v30 = vsub.f32 %v13187_v27, %v13180_v54 }
 0x6f8   : > { %13186 = vst [vmem:[#allocation119_spill] sm:$0xff] %v11311_v51  ;;  %v11316_v53 = vpop.eup %8411 }
 0x6f9   : > { %13188 = vst [vmem:[#allocation121_spill] sm:$0xff] %v11316_v53  ;;  %v3270_v0 = vmul.f32 1.442695, %v3193_v30 }
 0x6fa   : > { %v11325_v40 = vpop.eup %8413 }
 0x6fb   : > { %3489 = vperm.xlu1 %8249, %v13178_v10   ;;  %v4033_v10 = vsel %vm2923_vm3, %v11088_v39, 0.0  ;;  %13190 = vst [vmem:[#allocation114_spill] sm:$0xff] %v11325_v40  ;;  %8419 = vpow2.f32 %v3270_v0  ;;  %v4335_v39 = vld [vmem:[#allocation5 + $0x10] sm:$0xff]  ;;  %v4717_v0 = vmul.f32 %v4400_v34, %v4333_v42 }
 0x6ff   : > { %3439 = vperm.xlu1 %8249, %v13180_v54   ;;  %v3286_v54 = vmul.f32 1.442695, %v3201_v31 }
 0x701   : > { %8421 = vpow2.f32 %v3286_v54 }
 0x703   : > { %3479 = vperm.xlu1 %8249, %v13182_v45   ;;  %v4336_v45 = vld [vmem:[#allocation5 + $0x18] sm:$0xff] }
 0x707   : > { %4454 = vperm.xlu1 %8249, %v11304_v14   ;;  %v11318_v14 = vpop.permute.xlu0 %3444 }
 0x70b   : > { %4494 = vperm.xlu1 %8249, %v11311_v51   ;;  %v11328_v27 = vpop.permute.xlu0 %3484  ;;  %v11330_v51 = vpop.eup %8415 }
 0x70c   : > { %13191 = vst [vmem:[#allocation123_spill] sm:$0xff] %v11330_v51  ;;  %v11333_v30 = vpop.eup %8417 }
 0x70d   : > { %13192 = vst [vmem:[#allocation116_spill] sm:$0xff] %v11333_v30  ;;  %v11338_v36 = vpop.eup %8419 }
 0x70e   : > { %13193 = vst [vmem:[#allocation125_spill] sm:$0xff] %v11338_v36 }
 0x70f   : > { %4444 = vperm.xlu1 %8249, %v11316_v53   ;;  %v11335_v62 = vpop.permute.xlu0 %3434  ;;  %v4334_v53 = vld [vmem:[#allocation5 + $0x8] sm:$0xff] }
 0x710   : > { %4034 = vadd.xlane.f32.xlu0 %v4033_v10  ;;  %v4415_v10 = vpop.permute.xlu1 %4414  ;;  %v4718_v54 = vmul.f32 %v11119_v3, %v4334_v53  ;;  %v11368_v53 = vld [vmem:[#allocation3 + $0x190] sm:$0xff] }
 0x711   : > { %v4720_v55 = vmul.f32 %v4415_v10, %v4336_v45  ;;  %13200 = vst [vmem:[#allocation126_spill] sm:$0xff] %v11368_v53 }
 0x713   : > { %4484 = vperm.xlu1 %8249, %v11325_v40   ;;  %v4719_v40 = vmul.f32 %v4410_v15, %v4335_v39  ;;  %v11343_v15 = vpop.permute.xlu0 %3474 }
 0x717   : > { %4474 = vperm.xlu1 %8249, %v11330_v51   ;;  %v11351_v3 = vpop.permute.xlu0 %4449 }
 0x718   : > { %13195 = vst [vmem:[#allocation127_spill] sm:$0xff] %v11351_v3 }
 0x71b   : > { %4514 = vperm.xlu1 %8249, %v11333_v30  }
 0x71c   : > { %v7432_v31 = vpop.f32.mrb[48].mxu0 }
 0x71d   : > { %v5431_v22 = vadd.f32 %v7432_v31, %v4719_v40  ;;  %v4859_v5 = vpop.f32.mrb[49].mxu0  ;;  %v11347_v40 = vpop.eup %8421 }
 0x71e   : > { %v5429_v51 = vadd.f32 %v4859_v5, %v4717_v0  ;;  %v7433_v23 = vpop.f32.mrb[50].mxu0  ;;  %13194 = vst [vmem:[#allocation118_spill] sm:$0xff] %v11347_v40  ;;  %v11379_v0 = vld [vmem:[#allocation3 + $0x140] sm:$0xff] }
 0x71f   : > { %5495 = vst.msk [vmem:[#allocation5 + $0x10] sm:$0xff] %vm2146_vm2, %v5431_v22  ;;  %v5432_v16 = vadd.f32 %v7433_v23, %v4720_v55  ;;  %4464 = vperm.xlu1 %8249, %v11338_v36   ;;  %v4862_v50 = vpop.f32.mrb[51].mxu0  ;;  %v11354_v22 = vpop.permute.xlu1 %4434  ;;  %13202 = vst [vmem:[#allocation171_spill] sm:$0xff] %v11379_v0  ;;  %v11399_v36 = vld [vmem:[#allocation3 + $0x170] sm:$0xff] }
 0x720   : > { %5493 = vst.msk [vmem:[#allocation5] sm:$0xff] %vm2146_vm2, %v5429_v51  ;;  %v5430_v34 = vadd.f32 %v4862_v50, %v4718_v54  ;;  %v11357_v23 = vpop.permute.xlu0 %4489  ;;  %v11361_v50 = vld [vmem:[#allocation3 + $0x150] sm:$0xff]  ;;  %13205 = vst [vmem:[#allocation174_spill] sm:$0xff] %v11399_v36 }
 0x721   : > { %5496 = vst.msk [vmem:[#allocation5 + $0x18] sm:$0xff] %vm2146_vm2, %v5432_v16  ;;  %13196 = vst [vmem:[#allocation120_spill] sm:$0xff] %v11357_v23 }
 0x722   : > { %5494 = vst.msk [vmem:[#allocation5 + $0x8] sm:$0xff] %vm2146_vm2, %v5430_v34  ;;  %13197 = vst [vmem:[#allocation129_spill] sm:$0xff] %v11361_v50 }
 0x723   : > { %4504 = vperm.xlu1 %8249, %v11347_v40   ;;  %v11359_v5 = vpop.permute.xlu1 %4424 }
 0x724   : > { %v11363_v16 = vpop.permute.xlu0 %4439 }
 0x725   : > { %13198 = vst [vmem:[#allocation122_spill] sm:$0xff] %v11363_v16 }
 0x726   : > { %3524 = vperm.xlu0 %8250, %v11130_v9  }
 0x728   : > { %v11374_v45 = vpop.permute.xlu0 %4479 }
 0x729   : > { %13201 = vst [vmem:[#allocation128_spill] sm:$0xff] %v11374_v45  ;;  %v11410_v45 = vld [vmem:[#allocation3 + $0x1b0] sm:$0xff] }
 0x72a   : > { %3564 = vperm.xlu0 %8250, %v11141_v4   ;;  %13207 = vst [vmem:[#allocation176_spill] sm:$0xff] %v11410_v45 }
 0x72c   : > { %v11390_v39 = vpop.permute.xlu0 %4469 }
 0x72d   : > { %13204 = vst [vmem:[#allocation173_spill] sm:$0xff] %v11390_v39 }
 0x730   : > { %v11405_v39 = vpop.permute.xlu0 %4509 }
 0x731   : > { %13206 = vst [vmem:[#allocation175_spill] sm:$0xff] %v11405_v39  ;;  %v11423_v39 = vld [vmem:[#allocation3 + $0x160] sm:$0xff] }
 0x732   : > { %13208 = vst [vmem:[#allocation177_spill] sm:$0xff] %v11423_v39 }
 0x733   : > { %v3052_v55 = vpop.xlane.xlu1 %3051 }
 0x734   : > { %v11366_v51 = vmax.f32 %v11361_v50, %v3052_v55  ;;  %v11388_v55 = vld [vmem:[#allocation3 + $0x180] sm:$0xff]  ;;  %v11425_v3 = vpop.permute.xlu0 %4459 }
 0x735   : > { %13203 = vst [vmem:[#allocation172_spill] sm:$0xff] %v11388_v55  ;;  %13209 = vst [vmem:[#allocation178_spill] sm:$0xff] %v11425_v3  ;;  %v11457_v50 = vld [vmem:[#allocation3 + $0x1c0] sm:$0xff] }
 0x736   : > { %13199 = vst [vmem:[#allocation124_spill] sm:$0xff] %v11366_v51  ;;  %5599 = vst.msk [vmem:[#allocation3 + $0x150] sm:$0xff] %vm4268_vm4, %v11366_v51 }
 0x737   : > { %v3076_v42 = vpop.xlane.xlu1 %3075  ;;  %13213 = vst [vmem:[#allocation182_spill] sm:$0xff] %v11457_v50 }
 0x738   : > { %v11377_v10 = vmax.f32 %v11368_v53, %v3076_v42  ;;  %v11440_v3 = vpop.permute.xlu0 %4499  ;;  %v11445_v53 = vld [vmem:[#allocation3 + $0x1d0] sm:$0xff] }
 0x739   : > { %13211 = vst [vmem:[#allocation180_spill] sm:$0xff] %v11440_v3  ;;  %13212 = vst [vmem:[#allocation181_spill] sm:$0xff] %v11445_v53 }
 0x73a   : > { %5607 = vst.msk [vmem:[#allocation3 + $0x190] sm:$0xff] %vm4268_vm4, %v11377_v10 }
 0x73b   : > { %v3046_v54 = vpop.xlane.xlu1 %3045 }
 0x73c   : > { %v11386_v34 = vmax.f32 %v11379_v0, %v3046_v54  ;;  %v4015_v54 = vsel %vm2923_vm3, %v10912_v1, 0.0 }
 0x73e   : > { %5597 = vst.msk [vmem:[#allocation3 + $0x140] sm:$0xff] %vm4268_vm4, %v11386_v34 }
 0x73f   : > { %v3070_v40 = vpop.xlane.xlu1 %3069 }
 0x740   : > { %v11397_v31 = vmax.f32 %v11388_v55, %v3070_v40 }
 0x742   : > { %5605 = vst.msk [vmem:[#allocation3 + $0x180] sm:$0xff] %vm4268_vm4, %v11397_v31 }
 0x743   : > { %v3064_v30 = vpop.xlane.xlu1 %3063 }
 0x744   : > { %v11408_v42 = vmax.f32 %v11399_v36, %v3064_v30  ;;  %v4027_v30 = vsel %vm2923_vm3, %v11183_v29, 0.0  ;;  %v3204_v36 = vsub.f32 %v10992_v35, %v11009_v13 }
 0x746   : > { %5603 = vst.msk [vmem:[#allocation3 + $0x170] sm:$0xff] %vm4268_vm4, %v11408_v42  ;;  %v3292_v35 = vmul.f32 1.442695, %v3204_v36 }
 0x747   : > { %v3088_v23 = vpop.xlane.xlu1 %3087  ;;  %4016 = vadd.xlane.f32.xlu1 %v4015_v54 }
 0x748   : > { %v11419_v16 = vmax.f32 %v11410_v45, %v3088_v23  ;;  %v11434_v23 = vld [vmem:[#allocation3 + $0x1a0] sm:$0xff]  ;;  %v3886_v45 = vld [vmem:[#allocation4 + $0x10] sm:$0xff]  ;;  %8423 = vpow2.f32 %v3292_v35 }
 0x749   : > { %4028 = vadd.xlane.f32.xlu0 %v4027_v30  ;;  %13210 = vst [vmem:[#allocation179_spill] sm:$0xff] %v11434_v23  ;;  %v3950_v29 = vmul.f32 %v11004_v19, %v3886_v45  ;;  %v3948_v45 = vmul.f32 %v11022_v32, %v3884_v46  ;;  %v13220_v35 = vld [vmem:[#allocation59_spill] sm:$0xff] }
 0x74a   : > { %5611 = vst.msk [vmem:[#allocation3 + $0x1b0] sm:$0xff] %vm4268_vm4, %v11419_v16 }
 0x74b   : > { %v3058_v1 = vpop.xlane.xlu1 %3057 }
 0x74c   : > { %v11432_v54 = vmax.f32 %v11423_v39, %v3058_v1 }
 0x74e   : > { %5601 = vst.msk [vmem:[#allocation3 + $0x160] sm:$0xff] %vm4268_vm4, %v11432_v54 }
 0x74f   : > { %v3082_v30 = vpop.xlane.xlu1 %3081 }
 0x750   : > { %v11443_v40 = vmax.f32 %v11434_v23, %v3082_v30  ;;  %v11469_v23 = vld [vmem:[#allocation3 + $0x1f0] sm:$0xff] }
 0x751   : > { %13214 = vst [vmem:[#allocation183_spill] sm:$0xff] %v11469_v23 }
 0x752   : > { %5609 = vst.msk [vmem:[#allocation3 + $0x1a0] sm:$0xff] %vm4268_vm4, %v11443_v40 }
 0x753   : > { %v3100_v55 = vpop.xlane.xlu1 %3099 }
 0x754   : > { %v11455_v3 = vmax.f32 %v11445_v53, %v3100_v55  ;;  %v4020_v30 = vpop.xlane.xlu0 %4019 }
 0x755   : > { %v4206_v39 = vadd.f32 %v4020_v30, %v3950_v29  ;;  %v3887_v29 = vld [vmem:[#allocation4 + $0x18] sm:$0xff] }
 0x756   : > { %5615 = vst.msk [vmem:[#allocation3 + $0x1d0] sm:$0xff] %vm4268_vm4, %v11455_v3  ;;  %v3951_v36 = vmul.f32 %v11038_v6, %v3887_v29 }
 0x757   : > { %4271 = vst.msk [vmem:[#allocation4 + $0x10] sm:$0xff] %vm4268_vm4, %v4206_v39  ;;  %v3094_v19 = vpop.xlane.xlu1 %3093 }
 0x758   : > { %v11466_v13 = vmax.f32 %v11457_v50, %v3094_v19  ;;  %3509 = vperm.xlu1 %8249, %v10952_v2   ;;  %v4014_v55 = vpop.xlane.xlu0 %4013  ;;  %v13222_v50 = vld [vmem:[#allocation57_spill] sm:$0xff] }
 0x759   : > { %v4204_v30 = vadd.f32 %v4014_v55, %v3948_v45  ;;  %v11481_v45 = vld [vmem:[#allocation3 + $0x1e0] sm:$0xff] }
 0x75a   : > { %5613 = vst.msk [vmem:[#allocation3 + $0x1c0] sm:$0xff] %vm4268_vm4, %v11466_v13  ;;  %13216 = vst [vmem:[#allocation185_spill] sm:$0xff] %v11481_v45 }
 0x75b   : > { %4269 = vst.msk [vmem:[#allocation4] sm:$0xff] %vm4268_vm4, %v4204_v30  ;;  %v3112_v32 = vpop.xlane.xlu1 %3111 }
 0x75c   : > { %v11478_v46 = vmax.f32 %v11469_v23, %v3112_v32  ;;  %3549 = vperm.xlu1 %8249, %v10964_v57   ;;  %v4023_v39 = vpop.xlane.xlu0 %4022  ;;  %v11499_v32 = vpop.eup %8423  ;;  %v3702_v23 = vsub.f32 %v13220_v35, %v11294_v60  ;;  %v13221_v57 = vld [vmem:[#allocation56_spill] sm:$0xff] }
 0x75d   : > { %v4207_v19 = vadd.f32 %v4023_v39, %v3951_v36  ;;  %13217 = vst [vmem:[#allocation186_spill] sm:$0xff] %v11499_v32  ;;  %v13218_v39 = vld [vmem:[#allocation60_spill] sm:$0xff] }
 0x75e   : > { %13215 = vst [vmem:[#allocation184_spill] sm:$0xff] %v11478_v46  ;;  %5619 = vst.msk [vmem:[#allocation3 + $0x1f0] sm:$0xff] %vm4268_vm4, %v11478_v46 }
 0x75f   : > { %4272 = vst.msk [vmem:[#allocation4 + $0x18] sm:$0xff] %vm4268_vm4, %v4207_v19  ;;  %v3106_v30 = vpop.xlane.xlu1 %3105  ;;  %3514 = vperm.xlu0 %8250, %v11270_v37  }
 0x760   : > { %v11490_v6 = vmax.f32 %v11481_v45, %v3106_v30  ;;  %3499 = vperm.xlu1 %8249, %v10983_v52   ;;  %v13219_v30 = vld [vmem:[#allocation61_spill] sm:$0xff]  ;;  %v3708_v45 = vsub.f32 %v13221_v57, %v11309_v8  ;;  %v13225_v57 = vld [vmem:[#allocation58_spill] sm:$0xff] }
 0x762   : > { %5617 = vst.msk [vmem:[#allocation3 + $0x1e0] sm:$0xff] %vm4268_vm4, %v11490_v6 }
 0x763   : > { %v3415_v29 = vpop.permute.xlu1 %3414  ;;  %3554 = vperm.xlu0 %8250, %v11279_v7  }
 0x764   : > { %3539 = vperm.xlu1 %8249, %v10999_v44   ;;  %v3700_v19 = vsub.f32 %v13218_v39, %v3415_v29  ;;  %v3776_v39 = vmul.f32 1.442695, %v3702_v23 }
 0x766   : > { %v3772_v2 = vmul.f32 1.442695, %v3700_v19  ;;  %v13231_v19 = vld [vmem:[#allocation67_spill] sm:$0xff] }
 0x767   : > { %v3430_v36 = vpop.permute.xlu1 %3429  ;;  %4519 = vperm.xlu0 %8250, %v11499_v32   ;;  %v13223_v32 = vld [vmem:[#allocation62_spill] sm:$0xff] }
 0x768   : > { %v3703_v55 = vsub.f32 %v13219_v30, %v3430_v36  ;;  %v13224_v36 = vld [vmem:[#allocation55_spill] sm:$0xff]  ;;  %8425 = vpow2.f32 %v3772_v2  ;;  %v13226_v2 = vld [vmem:[#allocation68_spill] sm:$0xff] }
 0x769   : > { %v3710_v30 = vsub.f32 %v13224_v36, %v11299_v18  ;;  %v13227_v18 = vld [vmem:[#allocation69_spill] sm:$0xff] }
 0x76a   : > { %v3778_v44 = vmul.f32 1.442695, %v3703_v55 }
 0x76b   : > { %v3470_v1 = vpop.permute.xlu1 %3469  ;;  %3584 = vperm.xlu0 %8250, %v11366_v51   ;;  %v3788_v51 = vmul.f32 1.442695, %v3708_v45 }
 0x76c   : > { %v3711_v53 = vsub.f32 %v13222_v50, %v3470_v1  ;;  %8427 = vpow2.f32 %v3778_v44  ;;  %v3792_v50 = vmul.f32 1.442695, %v3710_v30  ;;  %v3704_v44 = vsub.f32 %v13226_v2, %v11335_v62  ;;  %v13233_v62 = vld [vmem:[#allocation64_spill] sm:$0xff]  ;;  %v13236_v2 = vld [vmem:[#allocation70_spill] sm:$0xff] }
 0x76d   : > { %v3712_v30 = vsub.f32 %v13233_v62, %v11343_v15  ;;  %v13237_v15 = vld [vmem:[#allocation44_spill] sm:$0xff] }
 0x76e   : > { %v3794_v60 = vmul.f32 1.442695, %v3711_v53  ;;  %v3780_v36 = vmul.f32 1.442695, %v3704_v44 }
 0x76f   : > { %v3420_v56 = vpop.permute.xlu1 %3419  ;;  %3624 = vperm.xlu0 %8250, %v11377_v10  }
 0x770   : > { %v3701_v29 = vsub.f32 %v13223_v32, %v3420_v56 }
 0x772   : > { %v3774_v0 = vmul.f32 1.442695, %v3701_v29  ;;  %v3706_v29 = vsub.f32 %v13231_v19, %v11318_v14 }
 0x773   : > { %v3460_v35 = vpop.permute.xlu1 %3459  ;;  %3574 = vperm.xlu0 %8250, %v11386_v34  }
 0x774   : > { %8429 = vpow2.f32 %v3774_v0  ;;  %v3709_v8 = vsub.f32 %v13225_v57, %v3460_v35  ;;  %v11521_v0 = vpop.eup %8425  ;;  %v13235_v57 = vld [vmem:[#allocation65_spill] sm:$0xff] }
 0x775   : > { %8431 = vpow2.f32 %v3776_v39  ;;  %13228 = vst [vmem:[#allocation60_spill] sm:$0xff] %v11521_v0 }
 0x776   : > { %8433 = vpow2.f32 %v3788_v51  ;;  %v3790_v1 = vmul.f32 1.442695, %v3709_v8  ;;  %v11523_v45 = vpop.eup %8427  ;;  %v13230_v51 = vld [vmem:[#allocation36_spill] sm:$0xff] }
 0x777   : > { %8435 = vpow2.f32 %v3794_v60  ;;  %v3450_v56 = vpop.permute.xlu1 %3449  ;;  %3614 = vperm.xlu0 %8250, %v11397_v31   ;;  %13229 = vst [vmem:[#allocation61_spill] sm:$0xff] %v11523_v45  ;;  %v8098_v55 = vunpack.i.h.bf16 %v13230_v51  ;;  %v8097_v32 = vunpack.i.l.bf16 %v13230_v51  ;;  %v8158_v51 = vunpack.i.h.bf16 %v13237_v15 }
 0x778   : > { %8437 = vpow2.f32 %v3790_v1  ;;  %v3707_v53 = vsub.f32 %v13227_v18, %v3450_v56 }
 0x779   : > { %8439 = vpow2.f32 %v3792_v50  ;;  %v2095_v62 = vpack.c.bf16 %v8098_v55, %v8097_v32  ;;  %v13240_v32 = vld [vmem:[#allocation66_spill] sm:$0xff] }
 0x77a   : > { %v3786_v35 = vmul.f32 1.442695, %v3707_v53  ;;  %v3784_v53 = vmul.f32 1.442695, %v3706_v29  ;;  %8441 = vpow2.f32 %v3780_v36  ;;  %v13239_v29 = vld [vmem:[#allocation48_spill] sm:$0xff] }
 0x77b   : > { %v3490_v23 = vpop.permute.xlu1 %3489  ;;  %3604 = vperm.xlu0 %8250, %v11408_v42  }
 0x77c   : > { %v3715_v8 = vsub.f32 %v13235_v57, %v3490_v23  ;;  %v13238_v23 = vld [vmem:[#allocation63_spill] sm:$0xff]  ;;  %8443 = vpow2.f32 %v3786_v35 }
 0x77d   : > { %v3714_v19 = vsub.f32 %v13238_v23, %v11328_v27 }
 0x77e   : > { %v11529_v39 = vpop.eup %8429 }
 0x77f   : > { %13232 = vst [vmem:[#allocation59_spill] sm:$0xff] %v11529_v39  ;;  %v11533_v60 = vpop.eup %8431  ;;  %v3440_v50 = vpop.permute.xlu1 %3439  ;;  %3644 = vperm.xlu0 %8250, %v11419_v16   ;;  %v4785_v1 = vpack.c.bf16 %v11529_v39, %v11521_v0  ;;  %v8157_v0 = vunpack.i.l.bf16 %v13237_v15  ;;  %v3796_v39 = vmul.f32 1.442695, %v3712_v30  ;;  %v13241_v30 = vld [vmem:[#allocation45_spill] sm:$0xff]  ;;  %v3800_v35 = vmul.f32 1.442695, %v3714_v19 }
 0x780   : > { %13234 = vst [vmem:[#allocation56_spill] sm:$0xff] %v11533_v60  ;;  %v11539_v56 = vpop.eup %8433  ;;  %v4786_v14 = vpack.c.bf16 %v11523_v45, %v11533_v60  ;;  %v3705_v44 = vsub.f32 %v13236_v2, %v3440_v50  ;;  %v3802_v2 = vmul.f32 1.442695, %v3715_v8  ;;  %v8217_v8 = vunpack.i.l.bf16 %v13241_v30  ;;  %v11567_v15 = vpop.permute.xlu0 %3504 }
 0x781   : > { %v11544_v18 = vpop.eup %8435  ;;  %7446 = vmatprep.mubr.msk.bf16.mxu1 %vm2923_vm3, %v4785_v1  ;;  %v8218_v1 = vunpack.i.h.bf16 %v13241_v30  ;;  %v3208_v19 = vsub.f32 %v11261_v47, %v11270_v37  ;;  %v13246_v30 = vld [vmem:[#allocation43_spill] sm:$0xff] }
 0x782   : > { %v11550_v57 = vpop.eup %8437  ;;  %v3782_v60 = vmul.f32 1.442695, %v3705_v44  ;;  %7447 = vmatmul.mubr.msk.bf16.vlgmr.msra.gmra.mrb[48].mxu1 %vm2923_vm3, %v4786_v14  ;;  %v2096_v44 = vpack.c.bf16 %v8158_v51, %v8157_v0  ;;  %v13243_v51 = vld [vmem:[#allocation37_spill] sm:$0xff] }
 0x783   : > { %v11554_v50 = vpop.eup %8439  ;;  %7471 = vmatpush3.bf16.msra.mxu1 %v13239_v29  ;;  %v3480_v45 = vpop.permute.xlu1 %3479  ;;  %3594 = vperm.xlu0 %8250, %v11432_v54   ;;  %v4789_v27 = vpack.c.bf16 %v11550_v57, %v11539_v56  ;;  %v2097_v0 = vpack.c.bf16 %v8218_v1, %v8217_v8  ;;  %v8057_v23 = vunpack.i.l.bf16 %v13243_v51  ;;  %v3210_v8 = vsub.f32 %v11123_v61, %v11130_v9 }
 0x784   : > { %v4790_v55 = vpack.c.bf16 %v11544_v18, %v11554_v50  ;;  %8445 = vpow2.f32 %v3782_v60  ;;  %v3713_v36 = vsub.f32 %v13240_v32, %v3480_v45  ;;  %7472 = vmatprep.subr.bf16.mxu1 %v2095_v62  ;;  %v4030_v45 = vsel %vm2923_vm3, %v11086_v11, 0.0  ;;  %v13242_v60 = vld [vmem:[#allocation34_spill] sm:$0xff] }
 0x785   : > { %8447 = vpow2.f32 %v3784_v53  ;;  %7462 = vmatprep.mubr.msk.bf16.mxu0 %vm2923_vm3, %v4789_v27  ;;  %v8058_v53 = vunpack.i.h.bf16 %v13243_v51  ;;  %v13245_v27 = vld [vmem:[#allocation38_spill] sm:$0xff]  ;;  %v3304_v51 = vmul.f32 1.442695, %v3210_v8 }
 0x786   : > { %8449 = vpow2.f32 %v3796_v39  ;;  %v3798_v14 = vmul.f32 1.442695, %v3713_v36  ;;  %7463 = vmatmul.mubr.msk.bf16.vlgmr.msra.gmra.mrb[56].mxu0 %vm2923_vm3, %v4790_v55  ;;  %v3206_v39 = vsub.f32 %v10958_v28, %v10971_v26  ;;  %v4024_v28 = vsel %vm2923_vm3, %v11181_v49, 0.0 }
 0x787   : > { %8451 = vpow2.f32 %v3802_v2  ;;  %7473 = vmatpush3.bf16.msra.mxu1 %v2095_v62  ;;  %7487 = vmatpush3.bf16.msra.mxu0 %v10170_v20  ;;  %v11579_v20 = vpop.eup %8441  ;;  %v11588_v62 = vpop.permute.xlu0 %3544  ;;  %v13244_v2 = vld [vmem:[#allocation35_spill] sm:$0xff]  ;;  %v8063_v55 = vunpack.i.h.bf16 %v13245_v27  ;;  %v8062_v32 = vunpack.i.l.bf16 %v13245_v27  ;;  %v11598_v49 = vpack.c.bf16 %v8058_v53, %v8057_v23  ;;  %v4337_v27 = vld [vmem:[#allocation5 + $0x20] sm:$0xff] }
 0x788   : > { %8453 = vpow2.f32 %v3798_v14  ;;  %3634 = vperm.xlu0 %8250, %v11443_v40   ;;  %7474 = vmatprep.subr.bf16.mxu1 %v2096_v44  ;;  %v11584_v26 = vpop.eup %8443  ;;  %v3296_v11 = vmul.f32 1.442695, %v3206_v39  ;;  %v3300_v14 = vmul.f32 1.442695, %v3208_v19  ;;  %v3214_v53 = vsub.f32 %v10973_v41, %v10990_v58  ;;  %v4340_v58 = vld [vmem:[#allocation5 + $0x38] sm:$0xff] }
 0x789   : > { %8455 = vpow2.f32 %v3800_v35  ;;  %7488 = vmatprep.subr.bf16.mxu0 %v13242_v60  ;;  %4031 = vadd.xlane.f32.xlu1 %v4030_v45  ;;  %v11617_v45 = vpack.c.bf16 %v8063_v55, %v8062_v32  ;;  %v3216_v41 = vsub.f32 %v11273_v48, %v11279_v7  ;;  %v4721_v8 = vmul.f32 %v11143_v59, %v4337_v27  ;;  %v13254_v27 = vld [vmem:[#allocation140_spill] sm:$0xff] }
 0x78a   : > { %8457 = vpow2.f32 %v3296_v11  ;;  %v3891_v11 = vld [vmem:[#allocation4 + $0x38] sm:$0xff] }
 0x78b   : > { %7475 = vmatpush3.bf16.msra.mxu1 %v2096_v44  ;;  %7489 = vmatpush3.bf16.msra.mxu0 %v13242_v60  ;;  %v11621_v60 = vpop.permute.xlu0 %3494  ;;  %8459 = vpow2.f32 %v3300_v14  ;;  %v3955_v55 = vmul.f32 %v11056_v24, %v3891_v11  ;;  %v4724_v24 = vmul.f32 %v11354_v22, %v4340_v58  ;;  %v13251_v11 = vld [vmem:[#allocation171_spill] sm:$0xff]  ;;  %v13256_v58 = vld [vmem:[#allocation129_spill] sm:$0xff] }
 0x78c   : > { %3664 = vperm.xlu0 %8250, %v11455_v3   ;;  %7476 = vmatprep.subr.bf16.mxu1 %v2097_v0  ;;  %8461 = vpow2.f32 %v3304_v51 }
 0x78d   : > { %7490 = vmatprep.subr.bf16.mxu0 %v13244_v2  ;;  %4025 = vadd.xlane.f32.xlu1 %v4024_v28 }
 0x78e   : > { %v11591_v29 = vpop.eup %8445 }
 0x78f   : > { %v11595_v36 = vpop.eup %8447  ;;  %7477 = vmatpush3.bf16.msra.mxu1 %v2097_v0  ;;  %7491 = vmatpush3.bf16.msra.mxu0 %v13244_v2  ;;  %v4787_v47 = vpack.c.bf16 %v11591_v29, %v11579_v20  ;;  %v3212_v0 = vsub.f32 %v11012_v17, %v11025_v25  ;;  %v11637_v28 = vpop.permute.xlu0 %3534  ;;  %v3205_v17 = vsub.f32 %v10966_v43, %v10983_v52  ;;  %v4339_v25 = vld [vmem:[#allocation5 + $0x30] sm:$0xff]  ;;  %v3312_v2 = vmul.f32 1.442695, %v3214_v53 }
 0x790   : > { %v11602_v37 = vpop.eup %8449  ;;  %3654 = vperm.xlu0 %8250, %v11466_v13   ;;  %7492 = vmatprep.subr.bf16.mxu0 %v13246_v30  ;;  %v4788_v1 = vpack.c.bf16 %v11584_v26, %v11595_v36 }
 0x791   : > { %v11608_v35 = vpop.eup %8451  ;;  %7502 = vmatprep.subr.bf16.mxu1 %v11598_v49  ;;  %7450 = vmatprep.mubr.msk.bf16.mxu1 %vm2923_vm3, %v4787_v47  ;;  %v3308_v23 = vmul.f32 1.442695, %v3212_v0  ;;  %v4723_v47 = vmul.f32 %v11125_v38, %v4339_v25  ;;  %v3294_v52 = vmul.f32 1.442695, %v3205_v17  ;;  %v3218_v38 = vsub.f32 %v11132_v33, %v11141_v4  ;;  %v11666_v4 = vpop.permute.xlu1 %4454 }
 0x792   : > { %v11614_v44 = vpop.eup %8453  ;;  %7451 = vmatmul.mubr.msk.bf16.gmra.mrb[52].mxu1 %vm2923_vm3, %v4788_v1  ;;  %v13252_v17 = vsub.f32 %v13251_v11, %v11386_v34  ;;  %v13260_v34 = vld [vmem:[#allocation177_spill] sm:$0xff] }
 0x793   : > { %v11619_v39 = vpop.eup %8455  ;;  %7493 = vmatpush3.bf16.msra.mxu0 %v13246_v30  ;;  %v4791_v61 = vpack.c.bf16 %v11614_v44, %v11602_v37  ;;  %8463 = vpow2.f32 %v3308_v23  ;;  %v4338_v30 = vld [vmem:[#allocation5 + $0x28] sm:$0xff]  ;;  %v3320_v33 = vmul.f32 1.442695, %v3218_v38 }
 0x794   : > { %3684 = vperm.xlu0 %8250, %v11478_v46   ;;  %7518 = vmatprep.subr.bf16.mxu0 %v11617_v45  ;;  %v4792_v9 = vpack.c.bf16 %v11608_v35, %v11619_v39  ;;  %v11639_v19 = vpop.eup %8457  ;;  %8465 = vpow2.f32 %v3312_v2  ;;  %v3324_v25 = vmul.f32 1.442695, %v13252_v17  ;;  %v13338_v46 = vld [vmem:[#allocation156_spill] sm:$0xff] }
 0x795   : > { %7466 = vmatprep.mubr.msk.bf16.mxu0 %vm2923_vm3, %v4791_v61  ;;  %13247 = vst [vmem:[#allocation57_spill] sm:$0xff] %v11639_v19  ;;  %v11649_v43 = vpop.eup %8459  ;;  %v3316_v61 = vmul.f32 1.442695, %v3216_v41  ;;  %8467 = vpow2.f32 %v3294_v52  ;;  %v13261_v52 = vsub.f32 %v13260_v34, %v11432_v54  ;;  %v13268_v54 = vld [vmem:[#allocation172_spill] sm:$0xff]  ;;  %v13278_v34 = vld [vmem:[#allocation157_spill] sm:$0xff] }
 0x796   : > { %7467 = vmatmul.mubr.msk.bf16.gmra.mrb[60].mxu0 %vm2923_vm3, %v4792_v9  ;;  %13248 = vst [vmem:[#allocation62_spill] sm:$0xff] %v11649_v43  ;;  %v4722_v9 = vmul.f32 %v11359_v5, %v4338_v30  ;;  %v11660_v53 = vpop.eup %8461 }
 0x797   : > { %13249 = vst [vmem:[#allocation55_spill] sm:$0xff] %v11660_v53  ;;  %8469 = vpow2.f32 %v3316_v61 }
 0x798   : > { %3674 = vperm.xlu0 %8250, %v11490_v6   ;;  %8471 = vpow2.f32 %v3320_v33 }
 0x799   : > { %8473 = vpow2.f32 %v3324_v25 }
 0x79c   : > { %4529 = vperm.xlu0 %8250, %v11639_v19  }
 0x79d   : > { %v4035_v32 = vpop.xlane.xlu0 %4034  ;;  %v11669_v5 = vpop.eup %8463 }
 0x79e   : > { %3529 = vperm.xlu1 %8249, %v11017_v21   ;;  %v4211_v1 = vadd.f32 %v4035_v32, %v3955_v55  ;;  %13250 = vst [vmem:[#allocation58_spill] sm:$0xff] %v11669_v5  ;;  %v11675_v2 = vpop.eup %8465  ;;  %v11678_v55 = vpop.permute.xlu1 %4494  ;;  %v13257_v32 = vld [vmem:[#allocation124_spill] sm:$0xff] }
 0x79f   : > { %v7436_v14 = vpop.f32.mrb[52].mxu0  ;;  %13253 = vst [vmem:[#allocation68_spill] sm:$0xff] %v11675_v2  ;;  %v11681_v41 = vpop.eup %8467 }
 0x7a0   : > { %4276 = vst.msk [vmem:[#allocation4 + $0x38] sm:$0xff] %vm4268_vm4, %v4211_v1  ;;  %v5435_v48 = vadd.f32 %v7436_v14, %v4723_v47  ;;  %4539 = vperm.xlu0 %8250, %v11649_v43   ;;  %v4875_v7 = vpop.f32.mrb[53].mxu0  ;;  %13255 = vst [vmem:[#allocation69_spill] sm:$0xff] %v11681_v41  ;;  %v13258_v47 = vsub.f32 %v13256_v58, %v13257_v32  ;;  %v13274_v58 = vld [vmem:[#allocation155_spill] sm:$0xff] }
 0x7a1   : > { %v5433_v0 = vadd.f32 %v4875_v7, %v4721_v8  ;;  %v7437_v51 = vpop.f32.mrb[54].mxu0  ;;  %v11687_v1 = vpop.eup %8469  ;;  %v3332_v8 = vmul.f32 1.442695, %v13261_v52  ;;  %v13264_v7 = vld [vmem:[#allocation174_spill] sm:$0xff] }
 0x7a2   : > { %5499 = vst.msk [vmem:[#allocation5 + $0x30] sm:$0xff] %vm2146_vm2, %v5435_v48  ;;  %3569 = vperm.xlu1 %8249, %v11033_v63   ;;  %v5436_v59 = vadd.f32 %v7437_v51, %v4724_v24  ;;  %v4878_v22 = vpop.f32.mrb[55].mxu0  ;;  %v3328_v30 = vmul.f32 1.442695, %v13258_v47  ;;  %13259 = vst [vmem:[#allocation36_spill] sm:$0xff] %v11687_v1  ;;  %v11693_v14 = vpop.permute.xlu1 %4444  ;;  %v13262_v24 = vld [vmem:[#allocation47_spill] sm:$0xff]  ;;  %v13265_v38 = vsub.f32 %v13264_v7, %v11408_v42 }
 0x7a3   : > { %5497 = vst.msk [vmem:[#allocation5 + $0x20] sm:$0xff] %vm2146_vm2, %v5433_v0  ;;  %v5434_v23 = vadd.f32 %v4878_v22, %v4722_v9  ;;  %v11696_v48 = vpop.eup %8471  ;;  %v13266_v9 = vld [vmem:[#allocation151_spill] sm:$0xff]  ;;  %v13272_v42 = vld [vmem:[#allocation126_spill] sm:$0xff] }
 0x7a4   : > { %5500 = vst.msk [vmem:[#allocation5 + $0x38] sm:$0xff] %vm2146_vm2, %v5436_v59  ;;  %4549 = vperm.xlu0 %8250, %v11660_v53   ;;  %8475 = vpow2.f32 %v3328_v30  ;;  %13263 = vst [vmem:[#allocation67_spill] sm:$0xff] %v11696_v48  ;;  %v3336_v61 = vmul.f32 1.442695, %v13265_v38  ;;  %v11703_v0 = vpop.eup %8473  ;;  %v13269_v59 = vsub.f32 %v13268_v54, %v11397_v31  ;;  %v13273_v11 = vsub.f32 %v13272_v42, %v11377_v10  ;;  %v13276_v31 = vld [vmem:[#allocation179_spill] sm:$0xff] }
 0x7a5   : > { %5498 = vst.msk [vmem:[#allocation5 + $0x28] sm:$0xff] %vm2146_vm2, %v5434_v23  ;;  %8477 = vpow2.f32 %v3332_v8  ;;  %13267 = vst [vmem:[#allocation64_spill] sm:$0xff] %v11703_v0  ;;  %v13270_v23 = vld [vmem:[#allocation153_spill] sm:$0xff]  ;;  %v13277_v47 = vsub.f32 %v13276_v31, %v11443_v40  ;;  %v13280_v8 = vld [vmem:[#allocation176_spill] sm:$0xff] }
 0x7a6   : > { %3519 = vperm.xlu1 %8249, %v11048_v12   ;;  %v11705_v51 = vpop.permute.xlu1 %4484  ;;  %v3340_v22 = vmul.f32 1.442695, %v13269_v59  ;;  %8479 = vpow2.f32 %v3336_v61  ;;  %v3344_v17 = vmul.f32 1.442695, %v13273_v11  ;;  %v13281_v7 = vsub.f32 %v13280_v8, %v11419_v16  ;;  %v13282_v61 = vld [vmem:[#allocation159_spill] sm:$0xff]  ;;  %v13284_v40 = vld [vmem:[#allocation181_spill] sm:$0xff]  ;;  %v11748_v16 = vpop.permute.xlu0 %3524 }
 0x7a7   : > { %v3348_v30 = vmul.f32 1.442695, %v13277_v47  ;;  %v13285_v59 = vsub.f32 %v13284_v40, %v11455_v3  ;;  %v13286_v11 = vld [vmem:[#allocation161_spill] sm:$0xff]  ;;  %v13288_v31 = vld [vmem:[#allocation182_spill] sm:$0xff]  ;;  %v13290_v8 = vld [vmem:[#allocation163_spill] sm:$0xff] }
 0x7a8   : > { %4559 = vperm.xlu0 %8250, %v11669_v5   ;;  %8481 = vpow2.f32 %v3340_v22  ;;  %v3352_v38 = vmul.f32 1.442695, %v13281_v7  ;;  %v13289_v47 = vsub.f32 %v13288_v31, %v11466_v13  ;;  %v13292_v3 = vld [vmem:[#allocation131_spill] sm:$0xff]  ;;  %v13296_v13 = vld [vmem:[#allocation165_spill] sm:$0xff] }
 0x7a9   : > { %8483 = vpow2.f32 %v3344_v17  ;;  %v3360_v22 = vmul.f32 1.442695, %v13285_v59  ;;  %v3889_v31 = vld [vmem:[#allocation4 + $0x28] sm:$0xff] }
 0x7aa   : > { %3559 = vperm.xlu1 %8249, %v13254_v27   ;;  %v11718_v25 = vpop.permute.xlu1 %4474  ;;  %8485 = vpow2.f32 %v3348_v30  ;;  %v3356_v30 = vmul.f32 1.442695, %v13289_v47 }
 0x7ab   : > { %8487 = vpow2.f32 %v3352_v38  ;;  %v13293_v38 = vld [vmem:[#allocation130_spill] sm:$0xff] }
 0x7ac   : > { %4569 = vperm.xlu0 %8250, %v11675_v2   ;;  %8489 = vpow2.f32 %v3360_v22  ;;  %v3207_v40 = vsub.f32 %v13293_v38, %v13292_v3  ;;  %v13298_v3 = vld [vmem:[#allocation138_spill] sm:$0xff]  ;;  %v13319_v2 = vld [vmem:[#allocation71_spill] sm:$0xff] }
 0x7ad   : > { %8491 = vpow2.f32 %v3356_v30  ;;  %v3209_v38 = vsub.f32 %v13298_v3, %v11048_v12  ;;  %v13307_v3 = vld [vmem:[#allocation134_spill] sm:$0xff] }
 0x7ae   : > { %4524 = vperm.xlu1 %8249, %v11681_v41   ;;  %v11712_v33 = vpop.eup %8475  ;;  %v11730_v10 = vpop.permute.xlu1 %4514 }
 0x7af   : > { %13271 = vst [vmem:[#allocation65_spill] sm:$0xff] %v11712_v33  ;;  %v11721_v32 = vpop.eup %8477  ;;  %v3302_v5 = vmul.f32 1.442695, %v3209_v38  ;;  %v13311_v38 = vld [vmem:[#allocation77_spill] sm:$0xff] }
 0x7b0   : > { %4579 = vperm.xlu0 %8250, %v11687_v1   ;;  %13275 = vst [vmem:[#allocation70_spill] sm:$0xff] %v11721_v32  ;;  %v11728_v52 = vpop.eup %8479 }
 0x7b1   : > { %13279 = vst [vmem:[#allocation44_spill] sm:$0xff] %v11728_v52 }
 0x7b2   : > { %3589 = vperm.xlu1 %8249, %v13262_v24   ;;  %v11737_v54 = vpop.eup %8481  ;;  %v11743_v42 = vpop.permute.xlu1 %4464 }
 0x7b3   : > { %13283 = vst [vmem:[#allocation63_spill] sm:$0xff] %v11737_v54  ;;  %v11746_v17 = vpop.eup %8483 }
 0x7b4   : > { %4589 = vperm.xlu0 %8250, %v11696_v48   ;;  %13287 = vst [vmem:[#allocation48_spill] sm:$0xff] %v11746_v17  ;;  %v11755_v7 = vpop.eup %8485 }
 0x7b5   : > { %13291 = vst [vmem:[#allocation66_spill] sm:$0xff] %v11755_v7  ;;  %v11768_v47 = vpop.eup %8487 }
 0x7b6   : > { %3629 = vperm.xlu1 %8249, %v13266_v9   ;;  %v11759_v59 = vpop.permute.xlu1 %4504  ;;  %13297 = vst [vmem:[#allocation45_spill] sm:$0xff] %v11768_v47  ;;  %v11776_v48 = vpop.eup %8489 }
 0x7b7   : > { %13302 = vst [vmem:[#allocation34_spill] sm:$0xff] %v11776_v48 }
 0x7b8   : > { %4599 = vperm.xlu0 %8250, %v11703_v0   ;;  %v11765_v0 = vpop.permute.xlu0 %3564 }
 0x7ba   : > { %3579 = vperm.xlu1 %8249, %v13270_v23  }
 0x7bc   : > { %4609 = vperm.xlu0 %8250, %v11712_v33   ;;  %v13299_v33 = vld [vmem:[#allocation111_spill] sm:$0xff] }
 0x7be   : > { %3619 = vperm.xlu1 %8249, %v13274_v58  }
 0x7c0   : > { %4619 = vperm.xlu0 %8250, %v11721_v32   ;;  %v3885_v32 = vld [vmem:[#allocation4 + $0x8] sm:$0xff] }
 0x7c1   : > { %v3949_v1 = vmul.f32 %v13299_v33, %v3885_v32  ;;  %v13304_v32 = vld [vmem:[#allocation133_spill] sm:$0xff] }
 0x7c2   : > { %3609 = vperm.xlu1 %8249, %v13278_v34  }
 0x7c4   : > { %4629 = vperm.xlu0 %8250, %v11728_v52   ;;  %v13294_v52 = vld [vmem:[#allocation185_spill] sm:$0xff] }
 0x7c5   : > { %v13295_v22 = vsub.f32 %v13294_v52, %v11490_v6  ;;  %v13300_v6 = vld [vmem:[#allocation141_spill] sm:$0xff] }
 0x7c6   : > { %3649 = vperm.xlu1 %8249, %v13282_v61   ;;  %v3953_v52 = vmul.f32 %v13300_v6, %v3889_v31  ;;  %v13306_v31 = vld [vmem:[#allocation135_spill] sm:$0xff]  ;;  %v13308_v6 = vld [vmem:[#allocation169_spill] sm:$0xff] }
 0x7c8   : > { %4639 = vperm.xlu0 %8250, %v11737_v54   ;;  %v3364_v54 = vmul.f32 1.442695, %v13295_v22  ;;  %v13301_v22 = vld [vmem:[#allocation167_spill] sm:$0xff] }
 0x7ca   : > { %3599 = vperm.xlu1 %8249, %v13286_v11   ;;  %8493 = vpow2.f32 %v3364_v54 }
 0x7cc   : > { %4649 = vperm.xlu0 %8250, %v11746_v17   ;;  %v3298_v17 = vmul.f32 1.442695, %v3207_v40  ;;  %v13303_v40 = vld [vmem:[#allocation136_spill] sm:$0xff] }
 0x7cd   : > { %v3211_v53 = vsub.f32 %v13303_v40, %v11017_v21 }
 0x7ce   : > { %3639 = vperm.xlu1 %8249, %v13290_v8   ;;  %8495 = vpow2.f32 %v3298_v17  ;;  %v11788_v17 = vpop.eup %8491 }
 0x7cf   : > { %13309 = vst [vmem:[#allocation37_spill] sm:$0xff] %v11788_v17  ;;  %v3306_v21 = vmul.f32 1.442695, %v3211_v53  ;;  %8497 = vpow2.f32 %v3302_v5 }
 0x7d0   : > { %4659 = vperm.xlu0 %8250, %v11755_v7  }
 0x7d1   : > { %8499 = vpow2.f32 %v3306_v21  ;;  %v3726_v21 = vsub.f32 %v13319_v2, %v11588_v62 }
 0x7d2   : > { %3669 = vperm.xlu1 %8249, %v13296_v13  }
 0x7d3   : > { %v3824_v62 = vmul.f32 1.442695, %v3726_v21 }
 0x7d4   : > { %4669 = vperm.xlu0 %8250, %v11768_v47   ;;  %v4017_v30 = vpop.xlane.xlu1 %4016  ;;  %v11799_v47 = vpop.eup %8493 }
 0x7d5   : > { %v4205_v7 = vadd.f32 %v4017_v30, %v3949_v1  ;;  %v13305_v1 = vld [vmem:[#allocation132_spill] sm:$0xff]  ;;  %v3213_v30 = vsub.f32 %v13307_v3, %v13306_v31  ;;  %v13313_v31 = vld [vmem:[#allocation115_spill] sm:$0xff]  ;;  %13314 = vst [vmem:[#allocation35_spill] sm:$0xff] %v11799_v47 }
 0x7d6   : > { %3659 = vperm.xlu1 %8249, %v13301_v22   ;;  %v4029_v43 = vpop.xlane.xlu0 %4028  ;;  %v3215_v54 = vsub.f32 %v13305_v1, %v13304_v32 }
 0x7d7   : > { %4270 = vst.msk [vmem:[#allocation4 + $0x8] sm:$0xff] %vm4268_vm4, %v4205_v7  ;;  %v4209_v12 = vadd.f32 %v4029_v43, %v3953_v52  ;;  %v13310_v7 = vld [vmem:[#allocation76_spill] sm:$0xff]  ;;  %v3310_v1 = vmul.f32 1.442695, %v3213_v30 }
 0x7d8   : > { %4689 = vperm.xlu0 %8250, %v11776_v48   ;;  %v3510_v33 = vpop.permute.xlu1 %3509  ;;  %v3716_v43 = vsub.f32 %v13310_v7, %v11621_v60  ;;  %v3314_v32 = vmul.f32 1.442695, %v3215_v54  ;;  %v13315_v60 = vld [vmem:[#allocation72_spill] sm:$0xff]  ;;  %v13316_v7 = vld [vmem:[#allocation73_spill] sm:$0xff]  ;;  %v11805_v30 = vpop.eup %8495 }
 0x7d9   : > { %4274 = vst.msk [vmem:[#allocation4 + $0x28] sm:$0xff] %vm4268_vm4, %v4209_v12  ;;  %v3719_v52 = vsub.f32 %v13311_v38, %v3510_v33  ;;  %v13312_v12 = vld [vmem:[#allocation75_spill] sm:$0xff]  ;;  %v3724_v5 = vsub.f32 %v13315_v60, %v11637_v28  ;;  %13317 = vst [vmem:[#allocation38_spill] sm:$0xff] %v11805_v30 }
 0x7da   : > { %3689 = vperm.xlu1 %8249, %v13308_v6   ;;  %v3718_v48 = vsub.f32 %v13312_v12, %v11567_v15  ;;  %v3804_v53 = vmul.f32 1.442695, %v3716_v43  ;;  %8501 = vpow2.f32 %v3314_v32  ;;  %v13318_v15 = vld [vmem:[#allocation78_spill] sm:$0xff]  ;;  %v13320_v28 = vld [vmem:[#allocation139_spill] sm:$0xff] }
 0x7db   : > { %v3810_v33 = vmul.f32 1.442695, %v3719_v52  ;;  %8503 = vpow2.f32 %v3310_v1  ;;  %v3217_v52 = vsub.f32 %v13320_v28, %v13254_v27 }
 0x7dc   : > { %4679 = vperm.xlu0 %8250, %v11788_v17   ;;  %v3550_v40 = vpop.permute.xlu1 %3549  ;;  %v3808_v17 = vmul.f32 1.442695, %v3718_v48  ;;  %8505 = vpow2.f32 %v3804_v53  ;;  %v13322_v48 = vld [vmem:[#allocation74_spill] sm:$0xff] }
 0x7dd   : > { %v3727_v38 = vsub.f32 %v13316_v7, %v3550_v40  ;;  %v3820_v40 = vmul.f32 1.442695, %v3724_v5  ;;  %8507 = vpow2.f32 %v3810_v33  ;;  %v3318_v53 = vmul.f32 1.442695, %v3217_v52 }
 0x7de   : > { %3679 = vperm.xlu1 %8249, %v13313_v31   ;;  %v11797_v3 = vpop.permute.xlu0 %3514 }
 0x7df   : > { %v3826_v7 = vmul.f32 1.442695, %v3727_v38 }
 0x7e0   : > { %4699 = vperm.xlu0 %8250, %v11799_v47   ;;  %v3500_v54 = vpop.permute.xlu1 %3499  ;;  %v11815_v47 = vpop.eup %8497 }
 0x7e1   : > { %v3717_v12 = vsub.f32 %v13318_v15, %v3500_v54  ;;  %13321 = vst [vmem:[#allocation43_spill] sm:$0xff] %v11815_v47  ;;  %v13324_v54 = vld [vmem:[#allocation137_spill] sm:$0xff]  ;;  %v11823_v33 = vpop.eup %8499 }
 0x7e2   : > { %4534 = vperm.xlu1 %8249, %v11805_v30   ;;  %v11811_v43 = vpop.permute.xlu0 %3554  ;;  %v3219_v27 = vsub.f32 %v13324_v54, %v11033_v63  ;;  %13325 = vst [vmem:[#allocation140_spill] sm:$0xff] %v11823_v33 }
 0x7e3   : > { %v3806_v60 = vmul.f32 1.442695, %v3717_v12  ;;  %v13327_v12 = vld [vmem:[#allocation152_spill] sm:$0xff] }
 0x7e4   : > { %v3540_v32 = vpop.permute.xlu1 %3539  ;;  %v3322_v15 = vmul.f32 1.442695, %v3219_v27  ;;  %v3221_v21 = vsub.f32 %v13327_v12, %v13270_v23 }
 0x7e5   : > { %8509 = vpow2.f32 %v3806_v60  ;;  %v3725_v1 = vsub.f32 %v13322_v48, %v3540_v32 }
 0x7e6   : > { %8511 = vpow2.f32 %v3808_v17  ;;  %4544 = vperm.xlu1 %8249, %v11815_v47   ;;  %v11819_v2 = vpop.permute.xlu0 %4519  ;;  %v11828_v17 = vpop.eup %8501 }
 0x7e7   : > { %13323 = vst [vmem:[#allocation171_spill] sm:$0xff] %v11819_v2  ;;  %8513 = vpow2.f32 %v3820_v40  ;;  %v3822_v5 = vmul.f32 1.442695, %v3725_v1  ;;  %13326 = vst [vmem:[#allocation129_spill] sm:$0xff] %v11828_v17  ;;  %v11832_v63 = vpop.eup %8503  ;;  %v13329_v40 = vld [vmem:[#allocation39_spill] sm:$0xff]  ;;  %v13330_v1 = vld [vmem:[#allocation46_spill] sm:$0xff] }
 0x7e8   : > { %8515 = vpow2.f32 %v3826_v7  ;;  %13328 = vst [vmem:[#allocation124_spill] sm:$0xff] %v11832_v63  ;;  %v11834_v28 = vpop.eup %8505  ;;  %v8118_v60 = vunpack.i.h.bf16 %v13329_v40  ;;  %v8117_v48 = vunpack.i.l.bf16 %v13329_v40  ;;  %v3223_v23 = vsub.f32 %v13330_v1, %v13262_v24 }
 0x7e9   : > { %8517 = vpow2.f32 %v3822_v5  ;;  %v11836_v52 = vpop.eup %8507  ;;  %v13332_v5 = vld [vmem:[#allocation41_spill] sm:$0xff] }
 0x7ea   : > { %8519 = vpow2.f32 %v3824_v62  ;;  %4554 = vperm.xlu1 %8249, %v11823_v33   ;;  %v11826_v38 = vpop.permute.xlu0 %3584  ;;  %v3326_v62 = vmul.f32 1.442695, %v3221_v21  ;;  %v8123_v12 = vunpack.i.h.bf16 %v13332_v5  ;;  %v8122_v19 = vunpack.i.l.bf16 %v13332_v5  ;;  %v13334_v5 = vld [vmem:[#allocation160_spill] sm:$0xff] }
 0x7eb   : > { %8521 = vpow2.f32 %v3318_v53  ;;  %v3330_v33 = vmul.f32 1.442695, %v3223_v23  ;;  %v2103_v6 = vpack.c.bf16 %v8118_v60, %v8117_v48 }
 0x7ec   : > { %8523 = vpow2.f32 %v3322_v15  ;;  %v13333_v15 = vld [vmem:[#allocation49_spill] sm:$0xff]  ;;  %v2107_v23 = vpack.c.bf16 %v8123_v12, %v8122_v19 }
 0x7ed   : > { %v8178_v47 = vunpack.i.h.bf16 %v13333_v15  ;;  %v8177_v24 = vunpack.i.l.bf16 %v13333_v15  ;;  %8525 = vpow2.f32 %v3326_v62  ;;  %v13336_v62 = vld [vmem:[#allocation51_spill] sm:$0xff] }
 0x7ee   : > { %4564 = vperm.xlu1 %8249, %v11832_v63   ;;  %v11840_v7 = vpop.permute.xlu0 %3624  ;;  %v3225_v63 = vsub.f32 %v13334_v5, %v13286_v11  ;;  %v8183_v30 = vunpack.i.h.bf16 %v13336_v62  ;;  %v8182_v11 = vunpack.i.l.bf16 %v13336_v62  ;;  %8527 = vpow2.f32 %v3330_v33  ;;  %v13340_v62 = vld [vmem:[#allocation40_spill] sm:$0xff] }
 0x7ef   : > { %v11842_v32 = vpop.eup %8509  ;;  %v2104_v48 = vpack.c.bf16 %v8178_v47, %v8177_v24  ;;  %v8067_v47 = vunpack.i.l.bf16 %v13340_v62  ;;  %v13341_v24 = vld [vmem:[#allocation52_spill] sm:$0xff] }
 0x7f0   : > { %v11847_v54 = vpop.eup %8511  ;;  %v4793_v27 = vpack.c.bf16 %v11842_v32, %v11834_v28  ;;  %v3334_v19 = vmul.f32 1.442695, %v3225_v63  ;;  %v8242_v33 = vunpack.i.l.bf16 %v13341_v24 }
 0x7f1   : > { %v11851_v53 = vpop.eup %8513  ;;  %v4794_v2 = vpack.c.bf16 %v11836_v52, %v11847_v54 }
 0x7f2   : > { %13331 = vst [vmem:[#allocation177_spill] sm:$0xff] %v11851_v53  ;;  %v11857_v40 = vpop.eup %8515  ;;  %4574 = vperm.xlu1 %8249, %v11828_v17   ;;  %7478 = vmatprep.mubr.msk.bf16.mxu1 %vm2923_vm3, %v4793_v27  ;;  %v11863_v21 = vpop.permute.xlu0 %3574  ;;  %8529 = vpow2.f32 %v3334_v19 }
 0x7f3   : > { %v11865_v1 = vpop.eup %8517  ;;  %7479 = vmatmul.mubr.msk.bf16.vlgmr.msra.gmra.mrb[56].mxu1 %vm2923_vm3, %v4794_v2  ;;  %v13337_v2 = vld [vmem:[#allocation50_spill] sm:$0xff] }
 0x7f4   : > { %v11870_v41 = vpop.eup %8519  ;;  %7503 = vmatpush3.bf16.msra.mxu1 %v11598_v49  ;;  %v4797_v15 = vpack.c.bf16 %v11865_v1, %v11851_v53  ;;  %v8238_v60 = vunpack.i.h.bf16 %v13337_v2  ;;  %v8237_v5 = vunpack.i.l.bf16 %v13337_v2  ;;  %v3227_v53 = vsub.f32 %v13338_v46, %v13278_v34 }
 0x7f5   : > { %v11875_v27 = vpop.eup %8521  ;;  %v4798_v17 = vpack.c.bf16 %v11857_v40, %v11870_v41  ;;  %7504 = vmatprep.subr.bf16.mxu1 %v2103_v6  ;;  %v2108_v34 = vpack.c.bf16 %v8183_v30, %v8182_v11 }
 0x7f6   : > { %13335 = vst [vmem:[#allocation47_spill] sm:$0xff] %v11875_v27  ;;  %4584 = vperm.xlu1 %8249, %v11875_v27   ;;  %7494 = vmatprep.mubr.msk.bf16.mxu0 %vm2923_vm3, %v4797_v15  ;;  %v11884_v49 = vpop.permute.xlu0 %3614  ;;  %v11891_v12 = vpop.eup %8523  ;;  %v8068_v27 = vunpack.i.h.bf16 %v13340_v62  ;;  %v8243_v15 = vunpack.i.h.bf16 %v13341_v24  ;;  %v2105_v63 = vpack.c.bf16 %v8238_v60, %v8237_v5  ;;  %v13343_v62 = vld [vmem:[#allocation61_spill] sm:$0xff] }
 0x7f7   : > { %7495 = vmatmul.mubr.msk.bf16.vlgmr.msra.gmra.mrb[64].mxu0 %vm2923_vm3, %v4798_v17  ;;  %13339 = vst [vmem:[#allocation174_spill] sm:$0xff] %v11891_v12  ;;  %v3338_v17 = vmul.f32 1.442695, %v3227_v53  ;;  %v11902_v2 = vpop.eup %8525  ;;  %v4045_v24 = vsel %vm2923_vm3, %v13343_v62, 0.0  ;;  %v13350_v62 = vld [vmem:[#allocation164_spill] sm:$0xff] }
 0x7f8   : > { %7505 = vmatpush3.bf16.msra.mxu1 %v2103_v6  ;;  %7519 = vmatpush3.bf16.msra.mxu0 %v11617_v45  ;;  %v13342_v6 = vld [vmem:[#allocation154_spill] sm:$0xff]  ;;  %v11909_v30 = vpack.c.bf16 %v8068_v27, %v8067_v47  ;;  %v11913_v60 = vpop.eup %8527  ;;  %v4069_v27 = vsel %vm2923_vm3, %v11544_v18, 0.0 }
 0x7f9   : > { %7506 = vmatprep.subr.bf16.mxu1 %v2104_v48  ;;  %7520 = vmatprep.subr.bf16.mxu0 %v2107_v23  ;;  %v3229_v45 = vsub.f32 %v13342_v6, %v13274_v58  ;;  %v13344_v58 = vld [vmem:[#allocation150_spill] sm:$0xff]  ;;  %8531 = vpow2.f32 %v3338_v17 }
 0x7fa   : > { %4594 = vperm.xlu1 %8249, %v11891_v12   ;;  %v11898_v46 = vpop.permute.xlu0 %3604  ;;  %v3231_v53 = vsub.f32 %v13344_v58, %v13266_v9  ;;  %v13345_v9 = vld [vmem:[#allocation162_spill] sm:$0xff] }
 0x7fb   : > { %v3342_v11 = vmul.f32 1.442695, %v3229_v45  ;;  %v3233_v19 = vsub.f32 %v13345_v9, %v13290_v8  ;;  %v4063_v8 = vsel %vm2923_vm3, %v11550_v57, 0.0  ;;  %v3890_v9 = vld [vmem:[#allocation4 + $0x30] sm:$0xff] }
 0x7fc   : > { %7507 = vmatpush3.bf16.msra.mxu1 %v2104_v48  ;;  %7521 = vmatpush3.bf16.msra.mxu0 %v2107_v23  ;;  %v2109_v23 = vpack.c.bf16 %v8243_v15, %v8242_v33  ;;  %v3346_v5 = vmul.f32 1.442695, %v3231_v53  ;;  %v11923_v47 = vpop.eup %8529  ;;  %v13347_v15 = vld [vmem:[#allocation59_spill] sm:$0xff]  ;;  %v4057_v53 = vsel %vm2923_vm3, %v11584_v26, 0.0  ;;  %v13352_v26 = vld [vmem:[#allocation170_spill] sm:$0xff] }
 0x7fd   : > { %7508 = vmatprep.subr.bf16.mxu1 %v2105_v63  ;;  %7522 = vmatprep.subr.bf16.mxu0 %v2108_v34  ;;  %8533 = vpow2.f32 %v3342_v11  ;;  %13346 = vst [vmem:[#allocation151_spill] sm:$0xff] %v11923_v47  ;;  %v4039_v33 = vsel %vm2923_vm3, %v13347_v15, 0.0  ;;  %v3350_v6 = vmul.f32 1.442695, %v3233_v19  ;;  %v3241_v15 = vsub.f32 %v13352_v26, %v13313_v31  ;;  %v13356_v31 = vld [vmem:[#allocation113_spill] sm:$0xff] }
 0x7fe   : > { %4604 = vperm.xlu1 %8249, %v11902_v2   ;;  %v11907_v12 = vpop.permute.xlu0 %3644  ;;  %8535 = vpow2.f32 %v3346_v5  ;;  %v13358_v26 = vld [vmem:[#allocation85_spill] sm:$0xff] }
 0x7ff   : > { %4046 = vadd.xlane.f32.xlu0 %v4045_v24  ;;  %8537 = vpow2.f32 %v3350_v6  ;;  %v3239_v24 = vsub.f32 %v13350_v62, %v13296_v13  ;;  %v4081_v13 = vsel %vm2923_vm3, %v11608_v35, 0.0  ;;  %v3888_v35 = vld [vmem:[#allocation4 + $0x20] sm:$0xff] }
 0x800   : > { %7509 = vmatpush3.bf16.msra.mxu1 %v2105_v63  ;;  %7523 = vmatpush3.bf16.msra.mxu0 %v2108_v34  ;;  %v13348_v34 = vld [vmem:[#allocation158_spill] sm:$0xff] }
 0x801   : > { %7524 = vmatprep.subr.bf16.mxu0 %v2109_v23  ;;  %7534 = vmatprep.subr.bf16.mxu1 %v11909_v30  ;;  %v3235_v18 = vsub.f32 %v13348_v34, %v13282_v61  ;;  %v3362_v11 = vmul.f32 1.442695, %v3239_v24 }
 0x802   : > { %4614 = vperm.xlu1 %8249, %v11913_v60   ;;  %v11919_v48 = vpop.permute.xlu0 %3594 }
 0x803   : > { %4070 = vadd.xlane.f32.xlu0 %v4069_v27  ;;  %v11932_v17 = vpop.eup %8531  ;;  %v3354_v63 = vmul.f32 1.442695, %v3235_v18 }
 0x804   : > { %7525 = vmatpush3.bf16.msra.mxu0 %v2109_v23  ;;  %13349 = vst [vmem:[#allocation172_spill] sm:$0xff] %v11932_v17  ;;  %v13351_v23 = vld [vmem:[#allocation166_spill] sm:$0xff] }
 0x805   : > { %8539 = vpow2.f32 %v3354_v63  ;;  %v3237_v57 = vsub.f32 %v13351_v23, %v13301_v22  ;;  %v13354_v22 = vld [vmem:[#allocation112_spill] sm:$0xff]  ;;  %v3366_v63 = vmul.f32 1.442695, %v3241_v15  ;;  %v4075_v23 = vsel %vm2923_vm3, %v11614_v44, 0.0 }
 0x806   : > { %4624 = vperm.xlu1 %8249, %v11923_v47   ;;  %8541 = vpow2.f32 %v3362_v11  ;;  %v3954_v34 = vmul.f32 %v13354_v22, %v3890_v9 }
 0x807   : > { %4040 = vadd.xlane.f32.xlu0 %v4039_v33  ;;  %v11930_v45 = vpop.permute.xlu0 %3634  ;;  %v11941_v61 = vpop.eup %8533  ;;  %v3358_v19 = vmul.f32 1.442695, %v3237_v57 }
 0x808   : > { %v11950_v5 = vpop.eup %8535 }
 0x809   : > { %v11957_v33 = vpop.eup %8537  ;;  %8543 = vpow2.f32 %v3358_v19  ;;  %v4093_v19 = vsel %vm2923_vm3, %v11836_v52, 0.0 }
 0x80a   : > { %4634 = vperm.xlu1 %8249, %v11932_v17   ;;  %13353 = vst [vmem:[#allocation153_spill] sm:$0xff] %v11957_v33  ;;  %8545 = vpow2.f32 %v3366_v63  ;;  %v4117_v63 = vsel %vm2923_vm3, %v11857_v40, 0.0  ;;  %v4087_v40 = vsel %vm2923_vm3, %v11842_v32, 0.0 }
 0x80b   : > { %4064 = vadd.xlane.f32.xlu0 %v4063_v8  ;;  %v11939_v58 = vpop.permute.xlu0 %3664  ;;  %v4051_v8 = vsel %vm2923_vm3, %v11591_v29, 0.0 }
 0x80e   : > { %4644 = vperm.xlu1 %8249, %v11941_v61  }
 0x80f   : > { %4058 = vadd.xlane.f32.xlu0 %v4057_v53  ;;  %v11948_v27 = vpop.permute.xlu0 %3654  ;;  %v11965_v24 = vpop.eup %8539  ;;  %v3952_v53 = vmul.f32 %v13356_v31, %v3888_v35  ;;  %v13362_v31 = vld [vmem:[#allocation83_spill] sm:$0xff] }
 0x810   : > { %13355 = vst [vmem:[#allocation126_spill] sm:$0xff] %v11965_v24 }
 0x812   : > { %4654 = vperm.xlu1 %8249, %v11950_v5  }
 0x813   : > { %4082 = vadd.xlane.f32.xlu0 %v4081_v13  ;;  %v11960_v18 = vpop.permute.xlu0 %3684  ;;  %v11974_v13 = vpop.eup %8541 }
 0x814   : > { %13357 = vst [vmem:[#allocation155_spill] sm:$0xff] %v11974_v13  ;;  %v11981_v22 = vpop.eup %8543 }
 0x815   : > { %13359 = vst [vmem:[#allocation179_spill] sm:$0xff] %v11981_v22 }
 0x816   : > { %v4032_v6 = vpop.xlane.xlu1 %4031  ;;  %4664 = vperm.xlu1 %8249, %v11957_v33   ;;  %v13399_v33 = vld [vmem:[#allocation122_spill] sm:$0xff] }
 0x817   : > { %v4210_v62 = vadd.f32 %v4032_v6, %v3954_v34  ;;  %4052 = vadd.xlane.f32.xlu0 %v4051_v8  ;;  %v11972_v29 = vpop.permute.xlu0 %3674  ;;  %v13360_v34 = vld [vmem:[#allocation84_spill] sm:$0xff] }
 0x818   : > { %v3720_v6 = vsub.f32 %v13360_v34, %v11797_v3  ;;  %v13364_v3 = vld [vmem:[#allocation80_spill] sm:$0xff] }
 0x819   : > { %4275 = vst.msk [vmem:[#allocation4 + $0x30] sm:$0xff] %vm4268_vm4, %v4210_v62  ;;  %v13361_v62 = vld [vmem:[#allocation81_spill] sm:$0xff] }
 0x81a   : > { %v4026_v11 = vpop.xlane.xlu1 %4025  ;;  %4674 = vperm.xlu1 %8249, %v11965_v24  }
 0x81b   : > { %v4208_v57 = vadd.f32 %v4026_v11, %v3952_v53  ;;  %4076 = vadd.xlane.f32.xlu0 %v4075_v23  ;;  %v11985_v8 = vpop.permute.xlu0 %4529  ;;  %v3722_v53 = vsub.f32 %v13362_v31, %v11748_v16  ;;  %v11993_v11 = vpop.eup %8545  ;;  %v13366_v16 = vld [vmem:[#allocation79_spill] sm:$0xff] }
 0x81c   : > { %13363 = vst [vmem:[#allocation157_spill] sm:$0xff] %v11993_v11  ;;  %v3730_v34 = vsub.f32 %v13366_v16, %v11765_v0  ;;  %v13369_v0 = vld [vmem:[#allocation91_spill] sm:$0xff] }
 0x81d   : > { %4273 = vst.msk [vmem:[#allocation4 + $0x20] sm:$0xff] %vm4268_vm4, %v4208_v57  ;;  %v3812_v57 = vmul.f32 1.442695, %v3720_v6 }
 0x81e   : > { %v3530_v9 = vpop.permute.xlu1 %3529  ;;  %4694 = vperm.xlu1 %8249, %v11974_v13   ;;  %v3832_v31 = vmul.f32 1.442695, %v3730_v34  ;;  %v13372_v34 = vld [vmem:[#allocation93_spill] sm:$0xff] }
 0x81f   : > { %v3723_v15 = vsub.f32 %v13358_v26, %v3530_v9  ;;  %4094 = vadd.xlane.f32.xlu0 %v4093_v19  ;;  %v3728_v9 = vsub.f32 %v13364_v3, %v11811_v43  ;;  %v13365_v26 = vld [vmem:[#allocation86_spill] sm:$0xff]  ;;  %v3734_v3 = vsub.f32 %v13369_v0, %v11826_v38 }
 0x821   : > { %v3818_v44 = vmul.f32 1.442695, %v3723_v15 }
 0x822   : > { %v3570_v35 = vpop.permute.xlu1 %3569  ;;  %4684 = vperm.xlu1 %8249, %v11981_v22   ;;  %v4060_v22 = vsel %vm2923_vm3, %v11539_v56, 0.0 }
 0x823   : > { %8547 = vpow2.f32 %v3818_v44  ;;  %v3731_v52 = vsub.f32 %v13361_v62, %v3570_v35  ;;  %4118 = vadd.xlane.f32.xlu0 %v4117_v63  ;;  %v3816_v44 = vmul.f32 1.442695, %v3722_v53  ;;  %v12003_v35 = vpop.permute.xlu0 %4539  ;;  %v3828_v63 = vmul.f32 1.442695, %v3728_v9 }
 0x824   : > { %13367 = vst [vmem:[#allocation176_spill] sm:$0xff] %v12003_v35  ;;  %v4111_v62 = vsel %vm2923_vm3, %v11865_v1, 0.0  ;;  %v13384_v35 = vld [vmem:[#allocation97_spill] sm:$0xff] }
 0x825   : > { %v3834_v23 = vmul.f32 1.442695, %v3731_v52  ;;  %v13368_v52 = vld [vmem:[#allocation82_spill] sm:$0xff] }
 0x826   : > { %v3520_v19 = vpop.permute.xlu1 %3519  ;;  %4704 = vperm.xlu1 %8249, %v11993_v11  }
 0x827   : > { %8549 = vpow2.f32 %v3834_v23  ;;  %v3721_v15 = vsub.f32 %v13365_v26, %v3520_v19  ;;  %4088 = vadd.xlane.f32.xlu0 %v4087_v40  ;;  %v12010_v19 = vpop.permute.xlu0 %4549  ;;  %v13371_v40 = vld [vmem:[#allocation87_spill] sm:$0xff] }
 0x828   : > { %8551 = vpow2.f32 %v3812_v57  ;;  %13370 = vst [vmem:[#allocation159_spill] sm:$0xff] %v12010_v19  ;;  %v3742_v26 = vsub.f32 %v13371_v40, %v11840_v7  ;;  %v13387_v19 = vld [vmem:[#allocation96_spill] sm:$0xff] }
 0x829   : > { %v3814_v6 = vmul.f32 1.442695, %v3721_v15  ;;  %v3840_v15 = vmul.f32 1.442695, %v3734_v3 }
 0x82a   : > { %v3560_v43 = vpop.permute.xlu1 %3559 }
 0x82b   : > { %8553 = vpow2.f32 %v3814_v6  ;;  %v3729_v32 = vsub.f32 %v13368_v52, %v3560_v43  ;;  %4112 = vadd.xlane.f32.xlu0 %v4111_v62  ;;  %v3856_v62 = vmul.f32 1.442695, %v3742_v26 }
 0x82c   : > { %8555 = vpow2.f32 %v3816_v44 }
 0x82d   : > { %v8548_v23 = vpop.eup %8547  ;;  %v3830_v53 = vmul.f32 1.442695, %v3729_v32  ;;  %8557 = vpow2.f32 %v3828_v63  ;;  %v12021_v63 = vpop.permute.xlu0 %4559 }
 0x82e   : > { %v12012_v57 = vpop.permute.xlu1 %4524  ;;  %v4105_v9 = vsel %vm2923_vm3, %v8548_v23, 0.0 }
 0x82f   : > { %8559 = vpow2.f32 %v3830_v53  ;;  %4106 = vadd.xlane.f32.xlu0 %v4105_v9  ;;  %v13374_v9 = vld [vmem:[#allocation89_spill] sm:$0xff] }
 0x830   : > { %8561 = vpow2.f32 %v3832_v31  ;;  %v13373_v31 = vld [vmem:[#allocation92_spill] sm:$0xff] }
 0x831   : > { %v8550_v1 = vpop.eup %8549  ;;  %8563 = vpow2.f32 %v3840_v15  ;;  %v3732_v7 = vsub.f32 %v13373_v31, %v11863_v21 }
 0x832   : > { %v3590_v44 = vpop.permute.xlu1 %3589  ;;  %v4129_v16 = vsel %vm2923_vm3, %v8550_v1, 0.0  ;;  %v12019_v38 = vpop.eup %8551 }
 0x833   : > { %v3735_v6 = vsub.f32 %v13372_v34, %v3590_v44  ;;  %4130 = vadd.xlane.f32.xlu0 %v4129_v16  ;;  %v3836_v34 = vmul.f32 1.442695, %v3732_v7  ;;  %v13377_v7 = vld [vmem:[#allocation99_spill] sm:$0xff] }
 0x835   : > { %v8554_v43 = vpop.eup %8553  ;;  %v3842_v52 = vmul.f32 1.442695, %v3735_v6  ;;  %v13375_v6 = vld [vmem:[#allocation88_spill] sm:$0xff] }
 0x836   : > { %v12023_v32 = vpop.eup %8555  ;;  %v3630_v53 = vpop.permute.xlu1 %3629  ;;  %v4099_v0 = vsel %vm2923_vm3, %v8554_v43, 0.0  ;;  %v4795_v3 = vpack.c.bf16 %v8554_v43, %v12019_v38  ;;  %v3740_v43 = vsub.f32 %v13375_v6, %v11884_v49  ;;  %v13378_v6 = vld [vmem:[#allocation90_spill] sm:$0xff] }
 0x837   : > { %8565 = vpow2.f32 %v3842_v52  ;;  %v3743_v40 = vsub.f32 %v13374_v9, %v3630_v53  ;;  %4100 = vadd.xlane.f32.xlu0 %v4099_v0  ;;  %v4796_v44 = vpack.c.bf16 %v8548_v23, %v12023_v32  ;;  %v12031_v16 = vpop.eup %8557  ;;  %v12039_v52 = vpop.permute.xlu0 %4569  ;;  %v13376_v0 = vld [vmem:[#allocation94_spill] sm:$0xff] }
 0x838   : > { %7482 = vmatprep.mubr.msk.bf16.mxu1 %vm2923_vm3, %v4795_v3  ;;  %8567 = vpow2.f32 %v3856_v62  ;;  %v3852_v49 = vmul.f32 1.442695, %v3740_v43 }
 0x839   : > { %v8560_v26 = vpop.eup %8559  ;;  %v3858_v15 = vmul.f32 1.442695, %v3743_v40  ;;  %7483 = vmatmul.mubr.msk.bf16.gmra.mrb[60].mxu1 %vm2923_vm3, %v4796_v44  ;;  %v3738_v40 = vsub.f32 %v13377_v7, %v11898_v46 }
 0x83a   : > { %v12035_v21 = vpop.eup %8561  ;;  %v3580_v31 = vpop.permute.xlu1 %3579  ;;  %v4123_v23 = vsel %vm2923_vm3, %v8560_v26, 0.0  ;;  %v4799_v53 = vpack.c.bf16 %v8560_v26, %v12031_v16 }
 0x83b   : > { %8569 = vpow2.f32 %v3858_v15  ;;  %v3733_v3 = vsub.f32 %v13376_v0, %v3580_v31  ;;  %4124 = vadd.xlane.f32.xlu0 %v4123_v23  ;;  %v4800_v62 = vpack.c.bf16 %v8550_v1, %v12035_v21  ;;  %v12050_v15 = vpop.eup %8563  ;;  %v12052_v31 = vpop.permute.xlu0 %4579  ;;  %v13380_v1 = vld [vmem:[#allocation95_spill] sm:$0xff] }
 0x83c   : > { %7498 = vmatprep.mubr.msk.bf16.mxu0 %vm2923_vm3, %v4799_v53  ;;  %8571 = vpow2.f32 %v3836_v34  ;;  %13379 = vst [vmem:[#allocation181_spill] sm:$0xff] %v12052_v31  ;;  %v3746_v53 = vsub.f32 %v13380_v1, %v11907_v12  ;;  %v13382_v12 = vld [vmem:[#allocation100_spill] sm:$0xff] }
 0x83d   : > { %v3838_v9 = vmul.f32 1.442695, %v3733_v3  ;;  %7499 = vmatmul.mubr.msk.bf16.gmra.mrb[68].mxu0 %vm2923_vm3, %v4800_v62  ;;  %v3848_v3 = vmul.f32 1.442695, %v3738_v40 }
 0x83e   : > { %v3620_v44 = vpop.permute.xlu1 %3619 }
 0x83f   : > { %8573 = vpow2.f32 %v3838_v9  ;;  %v3741_v26 = vsub.f32 %v13378_v6, %v3620_v44  ;;  %v13381_v9 = vld [vmem:[#allocation101_spill] sm:$0xff]  ;;  %v3864_v6 = vmul.f32 1.442695, %v3746_v53 }
 0x840   : > { %8575 = vpow2.f32 %v3852_v49  ;;  %v12063_v49 = vpop.permute.xlu0 %4589 }
 0x841   : > { %v8566_v23 = vpop.eup %8565  ;;  %v3854_v0 = vmul.f32 1.442695, %v3741_v26  ;;  %v3736_v26 = vsub.f32 %v13382_v12, %v11919_v48  ;;  %13383 = vst [vmem:[#allocation161_spill] sm:$0xff] %v12063_v49 }
 0x842   : > { %v4802_v34 = vpack.c.bf16 %v8566_v23, %v12050_v15  ;;  %v3610_v43 = vpop.permute.xlu1 %3609  ;;  %v4141_v46 = vsel %vm2923_vm3, %v8566_v23, 0.0  ;;  %v12058_v62 = vpop.eup %8567 }
 0x843   : > { %8577 = vpow2.f32 %v3854_v0  ;;  %v3739_v7 = vsub.f32 %v13381_v9, %v3610_v43  ;;  %4142 = vadd.xlane.f32.xlu0 %v4141_v46  ;;  %v13385_v46 = vld [vmem:[#allocation42_spill] sm:$0xff]  ;;  %v3844_v49 = vmul.f32 1.442695, %v3736_v26 }
 0x844   : > { %8579 = vpow2.f32 %v3848_v3  ;;  %v8128_v53 = vunpack.i.h.bf16 %v13385_v46  ;;  %v8127_v3 = vunpack.i.l.bf16 %v13385_v46 }
 0x845   : > { %v8570_v44 = vpop.eup %8569  ;;  %v3850_v31 = vmul.f32 1.442695, %v3739_v7  ;;  %v13386_v7 = vld [vmem:[#allocation56_spill] sm:$0xff] }
 0x846   : > { %v4806_v40 = vpack.c.bf16 %v8570_v44, %v12058_v62  ;;  %v3650_v1 = vpop.permute.xlu1 %3649  ;;  %v4165_v23 = vsel %vm2923_vm3, %v8570_v44, 0.0  ;;  %v12068_v43 = vpop.eup %8571  ;;  %v4042_v12 = vsel %vm2923_vm3, %v13386_v7, 0.0  ;;  %v3744_v44 = vsub.f32 %v13387_v19, %v11930_v45  ;;  %v13390_v7 = vld [vmem:[#allocation53_spill] sm:$0xff] }
 0x847   : > { %8581 = vpow2.f32 %v3850_v31  ;;  %v3747_v0 = vsub.f32 %v13384_v35, %v3650_v1  ;;  %4166 = vadd.xlane.f32.xlu0 %v4165_v23  ;;  %v13388_v23 = vld [vmem:[#allocation102_spill] sm:$0xff]  ;;  %v2111_v26 = vpack.c.bf16 %v8128_v53, %v8127_v3  ;;  %v8188_v45 = vunpack.i.h.bf16 %v13390_v7 }
 0x848   : > { %8583 = vpow2.f32 %v3864_v6  ;;  %v12081_v6 = vpop.permute.xlu0 %4599  ;;  %v8187_v19 = vunpack.i.l.bf16 %v13390_v7  ;;  %v13391_v3 = vld [vmem:[#allocation98_spill] sm:$0xff] }
 0x849   : > { %v8574_v9 = vpop.eup %8573  ;;  %v3866_v48 = vmul.f32 1.442695, %v3747_v0  ;;  %13389 = vst [vmem:[#allocation182_spill] sm:$0xff] %v12081_v6  ;;  %v4342_v6 = vld [vmem:[#allocation5 + $0x48] sm:$0xff] }
 0x84a   : > { %v3600_v31 = vpop.permute.xlu1 %3599  ;;  %4043 = vadd.xlane.f32.xlu1 %v4042_v12  ;;  %v4135_v35 = vsel %vm2923_vm3, %v8574_v9, 0.0  ;;  %v4801_v1 = vpack.c.bf16 %v8574_v9, %v12068_v43  ;;  %v12079_v46 = vpop.eup %8575  ;;  %v4066_v9 = vsel %vm2923_vm3, %v11554_v50, 0.0 }
 0x84b   : > { %8585 = vpow2.f32 %v3866_v48  ;;  %v3737_v11 = vsub.f32 %v13388_v23, %v3600_v31  ;;  %4136 = vadd.xlane.f32.xlu0 %v4135_v35  ;;  %v3860_v48 = vmul.f32 1.442695, %v3744_v44  ;;  %v13393_v44 = vld [vmem:[#allocation104_spill] sm:$0xff] }
 0x84c   : > { %7510 = vmatprep.mubr.msk.bf16.mxu1 %vm2923_vm3, %v4801_v1  ;;  %8587 = vpow2.f32 %v3844_v49  ;;  %v4343_v49 = vld [vmem:[#allocation5 + $0x50] sm:$0xff]  ;;  %v3748_v7 = vsub.f32 %v13393_v44, %v11948_v27  ;;  %v13396_v44 = vld [vmem:[#allocation105_spill] sm:$0xff] }
 0x84d   : > { %v8578_v0 = vpop.eup %8577  ;;  %v3846_v12 = vmul.f32 1.442695, %v3737_v11  ;;  %7511 = vmatmul.mubr.msk.bf16.vlgmr.msra.gmra.mrb[64].mxu1 %vm2923_vm3, %v4802_v34  ;;  %v13392_v34 = vld [vmem:[#allocation54_spill] sm:$0xff] }
 0x84e   : > { %7535 = vmatpush3.bf16.msra.mxu1 %v11909_v30  ;;  %v3640_v31 = vpop.permute.xlu1 %3639  ;;  %4067 = vadd.xlane.f32.xlu1 %v4066_v9  ;;  %v4159_v35 = vsel %vm2923_vm3, %v8578_v0, 0.0  ;;  %v4805_v53 = vpack.c.bf16 %v8578_v0, %v12079_v46  ;;  %v12093_v11 = vpop.eup %8579  ;;  %v8248_v23 = vunpack.i.h.bf16 %v13392_v34  ;;  %v8247_v50 = vunpack.i.l.bf16 %v13392_v34 }
 0x84f   : > { %8589 = vpow2.f32 %v3846_v12  ;;  %v3745_v1 = vsub.f32 %v13391_v3, %v3640_v31  ;;  %7536 = vmatprep.subr.bf16.mxu1 %v2111_v26  ;;  %4160 = vadd.xlane.f32.xlu0 %v4159_v35  ;;  %v13394_v12 = vld [vmem:[#allocation60_spill] sm:$0xff]  ;;  %v2112_v31 = vpack.c.bf16 %v8188_v45, %v8187_v19  ;;  %v4341_v35 = vld [vmem:[#allocation5 + $0x40] sm:$0xff]  ;;  %v12105_v3 = vpop.permute.xlu0 %4609  ;;  %v13397_v45 = vld [vmem:[#allocation127_spill] sm:$0xff]  ;;  %v3868_v47 = vmul.f32 1.442695, %v3748_v7 }
 0x850   : > { %7526 = vmatprep.mubr.msk.bf16.mxu0 %vm2923_vm3, %v4805_v53  ;;  %v4036_v9 = vsel %vm2923_vm3, %v13394_v12, 0.0  ;;  %8591 = vpow2.f32 %v3860_v48  ;;  %13395 = vst [vmem:[#allocation163_spill] sm:$0xff] %v12105_v3  ;;  %v4727_v19 = vmul.f32 %v13397_v45, %v4343_v49  ;;  %v4351_v48 = vld [vmem:[#allocation5 + $0x90] sm:$0xff]  ;;  %v2113_v27 = vpack.c.bf16 %v8248_v23, %v8247_v50  ;;  %v4352_v45 = vld [vmem:[#allocation5 + $0x98] sm:$0xff]  ;;  %v13400_v50 = vld [vmem:[#allocation106_spill] sm:$0xff] }
 0x851   : > { %v12098_v30 = vpop.eup %8581  ;;  %v3862_v0 = vmul.f32 1.442695, %v3745_v1  ;;  %7527 = vmatmul.mubr.msk.bf16.vlgmr.msra.gmra.mrb[72].mxu0 %vm2923_vm3, %v4806_v40  ;;  %v4344_v40 = vld [vmem:[#allocation5 + $0x58] sm:$0xff]  ;;  %v4054_v49 = vsel %vm2923_vm3, %v11595_v36, 0.0  ;;  %v4726_v23 = vmul.f32 %v11693_v14, %v4342_v6 }
 0x852   : > { %7537 = vmatpush3.bf16.msra.mxu1 %v2111_v26  ;;  %v3670_v34 = vpop.permute.xlu1 %3669  ;;  %4037 = vadd.xlane.f32.xlu1 %v4036_v9  ;;  %v4153_v53 = vsel %vm2923_vm3, %v12098_v30, 0.0  ;;  %v12111_v1 = vpop.eup %8583  ;;  %v4349_v26 = vld [vmem:[#allocation5 + $0x80] sm:$0xff]  ;;  %v13398_v9 = vld [vmem:[#allocation103_spill] sm:$0xff] }
 0x853   : > { %8593 = vpow2.f32 %v3862_v0  ;;  %v3751_v12 = vsub.f32 %v13396_v44, %v3670_v34  ;;  %7538 = vmatprep.subr.bf16.mxu1 %v2112_v31  ;;  %4154 = vadd.xlane.f32.xlu0 %v4153_v53  ;;  %v3750_v3 = vsub.f32 %v13398_v9, %v11939_v58  ;;  %v4725_v0 = vmul.f32 %v13399_v33, %v4341_v35  ;;  %v13401_v35 = vld [vmem:[#allocation120_spill] sm:$0xff]  ;;  %v12135_v17 = vpop.permute.xlu0 %4619 }
 0x854   : > { %v4728_v53 = vmul.f32 %v11666_v4, %v4344_v40  ;;  %v13402_v40 = vld [vmem:[#allocation128_spill] sm:$0xff] }
 0x855   : > { %v12119_v13 = vpop.eup %8585  ;;  %v3874_v34 = vmul.f32 1.442695, %v3751_v12  ;;  %v7448_v44 = vpop.f32.mrb[48].mxu1  ;;  %v4733_v12 = vmul.f32 %v13402_v40, %v4349_v26 }
 0x856   : > { %7539 = vmatpush3.bf16.msra.mxu1 %v2112_v31  ;;  %v3660_v24 = vpop.permute.xlu1 %3659  ;;  %v5439_v58 = vadd.f32 %v7448_v44, %v4727_v19  ;;  %4061 = vadd.xlane.f32.xlu1 %v4060_v22  ;;  %v4936_v9 = vpop.f32.mrb[49].mxu1  ;;  %v4177_v56 = vsel %vm2923_vm3, %v12119_v13, 0.0  ;;  %v4808_v33 = vpack.c.bf16 %v12119_v13, %v12111_v1  ;;  %v4735_v22 = vmul.f32 %v13401_v35, %v4351_v48  ;;  %v4350_v19 = vld [vmem:[#allocation5 + $0x88] sm:$0xff]  ;;  %v13403_v48 = vld [vmem:[#allocation108_spill] sm:$0xff] }
 0x857   : > { %8595 = vpow2.f32 %v3874_v34  ;;  %v3749_v7 = vsub.f32 %v13400_v50, %v3660_v24  ;;  %7540 = vmatprep.subr.bf16.mxu1 %v2113_v27  ;;  %v5437_v36 = vadd.f32 %v4936_v9, %v4725_v0  ;;  %4178 = vadd.xlane.f32.xlu0 %v4177_v56  ;;  %v7449_v4 = vpop.f32.mrb[50].mxu1  ;;  %v12131_v31 = vpop.eup %8587  ;;  %v3872_v44 = vmul.f32 1.442695, %v3750_v3 }
 0x858   : > { %5503 = vst.msk [vmem:[#allocation5 + $0x50] sm:$0xff] %vm2146_vm2, %v5439_v58  ;;  %v5440_v14 = vadd.f32 %v7449_v4, %v4728_v53  ;;  %v4939_v6 = vpop.f32.mrb[51].mxu1  ;;  %v4736_v24 = vmul.f32 %v11678_v55, %v4352_v45  ;;  %8597 = vpow2.f32 %v3868_v47  ;;  %v3752_v26 = vsub.f32 %v13403_v48, %v11972_v29  ;;  %v13404_v45 = vld [vmem:[#allocation109_spill] sm:$0xff] }
 0x859   : > { %v8590_v34 = vpop.eup %8589  ;;  %v3870_v0 = vmul.f32 1.442695, %v3749_v7  ;;  %5501 = vst.msk [vmem:[#allocation5 + $0x40] sm:$0xff] %vm2146_vm2, %v5437_v36  ;;  %v5438_v9 = vadd.f32 %v4939_v6, %v4726_v23  ;;  %v7464_v56 = vpop.f32.mrb[56].mxu0  ;;  %v4734_v47 = vmul.f32 %v11705_v51, %v4350_v19  ;;  %v4078_v19 = vsel %vm2923_vm3, %v11619_v39, 0.0 }
 0x85a   : > { %5504 = vst.msk [vmem:[#allocation5 + $0x58] sm:$0xff] %vm2146_vm2, %v5440_v14  ;;  %7541 = vmatpush3.bf16.msra.mxu1 %v2113_v27  ;;  %v3690_v3 = vpop.permute.xlu1 %3689  ;;  %v5447_v50 = vadd.f32 %v7464_v56, %v4735_v22  ;;  %4055 = vadd.xlane.f32.xlu1 %v4054_v49  ;;  %v5013_v53 = vpop.f32.mrb[57].mxu0  ;;  %v4147_v58 = vsel %vm2923_vm3, %v8590_v34, 0.0  ;;  %v4803_v55 = vpack.c.bf16 %v8590_v34, %v12131_v31  ;;  %v13405_v27 = vld [vmem:[#allocation107_spill] sm:$0xff]  ;;  %v4048_v48 = vsel %vm2923_vm3, %v11579_v20, 0.0 }
 0x85b   : > { %8599 = vpow2.f32 %v3870_v0  ;;  %5502 = vst.msk [vmem:[#allocation5 + $0x48] sm:$0xff] %vm2146_vm2, %v5438_v9  ;;  %v3755_v23 = vsub.f32 %v13404_v45, %v3690_v3  ;;  %v5445_v7 = vadd.f32 %v5013_v53, %v4733_v12  ;;  %4148 = vadd.xlane.f32.xlu0 %v4147_v58  ;;  %v7465_v29 = vpop.f32.mrb[58].mxu0  ;;  %v12148_v36 = vpop.eup %8591  ;;  %v3754_v49 = vsub.f32 %v13405_v27, %v11960_v18  ;;  %v4347_v9 = vld [vmem:[#allocation5 + $0x70] sm:$0xff]  ;;  %v4348_v53 = vld [vmem:[#allocation5 + $0x78] sm:$0xff] }
 0x85c   : > { %8601 = vpow2.f32 %v3872_v44  ;;  %5511 = vst.msk [vmem:[#allocation5 + $0x90] sm:$0xff] %vm2146_vm2, %v5447_v50  ;;  %v5448_v4 = vadd.f32 %v7465_v29, %v4736_v24  ;;  %7514 = vmatprep.mubr.msk.bf16.mxu1 %vm2923_vm3, %v4803_v55  ;;  %v5016_v51 = vpop.f32.mrb[59].mxu0  ;;  %v13406_v12 = vpack.c.bf16 %v12098_v30, %v12093_v11  ;;  %v3876_v18 = vmul.f32 1.442695, %v3752_v26  ;;  %v12161_v44 = vpop.permute.xlu0 %4629  ;;  %v13407_v30 = vld [vmem:[#allocation110_spill] sm:$0xff]  ;;  %v13408_v58 = vld [vmem:[#allocation173_spill] sm:$0xff] }
 0x85d   : > { %v8594_v35 = vpop.eup %8593  ;;  %v3882_v22 = vmul.f32 1.442695, %v3755_v23  ;;  %5509 = vst.msk [vmem:[#allocation5 + $0x80] sm:$0xff] %vm2146_vm2, %v5445_v7  ;;  %v5446_v40 = vadd.f32 %v5016_v51, %v4734_v47  ;;  %v3880_v0 = vmul.f32 1.442695, %v3754_v49  ;;  %v4345_v26 = vld [vmem:[#allocation5 + $0x60] sm:$0xff]  ;;  %v4731_v55 = vmul.f32 %v13408_v58, %v4347_v9 }
 0x85e   : > { %7515 = vmatmul.mubr.msk.bf16.gmra.mrb[68].mxu1 %vm2923_vm3, %v13406_v12  ;;  %5512 = vst.msk [vmem:[#allocation5 + $0x98] sm:$0xff] %vm2146_vm2, %v5448_v4  ;;  %v3680_v14 = vpop.permute.xlu1 %3679  ;;  %4079 = vadd.xlane.f32.xlu1 %v4078_v19  ;;  %v4171_v6 = vsel %vm2923_vm3, %v8594_v35, 0.0  ;;  %v4807_v34 = vpack.c.bf16 %v8594_v35, %v12148_v36  ;;  %v4346_v47 = vld [vmem:[#allocation5 + $0x68] sm:$0xff]  ;;  %v4355_v45 = vld [vmem:[#allocation5 + $0xb0] sm:$0xff]  ;;  %v4072_v29 = vsel %vm2923_vm3, %v11602_v37, 0.0  ;;  %v4353_v49 = vld [vmem:[#allocation5 + $0xa0] sm:$0xff]  ;;  %v4732_v4 = vmul.f32 %v11718_v25, %v4348_v53 }
 0x85f   : > { %8603 = vpow2.f32 %v3882_v22  ;;  %5510 = vst.msk [vmem:[#allocation5 + $0x88] sm:$0xff] %vm2146_vm2, %v5446_v40  ;;  %v3753_v24 = vsub.f32 %v13407_v30, %v3680_v14  ;;  %4172 = vadd.xlane.f32.xlu0 %v4171_v6  ;;  %v13409_v23 = vld [vmem:[#allocation178_spill] sm:$0xff]  ;;  %v4356_v12 = vld [vmem:[#allocation5 + $0xb8] sm:$0xff]  ;;  %v4730_v19 = vmul.f32 %v11743_v42, %v4346_v47  ;;  %v13410_v6 = vld [vmem:[#allocation175_spill] sm:$0xff] }
 0x860   : > { %7530 = vmatprep.mubr.msk.bf16.mxu0 %vm2923_vm3, %v4807_v34  ;;  %8605 = vpow2.f32 %v3876_v18  ;;  %v12179_v13 = vpop.permute.xlu0 %4639  ;;  %v4729_v20 = vmul.f32 %v13409_v23, %v4345_v26  ;;  %v4739_v34 = vmul.f32 %v13410_v6, %v4355_v45  ;;  %v4354_v30 = vld [vmem:[#allocation5 + $0xa8] sm:$0xff]  ;;  %v13411_v9 = vld [vmem:[#allocation180_spill] sm:$0xff]  ;;  %v4740_v26 = vmul.f32 %v11730_v10, %v4356_v12  ;;  %v13412_v12 = vld [vmem:[#allocation177_spill] sm:$0xff] }
 0x861   : > { %v8596_v39 = vpop.eup %8595  ;;  %v3878_v56 = vmul.f32 1.442695, %v3753_v24  ;;  %7531 = vmatmul.mubr.msk.bf16.gmra.mrb[76].mxu0 %vm2923_vm3, %v4808_v33  ;;  %v4738_v47 = vmul.f32 %v11759_v59, %v4354_v30  ;;  %v4114_v59 = vsel %vm2923_vm3, %v11870_v41, 0.0  ;;  %v4084_v41 = vsel %vm2923_vm3, %v11834_v28, 0.0 }
 0x862   : > { %4049 = vadd.xlane.f32.xlu1 %v4048_v48  ;;  %v4189_v3 = vsel %vm2923_vm3, %v8596_v39, 0.0  ;;  %v12176_v50 = vpop.eup %8597  ;;  %v4090_v48 = vsel %vm2923_vm3, %v11847_v54, 0.0 }
 0x863   : > { %8607 = vpow2.f32 %v3878_v56  ;;  %4190 = vadd.xlane.f32.xlu0 %v4189_v3  ;;  %v4737_v56 = vmul.f32 %v13411_v9, %v4353_v49  ;;  %v4096_v9 = vsel %vm2923_vm3, %v12019_v38, 0.0 }
 0x864   : > { %8609 = vpow2.f32 %v3880_v0  ;;  %v12200_v3 = vpop.permute.xlu0 %4649 }
 0x865   : > { %v8600_v33 = vpop.eup %8599  ;;  %v7452_v7 = vpop.f32.mrb[52].mxu1 }
 0x866   : > { %v12184_v27 = vpop.eup %8601  ;;  %v5443_v51 = vadd.f32 %v7452_v7, %v4731_v55  ;;  %4073 = vadd.xlane.f32.xlu1 %v4072_v29  ;;  %v4952_v35 = vpop.f32.mrb[53].mxu1  ;;  %v4183_v22 = vsel %vm2923_vm3, %v8600_v33, 0.0  ;;  %v4809_v40 = vpack.c.bf16 %v8600_v33, %v12176_v50 }
 0x867   : > { %v4810_v18 = vpack.c.bf16 %v8596_v39, %v12184_v27  ;;  %v5441_v14 = vadd.f32 %v4952_v35, %v4729_v20  ;;  %4184 = vadd.xlane.f32.xlu0 %v4183_v22  ;;  %v7453_v37 = vpop.f32.mrb[54].mxu1  ;;  %v12209_v7 = vpop.permute.xlu1 %4534 }
 0x868   : > { %5507 = vst.msk [vmem:[#allocation5 + $0x70] sm:$0xff] %vm2146_vm2, %v5443_v51  ;;  %v5444_v25 = vadd.f32 %v7453_v37, %v4732_v4  ;;  %7542 = vmatprep.mubr.msk.bf16.mxu1 %vm2923_vm3, %v4809_v40  ;;  %v4955_v24 = vpop.f32.mrb[55].mxu1  ;;  %v12221_v22 = vpop.permute.xlu0 %4659 }
 0x869   : > { %v8604_v0 = vpop.eup %8603  ;;  %5505 = vst.msk [vmem:[#allocation5 + $0x60] sm:$0xff] %vm2146_vm2, %v5441_v14  ;;  %v5442_v42 = vadd.f32 %v4955_v24, %v4730_v19  ;;  %7543 = vmatmul.mubr.msk.bf16.vlgmr.msra.gmra.mrb[72].mxu1 %vm2923_vm3, %v4810_v18  ;;  %v7468_v39 = vpop.f32.mrb[60].mxu0  ;;  %v4108_v19 = vsel %vm2923_vm3, %v13412_v12, 0.0  ;;  %v13413_v18 = vld [vmem:[#allocation183_spill] sm:$0xff]  ;;  %v13414_v14 = vld [vmem:[#allocation184_spill] sm:$0xff]  ;;  %v4126_v24 = vsel %vm2923_vm3, %v12035_v21, 0.0 }
 0x86a   : > { %5508 = vst.msk [vmem:[#allocation5 + $0x78] sm:$0xff] %vm2146_vm2, %v5444_v25  ;;  %v5451_v53 = vadd.f32 %v7468_v39, %v4739_v34  ;;  %4091 = vadd.xlane.f32.xlu1 %v4090_v48  ;;  %v5029_v58 = vpop.f32.mrb[61].mxu0  ;;  %v4201_v55 = vsel %vm2923_vm3, %v8604_v0, 0.0  ;;  %v12206_v23 = vpop.eup %8605  ;;  %v13415_v37 = vsub.f32 %v13413_v18, %v13414_v14  ;;  %v4102_v25 = vsel %vm2923_vm3, %v12023_v32, 0.0  ;;  %v3895_v48 = vld [vmem:[#allocation4 + $0x58] sm:$0xff]  ;;  %v13419_v18 = vld [vmem:[#allocation114_spill] sm:$0xff] }
 0x86b   : > { %5506 = vst.msk [vmem:[#allocation5 + $0x68] sm:$0xff] %vm2146_vm2, %v5442_v42  ;;  %v5449_v33 = vadd.f32 %v5029_v58, %v4737_v56  ;;  %4202 = vadd.xlane.f32.xlu0 %v4201_v55  ;;  %v7469_v45 = vpop.f32.mrb[62].mxu0  ;;  %v12227_v40 = vpop.permute.xlu1 %4544  ;;  %v4120_v32 = vsel %vm2923_vm3, %v12031_v16, 0.0  ;;  %v13417_v16 = vld [vmem:[#allocation119_spill] sm:$0xff]  ;;  %v4156_v12 = vsel %vm2923_vm3, %v12079_v46, 0.0  ;;  %v3907_v46 = vld [vmem:[#allocation4 + $0xb8] sm:$0xff] }
 0x86c   : > { %5515 = vst.msk [vmem:[#allocation5 + $0xb0] sm:$0xff] %vm2146_vm2, %v5451_v53  ;;  %v5452_v10 = vadd.f32 %v7469_v45, %v4740_v26  ;;  %v5032_v54 = vpop.f32.mrb[63].mxu0  ;;  %v3368_v6 = vmul.f32 1.442695, %v13415_v37  ;;  %v12234_v34 = vpop.permute.xlu0 %4669  ;;  %v4138_v26 = vsel %vm2923_vm3, %v12050_v15, 0.0  ;;  %v13416_v53 = vld [vmem:[#allocation117_spill] sm:$0xff] }
 0x86d   : > { %v8608_v20 = vpop.eup %8607  ;;  %5513 = vst.msk [vmem:[#allocation5 + $0xa0] sm:$0xff] %vm2146_vm2, %v5449_v33  ;;  %v5450_v29 = vadd.f32 %v5032_v54, %v4738_v47  ;;  %v3959_v58 = vmul.f32 %v13416_v53, %v3895_v48  ;;  %v3903_v47 = vld [vmem:[#allocation4 + $0x98] sm:$0xff]  ;;  %v4162_v45 = vsel %vm2923_vm3, %v12058_v62, 0.0  ;;  %v3901_v62 = vld [vmem:[#allocation4 + $0x88] sm:$0xff]  ;;  %v4174_v53 = vsel %vm2923_vm3, %v12111_v1, 0.0 }
 0x86e   : > { %v12214_v49 = vpop.eup %8609  ;;  %5516 = vst.msk [vmem:[#allocation5 + $0xb8] sm:$0xff] %vm2146_vm2, %v5452_v10  ;;  %4115 = vadd.xlane.f32.xlu1 %v4114_v59  ;;  %v4195_v4 = vsel %vm2923_vm3, %v8608_v20, 0.0  ;;  %v4811_v51 = vpack.c.bf16 %v8608_v20, %v12206_v23  ;;  %8611 = vpow2.f32 %v3368_v6  ;;  %v3967_v10 = vmul.f32 %v13417_v16, %v3903_v47  ;;  %v3893_v20 = vld [vmem:[#allocation4 + $0x48] sm:$0xff] }
 0x86f   : > { %5514 = vst.msk [vmem:[#allocation5 + $0xa8] sm:$0xff] %vm2146_vm2, %v5450_v29  ;;  %4196 = vadd.xlane.f32.xlu0 %v4195_v4  ;;  %v4812_v35 = vpack.c.bf16 %v8604_v0, %v12214_v49  ;;  %v12236_v30 = vpop.permute.xlu1 %4554  ;;  %v4132_v59 = vsel %vm2923_vm3, %v12068_v43, 0.0  ;;  %v13418_v4 = vld [vmem:[#allocation121_spill] sm:$0xff]  ;;  %v3965_v14 = vmul.f32 %v13419_v18, %v3901_v62  ;;  %v3905_v1 = vld [vmem:[#allocation4 + $0xa8] sm:$0xff] }
 0x870   : > { %7546 = vmatprep.mubr.msk.bf16.mxu1 %vm2923_vm3, %v4811_v51  ;;  %v12240_v28 = vpop.permute.xlu0 %4689  ;;  %v3957_v51 = vmul.f32 %v13418_v4, %v3893_v20  ;;  %v3899_v43 = vld [vmem:[#allocation4 + $0x78] sm:$0xff]  ;;  %v13423_v4 = vld [vmem:[#allocation118_spill] sm:$0xff] }
 0x871   : > { %7547 = vmatmul.mubr.msk.bf16.gmra.mrb[76].mxu1 %vm2923_vm3, %v4812_v35  ;;  %v13424_v18 = vld [vmem:[#allocation38_spill] sm:$0xff] }
 0x872   : > { %4085 = vadd.xlane.f32.xlu1 %v4084_v41 }
 0x873   : > { %v12244_v0 = vpop.permute.xlu1 %4564 }
 0x874   : > { %v12248_v56 = vpop.permute.xlu0 %4679 }
 0x876   : > { %4109 = vadd.xlane.f32.xlu1 %v4108_v19 }
 0x877   : > { %v12252_v39 = vpop.permute.xlu1 %4574 }
 0x878   : > { %v12250_v42 = vpop.eup %8611  ;;  %v12257_v21 = vpop.permute.xlu0 %4699 }
 0x87a   : > { %4103 = vadd.xlane.f32.xlu1 %v4102_v25  ;;  %v4150_v25 = vsel %vm2923_vm3, %v12093_v11, 0.0  ;;  %v3897_v11 = vld [vmem:[#allocation4 + $0x68] sm:$0xff] }
 0x87b   : > { %v12261_v38 = vpop.permute.xlu1 %4584 }
 0x87e   : > { %4127 = vadd.xlane.f32.xlu1 %v4126_v24  ;;  %v13420_v24 = vld [vmem:[#allocation123_spill] sm:$0xff] }
 0x87f   : > { %v12268_v29 = vpop.permute.xlu1 %4594 }
 0x882   : > { %4097 = vadd.xlane.f32.xlu1 %v4096_v9  ;;  %v3963_v9 = vmul.f32 %v13420_v24, %v3899_v43  ;;  %v13425_v24 = vld [vmem:[#allocation129_spill] sm:$0xff] }
 0x883   : > { %v12276_v19 = vpop.permute.xlu1 %4604 }
 0x885   : > { %4709 = vperm.xlu0 %8250, %v12250_v42  }
 0x886   : > { %4121 = vadd.xlane.f32.xlu1 %v4120_v32 }
 0x887   : > { %v12284_v48 = vpop.permute.xlu1 %4614 }
 0x88a   : > { %4139 = vadd.xlane.f32.xlu1 %v4138_v26 }
 0x88b   : > { %v12292_v16 = vpop.permute.xlu1 %4624 }
 0x88c   : > { %v4047_v55 = vpop.xlane.xlu0 %4046 }
 0x88d   : > { %v4215_v33 = vadd.f32 %v4047_v55, %v3959_v58  ;;  %v13421_v58 = vld [vmem:[#allocation116_spill] sm:$0xff] }
 0x88e   : > { %4163 = vadd.xlane.f32.xlu1 %v4162_v45  ;;  %v3971_v55 = vmul.f32 %v13421_v58, %v3907_v46  ;;  %v4144_v45 = vsel %vm2923_vm3, %v12131_v31, 0.0  ;;  %v3911_v31 = vld [vmem:[#allocation4 + $0xd8] sm:$0xff] }
 0x88f   : > { %4280 = vst.msk [vmem:[#allocation4 + $0x58] sm:$0xff] %vm4268_vm4, %v4215_v33  ;;  %v12300_v62 = vpop.permute.xlu1 %4634 }
 0x890   : > { %v4071_v54 = vpop.xlane.xlu0 %4070 }
 0x891   : > { %v4223_v15 = vadd.f32 %v4071_v54, %v3967_v10  ;;  %v13422_v10 = vld [vmem:[#allocation125_spill] sm:$0xff] }
 0x892   : > { %4133 = vadd.xlane.f32.xlu1 %v4132_v59  ;;  %v3961_v54 = vmul.f32 %v13422_v10, %v3897_v11  ;;  %v4168_v59 = vsel %vm2923_vm3, %v12148_v36, 0.0  ;;  %v3919_v36 = vld [vmem:[#allocation4 + $0x118] sm:$0xff] }
 0x893   : > { %4288 = vst.msk [vmem:[#allocation4 + $0x98] sm:$0xff] %vm4268_vm4, %v4223_v15 }
 0x894   : > { %v4041_v35 = vpop.xlane.xlu0 %4040 }
 0x895   : > { %v4213_v41 = vadd.f32 %v4041_v35, %v3957_v51  ;;  %v3969_v51 = vmul.f32 %v13423_v4, %v3905_v1 }
 0x896   : > { %4157 = vadd.xlane.f32.xlu1 %v4156_v12  ;;  %v4186_v12 = vsel %vm2923_vm3, %v12184_v27, 0.0  ;;  %v3909_v27 = vld [vmem:[#allocation4 + $0xc8] sm:$0xff] }
 0x897   : > { %4278 = vst.msk [vmem:[#allocation4 + $0x48] sm:$0xff] %vm4268_vm4, %v4213_v41 }
 0x898   : > { %v4065_v37 = vpop.xlane.xlu0 %4064 }
 0x899   : > { %v4221_v6 = vadd.f32 %v4065_v37, %v3965_v14  ;;  %v3975_v14 = vmul.f32 %v13424_v18, %v3911_v31 }
 0x89a   : > { %4151 = vadd.xlane.f32.xlu1 %v4150_v25  ;;  %v12308_v25 = vpop.permute.xlu1 %4644 }
 0x89b   : > { %4286 = vst.msk [vmem:[#allocation4 + $0x88] sm:$0xff] %vm4268_vm4, %v4221_v6  ;;  %v4180_v6 = vsel %vm2923_vm3, %v12176_v50, 0.0  ;;  %v13428_v50 = vld [vmem:[#allocation168_spill] sm:$0xff] }
 0x89c   : > { %v4059_v32 = vpop.xlane.xlu0 %4058 }
 0x89d   : > { %v4219_v26 = vadd.f32 %v4059_v32, %v3963_v9  ;;  %v3983_v9 = vmul.f32 %v13425_v24, %v3919_v36  ;;  %v3913_v36 = vld [vmem:[#allocation4 + $0xe8] sm:$0xff]  ;;  %v4359_v24 = vld [vmem:[#allocation5 + $0xd0] sm:$0xff] }
 0x89e   : > { %4175 = vadd.xlane.f32.xlu1 %v4174_v53  ;;  %v13426_v53 = vld [vmem:[#allocation69_spill] sm:$0xff] }
 0x89f   : > { %4284 = vst.msk [vmem:[#allocation4 + $0x78] sm:$0xff] %vm4268_vm4, %v4219_v26  ;;  %v4198_v26 = vsel %vm2923_vm3, %v12214_v49, 0.0  ;;  %v3973_v58 = vmul.f32 %v13426_v53, %v3909_v27  ;;  %v13429_v49 = vld [vmem:[#allocation124_spill] sm:$0xff]  ;;  %v3921_v53 = vld [vmem:[#allocation4 + $0x128] sm:$0xff] }
 0x8a0   : > { %v4083_v47 = vpop.xlane.xlu0 %4082 }
 0x8a1   : > { %v4227_v33 = vadd.f32 %v4083_v47, %v3971_v55  ;;  %v13427_v55 = vld [vmem:[#allocation169_spill] sm:$0xff] }
 0x8a2   : > { %4145 = vadd.xlane.f32.xlu1 %v4144_v45  ;;  %v3243_v47 = vsub.f32 %v13428_v50, %v13427_v55  ;;  %v12318_v45 = vpop.permute.xlu1 %4654  ;;  %v4358_v55 = vld [vmem:[#allocation5 + $0xc8] sm:$0xff] }
 0x8a3   : > { %4292 = vst.msk [vmem:[#allocation4 + $0xb8] sm:$0xff] %vm4268_vm4, %v4227_v33  ;;  %v3917_v33 = vld [vmem:[#allocation4 + $0x108] sm:$0xff] }
 0x8a4   : > { %v4053_v20 = vpop.xlane.xlu0 %4052  ;;  %v3370_v1 = vmul.f32 1.442695, %v3243_v47 }
 0x8a5   : > { %v4217_v15 = vadd.f32 %v4053_v20, %v3961_v54  ;;  %v4192_v54 = vsel %vm2923_vm3, %v12206_v23, 0.0  ;;  %v3981_v20 = vmul.f32 %v13429_v49, %v3917_v33  ;;  %v13431_v23 = vld [vmem:[#allocation174_spill] sm:$0xff] }
 0x8a6   : > { %4169 = vadd.xlane.f32.xlu1 %v4168_v59  ;;  %v3915_v59 = vld [vmem:[#allocation4 + $0xf8] sm:$0xff]  ;;  %8613 = vpow2.f32 %v3370_v1  ;;  %v4365_v49 = vld [vmem:[#allocation5 + $0x100] sm:$0xff] }
 0x8a7   : > { %4282 = vst.msk [vmem:[#allocation4 + $0x68] sm:$0xff] %vm4268_vm4, %v4217_v15 }
 0x8a8   : > { %v4077_v35 = vpop.xlane.xlu0 %4076 }
 0x8a9   : > { %v4225_v41 = vadd.f32 %v4077_v35, %v3969_v51  ;;  %v12324_v51 = vpop.permute.xlu1 %4664  ;;  %v13430_v35 = vld [vmem:[#allocation140_spill] sm:$0xff] }
 0x8aa   : > { %4187 = vadd.xlane.f32.xlu1 %v4186_v12  ;;  %v3979_v31 = vmul.f32 %v13430_v35, %v3915_v59  ;;  %v3923_v12 = vld [vmem:[#allocation4 + $0x138] sm:$0xff]  ;;  %v4742_v35 = vmul.f32 %v12012_v57, %v4358_v55 }
 0x8ab   : > { %4290 = vst.msk [vmem:[#allocation4 + $0xa8] sm:$0xff] %vm4268_vm4, %v4225_v41 }
 0x8ac   : > { %v4095_v37 = vpop.xlane.xlu0 %4094 }
 0x8ad   : > { %v4231_v43 = vadd.f32 %v4095_v37, %v3975_v14  ;;  %v3987_v14 = vmul.f32 %v13431_v23, %v3923_v12 }
 0x8ae   : > { %4181 = vadd.xlane.f32.xlu1 %v4180_v6 }
 0x8af   : > { %4296 = vst.msk [vmem:[#allocation4 + $0xd8] sm:$0xff] %vm4268_vm4, %v4231_v43  ;;  %v12330_v43 = vpop.permute.xlu1 %4674 }
 0x8b0   : > { %v4119_v32 = vpop.xlane.xlu0 %4118  ;;  %v12335_v47 = vpop.eup %8613 }
 0x8b1   : > { %v4239_v46 = vadd.f32 %v4119_v32, %v3983_v9  ;;  %v4357_v9 = vld [vmem:[#allocation5 + $0xc0] sm:$0xff]  ;;  %v13432_v32 = vld [vmem:[#allocation43_spill] sm:$0xff] }
 0x8b2   : > { %4199 = vadd.xlane.f32.xlu1 %v4198_v26  ;;  %v3977_v27 = vmul.f32 %v13432_v32, %v3913_v36 }
 0x8b3   : > { %4304 = vst.msk [vmem:[#allocation4 + $0x118] sm:$0xff] %vm4268_vm4, %v4239_v46  ;;  %v4360_v46 = vld [vmem:[#allocation5 + $0xd8] sm:$0xff]  ;;  %v12339_v1 = vpop.permute.xlu1 %4694 }
 0x8b4   : > { %v4089_v11 = vpop.xlane.xlu0 %4088 }
 0x8b5   : > { %v4229_v10 = vadd.f32 %v4089_v11, %v3973_v58  ;;  %v4743_v58 = vmul.f32 %v11985_v8, %v4359_v24  ;;  %v13433_v11 = vld [vmem:[#allocation171_spill] sm:$0xff] }
 0x8b6   : > { %4193 = vadd.xlane.f32.xlu1 %v4192_v54  ;;  %v4741_v33 = vmul.f32 %v13433_v11, %v4357_v9  ;;  %v13434_v8 = vld [vmem:[#allocation47_spill] sm:$0xff]  ;;  %v3935_v11 = vld [vmem:[#allocation4 + $0x198] sm:$0xff] }
 0x8b7   : > { %4294 = vst.msk [vmem:[#allocation4 + $0xc8] sm:$0xff] %vm4268_vm4, %v4229_v10  ;;  %v4367_v10 = vld [vmem:[#allocation5 + $0x110] sm:$0xff] }
 0x8b8   : > { %v4113_v15 = vpop.xlane.xlu0 %4112  ;;  %v4751_v23 = vmul.f32 %v12039_v52, %v4367_v10 }
 0x8b9   : > { %v4237_v4 = vadd.f32 %v4113_v15, %v3981_v20  ;;  %v4744_v20 = vmul.f32 %v12209_v7, %v4360_v46 }
 0x8bb   : > { %4302 = vst.msk [vmem:[#allocation4 + $0x108] sm:$0xff] %vm4268_vm4, %v4237_v4  ;;  %v3985_v4 = vmul.f32 %v13434_v8, %v3921_v53  ;;  %v3927_v53 = vld [vmem:[#allocation4 + $0x158] sm:$0xff]  ;;  %v13435_v8 = vld [vmem:[#allocation142_spill] sm:$0xff] }
 0x8bc   : > { %v4107_v41 = vpop.xlane.xlu0 %4106 }
 0x8bd   : > { %v4235_v18 = vadd.f32 %v4107_v41, %v3979_v31  ;;  %v4368_v31 = vld [vmem:[#allocation5 + $0x118] sm:$0xff] }
 0x8be   : > { %v4752_v57 = vmul.f32 %v12252_v39, %v4368_v31  ;;  %v3902_v31 = vld [vmem:[#allocation4 + $0x90] sm:$0xff] }
 0x8bf   : > { %4300 = vst.msk [vmem:[#allocation4 + $0xf8] sm:$0xff] %vm4268_vm4, %v4235_v18 }
 0x8c0   : > { %v4131_v37 = vpop.xlane.xlu0 %4130 }
 0x8c1   : > { %v4243_v6 = vadd.f32 %v4131_v37, %v3987_v14  ;;  %v4366_v14 = vld [vmem:[#allocation5 + $0x108] sm:$0xff] }
 0x8c3   : > { %4308 = vst.msk [vmem:[#allocation4 + $0x138] sm:$0xff] %vm4268_vm4, %v4243_v6  ;;  %v4749_v6 = vmul.f32 %v12021_v63, %v4365_v49  ;;  %v12354_v63 = vpop.permute.xlu1 %4684  ;;  %v3894_v49 = vld [vmem:[#allocation4 + $0x50] sm:$0xff] }
 0x8c4   : > { %v4101_v26 = vpop.xlane.xlu0 %4100 }
 0x8c5   : > { %v4233_v50 = vadd.f32 %v4101_v26, %v3977_v27  ;;  %v4750_v27 = vmul.f32 %v12244_v0, %v4366_v14  ;;  %v13436_v14 = vld [vmem:[#allocation143_spill] sm:$0xff] }
 0x8c6   : > { %v7480_v54 = vpop.f32.mrb[56].mxu1 }
 0x8c7   : > { %4298 = vst.msk [vmem:[#allocation4 + $0xe8] sm:$0xff] %vm4268_vm4, %v4233_v50  ;;  %v5455_v15 = vadd.f32 %v7480_v54, %v4743_v58  ;;  %4714 = vperm.xlu1 %8249, %v12335_v47   ;;  %v5090_v59 = vpop.f32.mrb[57].mxu1  ;;  %v3991_v50 = vmul.f32 %v11913_v60, %v3927_v53  ;;  %v12361_v10 = vpop.permute.xlu1 %4704  ;;  %v3999_v54 = vmul.f32 %v11950_v5, %v3935_v11  ;;  %v13440_v11 = vld [vmem:[#allocation126_spill] sm:$0xff] }
 0x8c8   : > { %v5453_v41 = vadd.f32 %v5090_v59, %v4741_v33  ;;  %v4125_v12 = vpop.xlane.xlu0 %4124  ;;  %v7481_v18 = vpop.f32.mrb[58].mxu1  ;;  %v3966_v5 = vmul.f32 %v13436_v14, %v3902_v31 }
 0x8c9   : > { %5519 = vst.msk [vmem:[#allocation5 + $0xd0] sm:$0xff] %vm2146_vm2, %v5455_v15  ;;  %v4241_v7 = vadd.f32 %v4125_v12, %v3985_v4  ;;  %v5456_v37 = vadd.f32 %v7481_v18, %v4744_v20  ;;  %v5093_v36 = vpop.f32.mrb[59].mxu1  ;;  %v3925_v15 = vld [vmem:[#allocation4 + $0x148] sm:$0xff]  ;;  %v3958_v4 = vmul.f32 %v13435_v8, %v3894_v49 }
 0x8ca   : > { %5517 = vst.msk [vmem:[#allocation5 + $0xc0] sm:$0xff] %vm2146_vm2, %v5453_v41  ;;  %v5454_v24 = vadd.f32 %v5093_v36, %v4742_v35  ;;  %v7496_v9 = vpop.f32.mrb[64].mxu0  ;;  %v3989_v35 = vmul.f32 %v11902_v2, %v3925_v15  ;;  %v3933_v18 = vld [vmem:[#allocation4 + $0x188] sm:$0xff]  ;;  %v3892_v36 = vld [vmem:[#allocation4 + $0x40] sm:$0xff]  ;;  %v13437_v2 = vld [vmem:[#allocation144_spill] sm:$0xff] }
 0x8cb   : > { %4306 = vst.msk [vmem:[#allocation4 + $0x128] sm:$0xff] %vm4268_vm4, %v4241_v7  ;;  %v5463_v32 = vadd.f32 %v7496_v9, %v4751_v23  ;;  %v5167_v52 = vpop.f32.mrb[65].mxu0  ;;  %v3931_v9 = vld [vmem:[#allocation4 + $0x178] sm:$0xff]  ;;  %v3929_v15 = vld [vmem:[#allocation4 + $0x168] sm:$0xff] }
 0x8cc   : > { %5520 = vst.msk [vmem:[#allocation5 + $0xd8] sm:$0xff] %vm2146_vm2, %v5456_v37  ;;  %5518 = vst.msk [vmem:[#allocation5 + $0xc8] sm:$0xff] %vm2146_vm2, %v5454_v24  ;;  %v5461_v46 = vadd.f32 %v5167_v52, %v4749_v6  ;;  %v7497_v26 = vpop.f32.mrb[66].mxu0  ;;  %v3997_v37 = vmul.f32 %v11941_v61, %v3933_v18  ;;  %v13439_v61 = vld [vmem:[#allocation145_spill] sm:$0xff]  ;;  %v13441_v8 = vld [vmem:[#allocation146_spill] sm:$0xff] }
 0x8cd   : > { %5527 = vst.msk [vmem:[#allocation5 + $0x110] sm:$0xff] %vm2146_vm2, %v5463_v32  ;;  %v5464_v58 = vadd.f32 %v7497_v26, %v4752_v57  ;;  %v5170_v55 = vpop.f32.mrb[67].mxu0  ;;  %v3956_v32 = vmul.f32 %v13437_v2, %v3892_v36  ;;  %v3900_v26 = vld [vmem:[#allocation4 + $0x80] sm:$0xff]  ;;  %v3943_v2 = vld [vmem:[#allocation4 + $0x1d8] sm:$0xff] }
 0x8ce   : > { %5525 = vst.msk [vmem:[#allocation5 + $0x100] sm:$0xff] %vm2146_vm2, %v5461_v46  ;;  %v5462_v39 = vadd.f32 %v5170_v55, %v4750_v27  ;;  %v13438_v27 = vld [vmem:[#allocation172_spill] sm:$0xff]  ;;  %v13444_v36 = vld [vmem:[#allocation153_spill] sm:$0xff] }
 0x8cf   : > { %5528 = vst.msk [vmem:[#allocation5 + $0x118] sm:$0xff] %vm2146_vm2, %v5464_v58  ;;  %v3995_v46 = vmul.f32 %v13438_v27, %v3931_v9  ;;  %v3939_v55 = vld [vmem:[#allocation4 + $0x1b8] sm:$0xff] }
 0x8d0   : > { %5526 = vst.msk [vmem:[#allocation5 + $0x108] sm:$0xff] %vm2146_vm2, %v5462_v39  ;;  %v4143_v0 = vpop.xlane.xlu0 %4142 }
 0x8d1   : > { %v4247_v33 = vadd.f32 %v4143_v0, %v3991_v50  ;;  %v3964_v50 = vmul.f32 %v13439_v61, %v3900_v26  ;;  %v13446_v26 = vld [vmem:[#allocation155_spill] sm:$0xff] }
 0x8d2   : > { %v3941_v61 = vld [vmem:[#allocation4 + $0x1c8] sm:$0xff] }
 0x8d3   : > { %4312 = vst.msk [vmem:[#allocation4 + $0x158] sm:$0xff] %vm4268_vm4, %v4247_v33  ;;  %v4003_v33 = vmul.f32 %v13440_v11, %v3939_v55 }
 0x8d4   : > { %v4167_v20 = vpop.xlane.xlu0 %4166 }
 0x8d5   : > { %v4255_v59 = vadd.f32 %v4167_v20, %v3999_v54  ;;  %v3898_v54 = vld [vmem:[#allocation4 + $0x70] sm:$0xff] }
 0x8d7   : > { %4320 = vst.msk [vmem:[#allocation4 + $0x198] sm:$0xff] %vm4268_vm4, %v4255_v59  ;;  %v4044_v60 = vpop.xlane.xlu1 %4043 }
 0x8d8   : > { %v4214_v41 = vadd.f32 %v4044_v60, %v3958_v4  ;;  %v4137_v12 = vpop.xlane.xlu0 %4136  ;;  %v3962_v4 = vmul.f32 %v13441_v8, %v3898_v54  ;;  %v13448_v54 = vld [vmem:[#allocation179_spill] sm:$0xff]  ;;  %v3947_v8 = vld [vmem:[#allocation4 + $0x1f8] sm:$0xff] }
 0x8d9   : > { %v4245_v23 = vadd.f32 %v4137_v12, %v3989_v35  ;;  %v13442_v35 = vld [vmem:[#allocation151_spill] sm:$0xff] }
 0x8da   : > { %4279 = vst.msk [vmem:[#allocation4 + $0x50] sm:$0xff] %vm4268_vm4, %v4214_v41  ;;  %v3993_v31 = vmul.f32 %v13442_v35, %v3929_v15  ;;  %v3906_v41 = vld [vmem:[#allocation4 + $0xb0] sm:$0xff] }
 0x8db   : > { %4310 = vst.msk [vmem:[#allocation4 + $0x148] sm:$0xff] %vm4268_vm4, %v4245_v23  ;;  %v4068_v7 = vpop.xlane.xlu1 %4067  ;;  %v3937_v23 = vld [vmem:[#allocation4 + $0x1a8] sm:$0xff] }
 0x8dc   : > { %v4222_v6 = vadd.f32 %v4068_v7, %v3966_v5  ;;  %v4161_v24 = vpop.xlane.xlu0 %4160  ;;  %v13443_v5 = vld [vmem:[#allocation147_spill] sm:$0xff] }
 0x8dd   : > { %v4253_v57 = vadd.f32 %v4161_v24, %v3997_v37  ;;  %v3970_v7 = vmul.f32 %v13443_v5, %v3906_v41  ;;  %v3896_v24 = vld [vmem:[#allocation4 + $0x60] sm:$0xff]  ;;  %v4011_v41 = vmul.f32 %v12335_v47, %v3947_v8 }
 0x8de   : > { %4287 = vst.msk [vmem:[#allocation4 + $0x90] sm:$0xff] %vm4268_vm4, %v4222_v6  ;;  %v4001_v6 = vmul.f32 %v13444_v36, %v3937_v23  ;;  %v13452_v47 = vld [vmem:[#allocation186_spill] sm:$0xff] }
 0x8df   : > { %4318 = vst.msk [vmem:[#allocation4 + $0x188] sm:$0xff] %vm4268_vm4, %v4253_v57  ;;  %v4038_v52 = vpop.xlane.xlu1 %4037 }
 0x8e0   : > { %v4212_v53 = vadd.f32 %v4038_v52, %v3956_v32  ;;  %v4155_v58 = vpop.xlane.xlu0 %4154  ;;  %v13445_v52 = vld [vmem:[#allocation148_spill] sm:$0xff] }
 0x8e1   : > { %v4251_v39 = vadd.f32 %v4155_v58, %v3995_v46  ;;  %v3960_v27 = vmul.f32 %v13445_v52, %v3896_v24  ;;  %v3904_v58 = vld [vmem:[#allocation4 + $0xa0] sm:$0xff] }
 0x8e2   : > { %4277 = vst.msk [vmem:[#allocation4 + $0x40] sm:$0xff] %vm4268_vm4, %v4212_v53  ;;  %v4007_v53 = vmul.f32 %v13446_v26, %v3943_v2 }
 0x8e3   : > { %4316 = vst.msk [vmem:[#allocation4 + $0x178] sm:$0xff] %vm4268_vm4, %v4251_v39  ;;  %v4062_v0 = vpop.xlane.xlu1 %4061 }
 0x8e4   : > { %v4220_v49 = vadd.f32 %v4062_v0, %v3964_v50  ;;  %v4179_v20 = vpop.xlane.xlu0 %4178  ;;  %v13447_v0 = vld [vmem:[#allocation149_spill] sm:$0xff] }
 0x8e5   : > { %v4259_v59 = vadd.f32 %v4179_v20, %v4003_v33  ;;  %v3968_v11 = vmul.f32 %v13447_v0, %v3904_v58  ;;  %v3910_v20 = vld [vmem:[#allocation4 + $0xd0] sm:$0xff] }
 0x8e6   : > { %4285 = vst.msk [vmem:[#allocation4 + $0x80] sm:$0xff] %vm4268_vm4, %v4220_v49  ;;  %v4005_v49 = vmul.f32 %v13448_v54, %v3941_v61  ;;  %v4363_v54 = vld [vmem:[#allocation5 + $0xf0] sm:$0xff] }
 0x8e7   : > { %4324 = vst.msk [vmem:[#allocation4 + $0x1b8] sm:$0xff] %vm4268_vm4, %v4259_v59  ;;  %v4056_v60 = vpop.xlane.xlu1 %4055 }
 0x8e8   : > { %v4218_v12 = vadd.f32 %v4056_v60, %v3962_v4  ;;  %v4149_v18 = vpop.xlane.xlu0 %4148  ;;  %v13449_v60 = vld [vmem:[#allocation57_spill] sm:$0xff] }
 0x8e9   : > { %v4249_v14 = vadd.f32 %v4149_v18, %v3993_v31  ;;  %v3974_v35 = vmul.f32 %v13449_v60, %v3910_v20  ;;  %v4361_v20 = vld [vmem:[#allocation5 + $0xe0] sm:$0xff] }
 0x8ea   : > { %4283 = vst.msk [vmem:[#allocation4 + $0x70] sm:$0xff] %vm4268_vm4, %v4218_v12  ;;  %v3918_v12 = vld [vmem:[#allocation4 + $0x110] sm:$0xff] }
 0x8eb   : > { %4314 = vst.msk [vmem:[#allocation4 + $0x168] sm:$0xff] %vm4268_vm4, %v4249_v14  ;;  %v4080_v37 = vpop.xlane.xlu1 %4079  ;;  %v3945_v14 = vld [vmem:[#allocation4 + $0x1e8] sm:$0xff] }
 0x8ec   : > { %v4226_v9 = vadd.f32 %v4080_v37, %v3970_v7  ;;  %v4173_v57 = vpop.xlane.xlu0 %4172  ;;  %v13450_v7 = vld [vmem:[#allocation68_spill] sm:$0xff] }
 0x8ed   : > { %v4257_v32 = vadd.f32 %v4173_v57, %v4001_v6  ;;  %v3982_v37 = vmul.f32 %v13450_v7, %v3918_v12  ;;  %v13451_v6 = vld [vmem:[#allocation157_spill] sm:$0xff]  ;;  %v13457_v12 = vld [vmem:[#allocation176_spill] sm:$0xff] }
 0x8ee   : > { %4291 = vst.msk [vmem:[#allocation4 + $0xb0] sm:$0xff] %vm4268_vm4, %v4226_v9  ;;  %v4009_v24 = vmul.f32 %v13451_v6, %v3945_v14  ;;  %v3908_v9 = vld [vmem:[#allocation4 + $0xc0] sm:$0xff] }
 0x8ef   : > { %4322 = vst.msk [vmem:[#allocation4 + $0x1a8] sm:$0xff] %vm4268_vm4, %v4257_v32  ;;  %v4050_v46 = vpop.xlane.xlu1 %4049  ;;  %v3972_v52 = vmul.f32 %v13452_v47, %v3908_v9  ;;  %v4369_v7 = vld [vmem:[#allocation5 + $0x120] sm:$0xff]  ;;  %v4372_v9 = vld [vmem:[#allocation5 + $0x138] sm:$0xff] }
 0x8f0   : > { %v4216_v55 = vadd.f32 %v4050_v46, %v3960_v27  ;;  %v4191_v39 = vpop.xlane.xlu0 %4190  ;;  %v3916_v46 = vld [vmem:[#allocation4 + $0x100] sm:$0xff] }
 0x8f1   : > { %v4263_v50 = vadd.f32 %v4191_v39, %v4007_v53  ;;  %v13453_v53 = vld [vmem:[#allocation58_spill] sm:$0xff]  ;;  %v3914_v39 = vld [vmem:[#allocation4 + $0xf0] sm:$0xff] }
 0x8f2   : > { %4281 = vst.msk [vmem:[#allocation4 + $0x60] sm:$0xff] %vm4268_vm4, %v4216_v55  ;;  %v3980_v58 = vmul.f32 %v13453_v53, %v3916_v46  ;;  %v4370_v46 = vld [vmem:[#allocation5 + $0x128] sm:$0xff] }
 0x8f3   : > { %4328 = vst.msk [vmem:[#allocation4 + $0x1d8] sm:$0xff] %vm4268_vm4, %v4263_v50  ;;  %v4074_v33 = vpop.xlane.xlu1 %4073  ;;  %v13454_v50 = vld [vmem:[#allocation55_spill] sm:$0xff] }
 0x8f4   : > { %v4224_v15 = vadd.f32 %v4074_v33, %v3968_v11  ;;  %v4185_v59 = vpop.xlane.xlu0 %4184  ;;  %v3978_v0 = vmul.f32 %v13454_v50, %v3914_v39  ;;  %v3922_v33 = vld [vmem:[#allocation4 + $0x130] sm:$0xff] }
 0x8f5   : > { %v4261_v4 = vadd.f32 %v4185_v59, %v4005_v49  ;;  %v13455_v59 = vld [vmem:[#allocation67_spill] sm:$0xff] }
 0x8f6   : > { %4289 = vst.msk [vmem:[#allocation4 + $0xa0] sm:$0xff] %vm4268_vm4, %v4224_v15  ;;  %v4364_v15 = vld [vmem:[#allocation5 + $0xf8] sm:$0xff]  ;;  %v3986_v8 = vmul.f32 %v13455_v59, %v3922_v33 }
 0x8f7   : > { %4326 = vst.msk [vmem:[#allocation4 + $0x1c8] sm:$0xff] %vm4268_vm4, %v4261_v4  ;;  %v4092_v31 = vpop.xlane.xlu1 %4091  ;;  %v13456_v4 = vld [vmem:[#allocation159_spill] sm:$0xff] }
 0x8f8   : > { %v4230_v18 = vadd.f32 %v4092_v31, %v3974_v35  ;;  %v4203_v23 = vpop.xlane.xlu0 %4202  ;;  %v4747_v60 = vmul.f32 %v13456_v4, %v4363_v54  ;;  %v4362_v35 = vld [vmem:[#allocation5 + $0xe8] sm:$0xff]  ;;  %v4754_v54 = vmul.f32 %v12261_v38, %v4370_v46  ;;  %v13462_v38 = vld [vmem:[#allocation65_spill] sm:$0xff] }
 0x8f9   : > { %v4267_v5 = vadd.f32 %v4203_v23, %v4011_v41  ;;  %v3912_v41 = vld [vmem:[#allocation4 + $0xe0] sm:$0xff]  ;;  %v4371_v23 = vld [vmem:[#allocation5 + $0x130] sm:$0xff] }
 0x8fa   : > { %4295 = vst.msk [vmem:[#allocation4 + $0xd0] sm:$0xff] %vm4268_vm4, %v4230_v18  ;;  %v4745_v18 = vmul.f32 %v13457_v12, %v4361_v20  ;;  %v3932_v46 = vld [vmem:[#allocation4 + $0x180] sm:$0xff] }
 0x8fb   : > { %4332 = vst.msk [vmem:[#allocation4 + $0x1f8] sm:$0xff] %vm4268_vm4, %v4267_v5  ;;  %v4116_v36 = vpop.xlane.xlu1 %4115 }
 0x8fc   : > { %v4238_v57 = vadd.f32 %v4116_v36, %v3982_v37  ;;  %v4197_v2 = vpop.xlane.xlu0 %4196  ;;  %v4748_v37 = vmul.f32 %v12236_v30, %v4364_v15  ;;  %v3920_v30 = vld [vmem:[#allocation4 + $0x120] sm:$0xff]  ;;  %v13461_v15 = vld [vmem:[#allocation36_spill] sm:$0xff] }
 0x8fd   : > { %v4265_v32 = vadd.f32 %v4197_v2, %v4009_v24  ;;  %v4746_v24 = vmul.f32 %v12227_v40, %v4362_v35  ;;  %v3984_v59 = vmul.f32 %v13461_v15, %v3920_v30 }
 0x8fe   : > { %4303 = vst.msk [vmem:[#allocation4 + $0x110] sm:$0xff] %vm4268_vm4, %v4238_v57 }
 0x8ff   : > { %4330 = vst.msk [vmem:[#allocation4 + $0x1e8] sm:$0xff] %vm4268_vm4, %v4265_v32  ;;  %v4086_v27 = vpop.xlane.xlu1 %4085  ;;  %v13458_v32 = vld [vmem:[#allocation62_spill] sm:$0xff] }
 0x900   : > { %v4228_v26 = vadd.f32 %v4086_v27, %v3972_v52  ;;  %v3976_v47 = vmul.f32 %v13458_v32, %v3912_v41  ;;  %v13459_v52 = vld [vmem:[#allocation161_spill] sm:$0xff]  ;;  %v13465_v32 = vld [vmem:[#allocation163_spill] sm:$0xff] }
 0x901   : > { %v4755_v27 = vmul.f32 %v13459_v52, %v4371_v23  ;;  %v4374_v52 = vld [vmem:[#allocation5 + $0x148] sm:$0xff] }
 0x902   : > { %4293 = vst.msk [vmem:[#allocation4 + $0xc0] sm:$0xff] %vm4268_vm4, %v4228_v26 }
 0x903   : > { %v4110_v55 = vpop.xlane.xlu1 %4109 }
 0x904   : > { %v4236_v61 = vadd.f32 %v4110_v55, %v3980_v58  ;;  %v13460_v55 = vld [vmem:[#allocation181_spill] sm:$0xff] }
 0x905   : > { %v4753_v39 = vmul.f32 %v13460_v55, %v4369_v7 }
 0x906   : > { %4301 = vst.msk [vmem:[#allocation4 + $0x100] sm:$0xff] %vm4268_vm4, %v4236_v61 }
 0x907   : > { %v4104_v11 = vpop.xlane.xlu1 %4103 }
 0x908   : > { %v4234_v49 = vadd.f32 %v4104_v11, %v3978_v0  ;;  %v4756_v0 = vmul.f32 %v12268_v29, %v4372_v9  ;;  %v3926_v29 = vld [vmem:[#allocation4 + $0x150] sm:$0xff]  ;;  %v4376_v9 = vld [vmem:[#allocation5 + $0x158] sm:$0xff] }
 0x909   : > { %v3990_v41 = vmul.f32 %v13462_v38, %v3926_v29 }
 0x90a   : > { %4299 = vst.msk [vmem:[#allocation4 + $0xf0] sm:$0xff] %vm4268_vm4, %v4234_v49 }
 0x90b   : > { %v4128_v31 = vpop.xlane.xlu1 %4127 }
 0x90c   : > { %v4242_v14 = vadd.f32 %v4128_v31, %v3986_v8  ;;  %v7484_v5 = vpop.f32.mrb[60].mxu1 }
 0x90d   : > { %v5459_v36 = vadd.f32 %v7484_v5, %v4747_v60  ;;  %v5106_v6 = vpop.f32.mrb[61].mxu1 }
 0x90e   : > { %4307 = vst.msk [vmem:[#allocation4 + $0x130] sm:$0xff] %vm4268_vm4, %v4242_v14  ;;  %v5457_v57 = vadd.f32 %v5106_v6, %v4745_v18  ;;  %v7485_v2 = vpop.f32.mrb[62].mxu1  ;;  %v3934_v18 = vld [vmem:[#allocation4 + $0x190] sm:$0xff] }
 0x90f   : > { %5523 = vst.msk [vmem:[#allocation5 + $0xf0] sm:$0xff] %vm2146_vm2, %v5459_v36  ;;  %v5460_v26 = vadd.f32 %v7485_v2, %v4748_v37  ;;  %v5109_v53 = vpop.f32.mrb[63].mxu1  ;;  %v4098_v58 = vpop.xlane.xlu1 %4097  ;;  %v13463_v14 = vld [vmem:[#allocation48_spill] sm:$0xff]  ;;  %v3924_v37 = vld [vmem:[#allocation4 + $0x140] sm:$0xff] }
 0x910   : > { %5521 = vst.msk [vmem:[#allocation5 + $0xe0] sm:$0xff] %vm2146_vm2, %v5457_v57  ;;  %v5458_v40 = vadd.f32 %v5109_v53, %v4746_v24  ;;  %v4232_v61 = vadd.f32 %v4098_v58, %v3976_v47  ;;  %v7500_v50 = vpop.f32.mrb[68].mxu0  ;;  %v3998_v5 = vmul.f32 %v13463_v14, %v3934_v18  ;;  %v4375_v36 = vld [vmem:[#allocation5 + $0x150] sm:$0xff]  ;;  %v4373_v24 = vld [vmem:[#allocation5 + $0x140] sm:$0xff] }
 0x911   : > { %5524 = vst.msk [vmem:[#allocation5 + $0xf8] sm:$0xff] %vm2146_vm2, %v5460_v26  ;;  %v5467_v11 = vadd.f32 %v7500_v50, %v4755_v27  ;;  %v5183_v33 = vpop.f32.mrb[69].mxu0  ;;  %v13464_v57 = vld [vmem:[#allocation64_spill] sm:$0xff]  ;;  %v4759_v47 = vmul.f32 %v13465_v32, %v4375_v36  ;;  %v13466_v26 = vld [vmem:[#allocation182_spill] sm:$0xff] }
 0x912   : > { %5522 = vst.msk [vmem:[#allocation5 + $0xe8] sm:$0xff] %vm2146_vm2, %v5458_v40  ;;  %v5465_v49 = vadd.f32 %v5183_v33, %v4753_v39  ;;  %v7501_v20 = vpop.f32.mrb[70].mxu0  ;;  %v3988_v2 = vmul.f32 %v13464_v57, %v3924_v37  ;;  %v4757_v53 = vmul.f32 %v13466_v26, %v4373_v24  ;;  %v4383_v58 = vld [vmem:[#allocation5 + $0x190] sm:$0xff]  ;;  %v4381_v39 = vld [vmem:[#allocation5 + $0x180] sm:$0xff]  ;;  %v4760_v40 = vmul.f32 %v12284_v48, %v4376_v9 }
 0x913   : > { %4297 = vst.msk [vmem:[#allocation4 + $0xe0] sm:$0xff] %vm4268_vm4, %v4232_v61  ;;  %v5468_v8 = vadd.f32 %v7501_v20, %v4756_v0  ;;  %v5186_v4 = vpop.f32.mrb[71].mxu0  ;;  %v4122_v60 = vpop.xlane.xlu1 %4121  ;;  %v4758_v0 = vmul.f32 %v12276_v19, %v4374_v52  ;;  %v4767_v15 = vmul.f32 %v12200_v3, %v4383_v58  ;;  %v3930_v48 = vld [vmem:[#allocation4 + $0x170] sm:$0xff]  ;;  %v4765_v29 = vmul.f32 %v12179_v13, %v4381_v39  ;;  %v3928_v57 = vld [vmem:[#allocation4 + $0x160] sm:$0xff]  ;;  %v4380_v52 = vld [vmem:[#allocation5 + $0x178] sm:$0xff] }
 0x914   : > { %5531 = vst.msk [vmem:[#allocation5 + $0x130] sm:$0xff] %vm2146_vm2, %v5467_v11  ;;  %5529 = vst.msk [vmem:[#allocation5 + $0x120] sm:$0xff] %vm2146_vm2, %v5465_v49  ;;  %v5466_v35 = vadd.f32 %v5186_v4, %v4754_v54  ;;  %v4240_v31 = vadd.f32 %v4122_v60, %v3984_v59  ;;  %v4384_v11 = vld [vmem:[#allocation5 + $0x198] sm:$0xff]  ;;  %v13467_v49 = vld [vmem:[#allocation63_spill] sm:$0xff] }
 0x915   : > { %5532 = vst.msk [vmem:[#allocation5 + $0x138] sm:$0xff] %vm2146_vm2, %v5468_v8  ;;  %v3996_v20 = vmul.f32 %v13467_v49, %v3932_v46  ;;  %v4382_v59 = vld [vmem:[#allocation5 + $0x188] sm:$0xff]  ;;  %v4768_v38 = vmul.f32 %v12318_v45, %v4384_v11  ;;  %v13468_v13 = vld [vmem:[#allocation44_spill] sm:$0xff] }
 0x916   : > { %5530 = vst.msk [vmem:[#allocation5 + $0x128] sm:$0xff] %vm2146_vm2, %v5466_v35  ;;  %v3994_v14 = vmul.f32 %v13468_v13, %v3930_v48  ;;  %v3938_v45 = vld [vmem:[#allocation4 + $0x1b0] sm:$0xff]  ;;  %v4388_v49 = vld [vmem:[#allocation5 + $0x1b8] sm:$0xff] }
 0x917   : > { %4305 = vst.msk [vmem:[#allocation4 + $0x120] sm:$0xff] %vm4268_vm4, %v4240_v31  ;;  %v4140_v12 = vpop.xlane.xlu1 %4139  ;;  %v4387_v39 = vld [vmem:[#allocation5 + $0x1b0] sm:$0xff] }
 0x918   : > { %v4246_v23 = vadd.f32 %v4140_v12, %v3990_v41  ;;  %v4766_v12 = vmul.f32 %v12308_v25, %v4382_v59  ;;  %v13469_v25 = vld [vmem:[#allocation45_spill] sm:$0xff] }
 0x919   : > { %v4002_v24 = vmul.f32 %v13469_v25, %v3938_v45  ;;  %v4392_v45 = vld [vmem:[#allocation5 + $0x1d8] sm:$0xff] }
 0x91a   : > { %4311 = vst.msk [vmem:[#allocation4 + $0x150] sm:$0xff] %vm4268_vm4, %v4246_v23 }
 0x91b   : > { %v4164_v7 = vpop.xlane.xlu1 %4163 }
 0x91c   : > { %v4254_v6 = vadd.f32 %v4164_v7, %v3998_v5 }
 0x91e   : > { %4319 = vst.msk [vmem:[#allocation4 + $0x190] sm:$0xff] %vm4268_vm4, %v4254_v6 }
 0x91f   : > { %v4134_v27 = vpop.xlane.xlu1 %4133 }
 0x920   : > { %v4244_v30 = vadd.f32 %v4134_v27, %v3988_v2  ;;  %v7512_v55 = vpop.f32.mrb[64].mxu1  ;;  %v4379_v2 = vld [vmem:[#allocation5 + $0x170] sm:$0xff]  ;;  %v13470_v27 = vld [vmem:[#allocation70_spill] sm:$0xff] }
 0x921   : > { %v5471_v61 = vadd.f32 %v7512_v55, %v4759_v47  ;;  %v5244_v50 = vpop.f32.mrb[65].mxu1  ;;  %v4377_v47 = vld [vmem:[#allocation5 + $0x160] sm:$0xff]  ;;  %v3992_v46 = vmul.f32 %v13470_v27, %v3928_v57  ;;  %v4763_v26 = vmul.f32 %v12161_v44, %v4379_v2  ;;  %v3946_v57 = vld [vmem:[#allocation4 + $0x1f0] sm:$0xff] }
 0x922   : > { %4309 = vst.msk [vmem:[#allocation4 + $0x140] sm:$0xff] %vm4268_vm4, %v4244_v30  ;;  %v5469_v33 = vadd.f32 %v5244_v50, %v4757_v53  ;;  %v7513_v54 = vpop.f32.mrb[66].mxu1  ;;  %v4378_v53 = vld [vmem:[#allocation5 + $0x168] sm:$0xff]  ;;  %v3936_v30 = vld [vmem:[#allocation4 + $0x1a0] sm:$0xff]  ;;  %v4761_v55 = vmul.f32 %v12135_v17, %v4377_v47 }
 0x923   : > { %5535 = vst.msk [vmem:[#allocation5 + $0x150] sm:$0xff] %vm2146_vm2, %v5471_v61  ;;  %v5472_v8 = vadd.f32 %v7513_v54, %v4760_v40  ;;  %v5247_v4 = vpop.f32.mrb[67].mxu1  ;;  %v4158_v60 = vpop.xlane.xlu1 %4157  ;;  %v4385_v50 = vld [vmem:[#allocation5 + $0x1a0] sm:$0xff]  ;;  %v4762_v54 = vmul.f32 %v12292_v16, %v4378_v53  ;;  %v4386_v17 = vld [vmem:[#allocation5 + $0x1a8] sm:$0xff] }
 0x924   : > { %5533 = vst.msk [vmem:[#allocation5 + $0x140] sm:$0xff] %vm2146_vm2, %v5469_v33  ;;  %v5470_v19 = vadd.f32 %v5247_v4, %v4758_v0  ;;  %v4252_v35 = vadd.f32 %v4158_v60, %v3996_v20  ;;  %v7528_v31 = vpop.f32.mrb[72].mxu0  ;;  %v4764_v0 = vmul.f32 %v12300_v62, %v4380_v52  ;;  %v3942_v62 = vld [vmem:[#allocation4 + $0x1d0] sm:$0xff]  ;;  %v4776_v52 = vmul.f32 %v12339_v1, %v4392_v45  ;;  %v5706_v45 = vld [vmem:[#allocation4 + $0x88] sm:$0xff] (!%p7123_p12) }
 0x925   : > { %5536 = vst.msk [vmem:[#allocation5 + $0x158] sm:$0xff] %vm2146_vm2, %v5472_v8  ;;  %v5479_v41 = vadd.f32 %v7528_v31, %v4767_v15  ;;  %v5321_v3 = vpop.f32.mrb[73].mxu0  ;;  %v13471_v15 = vld [vmem:[#allocation66_spill] sm:$0xff]  ;;  %v4771_v8 = vmul.f32 %v12234_v34, %v4387_v39  ;;  %v4772_v31 = vmul.f32 %v12330_v43, %v4388_v49 }
 0x926   : > { %5534 = vst.msk [vmem:[#allocation5 + $0x148] sm:$0xff] %vm2146_vm2, %v5470_v19  ;;  %v5477_v18 = vadd.f32 %v5321_v3, %v4765_v29  ;;  %v7529_v23 = vpop.f32.mrb[74].mxu0  ;;  %v4000_v59 = vmul.f32 %v13471_v15, %v3936_v30  ;;  %v4769_v29 = vmul.f32 %v12221_v22, %v4385_v50  ;;  %v13472_v22 = vld [vmem:[#allocation34_spill] sm:$0xff]  ;;  %v4010_v30 = vmul.f32 %v12250_v42, %v3946_v57  ;;  %v13474_v42 = vld [vmem:[#allocation35_spill] sm:$0xff] }
 0x927   : > { %4317 = vst.msk [vmem:[#allocation4 + $0x180] sm:$0xff] %vm4268_vm4, %v4252_v35  ;;  %v5480_v5 = vadd.f32 %v7529_v23, %v4768_v38  ;;  %v5324_v7 = vpop.f32.mrb[75].mxu0  ;;  %v4152_v37 = vpop.xlane.xlu1 %4151  ;;  %v3940_v43 = vld [vmem:[#allocation4 + $0x1c0] sm:$0xff] }
 0x928   : > { %5543 = vst.msk [vmem:[#allocation5 + $0x190] sm:$0xff] %vm2146_vm2, %v5479_v41  ;;  %5541 = vst.msk [vmem:[#allocation5 + $0x180] sm:$0xff] %vm2146_vm2, %v5477_v18  ;;  %v5478_v36 = vadd.f32 %v5324_v7, %v4766_v12  ;;  %v4250_v6 = vadd.f32 %v4152_v37, %v3994_v14  ;;  %v4770_v41 = vmul.f32 %v12324_v51, %v4386_v17  ;;  %v4389_v51 = vld [vmem:[#allocation5 + $0x1c0] sm:$0xff] }
 0x929   : > { %5544 = vst.msk [vmem:[#allocation5 + $0x198] sm:$0xff] %vm2146_vm2, %v5480_v5  ;;  %v4006_v18 = vmul.f32 %v13472_v22, %v3942_v62  ;;  %v4391_v5 = vld [vmem:[#allocation5 + $0x1d0] sm:$0xff]  ;;  %v4773_v2 = vmul.f32 %v12248_v56, %v4389_v51  ;;  %v3944_v56 = vld [vmem:[#allocation4 + $0x1e0] sm:$0xff] }
 0x92a   : > { %5542 = vst.msk [vmem:[#allocation5 + $0x188] sm:$0xff] %vm2146_vm2, %v5478_v36  ;;  %v13473_v36 = vld [vmem:[#allocation37_spill] sm:$0xff]  ;;  %v4775_v25 = vmul.f32 %v12240_v28, %v4391_v5  ;;  %v5742_v5 = vld [vmem:[#allocation4 + $0x1a8] sm:$0xff] (!%p7123_p12) }
 0x92b   : > { %4315 = vst.msk [vmem:[#allocation4 + $0x170] sm:$0xff] %vm4268_vm4, %v4250_v6  ;;  %v4176_v9 = vpop.xlane.xlu1 %4175  ;;  %v4004_v6 = vmul.f32 %v13473_v36, %v3940_v43 }
 0x92c   : > { %v4258_v32 = vadd.f32 %v4176_v9, %v4002_v24  ;;  %v4390_v24 = vld [vmem:[#allocation5 + $0x1c8] sm:$0xff] }
 0x92e   : > { %4323 = vst.msk [vmem:[#allocation4 + $0x1b0] sm:$0xff] %vm4268_vm4, %v4258_v32 }
 0x92f   : > { %v4146_v58 = vpop.xlane.xlu1 %4145 }
 0x930   : > { %v4248_v40 = vadd.f32 %v4146_v58, %v3992_v46 }
 0x931   : > { %v7516_v61 = vpop.f32.mrb[68].mxu1 }
 0x932   : > { %v5475_v11 = vadd.f32 %v7516_v61, %v4763_v26  ;;  %v5260_v33 = vpop.f32.mrb[69].mxu1  ;;  %4313 = vst.msk [vmem:[#allocation4 + $0x160] sm:$0xff] %vm4268_vm4, %v4248_v40  ;;  %v4774_v26 = vmul.f32 %v12354_v63, %v4390_v24  ;;  %v4395_v40 = vld [vmem:[#allocation5 + $0x1f0] sm:$0xff]  ;;  %v4710_v61 = vpop.permute.xlu0 %4709  ;;  %v4008_v63 = vmul.f32 %v13474_v42, %v3944_v56  ;;  %v5710_v24 = vld [vmem:[#allocation4 + $0xa8] sm:$0xff] (!%p7123_p12) }
 0x933   : > { %v5473_v20 = vadd.f32 %v5260_v33, %v4761_v55  ;;  %v7517_v44 = vpop.f32.mrb[70].mxu1  ;;  %v4170_v48 = vpop.xlane.xlu1 %4169  ;;  %v4779_v33 = vmul.f32 %v4710_v61, %v4395_v40  ;;  %v5718_v56 = vld [vmem:[#allocation4 + $0xe8] sm:$0xff] (!%p7123_p12)  ;;  %v5717_v61 = vld [vmem:[#allocation4 + $0xe0] sm:$0xff] (!%p7123_p12)  ;;  %v5731_v42 = vld [vmem:[#allocation4 + $0x150] sm:$0xff] (!%p7123_p12) }
 0x934   : > { %5539 = vst.msk [vmem:[#allocation5 + $0x170] sm:$0xff] %vm2146_vm2, %v5475_v11  ;;  %v5476_v4 = vadd.f32 %v7517_v44, %v4764_v0  ;;  %v5263_v60 = vpop.f32.mrb[71].mxu1  ;;  %v4256_v19 = vadd.f32 %v4170_v48, %v4000_v59  ;;  %v7532_v35 = vpop.f32.mrb[76].mxu0  ;;  %v4393_v0 = vld [vmem:[#allocation5 + $0x1e0] sm:$0xff]  ;;  %v4394_v11 = vld [vmem:[#allocation5 + $0x1e8] sm:$0xff] }
 0x935   : > { %5537 = vst.msk [vmem:[#allocation5 + $0x160] sm:$0xff] %vm2146_vm2, %v5473_v20  ;;  %v5474_v16 = vadd.f32 %v5263_v60, %v4762_v54  ;;  %v5483_v38 = vadd.f32 %v7532_v35, %v4771_v8  ;;  %v5337_v34 = vpop.f32.mrb[77].mxu0  ;;  %v4777_v49 = vmul.f32 %v12257_v21, %v4393_v0  ;;  %v4396_v8 = vld [vmem:[#allocation5 + $0x1f8] sm:$0xff]  ;;  %v4778_v17 = vmul.f32 %v12361_v10, %v4394_v11  ;;  %v5734_v35 = vld [vmem:[#allocation4 + $0x168] sm:$0xff] (!%p7123_p12) }
 0x936   : > { %5540 = vst.msk [vmem:[#allocation5 + $0x178] sm:$0xff] %vm2146_vm2, %v5476_v4  ;;  %v5481_v3 = vadd.f32 %v5337_v34, %v4769_v29  ;;  %v7533_v12 = vpop.f32.mrb[78].mxu0  ;;  %v5698_v34 = vld [vmem:[#allocation4 + $0x48] sm:$0xff] (!%p7123_p12)  ;;  %v5736_v11 = vld [vmem:[#allocation4 + $0x178] sm:$0xff] (!%p7123_p12) }
 0x937   : > { %5538 = vst.msk [vmem:[#allocation5 + $0x168] sm:$0xff] %vm2146_vm2, %v5474_v16  ;;  %5547 = vst.msk [vmem:[#allocation5 + $0x1b0] sm:$0xff] %vm2146_vm2, %v5483_v38  ;;  %v5484_v23 = vadd.f32 %v7533_v12, %v4772_v31  ;;  %v5340_v13 = vpop.f32.mrb[79].mxu0  ;;  %v4188_v14 = vpop.xlane.xlu1 %4187  ;;  %v9260_v31 = vmov (!%p7123_p12), 0   ;;  %v5730_v38 = vld [vmem:[#allocation4 + $0x148] sm:$0xff] (!%p7123_p12)  ;;  %v5701_v12 = vld [vmem:[#allocation4 + $0x60] sm:$0xff] (!%p7123_p12) }
 0x938   : > { %4321 = vst.msk [vmem:[#allocation4 + $0x1a0] sm:$0xff] %vm4268_vm4, %v4256_v19  ;;  %v5482_v7 = vadd.f32 %v5340_v13, %v4770_v41  ;;  %v4262_v37 = vadd.f32 %v4188_v14, %v4006_v18  ;;  %v5729_v19 = vld [vmem:[#allocation4 + $0x140] sm:$0xff] (!%p7123_p12)  ;;  %8616 = vset.pattern.permute.xlu1 (!%p7123_p12), %v9260_v31  ;;  %8615 = vset.pattern.permute.xlu0 (!%p7123_p12), %v9260_v31  ;;  %v5708_v31 = vld [vmem:[#allocation4 + $0x98] sm:$0xff] (!%p7123_p12) }
 0x939   : > { %5545 = vst.msk [vmem:[#allocation5 + $0x1a0] sm:$0xff] %vm2146_vm2, %v5481_v3  ;;  %5548 = vst.msk [vmem:[#allocation5 + $0x1b8] sm:$0xff] %vm2146_vm2, %v5484_v23  ;;  %v5733_v10 = vld [vmem:[#allocation4 + $0x160] sm:$0xff] (!%p7123_p12)  ;;  %v5702_v3 = vld [vmem:[#allocation4 + $0x68] sm:$0xff] (!%p7123_p12) }
 0x93a   : > { %5546 = vst.msk [vmem:[#allocation5 + $0x1a8] sm:$0xff] %vm2146_vm2, %v5482_v7  ;;  %8785 = vrcp.f32 (!%p7123_p12), %v5733_v10  ;;  %v5697_v41 = vld [vmem:[#allocation4 + $0x40] sm:$0xff] (!%p7123_p12)  ;;  %v5738_v23 = vld [vmem:[#allocation4 + $0x188] sm:$0xff] (!%p7123_p12) }
 0x93b   : > { %4327 = vst.msk [vmem:[#allocation4 + $0x1d0] sm:$0xff] %vm4268_vm4, %v4262_v37  ;;  %v4182_v9 = vpop.xlane.xlu1 %4181  ;;  %8787 = vrcp.f32 (!%p7123_p12), %v5729_v19  ;;  %v5737_v14 = vld [vmem:[#allocation4 + $0x180] sm:$0xff] (!%p7123_p12)  ;;  %v5743_v19 = vld [vmem:[#allocation4 + $0x1b0] sm:$0xff] (!%p7123_p12) }
 0x93c   : > { %v4260_v32 = vadd.f32 %v4182_v9, %v4004_v6  ;;  %v7544_v47 = vpop.f32.mrb[72].mxu1  ;;  %8789 = vrcp.f32 (!%p7123_p12), %v5734_v35  ;;  %v5705_v6 = vld [vmem:[#allocation4 + $0x80] sm:$0xff] (!%p7123_p12) }
 0x93d   : > { %v5487_v27 = vadd.f32 %v7544_v47, %v4775_v25  ;;  %v5398_v46 = vpop.f32.mrb[73].mxu1  ;;  %8791 = vrcp.f32 (!%p7123_p12), %v5730_v38  ;;  %v5709_v9 = vld [vmem:[#allocation4 + $0xa0] sm:$0xff] (!%p7123_p12) }
 0x93e   : > { %4325 = vst.msk [vmem:[#allocation4 + $0x1c0] sm:$0xff] %vm4268_vm4, %v4260_v32  ;;  %v5485_v53 = vadd.f32 %v5398_v46, %v4773_v2  ;;  %v7545_v58 = vpop.f32.mrb[74].mxu1  ;;  %8793 = vrcp.f32 (!%p7123_p12), %v5698_v34  ;;  %v5746_v32 = vld [vmem:[#allocation4 + $0x1c8] sm:$0xff] (!%p7123_p12)  ;;  %v5707_v34 = vld [vmem:[#allocation4 + $0x90] sm:$0xff] (!%p7123_p12) }
 0x93f   : > { %5551 = vst.msk [vmem:[#allocation5 + $0x1d0] sm:$0xff] %vm2146_vm2, %v5487_v27  ;;  %v5488_v28 = vadd.f32 %v7545_v58, %v4776_v52  ;;  %v5401_v55 = vpop.f32.mrb[75].mxu1  ;;  %v4200_v39 = vpop.xlane.xlu1 %4199  ;;  %8795 = vrcp.f32 (!%p7123_p12), %v5697_v41  ;;  %v5741_v37 = vld [vmem:[#allocation4 + $0x1a0] sm:$0xff] (!%p7123_p12)  ;;  %v5750_v46 = vld [vmem:[#allocation4 + $0x1e8] sm:$0xff] (!%p7123_p12) }
 0x940   : > { %5549 = vst.msk [vmem:[#allocation5 + $0x1c0] sm:$0xff] %vm2146_vm2, %v5485_v53  ;;  %v5486_v1 = vadd.f32 %v5401_v55, %v4774_v26  ;;  %v4266_v50 = vadd.f32 %v4200_v39, %v4010_v30  ;;  %8797 = vrcp.f32 (!%p7123_p12), %v5702_v3  ;;  %v5714_v30 = vld [vmem:[#allocation4 + $0xc8] sm:$0xff] (!%p7123_p12)  ;;  %v5713_v55 = vld [vmem:[#allocation4 + $0xc0] sm:$0xff] (!%p7123_p12)  ;;  %v5712_v3 = vld [vmem:[#allocation4 + $0xb8] sm:$0xff] (!%p7123_p12) }
 0x941   : > { %5552 = vst.msk [vmem:[#allocation5 + $0x1d8] sm:$0xff] %vm2146_vm2, %v5488_v28  ;;  %8799 = vrcp.f32 (!%p7123_p12), %v5701_v12 }
 0x942   : > { %5550 = vst.msk [vmem:[#allocation5 + $0x1c8] sm:$0xff] %vm2146_vm2, %v5486_v1  ;;  %8801 = vrcp.f32 (!%p7123_p12), %v5738_v23  ;;  %v5748_v23 = vld [vmem:[#allocation4 + $0x1d8] sm:$0xff] (!%p7123_p12) }
 0x943   : > { %4331 = vst.msk [vmem:[#allocation4 + $0x1f0] sm:$0xff] %vm4268_vm4, %v4266_v50  ;;  %v4194_v54 = vpop.xlane.xlu1 %4193  ;;  %8803 = vrcp.f32 (!%p7123_p12), %v5737_v14  ;;  %v5732_v50 = vld [vmem:[#allocation4 + $0x158] sm:$0xff] (!%p7123_p12)  ;;  %v5747_v14 = vld [vmem:[#allocation4 + $0x1d0] sm:$0xff] (!%p7123_p12) }
 0x944   : > { %v4264_v20 = vadd.f32 %v4194_v54, %v4008_v63  ;;  %v7548_v44 = vpop.f32.mrb[76].mxu1  ;;  %v8786_v22 = vpop.eup (!%p7123_p12), %8785  ;;  %8805 = vrcp.f32 (!%p7123_p12), %v5742_v5  ;;  %v5735_v54 = vld [vmem:[#allocation4 + $0x170] sm:$0xff] (!%p7123_p12)  ;;  %v5752_v5 = vld [vmem:[#allocation4 + $0x1f8] sm:$0xff] (!%p7123_p12) }
 0x945   : > { %v5491_v15 = vadd.f32 %v7548_v44, %v4779_v33  ;;  %v5414_v59 = vpop.f32.mrb[77].mxu1  ;;  %v8788_v18 = vpop.eup (!%p7123_p12), %8787  ;;  %6039 = vperm.xlu1 (!%p7123_p12), %8616, %v8786_v22   ;;  %8807 = vrcp.f32 (!%p7123_p12), %v5741_v37  ;;  %v5745_v47 = vld [vmem:[#allocation4 + $0x1c0] sm:$0xff] (!%p7123_p12)  ;;  %v5711_v22 = vld [vmem:[#allocation4 + $0xb0] sm:$0xff] (!%p7123_p12) }
 0x946   : > { %4329 = vst.msk [vmem:[#allocation4 + $0x1e0] sm:$0xff] %vm4268_vm4, %v4264_v20  ;;  %v5489_v4 = vadd.f32 %v5414_v59, %v4777_v49  ;;  %v7549_v60 = vpop.f32.mrb[78].mxu1  ;;  %5624 = sbr.rel (%p7123_p12) target bundleno = 2936 (0xb78), region = 76  ;;  %v8790_v13 = vpop.eup (!%p7123_p12), %8789  ;;  %6019 = vperm.xlu0 (!%p7123_p12), %8615, %v8788_v18   ;;  %8809 = vrcp.f32 (!%p7123_p12), %v5706_v45  ;;  %v5700_v20 = vld [vmem:[#allocation4 + $0x58] sm:$0xff] (!%p7123_p12) }
 0x947   : > { %5555 = vst.msk [vmem:[#allocation5 + $0x1f0] sm:$0xff] %vm2146_vm2, %v5491_v15  ;;  %v5417_v48 = vpop.f32.mrb[79].mxu1  ;;  %v4715_v62 = vpop.permute.xlu1 %4714  ;;  %8811 = vrcp.f32 (!%p7123_p12), %v5705_v6  ;;  %v5699_v15 = vld [vmem:[#allocation4 + $0x50] sm:$0xff] (!%p7123_p12)  ;;  %v5716_v45 = vld [vmem:[#allocation4 + $0xd8] sm:$0xff] (!%p7123_p12) }
 0x948   : > { %5553 = vst.msk [vmem:[#allocation5 + $0x1e0] sm:$0xff] %vm2146_vm2, %v5489_v4  ;;  %v5490_v29 = vadd.f32 %v5417_v48, %v4778_v17  ;;  %v4780_v16 = vmul.f32 %v4715_v62, %v4396_v8  ;;  %v8792_v43 = vpop.eup (!%p7123_p12), %8791  ;;  %8813 = vrcp.f32 (!%p7123_p12), %v5710_v24  ;;  %v5704_v8 = vld [vmem:[#allocation4 + $0x78] sm:$0xff] (!%p7123_p12)  ;;  %v5703_v4 = vld [vmem:[#allocation4 + $0x70] sm:$0xff] (!%p7123_p12) }
 0x949   : > { %6044 = vperm.xlu1 (!%p7123_p12), %8616, %v8790_v13   ;;  %v8794_v7 = vpop.eup (!%p7123_p12), %8793  ;;  %8815 = vrcp.f32 (!%p7123_p12), %v5709_v9  ;;  %v5740_v48 = vld [vmem:[#allocation4 + $0x198] sm:$0xff] (!%p7123_p12)  ;;  %v5715_v6 = vld [vmem:[#allocation4 + $0xd0] sm:$0xff] (!%p7123_p12) }
 0x94a   : > { %5554 = vst.msk [vmem:[#allocation5 + $0x1e8] sm:$0xff] %vm2146_vm2, %v5490_v29  ;;  %v5492_v21 = vadd.f32 %v7549_v60, %v4780_v16  ;;  %6024 = vperm.xlu0 (!%p7123_p12), %8615, %v8792_v43   ;;  %v8796_v51 = vpop.eup (!%p7123_p12), %8795  ;;  %8817 = vrcp.f32 (!%p7123_p12), %v5746_v32  ;;  %v5739_v29 = vld [vmem:[#allocation4 + $0x190] sm:$0xff] (!%p7123_p12)  ;;  %v5720_v24 = vld [vmem:[#allocation4 + $0xf8] sm:$0xff] (!%p7123_p12)  ;;  %v5722_v32 = vld [vmem:[#allocation4 + $0x108] sm:$0xff] (!%p7123_p12) }
 0x94b   : > { %v8798_v36 = vpop.eup (!%p7123_p12), %8797  ;;  %8819 = vrcp.f32 (!%p7123_p12), %v5745_v47  ;;  %v5751_v37 = vld [vmem:[#allocation4 + $0x1f0] sm:$0xff] (!%p7123_p12) }
 0x94c   : > { %5556 = vst.msk [vmem:[#allocation5 + $0x1f8] sm:$0xff] %vm2146_vm2, %v5492_v21  ;;  %v8800_v25 = vpop.eup (!%p7123_p12), %8799  ;;  %8821 = vrcp.f32 (!%p7123_p12), %v5750_v46  ;;  %v5744_v21 = vld [vmem:[#allocation4 + $0x1b8] sm:$0xff] (!%p7123_p12)  ;;  %v5726_v46 = vld [vmem:[#allocation4 + $0x128] sm:$0xff] (!%p7123_p12) }
 0x94d   : > { %5864 = vperm.xlu1 %8616, %v8794_v7   ;;  %v8802_v57 = vpop.eup %8801  ;;  %v5749_v26 = vld [vmem:[#allocation4 + $0x1e0] sm:$0xff] }
 0x94e   : > { %5859 = vperm.xlu0 %8615, %v8796_v51   ;;  %v8804_v2 = vpop.eup %8803  ;;  %8823 = vrcp.f32 %v5749_v26 }
 0x94f   : > { %v8806_v52 = vpop.eup %8805  ;;  %8825 = vrcp.f32 %v5714_v30  ;;  %v5690_v30 = vld [vmem:[#allocation4 + $0x8] sm:$0xff] }
 0x950   : > { %v8808_v27 = vpop.eup %8807  ;;  %8827 = vrcp.f32 %v5713_v55  ;;  %v5689_v55 = vld [vmem:[#allocation4] sm:$0xff] }
 0x951   : > { %5884 = vperm.xlu1 %8616, %v8798_v36   ;;  %v8810_v53 = vpop.eup %8809  ;;  %8829 = vrcp.f32 %v5718_v56  ;;  %v5694_v56 = vld [vmem:[#allocation4 + $0x28] sm:$0xff] }
 0x952   : > { %5879 = vperm.xlu0 %8615, %v8800_v25   ;;  %v8812_v58 = vpop.eup %8811  ;;  %8831 = vrcp.f32 %v5717_v61  ;;  %v5693_v61 = vld [vmem:[#allocation4 + $0x20] sm:$0xff] }
 0x953   : > { %v8814_v28 = vpop.eup %8813  ;;  %8833 = vrcp.f32 %v5732_v50  ;;  %v5724_v50 = vld [vmem:[#allocation4 + $0x118] sm:$0xff] }
 0x954   : > { %v8816_v39 = vpop.eup %8815  ;;  %8835 = vrcp.f32 %v5731_v42  ;;  %v5723_v42 = vld [vmem:[#allocation4 + $0x110] sm:$0xff] }
 0x955   : > { %6064 = vperm.xlu1 %8616, %v8802_v57   ;;  %v8818_v40 = vpop.eup %8817  ;;  %8837 = vrcp.f32 %v5736_v11  ;;  %v5719_v57 = vld [vmem:[#allocation4 + $0xf0] sm:$0xff]  ;;  %v8737_v11 = vld [vmem:[#allocation14 + $0x4] ss:$8 sps:$4 sm:$0xff]  }
 0x956   : > { %6059 = vperm.xlu0 %8615, %v8804_v2   ;;  %v8820_v1 = vpop.eup %8819  ;;  %8839 = vrcp.f32 %v5735_v54  ;;  %v8739_v54 = vld [vmem:[#allocation14] ss:$8 sps:$4 sm:$0xff]   ;;  %6654 = vmatprep.subr.bf16.mxu0 %v8737_v11 }
 0x957   : > { %v8822_v0 = vpop.eup %8821  ;;  %8841 = vrcp.f32 %v5700_v20  ;;  %v5727_v20 = vld [vmem:[#allocation4 + $0x130] sm:$0xff]  ;;  %6655 = vmatpush1.bf16.msra.mxu0 %v8739_v54  ;;  %7582 = vmatprep.subr.bf16.mxu1 %v8737_v11 }
 0x958   : > { %v8824_v63 = vpop.eup %8823  ;;  %8843 = vrcp.f32 %v5699_v15  ;;  %v8740_v15 = vld [vmem:[#allocation14 + $0x14] ss:$8 sps:$4 sm:$0xff]   ;;  %7598 = vmatpush1.bf16.msra.mxu1 %v8739_v54 }
 0x959   : > { %6084 = vperm.xlu1 %8616, %v8806_v52   ;;  %v8826_v33 = vpop.eup %8825  ;;  %8845 = vrcp.f32 %v5704_v8  ;;  %v5721_v52 = vld [vmem:[#allocation4 + $0x100] sm:$0xff]  ;;  %v8742_v8 = vld [vmem:[#allocation14 + $0x10] ss:$8 sps:$4 sm:$0xff]   ;;  %6656 = vmatprep.subr.bf16.mxu0 %v8740_v15 }
 0x95a   : > { %6079 = vperm.xlu0 %8615, %v8808_v27   ;;  %v8828_v49 = vpop.eup %8827  ;;  %8847 = vrcp.f32 %v5703_v4  ;;  %v5691_v4 = vld [vmem:[#allocation4 + $0x10] sm:$0xff]  ;;  %7583 = vmatprep.subr.bf16.mxu1 %v8740_v15 }
 0x95b   : > { %v8830_v44 = vpop.eup %8829  ;;  %8849 = vrcp.f32 %v5740_v48  ;;  %6657 = vmatpush1.bf16.msra.mxu0 %v8742_v8  ;;  %v8743_v48 = vld [vmem:[#allocation14 + $0x24] ss:$8 sps:$4 sm:$0xff]  }
 0x95c   : > { %v8832_v59 = vpop.eup %8831  ;;  %8851 = vrcp.f32 %v5739_v29  ;;  %7599 = vmatpush1.bf16.msra.mxu1 %v8742_v8  ;;  %v8745_v29 = vld [vmem:[#allocation14 + $0x20] ss:$8 sps:$4 sm:$0xff]   ;;  %6658 = vmatprep.subr.bf16.mxu0 %v8743_v48 }
 0x95d   : > { %5904 = vperm.xlu1 %8616, %v8810_v53   ;;  %v8834_v17 = vpop.eup %8833  ;;  %8853 = vrcp.f32 %v5744_v21  ;;  %v5725_v53 = vld [vmem:[#allocation4 + $0x120] sm:$0xff]  ;;  %v5695_v21 = vld [vmem:[#allocation4 + $0x30] sm:$0xff]  ;;  %7584 = vmatprep.subr.bf16.mxu1 %v8743_v48  ;;  %v5678_v48 = vld [vmem:[#allocation5 + $0x1a8] sm:$0xff] }
 0x95e   : > { %5899 = vperm.xlu0 %8615, %v8812_v58   ;;  %v8836_v60 = vpop.eup %8835  ;;  %8855 = vrcp.f32 %v5743_v19  ;;  %v8746_v19 = vld [vmem:[#allocation14 + $0x34] ss:$8 sps:$4 sm:$0xff]  }
 0x95f   : > { %v8838_v62 = vpop.eup %8837  ;;  %8857 = vrcp.f32 %v5708_v31  ;;  %6659 = vmatpush1.bf16.msra.mxu0 %v8745_v29 }
 0x960   : > { %v8840_v16 = vpop.eup %8839  ;;  %8859 = vrcp.f32 %v5707_v34  ;;  %7600 = vmatpush1.bf16.msra.mxu1 %v8745_v29  ;;  %6660 = vmatprep.subr.bf16.mxu0 %v8746_v19  ;;  %v8749_v34 = vld [vmem:[#allocation14 + $0x44] ss:$8 sps:$4 sm:$0xff]  }
 0x961   : > { %5924 = vperm.xlu1 %8616, %v8814_v28   ;;  %v8842_v10 = vpop.eup %8841  ;;  %8861 = vrcp.f32 %v5712_v3  ;;  %7585 = vmatprep.subr.bf16.mxu1 %v8746_v19 }
 0x962   : > { %5919 = vperm.xlu0 %8615, %v8816_v39   ;;  %v8844_v35 = vpop.eup %8843  ;;  %8863 = vrcp.f32 %v5711_v22  ;;  %v8752_v22 = vld [vmem:[#allocation14 + $0x54] ss:$8 sps:$4 sm:$0xff]  }
 0x963   : > { %v8846_v38 = vpop.eup %8845  ;;  %8865 = vrcp.f32 %v5748_v23 }
 0x964   : > { %v8848_v41 = vpop.eup %8847  ;;  %8867 = vrcp.f32 %v5747_v14  ;;  %v8755_v14 = vld [vmem:[#allocation14 + $0x64] ss:$8 sps:$4 sm:$0xff]  }
 0x965   : > { %6104 = vperm.xlu1 %8616, %v8818_v40   ;;  %v8850_v12 = vpop.eup %8849  ;;  %8869 = vrcp.f32 %v5752_v5 }
 0x966   : > { %6099 = vperm.xlu0 %8615, %v8820_v1   ;;  %v8852_v18 = vpop.eup %8851  ;;  %8871 = vrcp.f32 %v5751_v37 }
 0x967   : > { %v8854_v13 = vpop.eup %8853  ;;  %8873 = vrcp.f32 %v5716_v45  ;;  %v5669_v45 = vld [vmem:[#allocation5 + $0x160] sm:$0xff] }
 0x968   : > { %v8856_v43 = vpop.eup %8855  ;;  %8875 = vrcp.f32 %v5715_v6  ;;  %v5665_v6 = vld [vmem:[#allocation5 + $0x140] sm:$0xff] }
 0x969   : > { %6124 = vperm.xlu1 %8616, %v8822_v0   ;;  %v8858_v7 = vpop.eup %8857  ;;  %8877 = vrcp.f32 %v5720_v24 }
 0x96a   : > { %6119 = vperm.xlu0 %8615, %v8824_v63   ;;  %v8860_v51 = vpop.eup %8859  ;;  %8879 = vrcp.f32 %v5719_v57 }
 0x96b   : > { %v8862_v36 = vpop.eup %8861  ;;  %8881 = vrcp.f32 %v5722_v32 }
 0x96c   : > { %v8864_v25 = vpop.eup %8863  ;;  %8883 = vrcp.f32 %v5721_v52 }
 0x96d   : > { %5944 = vperm.xlu1 %8616, %v8826_v33   ;;  %v8866_v9 = vpop.eup %8865  ;;  %8885 = vrcp.f32 %v5726_v46  ;;  %v5728_v33 = vld [vmem:[#allocation4 + $0x138] sm:$0xff]  ;;  %v5634_v46 = vld [vmem:[#allocation5 + $0x48] sm:$0xff] }
 0x96e   : > { %5939 = vperm.xlu0 %8615, %v8828_v49   ;;  %v8868_v2 = vpop.eup %8867  ;;  %8887 = vrcp.f32 %v5725_v53  ;;  %v5633_v53 = vld [vmem:[#allocation5 + $0x40] sm:$0xff] }
 0x96f   : > { %v8870_v47 = vpop.eup %8869  ;;  %8889 = vrcp.f32 %v5690_v30 }
 0x970   : > { %v8872_v27 = vpop.eup %8871  ;;  %8891 = vrcp.f32 %v5689_v55 }
 0x971   : > { %5964 = vperm.xlu1 %8616, %v8830_v44   ;;  %v8874_v26 = vpop.eup %8873  ;;  %8893 = vrcp.f32 %v5694_v56  ;;  %v8766_v56 = vld [vmem:[#allocation14 + $0x90] ss:$8 sps:$4 sm:$0xff]  }
 0x972   : > { %5959 = vperm.xlu0 %8615, %v8832_v59   ;;  %v8876_v58 = vpop.eup %8875  ;;  %8895 = vrcp.f32 %v5693_v61  ;;  %v5692_v59 = vld [vmem:[#allocation4 + $0x18] sm:$0xff]  ;;  %v5638_v61 = vld [vmem:[#allocation5 + $0x68] sm:$0xff] }
 0x973   : > { %v8878_v28 = vpop.eup %8877  ;;  %8897 = vrcp.f32 %v5724_v50 }
 0x974   : > { %v8880_v39 = vpop.eup %8879  ;;  %8899 = vrcp.f32 %v5723_v42  ;;  %v8767_v42 = vld [vmem:[#allocation14 + $0xa4] ss:$8 sps:$4 sm:$0xff]  }
 0x975   : > { %6034 = vperm.xlu1 %8616, %v8834_v17   ;;  %v8882_v40 = vpop.eup %8881  ;;  %8901 = vrcp.f32 %v5728_v33  ;;  %v8769_v33 = vld [vmem:[#allocation14 + $0xa0] ss:$8 sps:$4 sm:$0xff]  }
 0x976   : > { %6029 = vperm.xlu0 %8615, %v8836_v60   ;;  %v8884_v1 = vpop.eup %8883  ;;  %8903 = vrcp.f32 %v5727_v20  ;;  %v5673_v20 = vld [vmem:[#allocation5 + $0x180] sm:$0xff] }
 0x977   : > { %v8886_v0 = vpop.eup %8885  ;;  %8905 = vrcp.f32 %v5692_v59  ;;  %v8770_v59 = vld [vmem:[#allocation14 + $0xb4] ss:$8 sps:$4 sm:$0xff]  }
 0x978   : > { %v8888_v63 = vpop.eup %8887  ;;  %8907 = vrcp.f32 %v5691_v4  ;;  %v8772_v4 = vld [vmem:[#allocation14 + $0xb0] ss:$8 sps:$4 sm:$0xff]  }
 0x979   : > { %6054 = vperm.xlu1 %8616, %v8838_v62   ;;  %v8890_v49 = vpop.eup %8889  ;;  %v5696_v62 = vld [vmem:[#allocation4 + $0x38] sm:$0xff] }
 0x97a   : > { %6049 = vperm.xlu0 %8615, %v8840_v16   ;;  %v8892_v44 = vpop.eup %8891  ;;  %8909 = vrcp.f32 %v5696_v62  ;;  %v5677_v62 = vld [vmem:[#allocation5 + $0x1a0] sm:$0xff] }
 0x97b   : > { %v8894_v17 = vpop.eup %8893  ;;  %8911 = vrcp.f32 %v5695_v21  ;;  %v8773_v21 = vld [vmem:[#allocation14 + $0xc4] ss:$8 sps:$4 sm:$0xff]  }
 0x97c   : > { %v8896_v60 = vpop.eup %8895 }
 0x97d   : > { %5874 = vperm.xlu1 %8616, %v8842_v10   ;;  %v8898_v16 = vpop.eup %8897 }
 0x97e   : > { %5869 = vperm.xlu0 %8615, %v8844_v35   ;;  %v8900_v10 = vpop.eup %8899  ;;  %v8748_v35 = vld [vmem:[#allocation14 + $0x30] ss:$8 sps:$4 sm:$0xff]  }
 0x97f   : > { %v8902_v31 = vpop.eup %8901  ;;  %6661 = vmatpush1.bf16.msra.mxu0 %v8748_v35  ;;  %7601 = vmatpush1.bf16.msra.mxu1 %v8748_v35  ;;  %v8775_v35 = vld [vmem:[#allocation14 + $0xc0] ss:$8 sps:$4 sm:$0xff]  }
 0x980   : > { %6662 = vmatprep.subr.bf16.mxu0 %v8749_v34  ;;  %7586 = vmatprep.subr.bf16.mxu1 %v8749_v34  ;;  %v5641_v34 = vld [vmem:[#allocation5 + $0x80] sm:$0xff] }
 0x981   : > { %5894 = vperm.xlu1 %8616, %v8846_v38   ;;  %v8904_v38 = vpop.eup %8903 }
 0x982   : > { %5889 = vperm.xlu0 %8615, %v8848_v41   ;;  %v8751_v41 = vld [vmem:[#allocation14 + $0x40] ss:$8 sps:$4 sm:$0xff]   ;;  %v8906_v3 = vpop.eup %8905 }
 0x983   : > { %6663 = vmatpush1.bf16.msra.mxu0 %v8751_v41  ;;  %7602 = vmatpush1.bf16.msra.mxu1 %v8751_v41 }
 0x984   : > { %6664 = vmatprep.subr.bf16.mxu0 %v8752_v22  ;;  %7587 = vmatprep.subr.bf16.mxu1 %v8752_v22 }
 0x985   : > { %6074 = vperm.xlu1 %8616, %v8850_v12   ;;  %v8908_v12 = vpop.eup %8907 }
 0x986   : > { %6069 = vperm.xlu0 %8615, %v8852_v18   ;;  %v8754_v18 = vld [vmem:[#allocation14 + $0x50] ss:$8 sps:$4 sm:$0xff]   ;;  %v8910_v23 = vpop.eup %8909 }
 0x987   : > { %6665 = vmatpush1.bf16.msra.mxu0 %v8754_v18  ;;  %7603 = vmatpush1.bf16.msra.mxu1 %v8754_v18 }
 0x988   : > { %6666 = vmatprep.subr.bf16.mxu0 %v8755_v14  ;;  %7588 = vmatprep.subr.bf16.mxu1 %v8755_v14  ;;  %v5646_v14 = vld [vmem:[#allocation5 + $0xa8] sm:$0xff] }
 0x989   : > { %6094 = vperm.xlu1 %8616, %v8854_v13   ;;  %v8912_v13 = vpop.eup %8911 }
 0x98a   : > { %6089 = vperm.xlu0 %8615, %v8856_v43   ;;  %v8757_v43 = vld [vmem:[#allocation14 + $0x60] ss:$8 sps:$4 sm:$0xff]  }
 0x98b   : > { %6667 = vmatpush1.bf16.msra.mxu0 %v8757_v43  ;;  %7604 = vmatpush1.bf16.msra.mxu1 %v8757_v43  ;;  %v5645_v43 = vld [vmem:[#allocation5 + $0xa0] sm:$0xff] }
 0x98d   : > { %5914 = vperm.xlu1 %8616, %v8858_v7   ;;  %v8758_v7 = vld [vmem:[#allocation14 + $0x74] ss:$8 sps:$4 sm:$0xff]  }
 0x98e   : > { %5909 = vperm.xlu0 %8615, %v8860_v51   ;;  %v8760_v51 = vld [vmem:[#allocation14 + $0x70] ss:$8 sps:$4 sm:$0xff]   ;;  %6668 = vmatprep.subr.bf16.mxu0 %v8758_v7 }
 0x98f   : > { %7589 = vmatprep.subr.bf16.mxu1 %v8758_v7  ;;  %6669 = vmatpush1.bf16.msra.mxu0 %v8760_v51 }
 0x990   : > { %7605 = vmatpush1.bf16.msra.mxu1 %v8760_v51 }
 0x991   : > { %5934 = vperm.xlu1 %8616, %v8862_v36   ;;  %v5670_v36 = vld [vmem:[#allocation5 + $0x168] sm:$0xff] }
 0x992   : > { %5929 = vperm.xlu0 %8615, %v8864_v25   ;;  %v5666_v25 = vld [vmem:[#allocation5 + $0x148] sm:$0xff] }
 0x995   : > { %6114 = vperm.xlu1 %8616, %v8866_v9   ;;  %v8761_v9 = vld [vmem:[#allocation14 + $0x84] ss:$8 sps:$4 sm:$0xff]  }
 0x996   : > { %6109 = vperm.xlu0 %8615, %v8868_v2   ;;  %6670 = vmatprep.subr.bf16.mxu0 %v8761_v9 }
 0x997   : > { %7590 = vmatprep.subr.bf16.mxu1 %v8761_v9 }
 0x999   : > { %6134 = vperm.xlu1 %8616, %v8870_v47   ;;  %v8763_v47 = vld [vmem:[#allocation14 + $0x80] ss:$8 sps:$4 sm:$0xff]  }
 0x99a   : > { %6129 = vperm.xlu0 %8615, %v8872_v27   ;;  %6671 = vmatpush1.bf16.msra.mxu0 %v8763_v47 }
 0x99b   : > { %7606 = vmatpush1.bf16.msra.mxu1 %v8763_v47 }
 0x99d   : > { %5954 = vperm.xlu1 %8616, %v8874_v26  }
 0x99e   : > { %5949 = vperm.xlu0 %8615, %v8876_v58  }
 0x9a1   : > { %5974 = vperm.xlu1 %8616, %v8878_v28   ;;  %v8764_v28 = vld [vmem:[#allocation14 + $0x94] ss:$8 sps:$4 sm:$0xff]  }
 0x9a2   : > { %5969 = vperm.xlu0 %8615, %v8880_v39   ;;  %6672 = vmatprep.subr.bf16.mxu0 %v8764_v28 }
 0x9a3   : > { %6673 = vmatpush1.bf16.msra.mxu0 %v8766_v56  ;;  %7591 = vmatprep.subr.bf16.mxu1 %v8764_v28 }
 0x9a4   : > { %7607 = vmatpush1.bf16.msra.mxu1 %v8766_v56  ;;  %6674 = vmatprep.subr.bf16.mxu0 %v8767_v42  ;;  %v5649_v56 = vld [vmem:[#allocation5 + $0xc0] sm:$0xff] }
 0x9a5   : > { %5984 = vperm.xlu1 %8616, %v8882_v40   ;;  %7592 = vmatprep.subr.bf16.mxu1 %v8767_v42  ;;  %v5654_v42 = vld [vmem:[#allocation5 + $0xe8] sm:$0xff] }
 0x9a6   : > { %5979 = vperm.xlu0 %8615, %v8884_v1   ;;  %v5637_v1 = vld [vmem:[#allocation5 + $0x60] sm:$0xff] }
 0x9a7   : > { %6675 = vmatpush1.bf16.msra.mxu0 %v8769_v33 }
 0x9a8   : > { %7608 = vmatpush1.bf16.msra.mxu1 %v8769_v33  ;;  %6676 = vmatprep.subr.bf16.mxu0 %v8770_v59 }
 0x9a9   : > { %6004 = vperm.xlu1 %8616, %v8886_v0   ;;  %7593 = vmatprep.subr.bf16.mxu1 %v8770_v59 }
 0x9aa   : > { %5999 = vperm.xlu0 %8615, %v8888_v63  }
 0x9ab   : > { %6677 = vmatpush1.bf16.msra.mxu0 %v8772_v4 }
 0x9ac   : > { %7609 = vmatpush1.bf16.msra.mxu1 %v8772_v4  ;;  %6678 = vmatprep.subr.bf16.mxu0 %v8773_v21 }
 0x9ad   : > { %5824 = vperm.xlu1 %8616, %v8890_v49   ;;  %v5674_v49 = vld [vmem:[#allocation5 + $0x188] sm:$0xff]  ;;  %7594 = vmatprep.subr.bf16.mxu1 %v8773_v21 }
 0x9ae   : > { %5819 = vperm.xlu0 %8615, %v8892_v44  }
 0x9af   : > { %6679 = vmatpush1.bf16.msra.mxu0 %v8775_v35 }
 0x9b0   : > { %7610 = vmatpush1.bf16.msra.mxu1 %v8775_v35  ;;  %v5636_v35 = vld [vmem:[#allocation5 + $0x58] sm:$0xff] }
 0x9b1   : > { %5844 = vperm.xlu1 %8616, %v8894_v17  }
 0x9b2   : > { %5839 = vperm.xlu0 %8615, %v8896_v60  }
 0x9b5   : > { %5994 = vperm.xlu1 %8616, %v8898_v16  }
 0x9b6   : > { %5989 = vperm.xlu0 %8615, %v8900_v10  }
 0x9b9   : > { %6014 = vperm.xlu1 %8616, %v8902_v31  }
 0x9ba   : > { %6009 = vperm.xlu0 %8615, %v8904_v38   ;;  %v5642_v38 = vld [vmem:[#allocation5 + $0x88] sm:$0xff] }
 0x9bd   : > { %5834 = vperm.xlu1 %8616, %v8906_v3  }
 0x9be   : > { %5829 = vperm.xlu0 %8615, %v8908_v12   ;;  %v8776_v12 = vld [vmem:[#allocation14 + $0xd4] ss:$8 sps:$4 sm:$0xff]  }
 0x9bf   : > { %6680 = vmatprep.subr.bf16.mxu0 %v8776_v12  ;;  %7595 = vmatprep.subr.bf16.mxu1 %v8776_v12 }
 0x9c1   : > { %5854 = vperm.xlu1 %8616, %v8910_v23   ;;  %v8778_v23 = vld [vmem:[#allocation14 + $0xd0] ss:$8 sps:$4 sm:$0xff]  }
 0x9c2   : > { %5849 = vperm.xlu0 %8615, %v8912_v13   ;;  %6681 = vmatpush1.bf16.msra.mxu0 %v8778_v23 }
 0x9c3   : > { %7611 = vmatpush1.bf16.msra.mxu1 %v8778_v23 }
 0x9c4   : > { %v6040_v5 = vpop.permute.xlu1 %6039 }
 0x9c5   : > { %v6020_v37 = vpop.permute.xlu0 %6019  ;;  %v6181_v57 = vmul.f32 %v6040_v5, %v5669_v45 }
 0x9c6   : > { %v6177_v52 = vmul.f32 %v6020_v37, %v5665_v6  ;;  %v8779_v37 = vld [vmem:[#allocation14 + $0xe4] ss:$8 sps:$4 sm:$0xff]  }
 0x9c7   : > { %6682 = vmatprep.subr.bf16.mxu0 %v8779_v37  ;;  %7596 = vmatprep.subr.bf16.mxu1 %v8779_v37  ;;  %v5675_v37 = vld [vmem:[#allocation5 + $0x190] sm:$0xff] }
 0x9c8   : > { %v6045_v24 = vpop.permute.xlu1 %6044 }
 0x9c9   : > { %v6182_v2 = vmul.f32 %v6045_v24, %v5670_v36  ;;  %v6025_v32 = vpop.permute.xlu0 %6024  ;;  %v8781_v36 = vld [vmem:[#allocation14 + $0xe0] ss:$8 sps:$4 sm:$0xff]  }
 0x9ca   : > { %v6178_v27 = vmul.f32 %v6025_v32, %v5666_v25  ;;  %v5682_v25 = vld [vmem:[#allocation5 + $0x1c8] sm:$0xff]  ;;  %v5681_v24 = vld [vmem:[#allocation5 + $0x1c0] sm:$0xff]  ;;  %6683 = vmatpush1.bf16.msra.mxu0 %v8781_v36  ;;  %7612 = vmatpush1.bf16.msra.mxu1 %v8781_v36 }
 0x9cb   : > { %v8622_v26 = vpack.i.bf16 %v6182_v2, %v6181_v57  ;;  %v8782_v2 = vld [vmem:[#allocation14 + $0xf4] ss:$8 sps:$4 sm:$0xff]  }
 0x9cc   : > { %v8617_v58 = vpack.i.bf16 %v6178_v27, %v6177_v52  ;;  %v5865_v30 = vpop.permute.xlu1 %5864  ;;  %v8784_v52 = vld [vmem:[#allocation14 + $0xf0] ss:$8 sps:$4 sm:$0xff]   ;;  %6684 = vmatprep.subr.bf16.mxu0 %v8782_v2  ;;  %7597 = vmatprep.subr.bf16.mxu1 %v8782_v2 }
 0x9cd   : > { %v6146_v55 = vmul.f32 %v5865_v30, %v5634_v46  ;;  %v5860_v39 = vpop.permute.xlu0 %5859  ;;  %8623 = vrot.lane.b32.xlu1 %v8622_v26, %s9261_s2  ;;  %v5686_v46 = vld [vmem:[#allocation5 + $0x1e8] sm:$0xff]  ;;  %v5685_v26 = vld [vmem:[#allocation5 + $0x1e0] sm:$0xff] }
 0x9ce   : > { %v6145_v40 = vmul.f32 %v5860_v39, %v5633_v53  ;;  %8618 = vrot.lane.b32.xlu0 %v8617_v58, %s9261_s2  ;;  %6685 = vmatpush1.bf16.msra.mxu0 %v8784_v52  ;;  %v5650_v39 = vld [vmem:[#allocation5 + $0xc8] sm:$0xff] }
 0x9cf   : > { %7613 = vmatpush1.bf16.msra.mxu1 %v8784_v52 }
 0x9d0   : > { %v8627_v50 = vpack.i.bf16 %v6146_v55, %v6145_v40  ;;  %v5885_v0 = vpop.permute.xlu1 %5884 }
 0x9d1   : > { %v6150_v63 = vmul.f32 %v5885_v0, %v5638_v61  ;;  %v5880_v11 = vpop.permute.xlu0 %5879 }
 0x9d2   : > { %v6149_v54 = vmul.f32 %v5880_v11, %v5637_v1  ;;  %8628 = vrot.lane.b32.xlu0 %v8627_v50, %s9261_s2 }
 0x9d4   : > { %v8632_v44 = vpack.i.bf16 %v6150_v63, %v6149_v54  ;;  %v6065_v15 = vpop.permute.xlu1 %6064  ;;  %v5653_v63 = vld [vmem:[#allocation5 + $0xe0] sm:$0xff] }
 0x9d5   : > { %v6186_v8 = vmul.f32 %v6065_v15, %v5674_v49  ;;  %v6060_v17 = vpop.permute.xlu0 %6059  ;;  %v5667_v15 = vld [vmem:[#allocation5 + $0x150] sm:$0xff] }
 0x9d6   : > { %v6185_v60 = vmul.f32 %v6060_v17, %v5673_v20  ;;  %8633 = vrot.lane.b32.xlu1 %v8632_v44, %s9261_s2  ;;  %v5668_v44 = vld [vmem:[#allocation5 + $0x158] sm:$0xff] }
 0x9d8   : > { %v8637_v29 = vpack.i.bf16 %v6186_v8, %v6185_v60  ;;  %v6085_v16 = vpop.permute.xlu1 %6084 }
 0x9d9   : > { %v6190_v10 = vmul.f32 %v6085_v16, %v5678_v48  ;;  %v6080_v19 = vpop.permute.xlu0 %6079  ;;  %v5672_v48 = vld [vmem:[#allocation5 + $0x178] sm:$0xff] }
 0x9da   : > { %v6189_v31 = vmul.f32 %v6080_v19, %v5677_v62  ;;  %8638 = vrot.lane.b32.xlu0 %v8637_v29, %s9262_s19  ;;  %v5671_v62 = vld [vmem:[#allocation5 + $0x170] sm:$0xff] }
 0x9dc   : > { %v8642_v41 = vpack.i.bf16 %v6190_v10, %v6189_v31  ;;  %v5905_v3 = vpop.permute.xlu1 %5904  ;;  %v5635_v31 = vld [vmem:[#allocation5 + $0x50] sm:$0xff] }
 0x9dd   : > { %v6154_v22 = vmul.f32 %v5905_v3, %v5642_v38  ;;  %v5900_v18 = vpop.permute.xlu0 %5899 }
 0x9de   : > { %v6153_v13 = vmul.f32 %v5900_v18, %v5641_v34  ;;  %8643 = vrot.lane.b32.xlu1 %v8642_v41, %s9262_s19  ;;  %v5639_v18 = vld [vmem:[#allocation5 + $0x70] sm:$0xff] }
 0x9e0   : > { %v8647_v5 = vpack.i.bf16 %v6154_v22, %v6153_v13  ;;  %v5925_v7 = vpop.permute.xlu1 %5924  ;;  %v5640_v22 = vld [vmem:[#allocation5 + $0x78] sm:$0xff] }
 0x9e1   : > { %v6158_v51 = vmul.f32 %v5925_v7, %v5646_v14  ;;  %v5920_v45 = vpop.permute.xlu0 %5919  ;;  %v5676_v7 = vld [vmem:[#allocation5 + $0x198] sm:$0xff] }
 0x9e2   : > { %v6157_v6 = vmul.f32 %v5920_v45, %v5645_v43  ;;  %8648 = vrot.lane.b32.xlu0 %v8647_v5, %s9262_s19 }
 0x9e4   : > { %v8652_v9 = vpack.i.bf16 %v6158_v51, %v6157_v6  ;;  %v6105_v57 = vpop.permute.xlu1 %6104 }
 0x9e5   : > { %v6194_v32 = vmul.f32 %v6105_v57, %v5682_v25  ;;  %v6100_v47 = vpop.permute.xlu0 %6099 }
 0x9e6   : > { %v6193_v27 = vmul.f32 %v6100_v47, %v5681_v24  ;;  %8653 = vrot.lane.b32.xlu1 %v8652_v9, %s9262_s19  ;;  %v5680_v24 = vld [vmem:[#allocation5 + $0x1b8] sm:$0xff]  ;;  %v5679_v9 = vld [vmem:[#allocation5 + $0x1b0] sm:$0xff] }
 0x9e8   : > { %v8657_v53 = vpack.i.bf16 %v6194_v32, %v6193_v27  ;;  %v6125_v58 = vpop.permute.xlu1 %6124  ;;  %v5644_v27 = vld [vmem:[#allocation5 + $0x98] sm:$0xff] }
 0x9e9   : > { %v6198_v30 = vmul.f32 %v6125_v58, %v5686_v46  ;;  %v6120_v28 = vpop.permute.xlu0 %6119  ;;  %v5643_v46 = vld [vmem:[#allocation5 + $0x90] sm:$0xff] }
 0x9ea   : > { %v6197_v55 = vmul.f32 %v6120_v28, %v5685_v26  ;;  %8658 = vrot.lane.b32.xlu0 %v8657_v53, %s9263_s12 }
 0x9ec   : > { %v8662_v40 = vpack.i.bf16 %v6198_v30, %v6197_v55  ;;  %v5945_v61 = vpop.permute.xlu1 %5944  ;;  %v5648_v55 = vld [vmem:[#allocation5 + $0xb8] sm:$0xff] }
 0x9ed   : > { %v6162_v1 = vmul.f32 %v5945_v61, %v5650_v39  ;;  %v5940_v50 = vpop.permute.xlu0 %5939  ;;  %v5647_v39 = vld [vmem:[#allocation5 + $0xb0] sm:$0xff] }
 0x9ee   : > { %v6161_v0 = vmul.f32 %v5940_v50, %v5649_v56  ;;  %8663 = vrot.lane.b32.xlu1 %v8662_v40, %s9263_s12 }
 0x9f0   : > { %v8667_v11 = vpack.i.bf16 %v6162_v1, %v6161_v0  ;;  %v5965_v33 = vpop.permute.xlu1 %5964  ;;  %v5684_v0 = vld [vmem:[#allocation5 + $0x1d8] sm:$0xff] }
 0x9f1   : > { %v6166_v54 = vmul.f32 %v5965_v33, %v5654_v42  ;;  %v5960_v49 = vpop.permute.xlu0 %5959  ;;  %v5683_v42 = vld [vmem:[#allocation5 + $0x1d0] sm:$0xff] }
 0x9f2   : > { %v6165_v20 = vmul.f32 %v5960_v49, %v5653_v63  ;;  %8668 = vrot.lane.b32.xlu0 %v8667_v11, %s9263_s12 }
 0x9f4   : > { %v8672_v59 = vpack.i.bf16 %v6166_v54, %v6165_v20  ;;  %v6035_v8 = vpop.permute.xlu1 %6034  ;;  %v5688_v20 = vld [vmem:[#allocation5 + $0x1f8] sm:$0xff] }
 0x9f5   : > { %v6180_v17 = vmul.f32 %v6035_v8, %v5668_v44  ;;  %v6030_v4 = vpop.permute.xlu0 %6029  ;;  %v5687_v44 = vld [vmem:[#allocation5 + $0x1f0] sm:$0xff] }
 0x9f6   : > { %v6179_v60 = vmul.f32 %v6030_v4, %v5667_v15  ;;  %8673 = vrot.lane.b32.xlu1 %v8672_v59, %s9263_s12 }
 0x9f8   : > { %v8677_v29 = vpack.i.bf16 %v6180_v17, %v6179_v60  ;;  %v6055_v16 = vpop.permute.xlu1 %6054  ;;  %v5652_v60 = vld [vmem:[#allocation5 + $0xd8] sm:$0xff] }
 0x9f9   : > { %v6184_v21 = vmul.f32 %v6055_v16, %v5672_v48  ;;  %v6050_v10 = vpop.permute.xlu0 %6049  ;;  %v5651_v48 = vld [vmem:[#allocation5 + $0xd0] sm:$0xff] }
 0x9fa   : > { %v6183_v19 = vmul.f32 %v6050_v10, %v5671_v62  ;;  %8678 = vrot.lane.b32.xlu0 %v8677_v29, %s9261_s2 }
 0x9fc   : > { %v8682_v38 = vpack.i.bf16 %v6184_v21, %v6183_v19  ;;  %v5875_v34 = vpop.permute.xlu1 %5874  ;;  %v5656_v19 = vld [vmem:[#allocation5 + $0xf8] sm:$0xff] }
 0x9fd   : > { %v6148_v41 = vmul.f32 %v5875_v34, %v5636_v35  ;;  %v5870_v3 = vpop.permute.xlu0 %5869  ;;  %v5655_v35 = vld [vmem:[#allocation5 + $0xf0] sm:$0xff] }
 0x9fe   : > { %v6147_v12 = vmul.f32 %v5870_v3, %v5635_v31  ;;  %8683 = vrot.lane.b32.xlu1 %v8682_v38, %s9261_s2 }
 0xa00   : > { %v8687_v23 = vpack.i.bf16 %v6148_v41, %v6147_v12  ;;  %v5895_v13 = vpop.permute.xlu1 %5894 }
 0xa01   : > { %v6152_v14 = vmul.f32 %v5895_v13, %v5640_v22  ;;  %v5890_v43 = vpop.permute.xlu0 %5889 }
 0xa02   : > { %v6151_v5 = vmul.f32 %v5890_v43, %v5639_v18  ;;  %8688 = vrot.lane.b32.xlu0 %v8687_v23, %s9261_s2 }
 0xa04   : > { %v8692_v51 = vpack.i.bf16 %v6152_v14, %v6151_v5  ;;  %v6075_v45 = vpop.permute.xlu1 %6074 }
 0xa05   : > { %v6188_v36 = vmul.f32 %v6075_v45, %v5676_v7  ;;  %v6070_v6 = vpop.permute.xlu0 %6069 }
 0xa06   : > { %v6187_v25 = vmul.f32 %v6070_v6, %v5675_v37  ;;  %8693 = vrot.lane.b32.xlu1 %v8692_v51, %s9261_s2 }
 0xa08   : > { %v8697_v57 = vpack.i.bf16 %v6188_v36, %v6187_v25  ;;  %v6095_v2 = vpop.permute.xlu1 %6094 }
 0xa09   : > { %v6192_v32 = vmul.f32 %v6095_v2, %v5680_v24  ;;  %v6090_v47 = vpop.permute.xlu0 %6089 }
 0xa0a   : > { %v6191_v52 = vmul.f32 %v6090_v47, %v5679_v9  ;;  %8698 = vrot.lane.b32.xlu0 %v8697_v57, %s9262_s19 }
 0xa0c   : > { %v8702_v26 = vpack.i.bf16 %v6192_v32, %v6191_v52  ;;  %v5915_v53 = vpop.permute.xlu1 %5914 }
 0xa0d   : > { %v6156_v58 = vmul.f32 %v5915_v53, %v5644_v27  ;;  %v5910_v30 = vpop.permute.xlu0 %5909  ;;  %v5658_v27 = vld [vmem:[#allocation5 + $0x108] sm:$0xff] }
 0xa0e   : > { %v6155_v28 = vmul.f32 %v5910_v30, %v5643_v46  ;;  %8703 = vrot.lane.b32.xlu1 %v8702_v26, %s9262_s19  ;;  %v5657_v46 = vld [vmem:[#allocation5 + $0x100] sm:$0xff] }
 0xa0f   : > { %v5661_v30 = vld [vmem:[#allocation5 + $0x120] sm:$0xff] }
 0xa10   : > { %v8707_v56 = vpack.i.bf16 %v6156_v58, %v6155_v28  ;;  %v5935_v40 = vpop.permute.xlu1 %5934  ;;  %v5662_v58 = vld [vmem:[#allocation5 + $0x128] sm:$0xff] }
 0xa11   : > { %v6160_v61 = vmul.f32 %v5935_v40, %v5648_v55  ;;  %v5930_v1 = vpop.permute.xlu0 %5929 }
 0xa12   : > { %v6159_v50 = vmul.f32 %v5930_v1, %v5647_v39  ;;  %8708 = vrot.lane.b32.xlu0 %v8707_v56, %s9262_s19 }
 0xa14   : > { %v8712_v63 = vpack.i.bf16 %v6160_v61, %v6159_v50  ;;  %v6115_v11 = vpop.permute.xlu1 %6114 }
 0xa15   : > { %v6196_v33 = vmul.f32 %v6115_v11, %v5684_v0  ;;  %v6110_v54 = vpop.permute.xlu0 %6109 }
 0xa16   : > { %v6195_v49 = vmul.f32 %v6110_v54, %v5683_v42  ;;  %8713 = vrot.lane.b32.xlu1 %v8712_v63, %s9262_s19 }
 0xa18   : > { %v8717_v15 = vpack.i.bf16 %v6196_v33, %v6195_v49  ;;  %v6135_v59 = vpop.permute.xlu1 %6134 }
 0xa19   : > { %v6200_v8 = vmul.f32 %v6135_v59, %v5688_v20  ;;  %v6130_v17 = vpop.permute.xlu0 %6129 }
 0xa1a   : > { %v6199_v4 = vmul.f32 %v6130_v17, %v5687_v44  ;;  %8718 = vrot.lane.b32.xlu0 %v8717_v15, %s9263_s12 }
 0xa1c   : > { %v8722_v62 = vpack.i.bf16 %v6200_v8, %v6199_v4  ;;  %v5955_v29 = vpop.permute.xlu1 %5954 }
 0xa1d   : > { %v6164_v16 = vmul.f32 %v5955_v29, %v5652_v60  ;;  %v5950_v21 = vpop.permute.xlu0 %5949  ;;  %v5626_v60 = vld [vmem:[#allocation5 + $0x8] sm:$0xff] }
 0xa1e   : > { %v6163_v10 = vmul.f32 %v5950_v21, %v5651_v48  ;;  %8723 = vrot.lane.b32.xlu1 %v8722_v62, %s9263_s12  ;;  %v5625_v48 = vld [vmem:[#allocation5] sm:$0xff] }
 0xa20   : > { %v8727_v31 = vpack.i.bf16 %v6164_v16, %v6163_v10  ;;  %v5975_v38 = vpop.permute.xlu1 %5974 }
 0xa21   : > { %v6168_v34 = vmul.f32 %v5975_v38, %v5656_v19  ;;  %v5970_v41 = vpop.permute.xlu0 %5969 }
 0xa22   : > { %v6167_v3 = vmul.f32 %v5970_v41, %v5655_v35  ;;  %8728 = vrot.lane.b32.xlu0 %v8727_v31, %s9263_s12 }
 0xa24   : > { %v8732_v12 = vpack.i.bf16 %v6168_v34, %v6167_v3  ;;  %v5985_v22 = vpop.permute.xlu1 %5984 }
 0xa25   : > { %v5980_v18 = vpop.permute.xlu0 %5979  ;;  %v6170_v40 = vmul.f32 %v5985_v22, %v5658_v27 }
 0xa26   : > { %8733 = vrot.lane.b32.xlu1 %v8732_v12, %s9263_s12  ;;  %v6169_v61 = vmul.f32 %v5980_v18, %v5657_v46 }
 0xa28   : > { %v6005_v23 = vpop.permute.xlu1 %6004 }
 0xa29   : > { %v6000_v13 = vpop.permute.xlu0 %5999  ;;  %v6174_v1 = vmul.f32 %v6005_v23, %v5662_v58 }
 0xa2a   : > { %v6173_v50 = vmul.f32 %v6000_v13, %v5661_v30  ;;  %v5630_v13 = vld [vmem:[#allocation5 + $0x28] sm:$0xff] }
 0xa2c   : > { %v5825_v14 = vpop.permute.xlu1 %5824 }
 0xa2d   : > { %v5820_v43 = vpop.permute.xlu0 %5819  ;;  %v6138_v12 = vmul.f32 %v5825_v14, %v5626_v60 }
 0xa2e   : > { %v6137_v22 = vmul.f32 %v5820_v43, %v5625_v48 }
 0xa30   : > { %v12529_v5 = vpop.permute.xlu1 %5844 }
 0xa31   : > { %v12531_v7 = vpop.permute.xlu0 %5839 }
 0xa34   : > { %v12535_v51 = vpop.permute.xlu1 %5994 }
 0xa35   : > { %v12533_v37 = vpop.permute.xlu0 %5989 }
 0xa38   : > { %v12539_v36 = vpop.permute.xlu1 %6014 }
 0xa39   : > { %v12537_v45 = vpop.permute.xlu0 %6009 }
 0xa3c   : > { %v12543_v25 = vpop.permute.xlu1 %5834 }
 0xa3d   : > { %v12541_v6 = vpop.permute.xlu0 %5829 }
 0xa40   : > { %v12547_v9 = vpop.permute.xlu1 %5854 }
 0xa41   : > { %v12545_v24 = vpop.permute.xlu0 %5849 }
 0xa44   : > { %v8624_v2 = vpop.permute.xlu1 %8623 }
 0xa45   : > { %v8619_v57 = vpop.permute.xlu0 %8618  ;;  %v8626_v0 = vunpack.i.h.bf16 %v8624_v2  ;;  %v8625_v42 = vunpack.i.l.bf16 %v8624_v2 }
 0xa46   : > { %v8621_v28 = vunpack.i.h.bf16 %v8619_v57  ;;  %v8620_v55 = vunpack.i.l.bf16 %v8619_v57  ;;  %v5629_v57 = vld [vmem:[#allocation5 + $0x20] sm:$0xff] }
 0xa47   : > { %v6422_v62 = vsel %vm2146_vm2, %v6173_v50, %v8625_v42  ;;  %v6423_v29 = vsel %vm2146_vm2, %v6174_v1, %v8626_v0 }
 0xa48   : > { %v12549_v47 = vpop.permute.xlu1 %8633  ;;  %v6418_v33 = vsel %vm2146_vm2, %v6169_v61, %v8620_v55  ;;  %v6419_v54 = vsel %vm2146_vm2, %v6170_v40, %v8621_v28  ;;  %v6142_v55 = vmul.f32 %v12529_v5, %v5630_v13 }
 0xa49   : > { %v8629_v32 = vpop.permute.xlu0 %8628  ;;  %v8636_v2 = vunpack.i.h.bf16 %v12549_v47 }
 0xa4a   : > { %v8631_v10 = vunpack.i.h.bf16 %v8629_v32  ;;  %v8630_v19 = vunpack.i.l.bf16 %v8629_v32  ;;  %v8635_v32 = vunpack.i.l.bf16 %v12549_v47 }
 0xa4b   : > { %v6398_v50 = vsel %vm2146_vm2, %v6142_v55, %v8636_v2 }
 0xa4c   : > { %v6393_v46 = vsel %vm2146_vm2, %v6137_v22, %v8630_v19 }
 0xa4d   : > { %v8639_v52 = vpop.permute.xlu0 %8638 }
 0xa4e   : > { %v8641_v39 = vunpack.i.h.bf16 %v8639_v52  ;;  %v8640_v56 = vunpack.i.l.bf16 %v8639_v52 }
 0xa50   : > { %v8644_v26 = vpop.permute.xlu1 %8643  ;;  %v6426_v59 = vsel %vm2923_vm3, %v6418_v33, %v8640_v56  ;;  %v6427_v8 = vsel %vm2923_vm3, %v6419_v54, %v8641_v39  ;;  %v6141_v39 = vmul.f32 %v12531_v7, %v5629_v57 }
 0xa51   : > { %v8646_v44 = vunpack.i.h.bf16 %v8644_v26  ;;  %v8645_v15 = vunpack.i.l.bf16 %v8644_v26  ;;  %v6394_v26 = vsel %vm2146_vm2, %v6138_v12, %v8631_v10  ;;  %v5627_v12 = vld [vmem:[#allocation5 + $0x10] sm:$0xff] }
 0xa52   : > { %v6397_v1 = vsel %vm2146_vm2, %v6141_v39, %v8635_v32 }
 0xa53   : > { %v6430_v41 = vsel %vm2923_vm3, %v6422_v62, %v8645_v15  ;;  %v6431_v3 = vsel %vm2923_vm3, %v6423_v29, %v8646_v44  ;;  %v5664_v62 = vld [vmem:[#allocation5 + $0x138] sm:$0xff] }
 0xa54   : > { %v8649_v53 = vpop.permute.xlu0 %8648  ;;  %v6176_v19 = vmul.f32 %v12539_v36, %v5664_v62 }
 0xa55   : > { %v8651_v38 = vunpack.i.h.bf16 %v8649_v53  ;;  %v8650_v34 = vunpack.i.l.bf16 %v8649_v53 }
 0xa57   : > { %v6401_v14 = vsel %vm2923_vm3, %v6393_v46, %v8650_v34  ;;  %v6402_v43 = vsel %vm2923_vm3, %v6394_v26, %v8651_v38  ;;  %v6139_v46 = vmul.f32 %v12541_v6, %v5627_v12 }
 0xa58   : > { %v8654_v63 = vpop.permute.xlu1 %8653 }
 0xa59   : > { %v8656_v30 = vunpack.i.h.bf16 %v8654_v63  ;;  %v8655_v28 = vunpack.i.l.bf16 %v8654_v63 }
 0xa5b   : > { %v6406_v63 = vsel %vm2923_vm3, %v6398_v50, %v8656_v30 }
 0xa5c   : > { %v8659_v11 = vpop.permute.xlu0 %8658 }
 0xa5d   : > { %v8661_v49 = vunpack.i.h.bf16 %v8659_v11  ;;  %v8660_v20 = vunpack.i.l.bf16 %v8659_v11  ;;  %v6405_v11 = vsel %vm2923_vm3, %v6397_v1, %v8655_v28 }
 0xa5f   : > { %v6434_v17 = vsel %vm6409_vm5, %v6426_v59, %v8660_v20  ;;  %v6435_v4 = vsel %vm6409_vm5, %v6427_v8, %v8661_v49  ;;  %v5660_v59 = vld [vmem:[#allocation5 + $0x118] sm:$0xff]  ;;  %v5659_v8 = vld [vmem:[#allocation5 + $0x110] sm:$0xff] }
 0xa60   : > { %v8664_v16 = vpop.permute.xlu1 %8663  ;;  %v6443_v21 = vpack.c.bf16 %v6435_v4, %v6434_v17  ;;  %v6172_v29 = vmul.f32 %v12535_v51, %v5660_v59 }
 0xa61   : > { %v8666_v35 = vunpack.i.h.bf16 %v8664_v16  ;;  %v8665_v31 = vunpack.i.l.bf16 %v8664_v16  ;;  %v6171_v16 = vmul.f32 %v12533_v37, %v5659_v8 }
 0xa62   : > { %6686 = vmatprep.mubr.bf16.mxu0 %v6443_v21 }
 0xa63   : > { %v6438_v18 = vsel %vm6409_vm5, %v6430_v41, %v8665_v31  ;;  %v6439_v23 = vsel %vm6409_vm5, %v6431_v3, %v8666_v35  ;;  %v5663_v35 = vld [vmem:[#allocation5 + $0x130] sm:$0xff]  ;;  %v5628_v31 = vld [vmem:[#allocation5 + $0x18] sm:$0xff] }
 0xa64   : > { %v8669_v52 = vpop.permute.xlu0 %8668  ;;  %v6447_v27 = vpack.c.bf16 %v6439_v23, %v6438_v18  ;;  %v6175_v36 = vmul.f32 %v12537_v45, %v5663_v35  ;;  %v6140_v32 = vmul.f32 %v12543_v25, %v5628_v31 }
 0xa65   : > { %v8671_v53 = vunpack.i.h.bf16 %v8669_v52  ;;  %v8670_v58 = vunpack.i.l.bf16 %v8669_v52 }
 0xa66   : > { %6706 = vmatprep.mubr.bf16.mxu1 %v6447_v27 }
 0xa67   : > { %v6410_v47 = vsel %vm6409_vm5, %v6401_v14, %v8670_v58  ;;  %v6411_v56 = vsel %vm6409_vm5, %v6402_v43, %v8671_v53 }
 0xa68   : > { %v8674_v40 = vpop.permute.xlu1 %8673  ;;  %v6442_v61 = vpack.c.bf16 %v6411_v56, %v6410_v47 }
 0xa69   : > { %v8676_v0 = vunpack.i.h.bf16 %v8674_v40  ;;  %v8675_v42 = vunpack.i.l.bf16 %v8674_v40  ;;  %v5632_v40 = vld [vmem:[#allocation5 + $0x38] sm:$0xff] }
 0xa6a   : > { %6687 = vmatmul.mubr.bf16.vlgmr.msra.gmra.mrb[0].mxu0 %v6442_v61  ;;  %v5631_v61 = vld [vmem:[#allocation5 + $0x30] sm:$0xff] }
 0xa6b   : > { %v6414_v5 = vsel %vm6409_vm5, %v6405_v11, %v8675_v42  ;;  %v6415_v7 = vsel %vm6409_vm5, %v6406_v63, %v8676_v0  ;;  %v6143_v59 = vmul.f32 %v12545_v24, %v5631_v61 }
 0xa6c   : > { %v6446_v33 = vpack.c.bf16 %v6415_v7, %v6414_v5  ;;  %v8679_v54 = vpop.permute.xlu0 %8678 }
 0xa6d   : > { %v8681_v17 = vunpack.i.h.bf16 %v8679_v54  ;;  %v8680_v4 = vunpack.i.l.bf16 %v8679_v54 }
 0xa6e   : > { %6707 = vmatmul.mubr.bf16.vlgmr.msra.gmra.mrb[0].mxu1 %v6446_v33 }
 0xa6f   : > { %v6421_v38 = vsel %vm2146_vm2, %v6172_v29, %v8681_v17  ;;  %v6420_v34 = vsel %vm2146_vm2, %v6171_v16, %v8680_v4 }
 0xa70   : > { %v8684_v49 = vpop.permute.xlu1 %8683 }
 0xa71   : > { %v8686_v22 = vunpack.i.h.bf16 %v8684_v49  ;;  %v8685_v18 = vunpack.i.l.bf16 %v8684_v49 }
 0xa73   : > { %v6425_v43 = vsel %vm2146_vm2, %v6176_v19, %v8686_v22  ;;  %v6424_v30 = vsel %vm2146_vm2, %v6175_v36, %v8685_v18  ;;  %v6484_v19 = vlaneseq }
 0xa74   : > { %v8689_v20 = vpop.permute.xlu0 %8688 }
 0xa75   : > { %v8691_v26 = vunpack.i.h.bf16 %v8689_v20  ;;  %v8690_v53 = vunpack.i.l.bf16 %v8689_v20  ;;  %v6485_v35 = vshrl.u32 %v6484_v19, 7 }
 0xa77   : > { %v6395_v1 = vsel %vm2146_vm2, %v6139_v46, %v8690_v53  ;;  %v6396_v50 = vsel %vm2146_vm2, %v6140_v32, %v8691_v26  ;;  %v6486_v31 = vsub.s32 0, %v6485_v35 }
 0xa78   : > { %v12579_v44 = vpop.permute.xlu1 %8693 }
 0xa79   : > { %v8696_v11 = vunpack.i.h.bf16 %v12579_v44  ;;  %v8695_v63 = vunpack.i.l.bf16 %v12579_v44 }
 0xa7b   : > { %v6399_v44 = vsel %vm2146_vm2, %v6143_v59, %v8695_v63 }
 0xa7c   : > { %v8699_v15 = vpop.permute.xlu0 %8698 }
 0xa7d   : > { %v8701_v21 = vunpack.i.h.bf16 %v8699_v15  ;;  %v8700_v10 = vunpack.i.l.bf16 %v8699_v15  ;;  %v6144_v15 = vmul.f32 %v12547_v9, %v5632_v40 }
 0xa7f   : > { %v6428_v51 = vsel %vm2923_vm3, %v6420_v34, %v8700_v10  ;;  %v6429_v37 = vsel %vm2923_vm3, %v6421_v38, %v8701_v21  ;;  %v6482_v38 = vld [vmem:[#allocation15] sm:$0x3]  ;;  %v6490_v34 = vsub.s32 1, %v6485_v35 }
 0xa80   : > { %v8704_v60 = vpop.permute.xlu1 %8703 }
 0xa81   : > { %v8706_v57 = vunpack.i.h.bf16 %v8704_v60  ;;  %v8705_v2 = vunpack.i.l.bf16 %v8704_v60 }
 0xa83   : > { %v6432_v45 = vsel %vm2923_vm3, %v6424_v30, %v8705_v2  ;;  %v6433_v25 = vsel %vm2923_vm3, %v6425_v43, %v8706_v57 }
 0xa84   : > { %v8709_v48 = vpop.permute.xlu0 %8708 }
 0xa85   : > { %v8711_v39 = vunpack.i.h.bf16 %v8709_v48  ;;  %v8710_v47 = vunpack.i.l.bf16 %v8709_v48  ;;  %v6400_v48 = vsel %vm2146_vm2, %v6144_v15, %v8696_v11 }
 0xa87   : > { %v6403_v33 = vsel %vm2923_vm3, %v6395_v1, %v8710_v47  ;;  %v6404_v54 = vsel %vm2923_vm3, %v6396_v50, %v8711_v39 }
 0xa88   : > { %v8714_v41 = vpop.permute.xlu1 %8713 }
 0xa89   : > { %v8716_v49 = vunpack.i.h.bf16 %v8714_v41  ;;  %v8715_v20 = vunpack.i.l.bf16 %v8714_v41  ;;  %v6487_v41 = vrot.slane %v6482_v38, %v6486_v31 }
 0xa8b   : > { %v6407_v16 = vsel %vm2923_vm3, %v6399_v44, %v8715_v20  ;;  %v6408_v21 = vsel %vm2923_vm3, %v6400_v48, %v8716_v49 }
 0xa8c   : > { %v8719_v3 = vpop.permute.xlu0 %8718 }
 0xa8d   : > { %v8721_v23 = vunpack.i.h.bf16 %v8719_v3  ;;  %v8720_v13 = vunpack.i.l.bf16 %v8719_v3  ;;  %v6491_v3 = vrot.slane %v6482_v38, %v6490_v34 }
 0xa8f   : > { %v6436_v52 = vsel %vm6409_vm5, %v6428_v51, %v8720_v13  ;;  %v6437_v27 = vsel %vm6409_vm5, %v6429_v37, %v8721_v23 }
 0xa90   : > { %v8724_v58 = vpop.permute.xlu1 %8723  ;;  %v6445_v14 = vpack.c.bf16 %v6437_v27, %v6436_v52 }
 0xa91   : > { %v8726_v28 = vunpack.i.h.bf16 %v8724_v58  ;;  %v8725_v55 = vunpack.i.l.bf16 %v8724_v58 }
 0xa92   : > { %6696 = vmatprep.mubr.bf16.mxu0 %v6445_v14 }
 0xa93   : > { %v6440_v56 = vsel %vm6409_vm5, %v6432_v45, %v8725_v55  ;;  %v6441_v6 = vsel %vm6409_vm5, %v6433_v25, %v8726_v28 }
 0xa94   : > { %v8729_v0 = vpop.permute.xlu0 %8728  ;;  %v6449_v42 = vpack.c.bf16 %v6441_v6, %v6440_v56 }
 0xa95   : > { %v8731_v5 = vunpack.i.h.bf16 %v8729_v0  ;;  %v8730_v7 = vunpack.i.l.bf16 %v8729_v0 }
 0xa96   : > { %6716 = vmatprep.mubr.bf16.mxu1 %v6449_v42 }
 0xa97   : > { %v6412_v8 = vsel %vm6409_vm5, %v6403_v33, %v8730_v7  ;;  %v6413_v17 = vsel %vm6409_vm5, %v6404_v54, %v8731_v5 }
 0xa98   : > { %v8734_v4 = vpop.permute.xlu1 %8733  ;;  %v6444_v60 = vpack.c.bf16 %v6413_v17, %v6412_v8 }
 0xa99   : > { %v8736_v62 = vunpack.i.h.bf16 %v8734_v4  ;;  %v8735_v29 = vunpack.i.l.bf16 %v8734_v4 }
 0xa9a   : > { %6697 = vmatmul.mubr.bf16.gmra.mrb[4].mxu0 %v6444_v60 }
 0xa9b   : > { %v6416_v9 = vsel %vm6409_vm5, %v6407_v16, %v8735_v29  ;;  %v6417_v24 = vsel %vm6409_vm5, %v6408_v21, %v8736_v62 }
 0xa9c   : > { %v6448_v10 = vpack.c.bf16 %v6417_v24, %v6416_v9 }
 0xa9e   : > { %6717 = vmatmul.mubr.bf16.gmra.mrb[4].mxu1 %v6448_v10 }
 0xb3d   : > { %v6688_v12 = vpop.f32.mrb[0].mxu0 }
 0xb3e   : > { %v6689_v22 = vadd.f32 %v6688_v12, %v6487_v41  ;;  %v6690_v18 = vpop.f32.mrb[1].mxu0 }
 0xb3f   : > { %v6691_v23 = vadd.f32 %v6690_v18, %v6491_v3  ;;  %v6692_v13 = vpop.f32.mrb[2].mxu0 }
 0xb40   : > { %6727 = vst [vmem:[%s9684_s20] sm:$0xff] %v6689_v22  ;;  %v6693_v51 = vadd.f32 %v6692_v13, %v6487_v41  ;;  %v6694_v37 = vpop.f32.mrb[3].mxu0 }
 0xb41   : > { %6728 = vst [vmem:[%s9684_s20 + $0x8] sm:$0xff] %v6691_v23  ;;  %v6695_v57 = vadd.f32 %v6694_v37, %v6491_v3  ;;  %v6708_v2 = vpop.f32.mrb[0].mxu1 }
 0xb42   : > { %6729 = vst [vmem:[%s9684_s20 + $0x10] sm:$0xff] %v6693_v51  ;;  %v6709_v36 = vadd.f32 %v6708_v2, %v6487_v41  ;;  %v6710_v32 = vpop.f32.mrb[1].mxu1 }
 0xb43   : > { %6730 = vst [vmem:[%s9684_s20 + $0x18] sm:$0xff] %v6695_v57  ;;  %v6711_v52 = vadd.f32 %v6710_v32, %v6491_v3  ;;  %v6712_v27 = vpop.f32.mrb[2].mxu1 }
 0xb44   : > { %6735 = vst [vmem:[%s9684_s20 + $0x40] sm:$0xff] %v6709_v36  ;;  %v6713_v46 = vadd.f32 %v6712_v27, %v6487_v41  ;;  %v6714_v26 = vpop.f32.mrb[3].mxu1 }
 0xb45   : > { %6736 = vst [vmem:[%s9684_s20 + $0x48] sm:$0xff] %v6711_v52  ;;  %v6715_v53 = vadd.f32 %v6714_v26, %v6491_v3 }
 0xb46   : > { %6737 = vst [vmem:[%s9684_s20 + $0x50] sm:$0xff] %v6713_v46 }
 0xb47   : > { %6738 = vst [vmem:[%s9684_s20 + $0x58] sm:$0xff] %v6715_v53 }
 0xb6d   : > { %v6698_v58 = vpop.f32.mrb[4].mxu0 }
 0xb6e   : > { %v6699_v14 = vadd.f32 %v6698_v58, %v6487_v41  ;;  %v6700_v43 = vpop.f32.mrb[5].mxu0 }
 0xb6f   : > { %v6701_v30 = vadd.f32 %v6700_v43, %v6491_v3  ;;  %v6702_v28 = vpop.f32.mrb[6].mxu0 }
 0xb70   : > { %6731 = vst [vmem:[%s9684_s20 + $0x20] sm:$0xff] %v6699_v14  ;;  %v6703_v55 = vadd.f32 %v6702_v28, %v6487_v41  ;;  %v6704_v45 = vpop.f32.mrb[7].mxu0 }
 0xb71   : > { %6732 = vst [vmem:[%s9684_s20 + $0x28] sm:$0xff] %v6701_v30  ;;  %v6705_v25 = vadd.f32 %v6704_v45, %v6491_v3  ;;  %v6718_v39 = vpop.f32.mrb[4].mxu1 }
 0xb72   : > { %6733 = vst [vmem:[%s9684_s20 + $0x30] sm:$0xff] %v6703_v55  ;;  %v6719_v47 = vadd.f32 %v6718_v39, %v6487_v41  ;;  %v6720_v56 = vpop.f32.mrb[5].mxu1 }
 0xb73   : > { %6734 = vst [vmem:[%s9684_s20 + $0x38] sm:$0xff] %v6705_v25  ;;  %v6721_v6 = vadd.f32 %v6720_v56, %v6491_v3  ;;  %v6722_v40 = vpop.f32.mrb[6].mxu1 }
 0xb74   : > { %6739 = vst [vmem:[%s9684_s20 + $0x60] sm:$0xff] %v6719_v47  ;;  %v6723_v61 = vadd.f32 %v6722_v40, %v6487_v41  ;;  %v6724_v1 = vpop.f32.mrb[7].mxu1 }
 0xb75   : > { %6740 = vst [vmem:[%s9684_s20 + $0x68] sm:$0xff] %v6721_v6  ;;  %v6725_v50 = vadd.f32 %v6724_v1, %v6491_v3 }
 0xb76   : > { %6741 = vst [vmem:[%s9684_s20 + $0x70] sm:$0xff] %v6723_v61 }
 0xb77   : > { %6742 = vst [vmem:[%s9684_s20 + $0x78] sm:$0xff] %v6725_v50 }
 0xb78 PF: > { %s13476_s22 = sld [smem:[#allocation27_spill]]  ;;  %s13477_s21 = sld [smem:[#allocation28_spill]] }
 0xb79   : > { %s6760_s27 = sshll.u32 %s9684_s20, 4  ;;  %s13478_s5 = sld [smem:[#allocation192_spill]]  ;;  %s12634_s27 = int_to_ptr.vmem [resolvable:$true] %s6760_s27 }
 0xb7a   : > { %s6744_s24 = scalar_lea.sflag [#allocation8], %s9653_s6  ;;  %s9085_s15 = scalar_lea.vmem %s12634_s27, 2048 }
 0xb7b   : > { %p9086_p5 = scmp.ne.s32.totalorder %s12634_s27, %s9085_s15  ;;  %p13479_p0 = scmp.ne.s32.totalorder %s12992_s11, 0 }
 0xb7c   : > { %s9264_s2 = smov [#allocation17]  }
 0xb7d   : > { %p9087_p3 = pnand %p9086_p5, %p13479_p0  ;;  %s9089_s20 = sshll.u32 %s9264_s2, 4  ;;  %s9090_s20 = int_to_ptr.vmem [resolvable:$false] %s9089_s20 }
 0xb7e   : > { %s7165_s13 = sshll.u32 %s13476_s22, 4  ;;  %s7159_s16 = sshll.u32 %s13477_s21, 5 }
 0xb7f   : > { %s6757_s28 = sadd.s32 %s7165_s13, %s7159_s16  ;;  %p9088_p4 = pneg %p9087_p3 }
 0xb80   : > { %s7160_s10 = sshll.u32 %s6757_s28, 7  ;;  %s9091_s19 = scalar_lea.vmem %s9090_s20, 4096 }
 0xb81   : > { %s12639_s18 = scalar_lea.hbm %s13478_s5, %s7160_s10  ;;  %p9092_p10 = scmp.lt.s32.totalorder %s12634_s27, %s9090_s20 }
 0xb82   : > { %p9093_p6 = scmp.lt.s32.totalorder %s9091_s19, %s9085_s15 }
 0xb84   : > { %p9094_p9 = por %p9093_p6, %p9092_p10 }
 0xb86   : > { %p9095_p2 = pnand %p9094_p9, %p9088_p4 }
 0xb88   : > { %9098 = shalt.err (!%p9095_p2)
}
 0xb89   : > { %s9099_s12 = scalar_lea.hbm %s12639_s18, 2048  ;;  %s9103_s13 = scalar_lea.hbm %s13478_s5, 8192 }
 0xb8a   : > { %p9100_p11 = scmp.ne.s32.totalorder %s12639_s18, %s9099_s12  ;;  %p9104_p1 = scmp.lt.u32.totalorder %s12639_s18, %s13478_s5 }
 0xb8b   : > { %p9105_p8 = scmp.lt.u32.totalorder %s9103_s13, %s9099_s12  ;;  %p9107_p5 = scmp.lt.u32.totalorder %s9099_s12, %s12639_s18 }
 0xb8c   : > { %p9101_p13 = pnand %p9100_p11, %p13479_p0 }
 0xb8d   : > { %p9106_p12 = por %p9105_p8, %p9104_p1 }
 0xb8e   : > { %p9102_p7 = pneg %p9101_p13 }
 0xb8f   : > { %p9108_p3 = por %p9107_p5, %p9106_p12 }
 0xb91   : > { %p9109_p4 = pnand %p9108_p3, %p9102_p7 }
 0xb93   : > { %9112 = shalt.err (!%p9109_p4)
}
 0xb94   : > { %s9265_s10 = smov 256   ;;  %s9266_s17 = smov 16  }
 0xb95   : > { %7666 = dma.vmem_to_hbm [thread:$0]  (%p13479_p0), %s12634_s27, 2048, %s12639_s18, %s6744_s24, %s9265_s10, %s9265_s10, %s9266_s17  }
 0xb96 PF: > { %s13480_s14 = sld [smem:[#allocation25_spill]]  ;;  %p7701_p10 = scmp.ge.s32.totalorder %s9239_s9, 2 }
 0xb97   : > { %p13481_p6 = scmp.ne.s32.totalorder %s12994_s29, 0 }
 0xb99   : > { %p7689_p9 = pnand %p7701_p10, %p13481_p6 }
 0xb9c   : > { %s6775_s15 = sand.u32 1, %s13480_s14  }
 0xb9d   : > { %s6776_s2 = scalar_lea.sflag [#allocation8], %s6775_s15 }
 0xb9e   : > { %9186 = dma.done.wait (!%p7689_p9), %s6776_s2, 2048  }
 0xb9f   : > { %9188 = vsyncadd (!%p7689_p9), %s6776_s2, 4294965248  ;;  %s27_s9 = sadd.s32 1, %s9239_s9   ;;  %s13483_s21 = sld [smem:[#allocation24_spill]] }
 0xba0   : > { %p12670_p2 = scmp.ge.s32.totalorder %s27_s9, 10   ;;  %s13484_s11 = sld [smem:[#allocation31_spill]] }
 0xba1   : > { %s13485_s6 = sld [smem:[#allocation32_spill]]  ;;  %s13486_s18 = sld [smem:[#allocation33_spill]] }
 0xba2   : > { %s13487_s22 = smov %s9199_s23  ;;  %s13488_s23 = smov %s9600_s1 }
 0xba3   : > { %s13489_s24 = smov %s9207_s25  ;;  %s13490_s25 = smov %s9211_s26 }
 0xba4   : > { %s13491_s26 = smov %s9541_s3  ;;  %s13492_s27 = smov %s9227_s30 }
 0xba5   : > { %s13493_s28 = smov %s9231_s7  ;;  %s13494_s29 = smov %s9235_s8 }
 0xba6   : > { %s13495_s30 = smov %s13484_s11  ;;  %26 = sbr.rel (!%p12670_p2) target bundleno = 21 (0x15), region = 126 }
 0xba7   : > { %s13496_s7 = smov %s13485_s6  ;;  %s13497_s8 = smov %s13486_s18 }
 0xbad   :  { %6781 = vsyncpa [#allocation7], 1 }
 0xbae   :  { %6783 = vsyncpa [#allocation7 + $0x1], 1 }
 0xbaf   :  { %6784 = vsyncpa [#allocation10], 1 }
 0xbb0   :  { %6786 = vsyncpa [#allocation10 + $0x1], 1 }
 0xbb1   :  { %6787 = vsyncpa [#allocation13], 1 }
 0xbb2   :  { %6788 = vsyncpa [#allocation16], 1 }
 0xbb3   :  { %6789 = vsyncpa [#allocation8], 1 }
 0xbb4   :  { %6791 = vsyncpa [#allocation8 + $0x1], 1 }

</bundles_post_ra>
